<compile_context>
chip_gen: v7x
topology: tpu7x:2x2x1
jax: 0.10.0
libtpu: 0.0.40
codegen_flags: <defaults>
</compile_context>

<pallas_src>
import functools

import jax
import jax.numpy as jnp
from jax import lax
from jax.experimental import pallas as pl
from jax.experimental.pallas import tpu as pltpu


# ----------------------------- tiling helpers -------------------------------

_MAX_TILE_M = 256            # rows per grid step (256-512 sweet spot)


def _round_up(x, m):
    return (x + m - 1) // m * m


def _grid_geometry(m_rows):
    m8 = _round_up(max(m_rows, 1), 8)
    tile_m = min(_MAX_TILE_M, m8)
    m_pad = _round_up(m8, tile_m)
    return tile_m, m_pad


def _vmem_limit_bytes():
    default_cap = 64 * 1024 * 1024           # v7x physical VMEM per TensorCore
    try:
        cap = int(pltpu.get_tpu_info().vmem_capacity_bytes)
        if cap <= 0:
            cap = default_cap
    except Exception:
        cap = default_cap
    return max(32 * 1024 * 1024, cap - 16 * 1024 * 1024)


_CP = pltpu.CompilerParams(dimension_semantics=("parallel",),
                           vmem_limit_bytes=_vmem_limit_bytes())


# ----------------------------- Pallas kernels ------------------------------

def _mm_bias_act_kernel(x_ref, w_ref, b_ref, o_ref, *, leaky):
    # x: (tm, K) bf16, w: (K, Cout) bf16, b: (1, Cout) f32 -> o: (tm, Cout) f32
    acc = jnp.dot(x_ref[...], w_ref[...], preferred_element_type=jnp.float32)
    acc = acc + b_ref[...]
    if leaky:                                            # LeakyReLU(0.2)
        acc = jnp.where(acc >= 0.0, acc, 0.2 * acc)
    o_ref[...] = acc.astype(o_ref.dtype)


def _mm_stats_kernel(x_ref, w_ref, o_ref, s_ref):
    # Conv matmul (no bias; it cancels under batch-stat BN) + per-tile BN
    # partial sums so the activation is not re-read for statistics.
    acc = jnp.dot(x_ref[...], w_ref[...], preferred_element_type=jnp.float32)
    o_ref[...] = acc
    ssum = jnp.sum(acc, axis=0, keepdims=True)           # (1, Cout)
    ssq = jnp.sum(acc * acc, axis=0, keepdims=True)      # (1, Cout)
    pad = jnp.zeros((6, acc.shape[1]), jnp.float32)
    s_ref[...] = jnp.concatenate([ssum, ssq, pad], axis=0)[None, :, :]


def _bn_apply_lrelu_kernel(x_ref, a_ref, c_ref, o_ref):
    # y = x * scale + shift, then LeakyReLU(0.2). All f32 elementwise (VPU).
    y = x_ref[...] * a_ref[...] + c_ref[...]
    o_ref[...] = jnp.where(y >= 0.0, y, 0.2 * y)


# ----------------------------- Pallas wrappers ------------------------------

def _pad_rows(x, m_pad):
    m = x.shape[0]
    return x if m == m_pad else jnp.pad(x, ((0, m_pad - m), (0, 0)))


def _matmul_bias_act(patches, wmat, bias, *, leaky):
    m, k = patches.shape
    cout = wmat.shape[1]
    tm, m_pad = _grid_geometry(m)
    xp = _pad_rows(patches, m_pad).astype(jnp.bfloat16)
    wb = wmat.astype(jnp.bfloat16)
    out = pl.pallas_call(
        functools.partial(_mm_bias_act_kernel, leaky=leaky),
        out_shape=jax.ShapeDtypeStruct((m_pad, cout), jnp.float32),
        grid=(m_pad // tm,),
        in_specs=[pl.BlockSpec((tm, k), lambda i: (i, 0)),
                  pl.BlockSpec((k, cout), lambda i: (0, 0)),
                  pl.BlockSpec((1, cout), lambda i: (0, 0))],
        out_specs=pl.BlockSpec((tm, cout), lambda i: (i, 0)),
        compiler_params=_CP,
    )(xp, wb, bias.reshape(1, cout).astype(jnp.float32))
    return out[:m]


def _matmul_bn_lrelu(patches, wmat, gamma, beta, eps=1e-5):
    m, k = patches.shape
    cout = wmat.shape[1]
    tm, m_pad = _grid_geometry(m)
    n_tiles = m_pad // tm
    xp = _pad_rows(patches, m_pad).astype(jnp.bfloat16)
    wb = wmat.astype(jnp.bfloat16)
    conv, stats = pl.pallas_call(
        _mm_stats_kernel,
        out_shape=(jax.ShapeDtypeStruct((m_pad, cout), jnp.float32),
                   jax.ShapeDtypeStruct((n_tiles, 8, cout), jnp.float32)),
        grid=(n_tiles,),
        in_specs=[pl.BlockSpec((tm, k), lambda i: (i, 0)),
                  pl.BlockSpec((k, cout), lambda i: (0, 0))],
        out_specs=(pl.BlockSpec((tm, cout), lambda i: (i, 0)),
                   pl.BlockSpec((1, 8, cout), lambda i: (i, 0, 0))),
        compiler_params=_CP,
    )(xp, wb)
    # Batch statistics over the true (unpadded) row count; zero-padded rows
    # produce exactly-zero conv output and contribute nothing to the partials.
    s1 = jnp.sum(stats[:, 0, :], axis=0)
    s2 = jnp.sum(stats[:, 1, :], axis=0)
    mean = s1 / float(m)
    var = s2 / float(m) - mean * mean                 # biased var (PyTorch BN)
    scale = gamma.reshape(-1) * lax.rsqrt(var + eps)
    shift = beta.reshape(-1) - mean * scale
    out = pl.pallas_call(
        _bn_apply_lrelu_kernel,
        out_shape=jax.ShapeDtypeStruct((m_pad, cout), jnp.float32),
        grid=(n_tiles,),
        in_specs=[pl.BlockSpec((tm, cout), lambda i: (i, 0)),
                  pl.BlockSpec((1, cout), lambda i: (0, 0)),
                  pl.BlockSpec((1, cout), lambda i: (0, 0))],
        out_specs=pl.BlockSpec((tm, cout), lambda i: (i, 0)),
        compiler_params=_CP,
    )(conv, scale.reshape(1, cout), shift.reshape(1, cout))
    return out[:m]


# ----------------------------- glue (im2col etc.) ---------------------------

def _extract_patches(x_nhwc, ksize, stride, pad):
    # Single fused XLA gather; K ordering is channel-major:
    #   k = cin * KH*KW + kh * KW + kw
    n = x_nhwc.shape[0]
    patches = lax.conv_general_dilated_patches(
        x_nhwc, (ksize, ksize), (stride, stride),
        [(pad, pad), (pad, pad)],
        dimension_numbers=("NHWC", "HWIO", "NHWC"))
    _, ho, wo, k = patches.shape
    return patches.reshape(n * ho * wo, k), (n, ho, wo)


def _weight_matrix(w_oihw):
    # (Cout, Cin, KH, KW) -> (Cin*KH*KW, Cout): matches the patch K ordering.
    cout = w_oihw.shape[0]
    return jnp.transpose(w_oihw, (1, 2, 3, 0)).reshape(-1, cout)


def _stage0(x_nhwc, in_ch, w0, b0, w1, b1):
    # c0_0 and c0_1 fused into a single conv with a block-diagonal weight:
    # first 32 out-channels only see x[..., :in_ch], next 32 only the rest.
    patches, (n, ho, wo) = _extract_patches(x_nhwc, 4, 2, 1)
    w0m = _weight_matrix(w0)                              # (in_ch*16, 32)
    w1m = _weight_matrix(w1)                              # (out_ch*16, 32)
    c0, c1 = w0m.shape[1], w1m.shape[1]
    wmat = jnp.concatenate(
        [jnp.concatenate([w0m, jnp.zeros((w0m.shape[0], c1), w0m.dtype)], axis=1),
         jnp.concatenate([jnp.zeros((w1m.shape[0], c0), w1m.dtype), w1m], axis=1)],
        axis=0)                                           # (K_total, 64)
    bias = jnp.concatenate([b0, b1])
    out = _matmul_bias_act(patches, wmat, bias, leaky=True)
    return out.reshape(n, ho, wo, c0 + c1)


def _conv_bn_lrelu(x_nhwc, w_oihw, gamma, beta):
    patches, (n, ho, wo) = _extract_patches(x_nhwc, 4, 2, 1)
    wmat = _weight_matrix(w_oihw)
    out = _matmul_bn_lrelu(patches, wmat, gamma, beta)
    return out.reshape(n, ho, wo, wmat.shape[1])


def _final_conv(x_nhwc, w_oihw, bias, lane_pad=128):
    # 1-channel output zero-padded to 128 lanes so stores stay unmasked.
    patches, (n, ho, wo) = _extract_patches(x_nhwc, 3, 1, 1)
    cout = w_oihw.shape[0]
    wmat = jnp.pad(_weight_matrix(w_oihw), ((0, 0), (0, lane_pad - cout)))
    bpad = jnp.pad(bias, (0, lane_pad - cout))
    out = _matmul_bias_act(patches, wmat, bpad, leaky=False)
    return out[:, :cout].reshape(n, ho, wo, cout)


# ------------------------------ parameters ----------------------------------

def init_params(key, in_ch, out_ch):
    def conv_p(k, cin, cout, ks):
        k1, k2 = jax.random.split(k)
        w = jax.random.normal(k1, (cout, cin, ks, ks), jnp.float32) * 0.05
        b = jax.random.normal(k2, (cout,), jnp.float32) * 0.05
        return w, b

    keys = jax.random.split(key, 6)
    p = {}
    p["c0_0"] = conv_p(keys[0], in_ch, 32, 4)                     # no BN
    p["c0_1"] = conv_p(keys[1], out_ch, 32, 4)                    # no BN
    for name, k, cin, cout in (("c1", keys[2], 64, 128),
                               ("c2", keys[3], 128, 256),
                               ("c3", keys[4], 256, 512)):
        w, b = conv_p(k, cin, cout, 4)
        gamma = jnp.ones((cout,), jnp.float32)                    # BN affine
        beta = jnp.zeros((cout,), jnp.float32)
        # `b` is kept for parameter parity with PyTorch but is not fed to the
        # kernel: a conv bias cancels exactly under batch-statistic BatchNorm.
        p[name] = (w, b, gamma, beta)
    p["c4"] = conv_p(keys[5], 512, 1, 3)                          # final conv
    return p


# ------------------------------ forward pass ---------------------------------

def discriminator_forward(x_nchw, params, *, in_ch):
    # BatchNorm uses training-mode batch statistics (PyTorch default forward);
    # running-stat bookkeeping is a training side effect and is not modeled.
    x = jnp.transpose(x_nchw, (0, 2, 3, 1)).astype(jnp.float32)   # NCHW -> NHWC
    w0, b0 = params["c0_0"]
    w1, b1 = params["c0_1"]
    h = _stage0(x, in_ch, w0, b0, w1, b1)                         # cat(c0_0, c0_1)
    for name in ("c1", "c2", "c3"):                               # conv + BN + LReLU
        w, _b_unused, gamma, beta = params[name]
        h = _conv_bn_lrelu(h, w, gamma, beta)
    h = _final_conv(h, *params["c4"])                             # plain 3x3 conv
    return jnp.transpose(h, (0, 3, 1, 2))                         # NHWC -> NCHW


# --------------------------------- main --------------------------------------

if __name__ == "__main__":
    in_ch, out_ch = 3, 3
    N, H, W = 2, 32, 32

    key = jax.random.PRNGKey(0)
    kx, kp = jax.random.split(key)
    x = jax.random.normal(kx, (N, in_ch + out_ch, H, W), jnp.float32)
    params = init_params(kp, in_ch, out_ch)

    fwd = jax.jit(functools.partial(discriminator_forward, in_ch=in_ch))
    out = fwd(x, params)
    jax.block_until_ready(out)

    assert out.shape == (N, 1, H // 16, W // 16), out.shape
    assert out.dtype == jnp.float32
    print("KERNEL_OK")
</pallas_src>

<mosaic_0001>
module attributes {stable_mosaic.version = 11 : i64} {
  func.func @_mm_bias_act_kernel(%arg0: i32, %arg1: memref<256x96xbf16, #tpu.memory_space<vmem>>, %arg2: memref<96x64xbf16, #tpu.memory_space<vmem>>, %arg3: memref<1x64xf32, #tpu.memory_space<vmem>>, %arg4: memref<256x64xf32, #tpu.memory_space<vmem>>) attributes {dimension_semantics = [#tpu.dimension_semantics<parallel>], iteration_bounds = array<i64: 2>, scalar_prefetch = 0 : i64, scratch_operands = 0 : i64, tpu.core_type = #tpu.core_type<tc>, window_params = [{transform_indices = @transform_0, window_bounds = array<i64: 256, 96>}, {pipeline_mode = #tpu.pipeline_mode<synchronous>, transform_indices = @transform_1, window_bounds = array<i64: 96, 64>}, {pipeline_mode = #tpu.pipeline_mode<synchronous>, transform_indices = @transform_2, window_bounds = array<i64: 1, 64>}, {transform_indices = @transform_3, window_bounds = array<i64: 256, 64>}]} {
    %c0 = arith.constant 0 : index
    %c0_0 = arith.constant 0 : index
    %0 = vector.load %arg1[%c0, %c0_0] : memref<256x96xbf16, #tpu.memory_space<vmem>>, vector<256x96xbf16>
    %c0_1 = arith.constant 0 : index
    %c0_2 = arith.constant 0 : index
    %1 = vector.load %arg2[%c0_1, %c0_2] : memref<96x64xbf16, #tpu.memory_space<vmem>>, vector<96x64xbf16>
    %cst = arith.constant dense<0.000000e+00> : vector<256x64xf32>
    %2 = tpu.matmul %0, %1, %cst {dimension_numbers = #tpu.dot_dimension_numbers<[1], [0], [0], [1], [0, 0, 1, 1], [], []>} : vector<256x96xbf16>, vector<96x64xbf16>, vector<256x64xf32> -> vector<256x64xf32>
    %c0_3 = arith.constant 0 : index
    %c0_4 = arith.constant 0 : index
    %3 = vector.load %arg3[%c0_3, %c0_4] : memref<1x64xf32, #tpu.memory_space<vmem>>, vector<1x64xf32>
    %4 = vector.broadcast %3 : vector<1x64xf32> to vector<256x64xf32>
    %5 = arith.addf %2, %4 : vector<256x64xf32>
    %cst_5 = arith.constant 0.000000e+00 : f32
    %6 = vector.broadcast %cst_5 : f32 to vector<256x64xf32>
    %7 = arith.cmpf oge, %5, %6 : vector<256x64xf32>
    %cst_6 = arith.constant 2.000000e-01 : f32
    %8 = vector.broadcast %cst_6 : f32 to vector<256x64xf32>
    %9 = arith.mulf %8, %5 : vector<256x64xf32>
    %10 = arith.select %7, %5, %9 : vector<256x64xi1>, vector<256x64xf32>
    %c0_7 = arith.constant 0 : index
    %c0_8 = arith.constant 0 : index
    %11 = vector.load %arg4[%c0_7, %c0_8] : memref<256x64xf32, #tpu.memory_space<vmem>>, vector<256x64xf32>
    tpu.vector_store %arg4[%c0_7, %c0_8], %10 {strides = array<i32>} : memref<256x64xf32, #tpu.memory_space<vmem>>, vector<256x64xf32>,
    return
  }
  func.func @transform_0(%arg0: i32) -> (i32, i32) {
    %c0_i32 = arith.constant 0 : i32
    %c0_i32_0 = arith.constant 0 : i32
    return %arg0, %c0_i32 : i32, i32
  }
  func.func @transform_1(%arg0: i32) -> (i32, i32) {
    %c0_i32 = arith.constant 0 : i32
    %c0_i32_0 = arith.constant 0 : i32
    %c0_i32_1 = arith.constant 0 : i32
    return %c0_i32, %c0_i32_0 : i32, i32
  }
  func.func @transform_2(%arg0: i32) -> (i32, i32) {
    %c0_i32 = arith.constant 0 : i32
    %c0_i32_0 = arith.constant 0 : i32
    %c0_i32_1 = arith.constant 0 : i32
    return %c0_i32, %c0_i32_0 : i32, i32
  }
  func.func @transform_3(%arg0: i32) -> (i32, i32) {
    %c0_i32 = arith.constant 0 : i32
    %c0_i32_0 = arith.constant 0 : i32
    return %arg0, %c0_i32 : i32, i32
  }
}

module attributes {stable_mosaic.version = 11 : i64} {
  func.func @_mm_stats_kernel(%arg0: i32, %arg1: memref<128x1024xbf16, #tpu.memory_space<vmem>>, %arg2: memref<1024x128xbf16, #tpu.memory_space<vmem>>, %arg3: memref<128x128xf32, #tpu.memory_space<vmem>>, %arg4: memref<1x8x128xf32, #tpu.memory_space<vmem>>) attributes {dimension_semantics = [#tpu.dimension_semantics<parallel>], iteration_bounds = array<i64: 1>, scalar_prefetch = 0 : i64, scratch_operands = 0 : i64, tpu.core_type = #tpu.core_type<tc>, window_params = [{transform_indices = @transform_0, window_bounds = array<i64: 128, 1024>}, {pipeline_mode = #tpu.pipeline_mode<synchronous>, transform_indices = @transform_1, window_bounds = array<i64: 1024, 128>}, {transform_indices = @transform_2, window_bounds = array<i64: 128, 128>}, {transform_indices = @transform_3, window_bounds = array<i64: 1, 8, 128>}]} {
    %c0 = arith.constant 0 : index
    %c0_0 = arith.constant 0 : index
    %0 = vector.load %arg1[%c0, %c0_0] : memref<128x1024xbf16, #tpu.memory_space<vmem>>, vector<128x1024xbf16>
    %c0_1 = arith.constant 0 : index
    %c0_2 = arith.constant 0 : index
    %1 = vector.load %arg2[%c0_1, %c0_2] : memref<1024x128xbf16, #tpu.memory_space<vmem>>, vector<1024x128xbf16>
    %cst = arith.constant dense<0.000000e+00> : vector<128x128xf32>
    %2 = tpu.matmul %0, %1, %cst {dimension_numbers = #tpu.dot_dimension_numbers<[1], [0], [0], [1], [0, 0, 1, 1], [], []>} : vector<128x1024xbf16>, vector<1024x128xbf16>, vector<128x128xf32> -> vector<128x128xf32>
    %c0_3 = arith.constant 0 : index
    %c0_4 = arith.constant 0 : index
    %3 = vector.load %arg3[%c0_3, %c0_4] : memref<128x128xf32, #tpu.memory_space<vmem>>, vector<128x128xf32>
    tpu.vector_store %arg3[%c0_3, %c0_4], %2 {strides = array<i32>} : memref<128x128xf32, #tpu.memory_space<vmem>>, vector<128x128xf32>,
    %cst_5 = arith.constant dense<0.000000e+00> : vector<128xf32>
    %4 = vector.multi_reduction <add>, %2, %cst_5 [0] : vector<128x128xf32> to vector<128xf32>
    %5 = vector.shape_cast %4 : vector<128xf32> to vector<1x128xf32>
    %6 = arith.mulf %2, %2 : vector<128x128xf32>
    %cst_6 = arith.constant dense<0.000000e+00> : vector<128xf32>
    %7 = vector.multi_reduction <add>, %6, %cst_6 [0] : vector<128x128xf32> to vector<128xf32>
    %8 = vector.shape_cast %7 : vector<128xf32> to vector<1x128xf32>
    %cst_7 = arith.constant 0.000000e+00 : f32
    %9 = vector.broadcast %cst_7 : f32 to vector<6x128xf32>
    %10 = tpu.concatenate %5, %8, %9 in 0 : vector<1x128xf32>, vector<1x128xf32>, vector<6x128xf32> -> vector<8x128xf32>
    %11 = vector.shape_cast %10 : vector<8x128xf32> to vector<1x8x128xf32>
    %c0_8 = arith.constant 0 : index
    %c0_9 = arith.constant 0 : index
    %c0_10 = arith.constant 0 : index
    %12 = vector.load %arg4[%c0_8, %c0_9, %c0_10] : memref<1x8x128xf32, #tpu.memory_space<vmem>>, vector<1x8x128xf32>
    tpu.vector_store %arg4[%c0_8, %c0_9, %c0_10], %11 {strides = array<i32>} : memref<1x8x128xf32, #tpu.memory_space<vmem>>, vector<1x8x128xf32>,
    return
  }
  func.func @transform_0(%arg0: i32) -> (i32, i32) {
    %c0_i32 = arith.constant 0 : i32
    %c0_i32_0 = arith.constant 0 : i32
    return %arg0, %c0_i32 : i32, i32
  }
  func.func @transform_1(%arg0: i32) -> (i32, i32) {
    %c0_i32 = arith.constant 0 : i32
    %c0_i32_0 = arith.constant 0 : i32
    %c0_i32_1 = arith.constant 0 : i32
    return %c0_i32, %c0_i32_0 : i32, i32
  }
  func.func @transform_2(%arg0: i32) -> (i32, i32) {
    %c0_i32 = arith.constant 0 : i32
    %c0_i32_0 = arith.constant 0 : i32
    return %arg0, %c0_i32 : i32, i32
  }
  func.func @transform_3(%arg0: i32) -> (i32, i32, i32) {
    %c0_i32 = arith.constant 0 : i32
    %c0_i32_0 = arith.constant 0 : i32
    %c0_i32_1 = arith.constant 0 : i32
    return %arg0, %c0_i32, %c0_i32_0 : i32, i32, i32
  }
}

module attributes {stable_mosaic.version = 11 : i64} {
  func.func @_bn_apply_lrelu_kernel(%arg0: i32, %arg1: memref<128x128xf32, #tpu.memory_space<vmem>>, %arg2: memref<1x128xf32, #tpu.memory_space<vmem>>, %arg3: memref<1x128xf32, #tpu.memory_space<vmem>>, %arg4: memref<128x128xf32, #tpu.memory_space<vmem>>) attributes {dimension_semantics = [#tpu.dimension_semantics<parallel>], iteration_bounds = array<i64: 1>, scalar_prefetch = 0 : i64, scratch_operands = 0 : i64, tpu.core_type = #tpu.core_type<tc>, window_params = [{transform_indices = @transform_0, window_bounds = array<i64: 128, 128>}, {pipeline_mode = #tpu.pipeline_mode<synchronous>, transform_indices = @transform_1, window_bounds = array<i64: 1, 128>}, {pipeline_mode = #tpu.pipeline_mode<synchronous>, transform_indices = @transform_2, window_bounds = array<i64: 1, 128>}, {transform_indices = @transform_3, window_bounds = array<i64: 128, 128>}]} {
    %c0 = arith.constant 0 : index
    %c0_0 = arith.constant 0 : index
    %0 = vector.load %arg1[%c0, %c0_0] : memref<128x128xf32, #tpu.memory_space<vmem>>, vector<128x128xf32>
    %c0_1 = arith.constant 0 : index
    %c0_2 = arith.constant 0 : index
    %1 = vector.load %arg2[%c0_1, %c0_2] : memref<1x128xf32, #tpu.memory_space<vmem>>, vector<1x128xf32>
    %2 = vector.broadcast %1 : vector<1x128xf32> to vector<128x128xf32>
    %3 = arith.mulf %0, %2 : vector<128x128xf32>
    %c0_3 = arith.constant 0 : index
    %c0_4 = arith.constant 0 : index
    %4 = vector.load %arg3[%c0_3, %c0_4] : memref<1x128xf32, #tpu.memory_space<vmem>>, vector<1x128xf32>
    %5 = vector.broadcast %4 : vector<1x128xf32> to vector<128x128xf32>
    %6 = arith.addf %3, %5 : vector<128x128xf32>
    %cst = arith.constant 0.000000e+00 : f32
    %7 = vector.broadcast %cst : f32 to vector<128x128xf32>
    %8 = arith.cmpf oge, %6, %7 : vector<128x128xf32>
    %cst_5 = arith.constant 2.000000e-01 : f32
    %9 = vector.broadcast %cst_5 : f32 to vector<128x128xf32>
    %10 = arith.mulf %9, %6 : vector<128x128xf32>
    %11 = arith.select %8, %6, %10 : vector<128x128xi1>, vector<128x128xf32>
    %c0_6 = arith.constant 0 : index
    %c0_7 = arith.constant 0 : index
    %12 = vector.load %arg4[%c0_6, %c0_7] : memref<128x128xf32, #tpu.memory_space<vmem>>, vector<128x128xf32>
    tpu.vector_store %arg4[%c0_6, %c0_7], %11 {strides = array<i32>} : memref<128x128xf32, #tpu.memory_space<vmem>>, vector<128x128xf32>,
    return
  }
  func.func @transform_0(%arg0: i32) -> (i32, i32) {
    %c0_i32 = arith.constant 0 : i32
    %c0_i32_0 = arith.constant 0 : i32
    return %arg0, %c0_i32 : i32, i32
  }
  func.func @transform_1(%arg0: i32) -> (i32, i32) {
    %c0_i32 = arith.constant 0 : i32
    %c0_i32_0 = arith.constant 0 : i32
    %c0_i32_1 = arith.constant 0 : i32
    return %c0_i32, %c0_i32_0 : i32, i32
  }
  func.func @transform_2(%arg0: i32) -> (i32, i32) {
    %c0_i32 = arith.constant 0 : i32
    %c0_i32_0 = arith.constant 0 : i32
    %c0_i32_1 = arith.constant 0 : i32
    return %c0_i32, %c0_i32_0 : i32, i32
  }
  func.func @transform_3(%arg0: i32) -> (i32, i32) {
    %c0_i32 = arith.constant 0 : i32
    %c0_i32_0 = arith.constant 0 : i32
    return %arg0, %c0_i32 : i32, i32
  }
}

module attributes {stable_mosaic.version = 11 : i64} {
  func.func @_mm_stats_kernel(%arg0: i32, %arg1: memref<32x2048xbf16, #tpu.memory_space<vmem>>, %arg2: memref<2048x256xbf16, #tpu.memory_space<vmem>>, %arg3: memref<32x256xf32, #tpu.memory_space<vmem>>, %arg4: memref<1x8x256xf32, #tpu.memory_space<vmem>>) attributes {dimension_semantics = [#tpu.dimension_semantics<parallel>], iteration_bounds = array<i64: 1>, scalar_prefetch = 0 : i64, scratch_operands = 0 : i64, tpu.core_type = #tpu.core_type<tc>, window_params = [{transform_indices = @transform_0, window_bounds = array<i64: 32, 2048>}, {pipeline_mode = #tpu.pipeline_mode<synchronous>, transform_indices = @transform_1, window_bounds = array<i64: 2048, 256>}, {transform_indices = @transform_2, window_bounds = array<i64: 32, 256>}, {transform_indices = @transform_3, window_bounds = array<i64: 1, 8, 256>}]} {
    %c0 = arith.constant 0 : index
    %c0_0 = arith.constant 0 : index
    %0 = vector.load %arg1[%c0, %c0_0] : memref<32x2048xbf16, #tpu.memory_space<vmem>>, vector<32x2048xbf16>
    %c0_1 = arith.constant 0 : index
    %c0_2 = arith.constant 0 : index
    %1 = vector.load %arg2[%c0_1, %c0_2] : memref<2048x256xbf16, #tpu.memory_space<vmem>>, vector<2048x256xbf16>
    %cst = arith.constant dense<0.000000e+00> : vector<32x256xf32>
    %2 = tpu.matmul %0, %1, %cst {dimension_numbers = #tpu.dot_dimension_numbers<[1], [0], [0], [1], [0, 0, 1, 1], [], []>} : vector<32x2048xbf16>, vector<2048x256xbf16>, vector<32x256xf32> -> vector<32x256xf32>
    %c0_3 = arith.constant 0 : index
    %c0_4 = arith.constant 0 : index
    %3 = vector.load %arg3[%c0_3, %c0_4] : memref<32x256xf32, #tpu.memory_space<vmem>>, vector<32x256xf32>
    tpu.vector_store %arg3[%c0_3, %c0_4], %2 {strides = array<i32>} : memref<32x256xf32, #tpu.memory_space<vmem>>, vector<32x256xf32>,
    %cst_5 = arith.constant dense<0.000000e+00> : vector<256xf32>
    %4 = vector.multi_reduction <add>, %2, %cst_5 [0] : vector<32x256xf32> to vector<256xf32>
    %5 = vector.shape_cast %4 : vector<256xf32> to vector<1x256xf32>
    %6 = arith.mulf %2, %2 : vector<32x256xf32>
    %cst_6 = arith.constant dense<0.000000e+00> : vector<256xf32>
    %7 = vector.multi_reduction <add>, %6, %cst_6 [0] : vector<32x256xf32> to vector<256xf32>
    %8 = vector.shape_cast %7 : vector<256xf32> to vector<1x256xf32>
    %cst_7 = arith.constant 0.000000e+00 : f32
    %9 = vector.broadcast %cst_7 : f32 to vector<6x256xf32>
    %10 = tpu.concatenate %5, %8, %9 in 0 : vector<1x256xf32>, vector<1x256xf32>, vector<6x256xf32> -> vector<8x256xf32>
    %11 = vector.shape_cast %10 : vector<8x256xf32> to vector<1x8x256xf32>
    %c0_8 = arith.constant 0 : index
    %c0_9 = arith.constant 0 : index
    %c0_10 = arith.constant 0 : index
    %12 = vector.load %arg4[%c0_8, %c0_9, %c0_10] : memref<1x8x256xf32, #tpu.memory_space<vmem>>, vector<1x8x256xf32>
    tpu.vector_store %arg4[%c0_8, %c0_9, %c0_10], %11 {strides = array<i32>} : memref<1x8x256xf32, #tpu.memory_space<vmem>>, vector<1x8x256xf32>,
    return
  }
  func.func @transform_0(%arg0: i32) -> (i32, i32) {
    %c0_i32 = arith.constant 0 : i32
    %c0_i32_0 = arith.constant 0 : i32
    return %arg0, %c0_i32 : i32, i32
  }
  func.func @transform_1(%arg0: i32) -> (i32, i32) {
    %c0_i32 = arith.constant 0 : i32
    %c0_i32_0 = arith.constant 0 : i32
    %c0_i32_1 = arith.constant 0 : i32
    return %c0_i32, %c0_i32_0 : i32, i32
  }
  func.func @transform_2(%arg0: i32) -> (i32, i32) {
    %c0_i32 = arith.constant 0 : i32
    %c0_i32_0 = arith.constant 0 : i32
    return %arg0, %c0_i32 : i32, i32
  }
  func.func @transform_3(%arg0: i32) -> (i32, i32, i32) {
    %c0_i32 = arith.constant 0 : i32
    %c0_i32_0 = arith.constant 0 : i32
    %c0_i32_1 = arith.constant 0 : i32
    return %arg0, %c0_i32, %c0_i32_0 : i32, i32, i32
  }
}

module attributes {stable_mosaic.version = 11 : i64} {
  func.func @_bn_apply_lrelu_kernel(%arg0: i32, %arg1: memref<32x256xf32, #tpu.memory_space<vmem>>, %arg2: memref<1x256xf32, #tpu.memory_space<vmem>>, %arg3: memref<1x256xf32, #tpu.memory_space<vmem>>, %arg4: memref<32x256xf32, #tpu.memory_space<vmem>>) attributes {dimension_semantics = [#tpu.dimension_semantics<parallel>], iteration_bounds = array<i64: 1>, scalar_prefetch = 0 : i64, scratch_operands = 0 : i64, tpu.core_type = #tpu.core_type<tc>, window_params = [{transform_indices = @transform_0, window_bounds = array<i64: 32, 256>}, {pipeline_mode = #tpu.pipeline_mode<synchronous>, transform_indices = @transform_1, window_bounds = array<i64: 1, 256>}, {pipeline_mode = #tpu.pipeline_mode<synchronous>, transform_indices = @transform_2, window_bounds = array<i64: 1, 256>}, {transform_indices = @transform_3, window_bounds = array<i64: 32, 256>}]} {
    %c0 = arith.constant 0 : index
    %c0_0 = arith.constant 0 : index
    %0 = vector.load %arg1[%c0, %c0_0] : memref<32x256xf32, #tpu.memory_space<vmem>>, vector<32x256xf32>
    %c0_1 = arith.constant 0 : index
    %c0_2 = arith.constant 0 : index
    %1 = vector.load %arg2[%c0_1, %c0_2] : memref<1x256xf32, #tpu.memory_space<vmem>>, vector<1x256xf32>
    %2 = vector.broadcast %1 : vector<1x256xf32> to vector<32x256xf32>
    %3 = arith.mulf %0, %2 : vector<32x256xf32>
    %c0_3 = arith.constant 0 : index
    %c0_4 = arith.constant 0 : index
    %4 = vector.load %arg3[%c0_3, %c0_4] : memref<1x256xf32, #tpu.memory_space<vmem>>, vector<1x256xf32>
    %5 = vector.broadcast %4 : vector<1x256xf32> to vector<32x256xf32>
    %6 = arith.addf %3, %5 : vector<32x256xf32>
    %cst = arith.constant 0.000000e+00 : f32
    %7 = vector.broadcast %cst : f32 to vector<32x256xf32>
    %8 = arith.cmpf oge, %6, %7 : vector<32x256xf32>
    %cst_5 = arith.constant 2.000000e-01 : f32
    %9 = vector.broadcast %cst_5 : f32 to vector<32x256xf32>
    %10 = arith.mulf %9, %6 : vector<32x256xf32>
    %11 = arith.select %8, %6, %10 : vector<32x256xi1>, vector<32x256xf32>
    %c0_6 = arith.constant 0 : index
    %c0_7 = arith.constant 0 : index
    %12 = vector.load %arg4[%c0_6, %c0_7] : memref<32x256xf32, #tpu.memory_space<vmem>>, vector<32x256xf32>
    tpu.vector_store %arg4[%c0_6, %c0_7], %11 {strides = array<i32>} : memref<32x256xf32, #tpu.memory_space<vmem>>, vector<32x256xf32>,
    return
  }
  func.func @transform_0(%arg0: i32) -> (i32, i32) {
    %c0_i32 = arith.constant 0 : i32
    %c0_i32_0 = arith.constant 0 : i32
    return %arg0, %c0_i32 : i32, i32
  }
  func.func @transform_1(%arg0: i32) -> (i32, i32) {
    %c0_i32 = arith.constant 0 : i32
    %c0_i32_0 = arith.constant 0 : i32
    %c0_i32_1 = arith.constant 0 : i32
    return %c0_i32, %c0_i32_0 : i32, i32
  }
  func.func @transform_2(%arg0: i32) -> (i32, i32) {
    %c0_i32 = arith.constant 0 : i32
    %c0_i32_0 = arith.constant 0 : i32
    %c0_i32_1 = arith.constant 0 : i32
    return %c0_i32, %c0_i32_0 : i32, i32
  }
  func.func @transform_3(%arg0: i32) -> (i32, i32) {
    %c0_i32 = arith.constant 0 : i32
    %c0_i32_0 = arith.constant 0 : i32
    return %arg0, %c0_i32 : i32, i32
  }
}

module attributes {stable_mosaic.version = 11 : i64} {
  func.func @_mm_stats_kernel(%arg0: i32, %arg1: memref<8x4096xbf16, #tpu.memory_space<vmem>>, %arg2: memref<4096x512xbf16, #tpu.memory_space<vmem>>, %arg3: memref<8x512xf32, #tpu.memory_space<vmem>>, %arg4: memref<1x8x512xf32, #tpu.memory_space<vmem>>) attributes {dimension_semantics = [#tpu.dimension_semantics<parallel>], iteration_bounds = array<i64: 1>, scalar_prefetch = 0 : i64, scratch_operands = 0 : i64, tpu.core_type = #tpu.core_type<tc>, window_params = [{transform_indices = @transform_0, window_bounds = array<i64: 8, 4096>}, {pipeline_mode = #tpu.pipeline_mode<synchronous>, transform_indices = @transform_1, window_bounds = array<i64: 4096, 512>}, {transform_indices = @transform_2, window_bounds = array<i64: 8, 512>}, {transform_indices = @transform_3, window_bounds = array<i64: 1, 8, 512>}]} {
    %c0 = arith.constant 0 : index
    %c0_0 = arith.constant 0 : index
    %0 = vector.load %arg1[%c0, %c0_0] : memref<8x4096xbf16, #tpu.memory_space<vmem>>, vector<8x4096xbf16>
    %c0_1 = arith.constant 0 : index
    %c0_2 = arith.constant 0 : index
    %1 = vector.load %arg2[%c0_1, %c0_2] : memref<4096x512xbf16, #tpu.memory_space<vmem>>, vector<4096x512xbf16>
    %cst = arith.constant dense<0.000000e+00> : vector<8x512xf32>
    %2 = tpu.matmul %0, %1, %cst {dimension_numbers = #tpu.dot_dimension_numbers<[1], [0], [0], [1], [0, 0, 1, 1], [], []>} : vector<8x4096xbf16>, vector<4096x512xbf16>, vector<8x512xf32> -> vector<8x512xf32>
    %c0_3 = arith.constant 0 : index
    %c0_4 = arith.constant 0 : index
    %3 = vector.load %arg3[%c0_3, %c0_4] : memref<8x512xf32, #tpu.memory_space<vmem>>, vector<8x512xf32>
    tpu.vector_store %arg3[%c0_3, %c0_4], %2 {strides = array<i32>} : memref<8x512xf32, #tpu.memory_space<vmem>>, vector<8x512xf32>,
    %cst_5 = arith.constant dense<0.000000e+00> : vector<512xf32>
    %4 = vector.multi_reduction <add>, %2, %cst_5 [0] : vector<8x512xf32> to vector<512xf32>
    %5 = vector.shape_cast %4 : vector<512xf32> to vector<1x512xf32>
    %6 = arith.mulf %2, %2 : vector<8x512xf32>
    %cst_6 = arith.constant dense<0.000000e+00> : vector<512xf32>
    %7 = vector.multi_reduction <add>, %6, %cst_6 [0] : vector<8x512xf32> to vector<512xf32>
    %8 = vector.shape_cast %7 : vector<512xf32> to vector<1x512xf32>
    %cst_7 = arith.constant 0.000000e+00 : f32
    %9 = vector.broadcast %cst_7 : f32 to vector<6x512xf32>
    %10 = tpu.concatenate %5, %8, %9 in 0 : vector<1x512xf32>, vector<1x512xf32>, vector<6x512xf32> -> vector<8x512xf32>
    %11 = vector.shape_cast %10 : vector<8x512xf32> to vector<1x8x512xf32>
    %c0_8 = arith.constant 0 : index
    %c0_9 = arith.constant 0 : index
    %c0_10 = arith.constant 0 : index
    %12 = vector.load %arg4[%c0_8, %c0_9, %c0_10] : memref<1x8x512xf32, #tpu.memory_space<vmem>>, vector<1x8x512xf32>
    tpu.vector_store %arg4[%c0_8, %c0_9, %c0_10], %11 {strides = array<i32>} : memref<1x8x512xf32, #tpu.memory_space<vmem>>, vector<1x8x512xf32>,
    return
  }
  func.func @transform_0(%arg0: i32) -> (i32, i32) {
    %c0_i32 = arith.constant 0 : i32
    %c0_i32_0 = arith.constant 0 : i32
    return %arg0, %c0_i32 : i32, i32
  }
  func.func @transform_1(%arg0: i32) -> (i32, i32) {
    %c0_i32 = arith.constant 0 : i32
    %c0_i32_0 = arith.constant 0 : i32
    %c0_i32_1 = arith.constant 0 : i32
    return %c0_i32, %c0_i32_0 : i32, i32
  }
  func.func @transform_2(%arg0: i32) -> (i32, i32) {
    %c0_i32 = arith.constant 0 : i32
    %c0_i32_0 = arith.constant 0 : i32
    return %arg0, %c0_i32 : i32, i32
  }
  func.func @transform_3(%arg0: i32) -> (i32, i32, i32) {
    %c0_i32 = arith.constant 0 : i32
    %c0_i32_0 = arith.constant 0 : i32
    %c0_i32_1 = arith.constant 0 : i32
    return %arg0, %c0_i32, %c0_i32_0 : i32, i32, i32
  }
}

module attributes {stable_mosaic.version = 11 : i64} {
  func.func @_bn_apply_lrelu_kernel(%arg0: i32, %arg1: memref<8x512xf32, #tpu.memory_space<vmem>>, %arg2: memref<1x512xf32, #tpu.memory_space<vmem>>, %arg3: memref<1x512xf32, #tpu.memory_space<vmem>>, %arg4: memref<8x512xf32, #tpu.memory_space<vmem>>) attributes {dimension_semantics = [#tpu.dimension_semantics<parallel>], iteration_bounds = array<i64: 1>, scalar_prefetch = 0 : i64, scratch_operands = 0 : i64, tpu.core_type = #tpu.core_type<tc>, window_params = [{transform_indices = @transform_0, window_bounds = array<i64: 8, 512>}, {pipeline_mode = #tpu.pipeline_mode<synchronous>, transform_indices = @transform_1, window_bounds = array<i64: 1, 512>}, {pipeline_mode = #tpu.pipeline_mode<synchronous>, transform_indices = @transform_2, window_bounds = array<i64: 1, 512>}, {transform_indices = @transform_3, window_bounds = array<i64: 8, 512>}]} {
    %c0 = arith.constant 0 : index
    %c0_0 = arith.constant 0 : index
    %0 = vector.load %arg1[%c0, %c0_0] : memref<8x512xf32, #tpu.memory_space<vmem>>, vector<8x512xf32>
    %c0_1 = arith.constant 0 : index
    %c0_2 = arith.constant 0 : index
    %1 = vector.load %arg2[%c0_1, %c0_2] : memref<1x512xf32, #tpu.memory_space<vmem>>, vector<1x512xf32>
    %2 = vector.broadcast %1 : vector<1x512xf32> to vector<8x512xf32>
    %3 = arith.mulf %0, %2 : vector<8x512xf32>
    %c0_3 = arith.constant 0 : index
    %c0_4 = arith.constant 0 : index
    %4 = vector.load %arg3[%c0_3, %c0_4] : memref<1x512xf32, #tpu.memory_space<vmem>>, vector<1x512xf32>
    %5 = vector.broadcast %4 : vector<1x512xf32> to vector<8x512xf32>
    %6 = arith.addf %3, %5 : vector<8x512xf32>
    %cst = arith.constant 0.000000e+00 : f32
    %7 = vector.broadcast %cst : f32 to vector<8x512xf32>
    %8 = arith.cmpf oge, %6, %7 : vector<8x512xf32>
    %cst_5 = arith.constant 2.000000e-01 : f32
    %9 = vector.broadcast %cst_5 : f32 to vector<8x512xf32>
    %10 = arith.mulf %9, %6 : vector<8x512xf32>
    %11 = arith.select %8, %6, %10 : vector<8x512xi1>, vector<8x512xf32>
    %c0_6 = arith.constant 0 : index
    %c0_7 = arith.constant 0 : index
    %12 = vector.load %arg4[%c0_6, %c0_7] : memref<8x512xf32, #tpu.memory_space<vmem>>, vector<8x512xf32>
    tpu.vector_store %arg4[%c0_6, %c0_7], %11 {strides = array<i32>} : memref<8x512xf32, #tpu.memory_space<vmem>>, vector<8x512xf32>,
    return
  }
  func.func @transform_0(%arg0: i32) -> (i32, i32) {
    %c0_i32 = arith.constant 0 : i32
    %c0_i32_0 = arith.constant 0 : i32
    return %arg0, %c0_i32 : i32, i32
  }
  func.func @transform_1(%arg0: i32) -> (i32, i32) {
    %c0_i32 = arith.constant 0 : i32
    %c0_i32_0 = arith.constant 0 : i32
    %c0_i32_1 = arith.constant 0 : i32
    return %c0_i32, %c0_i32_0 : i32, i32
  }
  func.func @transform_2(%arg0: i32) -> (i32, i32) {
    %c0_i32 = arith.constant 0 : i32
    %c0_i32_0 = arith.constant 0 : i32
    %c0_i32_1 = arith.constant 0 : i32
    return %c0_i32, %c0_i32_0 : i32, i32
  }
  func.func @transform_3(%arg0: i32) -> (i32, i32) {
    %c0_i32 = arith.constant 0 : i32
    %c0_i32_0 = arith.constant 0 : i32
    return %arg0, %c0_i32 : i32, i32
  }
}

module attributes {stable_mosaic.version = 11 : i64} {
  func.func @_mm_bias_act_kernel(%arg0: i32, %arg1: memref<8x4608xbf16, #tpu.memory_space<vmem>>, %arg2: memref<4608x128xbf16, #tpu.memory_space<vmem>>, %arg3: memref<1x128xf32, #tpu.memory_space<vmem>>, %arg4: memref<8x128xf32, #tpu.memory_space<vmem>>) attributes {dimension_semantics = [#tpu.dimension_semantics<parallel>], iteration_bounds = array<i64: 1>, scalar_prefetch = 0 : i64, scratch_operands = 0 : i64, tpu.core_type = #tpu.core_type<tc>, window_params = [{transform_indices = @transform_0, window_bounds = array<i64: 8, 4608>}, {pipeline_mode = #tpu.pipeline_mode<synchronous>, transform_indices = @transform_1, window_bounds = array<i64: 4608, 128>}, {pipeline_mode = #tpu.pipeline_mode<synchronous>, transform_indices = @transform_2, window_bounds = array<i64: 1, 128>}, {transform_indices = @transform_3, window_bounds = array<i64: 8, 128>}]} {
    %c0 = arith.constant 0 : index
    %c0_0 = arith.constant 0 : index
    %0 = vector.load %arg1[%c0, %c0_0] : memref<8x4608xbf16, #tpu.memory_space<vmem>>, vector<8x4608xbf16>
    %c0_1 = arith.constant 0 : index
    %c0_2 = arith.constant 0 : index
    %1 = vector.load %arg2[%c0_1, %c0_2] : memref<4608x128xbf16, #tpu.memory_space<vmem>>, vector<4608x128xbf16>
    %cst = arith.constant dense<0.000000e+00> : vector<8x128xf32>
    %2 = tpu.matmul %0, %1, %cst {dimension_numbers = #tpu.dot_dimension_numbers<[1], [0], [0], [1], [0, 0, 1, 1], [], []>} : vector<8x4608xbf16>, vector<4608x128xbf16>, vector<8x128xf32> -> vector<8x128xf32>
    %c0_3 = arith.constant 0 : index
    %c0_4 = arith.constant 0 : index
    %3 = vector.load %arg3[%c0_3, %c0_4] : memref<1x128xf32, #tpu.memory_space<vmem>>, vector<1x128xf32>
    %4 = vector.broadcast %3 : vector<1x128xf32> to vector<8x128xf32>
    %5 = arith.addf %2, %4 : vector<8x128xf32>
    %c0_5 = arith.constant 0 : index
    %c0_6 = arith.constant 0 : index
    %6 = vector.load %arg4[%c0_5, %c0_6] : memref<8x128xf32, #tpu.memory_space<vmem>>, vector<8x128xf32>
    tpu.vector_store %arg4[%c0_5, %c0_6], %5 {strides = array<i32>} : memref<8x128xf32, #tpu.memory_space<vmem>>, vector<8x128xf32>,
    return
  }
  func.func @transform_0(%arg0: i32) -> (i32, i32) {
    %c0_i32 = arith.constant 0 : i32
    %c0_i32_0 = arith.constant 0 : i32
    return %arg0, %c0_i32 : i32, i32
  }
  func.func @transform_1(%arg0: i32) -> (i32, i32) {
    %c0_i32 = arith.constant 0 : i32
    %c0_i32_0 = arith.constant 0 : i32
    %c0_i32_1 = arith.constant 0 : i32
    return %c0_i32, %c0_i32_0 : i32, i32
  }
  func.func @transform_2(%arg0: i32) -> (i32, i32) {
    %c0_i32 = arith.constant 0 : i32
    %c0_i32_0 = arith.constant 0 : i32
    %c0_i32_1 = arith.constant 0 : i32
    return %c0_i32, %c0_i32_0 : i32, i32
  }
  func.func @transform_3(%arg0: i32) -> (i32, i32) {
    %c0_i32 = arith.constant 0 : i32
    %c0_i32_0 = arith.constant 0 : i32
    return %arg0, %c0_i32 : i32, i32
  }
}

</mosaic_0001>

<bundles_post_ra>
// kernel: discriminator_forward.8
= control target key start
LH: loop header
LB: loop body
LE: loop exit
PB: predicated region body
PF: predicated region fallthrough
CT: control target
= control target key end

     0   :  { %s923_s12 = smov 0   ;;  %s1099_s0 = inlined_call_operand.vmem [shape: bf16[512,96], index: 0, kind: input, shape index: {}]   ;;  %s1100_s1 = inlined_call_operand.vmem [shape: bf16[96,64], index: 1, kind: input, shape index: {}]   ;;  %s1101_s2 = inlined_call_operand.vmem [shape: f32[1,64], index: 2, kind: input, shape index: {}]   ;;  %s1102_s3 = inlined_call_operand.vmem [shape: f32[512,64], index: 3, kind: output, shape index: {}]  }
   0x1 LB: > { %s737_s13 = sadd.s32 4294967295, %s901_s12   ;;  %p741_p0 = scmp.ge.s32.totalorder %s901_s12, 1  ;;  %s901_s12 = sphi %s923_s12, %s13_s12  }
   0x2   : > { %p138_p1 = scmp.lt.s32.totalorder %s901_s12, 3 }
   0x4   : > { %p139_p2 = pnand %p741_p0, %p138_p1 }
   0x5   : > { %v873_v0 = vld [vmem:[%s1100_s1] sm:$0xff] (!%p139_p2)   ;;  %s742_s16 = sshll.u32 (!%p139_p2), %s737_s13, 5  ;;  %v874_v1 = vld [vmem:[%s1100_s1 + $0x8] sm:$0xff] (!%p139_p2)   ;;  %v875_v2 = vld [vmem:[%s1100_s1 + $0x10] sm:$0xff] (!%p139_p2)   ;;  %vm342_vm0 = vcmask (!%p139_p2), 785408   ;;  %vm648_vm1 = vcmask (!%p139_p2), 523264  }
   0x6   : > { %142 = sbr.rel (%p139_p2) target bundleno = 279 (0x117), region = 32  ;;  %p163_p3 = scmp.lt.s32.totalorder (!%p139_p2), %s742_s16, 63  ;;  %809 = vmatprep.subr.bf16.mxu0 (!%p139_p2), %v873_v0  ;;  %853 = vmatprep.subr.bf16.mxu1 (!%p139_p2), %v873_v0  ;;  %v876_v3 = vld [vmem:[%s1100_s1 + $0x18] sm:$0xff] (!%p139_p2)   ;;  %v877_v6 = vld [vmem:[%s1100_s1 + $0x20] sm:$0xff] (!%p139_p2)   ;;  %v878_v7 = vld [vmem:[%s1100_s1 + $0x28] sm:$0xff] (!%p139_p2)  }
   0x7   : > { %810 = vmatpush3.bf16.msra.mxu0 (!%p139_p2), %v873_v0  ;;  %859 = vmatpush3.bf16.msra.mxu1 (!%p139_p2), %v873_v0  ;;  %v992_v22 = vld [vmem:[%s1101_s2] ss:$0 sm:$0xff] (!%p139_p2) }
   0x8   : > { %811 = vmatprep.subr.bf16.mxu0 (!%p139_p2), %v874_v1  ;;  %854 = vmatprep.subr.bf16.mxu1 (!%p139_p2), %v874_v1 }
   0xb   : > { %812 = vmatpush3.bf16.msra.mxu0 (!%p139_p2), %v874_v1  ;;  %860 = vmatpush3.bf16.msra.mxu1 (!%p139_p2), %v874_v1 }
   0xc   : > { %813 = vmatprep.subr.bf16.mxu0 (!%p139_p2), %v875_v2  ;;  %855 = vmatprep.subr.bf16.mxu1 (!%p139_p2), %v875_v2 }
   0xd   : > { %s1104_s16 = smov (!%p163_p3, %s742_s16), 63 }
   0xe   : > { %s743_s21 = sshll.u32 %s1104_s16, 2  ;;  %s745_s6 = sshll.u32 %s1104_s16, 3 }
   0xf   : > { %s949_s26 = scalar_lea.vmem %s1099_s0, %s743_s21  ;;  %814 = vmatpush3.bf16.msra.mxu0 %v875_v2  ;;  %861 = vmatpush3.bf16.msra.mxu1 %v875_v2  ;;  %s1002_s9 = scalar_lea.vmem %s1102_s3, %s745_s6 }
  0x10   : > { %v879_v4 = vld [vmem:[%s949_s26] sm:$0xff]   ;;  %815 = vmatprep.subr.bf16.mxu0 %v876_v3  ;;  %856 = vmatprep.subr.bf16.mxu1 %v876_v3  ;;  %v881_v8 = vld [vmem:[%s949_s26 + $0x8] sm:$0xff]   ;;  %v883_v10 = vld [vmem:[%s949_s26 + $0x10] sm:$0xff]  }
  0x11   : > { %v880_v5 = vld [vmem:[%s949_s26 + $0x40] sm:$0xff]   ;;  %821 = vmatprep.mubr.msk.bf16.mxu0 %vm342_vm0, %v879_v4  ;;  %v882_v9 = vld [vmem:[%s949_s26 + $0x48] sm:$0xff]   ;;  %v884_v11 = vld [vmem:[%s949_s26 + $0x50] sm:$0xff]  }
  0x12   : > { %837 = vmatprep.mubr.msk.bf16.mxu1 %vm342_vm0, %v880_v5  ;;  %v885_v12 = vld [vmem:[%s949_s26 + $0x18] sm:$0xff]   ;;  %v887_v14 = vld [vmem:[%s949_s26 + $0x20] sm:$0xff]   ;;  %v889_v16 = vld [vmem:[%s949_s26 + $0x28] sm:$0xff]  }
  0x13   : > { %816 = vmatpush3.bf16.msra.mxu0 %v876_v3  ;;  %862 = vmatpush3.bf16.msra.mxu1 %v876_v3  ;;  %v886_v13 = vld [vmem:[%s949_s26 + $0x58] sm:$0xff]   ;;  %v888_v15 = vld [vmem:[%s949_s26 + $0x60] sm:$0xff]   ;;  %v890_v17 = vld [vmem:[%s949_s26 + $0x68] sm:$0xff]  }
  0x14   : > { %817 = vmatprep.subr.bf16.mxu0 %v877_v6  ;;  %857 = vmatprep.subr.bf16.mxu1 %v877_v6  ;;  %v891_v18 = vld [vmem:[%s949_s26 + $0x30] sm:$0xff]   ;;  %v893_v20 = vld [vmem:[%s949_s26 + $0x38] sm:$0xff]  }
  0x15   : > { %v892_v19 = vld [vmem:[%s949_s26 + $0x70] sm:$0xff]   ;;  %v894_v21 = vld [vmem:[%s949_s26 + $0x78] sm:$0xff]  }
  0x17   : > { %818 = vmatpush3.bf16.msra.mxu0 %v877_v6  ;;  %863 = vmatpush3.bf16.msra.mxu1 %v877_v6 }
  0x18   : > { %819 = vmatprep.subr.bf16.mxu0 %v878_v7  ;;  %858 = vmatprep.subr.bf16.mxu1 %v878_v7 }
  0x1b   : > { %820 = vmatpush3.bf16.msra.mxu0 %v878_v7  ;;  %864 = vmatpush3.bf16.msra.mxu1 %v878_v7 }
  0x1e   : > { %822 = vmatmul.mubr.msk.bf16.vlgmr.msra.gmra.mrb[0].mxu0 %vm342_vm0, %v881_v8  ;;  %838 = vmatmul.mubr.msk.bf16.vlgmr.msra.gmra.mrb[0].mxu1 %vm342_vm0, %v882_v9 }
  0x1f   : > { %825 = vmatprep.mubr.msk.bf16.mxu0 %vm342_vm0, %v883_v10  ;;  %841 = vmatprep.mubr.msk.bf16.mxu1 %vm342_vm0, %v884_v11 }
  0x26   : > { %826 = vmatmul.mubr.msk.bf16.gmra.mrb[4].mxu0 %vm342_vm0, %v885_v12  ;;  %842 = vmatmul.mubr.msk.bf16.gmra.mrb[4].mxu1 %vm342_vm0, %v886_v13 }
  0x27   : > { %829 = vmatprep.mubr.msk.bf16.mxu0 %vm342_vm0, %v887_v14  ;;  %845 = vmatprep.mubr.msk.bf16.mxu1 %vm342_vm0, %v888_v15 }
  0x2e   : > { %830 = vmatmul.mubr.msk.bf16.gmra.mrb[8].mxu0 %vm342_vm0, %v889_v16  ;;  %846 = vmatmul.mubr.msk.bf16.gmra.mrb[8].mxu1 %vm342_vm0, %v890_v17 }
  0x2f   : > { %833 = vmatprep.mubr.msk.bf16.mxu0 %vm342_vm0, %v891_v18  ;;  %849 = vmatprep.mubr.msk.bf16.mxu1 %vm342_vm0, %v892_v19 }
  0x36   : > { %834 = vmatmul.mubr.msk.bf16.gmra.mrb[12].mxu0 %vm342_vm0, %v893_v20  ;;  %850 = vmatmul.mubr.msk.bf16.gmra.mrb[12].mxu1 %vm342_vm0, %v894_v21 }
  0xf1   : > { %v823_v23 = vpop.f32.mrb[0].mxu0  ;;  %v839_v24 = vpop.f32.mrb[0].mxu1 }
  0xf2   : > { %v434_v25 = vadd.f32 %v823_v23, %v992_v22  ;;  %v498_v26 = vadd.f32 %v839_v24, %v992_v22  ;;  %v425_v27 = vpop.f32.mrb[1].mxu0  ;;  %v489_v28 = vpop.f32.mrb[1].mxu1 }
  0xf3   : > { %v426_v29 = vadd.f32 %v992_v22, %v425_v27  ;;  %v490_v30 = vadd.f32 %v992_v22, %v489_v28  ;;  %v824_v31 = vpop.f32.mrb[2].mxu0  ;;  %v840_v32 = vpop.f32.mrb[2].mxu1 }
  0xf4   : > { %vm554_vm2 = vcmp.ge.f32.partialorder %v434_v25, 0.0  ;;  %v586_v33 = vmul.f32 0.2, %v434_v25  ;;  %vm570_vm3 = vcmp.ge.f32.partialorder %v498_v26, 0.0  ;;  %v602_v34 = vmul.f32 0.2, %v498_v26 }
  0xf5   : > { %vm552_vm4 = vcmp.ge.f32.partialorder %v426_v29, 0.0  ;;  %v584_v35 = vmul.f32 0.2, %v426_v29  ;;  %vm568_vm5 = vcmp.ge.f32.partialorder %v490_v30, 0.0  ;;  %v600_v36 = vmul.f32 0.2, %v490_v30 }
  0xf6   : > { %v618_v37 = vsel %vm554_vm2, %v434_v25, %v586_v33  ;;  %v634_v38 = vsel %vm570_vm3, %v498_v26, %v602_v34  ;;  %v437_v39 = vadd.f32 %v824_v31, %v992_v22  ;;  %v501_v40 = vadd.f32 %v840_v32, %v992_v22  ;;  %v428_v41 = vpop.f32.mrb[3].mxu0  ;;  %v492_v42 = vpop.f32.mrb[3].mxu1 }
  0xf7   : > { %651 = vst.msk [vmem:[%s1002_s9 + $0x10] sm:$0xff] %vm648_vm1, %v618_v37  ;;  %667 = vst.msk [vmem:[%s1002_s9 + $0x90] sm:$0xff] %vm648_vm1, %v634_v38  ;;  %v616_v43 = vsel %vm552_vm4, %v426_v29, %v584_v35  ;;  %v632_v44 = vsel %vm568_vm5, %v490_v30, %v600_v36  ;;  %v429_v45 = vadd.f32 %v992_v22, %v428_v41 }
  0xf8   : > { %v493_v46 = vadd.f32 %v992_v22, %v492_v42  ;;  %649 = vst.msk [vmem:[%s1002_s9] sm:$0xff] %vm648_vm1, %v616_v43  ;;  %665 = vst.msk [vmem:[%s1002_s9 + $0x80] sm:$0xff] %vm648_vm1, %v632_v44  ;;  %vm555_vm6 = vcmp.ge.f32.partialorder %v437_v39, 0.0  ;;  %v587_v47 = vmul.f32 0.2, %v437_v39  ;;  %vm571_vm7 = vcmp.ge.f32.partialorder %v501_v40, 0.0 }
  0xf9   : > { %v603_v48 = vmul.f32 0.2, %v501_v40  ;;  %vm553_vm8 = vcmp.ge.f32.partialorder %v429_v45, 0.0  ;;  %v585_v49 = vmul.f32 0.2, %v429_v45  ;;  %v827_v53 = vpop.f32.mrb[4].mxu0 }
  0xfa   : > { %vm569_vm9 = vcmp.ge.f32.partialorder %v493_v46, 0.0  ;;  %v601_v50 = vmul.f32 0.2, %v493_v46  ;;  %v619_v51 = vsel %vm555_vm6, %v437_v39, %v587_v47  ;;  %v843_v54 = vpop.f32.mrb[4].mxu1  ;;  %v450_v57 = vadd.f32 %v827_v53, %v992_v22  ;;  %v441_v59 = vpop.f32.mrb[5].mxu0 }
  0xfb   : > { %v635_v52 = vsel %vm571_vm7, %v501_v40, %v603_v48  ;;  %652 = vst.msk [vmem:[%s1002_s9 + $0x18] sm:$0xff] %vm648_vm1, %v619_v51  ;;  %v617_v55 = vsel %vm553_vm8, %v429_v45, %v585_v49  ;;  %v514_v58 = vadd.f32 %v843_v54, %v992_v22  ;;  %v505_v60 = vpop.f32.mrb[5].mxu1  ;;  %v442_v61 = vadd.f32 %v992_v22, %v441_v59  ;;  %v828_v63 = vpop.f32.mrb[6].mxu0 }
  0xfc   : > { %668 = vst.msk [vmem:[%s1002_s9 + $0x98] sm:$0xff] %vm648_vm1, %v635_v52  ;;  %v633_v56 = vsel %vm569_vm9, %v493_v46, %v601_v50  ;;  %650 = vst.msk [vmem:[%s1002_s9 + $0x8] sm:$0xff] %vm648_vm1, %v617_v55  ;;  %v506_v62 = vadd.f32 %v992_v22, %v505_v60  ;;  %v844_v0 = vpop.f32.mrb[6].mxu1  ;;  %vm558_vm10 = vcmp.ge.f32.partialorder %v450_v57, 0.0  ;;  %v590_v1 = vmul.f32 0.2, %v450_v57 }
  0xfd   : > { %666 = vst.msk [vmem:[%s1002_s9 + $0x88] sm:$0xff] %vm648_vm1, %v633_v56  ;;  %vm574_vm11 = vcmp.ge.f32.partialorder %v514_v58, 0.0  ;;  %v606_v2 = vmul.f32 0.2, %v514_v58  ;;  %vm556_vm12 = vcmp.ge.f32.partialorder %v442_v61, 0.0  ;;  %v453_v7 = vadd.f32 %v828_v63, %v992_v22  ;;  %v444_v9 = vpop.f32.mrb[7].mxu0 }
  0xfe   : > { %v588_v3 = vmul.f32 0.2, %v442_v61  ;;  %vm572_vm13 = vcmp.ge.f32.partialorder %v506_v62, 0.0  ;;  %v604_v4 = vmul.f32 0.2, %v506_v62  ;;  %v622_v5 = vsel %vm558_vm10, %v450_v57, %v590_v1  ;;  %v508_v10 = vpop.f32.mrb[7].mxu1 }
  0xff   : > { %v638_v6 = vsel %vm574_vm11, %v514_v58, %v606_v2  ;;  %v517_v8 = vadd.f32 %v844_v0, %v992_v22  ;;  %655 = vst.msk [vmem:[%s1002_s9 + $0x30] sm:$0xff] %vm648_vm1, %v622_v5  ;;  %v445_v13 = vadd.f32 %v992_v22, %v444_v9  ;;  %v509_v14 = vadd.f32 %v992_v22, %v508_v10 }
 0x100   : > { %671 = vst.msk [vmem:[%s1002_s9 + $0xb0] sm:$0xff] %vm648_vm1, %v638_v6  ;;  %v620_v11 = vsel %vm556_vm12, %v442_v61, %v588_v3  ;;  %v636_v12 = vsel %vm572_vm13, %v506_v62, %v604_v4  ;;  %vm559_vm14 = vcmp.ge.f32.partialorder %v453_v7, 0.0  ;;  %v591_v15 = vmul.f32 0.2, %v453_v7 }
 0x101   : > { %653 = vst.msk [vmem:[%s1002_s9 + $0x20] sm:$0xff] %vm648_vm1, %v620_v11  ;;  %669 = vst.msk [vmem:[%s1002_s9 + $0xa0] sm:$0xff] %vm648_vm1, %v636_v12  ;;  %vm575_vm15 = vcmp.ge.f32.partialorder %v517_v8, 0.0  ;;  %v607_v16 = vmul.f32 0.2, %v517_v8  ;;  %vm557_vm0 = vcmp.ge.f32.partialorder %v445_v13, 0.0 }
 0x102   : > { %v589_v17 = vmul.f32 0.2, %v445_v13  ;;  %vm573_vm2 = vcmp.ge.f32.partialorder %v509_v14, 0.0  ;;  %v605_v18 = vmul.f32 0.2, %v509_v14  ;;  %v623_v19 = vsel %vm559_vm14, %v453_v7, %v591_v15  ;;  %v831_v21 = vpop.f32.mrb[8].mxu0 }
 0x103   : > { %v639_v20 = vsel %vm575_vm15, %v517_v8, %v607_v16  ;;  %v847_v23 = vpop.f32.mrb[8].mxu1  ;;  %656 = vst.msk [vmem:[%s1002_s9 + $0x38] sm:$0xff] %vm648_vm1, %v623_v19  ;;  %v466_v26 = vadd.f32 %v831_v21, %v992_v22  ;;  %v457_v28 = vpop.f32.mrb[9].mxu0 }
 0x104   : > { %672 = vst.msk [vmem:[%s1002_s9 + $0xb8] sm:$0xff] %vm648_vm1, %v639_v20  ;;  %v621_v24 = vsel %vm557_vm0, %v445_v13, %v589_v17  ;;  %v637_v25 = vsel %vm573_vm2, %v509_v14, %v605_v18  ;;  %v530_v27 = vadd.f32 %v847_v23, %v992_v22  ;;  %v521_v29 = vpop.f32.mrb[9].mxu1  ;;  %v458_v30 = vadd.f32 %v992_v22, %v457_v28  ;;  %v832_v32 = vpop.f32.mrb[10].mxu0 }
 0x105   : > { %654 = vst.msk [vmem:[%s1002_s9 + $0x28] sm:$0xff] %vm648_vm1, %v621_v24  ;;  %670 = vst.msk [vmem:[%s1002_s9 + $0xa8] sm:$0xff] %vm648_vm1, %v637_v25  ;;  %v522_v31 = vadd.f32 %v992_v22, %v521_v29  ;;  %v848_v33 = vpop.f32.mrb[10].mxu1  ;;  %vm562_vm3 = vcmp.ge.f32.partialorder %v466_v26, 0.0  ;;  %v594_v34 = vmul.f32 0.2, %v466_v26  ;;  %v469_v40 = vadd.f32 %v832_v32, %v992_v22 }
 0x106   : > { %vm578_vm4 = vcmp.ge.f32.partialorder %v530_v27, 0.0  ;;  %v610_v35 = vmul.f32 0.2, %v530_v27  ;;  %vm560_vm5 = vcmp.ge.f32.partialorder %v458_v30, 0.0  ;;  %v592_v36 = vmul.f32 0.2, %v458_v30 }
 0x107   : > { %vm576_vm6 = vcmp.ge.f32.partialorder %v522_v31, 0.0  ;;  %v608_v37 = vmul.f32 0.2, %v522_v31  ;;  %v626_v38 = vsel %vm562_vm3, %v466_v26, %v594_v34  ;;  %v533_v41 = vadd.f32 %v848_v33, %v992_v22  ;;  %v460_v42 = vpop.f32.mrb[11].mxu0  ;;  %v524_v43 = vpop.f32.mrb[11].mxu1 }
 0x108   : > { %v642_v39 = vsel %vm578_vm4, %v530_v27, %v610_v35  ;;  %659 = vst.msk [vmem:[%s1002_s9 + $0x50] sm:$0xff] %vm648_vm1, %v626_v38  ;;  %v624_v44 = vsel %vm560_vm5, %v458_v30, %v592_v36  ;;  %v461_v46 = vadd.f32 %v992_v22, %v460_v42  ;;  %v525_v47 = vadd.f32 %v992_v22, %v524_v43 }
 0x109   : > { %675 = vst.msk [vmem:[%s1002_s9 + $0xd0] sm:$0xff] %vm648_vm1, %v642_v39  ;;  %v640_v45 = vsel %vm576_vm6, %v522_v31, %v608_v37  ;;  %v835_v48 = vpop.f32.mrb[12].mxu0  ;;  %v851_v49 = vpop.f32.mrb[12].mxu1  ;;  %657 = vst.msk [vmem:[%s1002_s9 + $0x40] sm:$0xff] %vm648_vm1, %v624_v44  ;;  %vm563_vm7 = vcmp.ge.f32.partialorder %v469_v40, 0.0  ;;  %vm579_vm8 = vcmp.ge.f32.partialorder %v533_v41, 0.0 }
 0x10a   : > { %673 = vst.msk [vmem:[%s1002_s9 + $0xc0] sm:$0xff] %vm648_vm1, %v640_v45  ;;  %v595_v50 = vmul.f32 0.2, %v469_v40  ;;  %v611_v51 = vmul.f32 0.2, %v533_v41  ;;  %vm561_vm9 = vcmp.ge.f32.partialorder %v461_v46, 0.0  ;;  %v482_v56 = vadd.f32 %v835_v48, %v992_v22 }
 0x10b   : > { %v593_v52 = vmul.f32 0.2, %v461_v46  ;;  %vm577_vm10 = vcmp.ge.f32.partialorder %v525_v47, 0.0  ;;  %v609_v53 = vmul.f32 0.2, %v525_v47  ;;  %v546_v57 = vadd.f32 %v851_v49, %v992_v22  ;;  %v473_v58 = vpop.f32.mrb[13].mxu0 }
 0x10c   : > { %v627_v54 = vsel %vm563_vm7, %v469_v40, %v595_v50  ;;  %v643_v55 = vsel %vm579_vm8, %v533_v41, %v611_v51  ;;  %v537_v59 = vpop.f32.mrb[13].mxu1  ;;  %v474_v62 = vadd.f32 %v992_v22, %v473_v58  ;;  %v836_v0 = vpop.f32.mrb[14].mxu0  ;;  %vm566_vm11 = vcmp.ge.f32.partialorder %v482_v56, 0.0 }
 0x10d   : > { %660 = vst.msk [vmem:[%s1002_s9 + $0x58] sm:$0xff] %vm648_vm1, %v627_v54  ;;  %676 = vst.msk [vmem:[%s1002_s9 + $0xd8] sm:$0xff] %vm648_vm1, %v643_v55  ;;  %v625_v60 = vsel %vm561_vm9, %v461_v46, %v593_v52  ;;  %v641_v61 = vsel %vm577_vm10, %v525_v47, %v609_v53  ;;  %v538_v63 = vadd.f32 %v992_v22, %v537_v59  ;;  %v852_v1 = vpop.f32.mrb[14].mxu1  ;;  %v598_v2 = vmul.f32 0.2, %v482_v56  ;;  %v476_v10 = vpop.f32.mrb[15].mxu0 }
 0x10e   : > { %658 = vst.msk [vmem:[%s1002_s9 + $0x48] sm:$0xff] %vm648_vm1, %v625_v60  ;;  %674 = vst.msk [vmem:[%s1002_s9 + $0xc8] sm:$0xff] %vm648_vm1, %v641_v61  ;;  %vm582_vm12 = vcmp.ge.f32.partialorder %v546_v57, 0.0  ;;  %v614_v3 = vmul.f32 0.2, %v546_v57  ;;  %vm564_vm13 = vcmp.ge.f32.partialorder %v474_v62, 0.0  ;;  %v485_v8 = vadd.f32 %v836_v0, %v992_v22 }
 0x10f   : > { %v596_v4 = vmul.f32 0.2, %v474_v62  ;;  %vm580_vm14 = vcmp.ge.f32.partialorder %v538_v63, 0.0  ;;  %v612_v5 = vmul.f32 0.2, %v538_v63  ;;  %v630_v6 = vsel %vm566_vm11, %v482_v56, %v598_v2  ;;  %v540_v11 = vpop.f32.mrb[15].mxu1 }
 0x110   : > { %v646_v7 = vsel %vm582_vm12, %v546_v57, %v614_v3  ;;  %v549_v9 = vadd.f32 %v852_v1, %v992_v22  ;;  %663 = vst.msk [vmem:[%s1002_s9 + $0x70] sm:$0xff] %vm648_vm1, %v630_v6  ;;  %v477_v14 = vadd.f32 %v992_v22, %v476_v10  ;;  %v541_v15 = vadd.f32 %v992_v22, %v540_v11 }
 0x111   : > { %679 = vst.msk [vmem:[%s1002_s9 + $0xf0] sm:$0xff] %vm648_vm1, %v646_v7  ;;  %v628_v12 = vsel %vm564_vm13, %v474_v62, %v596_v4  ;;  %v644_v13 = vsel %vm580_vm14, %v538_v63, %v612_v5  ;;  %vm567_vm15 = vcmp.ge.f32.partialorder %v485_v8, 0.0  ;;  %v599_v16 = vmul.f32 0.2, %v485_v8 }
 0x112   : > { %661 = vst.msk [vmem:[%s1002_s9 + $0x60] sm:$0xff] %vm648_vm1, %v628_v12  ;;  %677 = vst.msk [vmem:[%s1002_s9 + $0xe0] sm:$0xff] %vm648_vm1, %v644_v13  ;;  %vm583_vm0 = vcmp.ge.f32.partialorder %v549_v9, 0.0  ;;  %v615_v17 = vmul.f32 0.2, %v549_v9  ;;  %vm565_vm2 = vcmp.ge.f32.partialorder %v477_v14, 0.0 }
 0x113   : > { %v597_v18 = vmul.f32 0.2, %v477_v14  ;;  %vm581_vm3 = vcmp.ge.f32.partialorder %v541_v15, 0.0  ;;  %v613_v19 = vmul.f32 0.2, %v541_v15  ;;  %v631_v20 = vsel %vm567_vm15, %v485_v8, %v599_v16 }
 0x114   : > { %v647_v21 = vsel %vm583_vm0, %v549_v9, %v615_v17  ;;  %664 = vst.msk [vmem:[%s1002_s9 + $0x78] sm:$0xff] %vm648_vm1, %v631_v20 }
 0x115   : > { %680 = vst.msk [vmem:[%s1002_s9 + $0xf8] sm:$0xff] %vm648_vm1, %v647_v21  ;;  %v629_v22 = vsel %vm565_vm2, %v477_v14, %v597_v18  ;;  %v645_v23 = vsel %vm581_vm3, %v541_v15, %v613_v19 }
 0x116   : > { %662 = vst.msk [vmem:[%s1002_s9 + $0x68] sm:$0xff] %vm648_vm1, %v629_v22  ;;  %678 = vst.msk [vmem:[%s1002_s9 + $0xe8] sm:$0xff] %vm648_vm1, %v645_v23 }
 0x117 PF: > { %s13_s12 = sadd.s32 1, %s901_s12  }
 0x118   : > { %p10_p4 = scmp.ge.s32.totalorder %s13_s12, 4  }
 0x11a   :  { %12 = sbr.rel (!%p10_p4) target bundleno = 1 (0x1), region = 62 }

// kernel: discriminator_forward.9
= control target key start
LH: loop header
LB: loop body
LE: loop exit
PB: predicated region body
PF: predicated region fallthrough
CT: control target
= control target key end

     0   :  { %vm1372_vm0 = vcmask 1040384   ;;  %vm1374_vm1 = vcmask 1041408   ;;  %s2336_s1 = inlined_call_operand.vmem [shape: bf16[1024,128], index: 1, kind: input, shape index: {}]   ;;  %s2337_s0 = inlined_call_operand.vmem [shape: bf16[128,1024], index: 0, kind: input, shape index: {}]   ;;  %s2338_s2 = inlined_call_operand.vmem [shape: f32[128,128], index: 2, kind: output, shape index: {0}]   ;;  %s2339_s3 = inlined_call_operand.vmem [shape: f32[1,8,128], index: 3, kind: output, shape index: {1}]  }
   0x1   :  { %v1769_v0 = vld [vmem:[%s2336_s1 + $0x40] sm:$0xff]   ;;  %v1773_v4 = vld [vmem:[%s2336_s1 + $0x48] sm:$0xff]   ;;  %v1777_v8 = vld [vmem:[%s2336_s1 + $0x50] sm:$0xff]  }
   0x2   :  { %v1770_v1 = vld [vmem:[%s2336_s1 + $0xc0] sm:$0xff]   ;;  %1513 = vmatprep.subr.bf16.mxu0 %v1769_v0  ;;  %v1774_v5 = vld [vmem:[%s2336_s1 + $0xc8] sm:$0xff]   ;;  %v1778_v9 = vld [vmem:[%s2336_s1 + $0xd0] sm:$0xff]  }
   0x3   :  { %v1771_v2 = vld [vmem:[%s2336_s1] sm:$0xff]   ;;  %1577 = vmatprep.subr.bf16.mxu1 %v1770_v1  ;;  %v1775_v6 = vld [vmem:[%s2336_s1 + $0x8] sm:$0xff]   ;;  %v1779_v10 = vld [vmem:[%s2336_s1 + $0x10] sm:$0xff]  }
   0x4   :  { %v1772_v3 = vld [vmem:[%s2336_s1 + $0x80] sm:$0xff]   ;;  %1514 = vmatpush3.bf16.msra.mxu0 %v1771_v2  ;;  %v1776_v7 = vld [vmem:[%s2336_s1 + $0x88] sm:$0xff]   ;;  %v1780_v11 = vld [vmem:[%s2336_s1 + $0x90] sm:$0xff]  }
   0x5   :  { %1578 = vmatpush3.bf16.msra.mxu1 %v1772_v3  ;;  %1515 = vmatprep.subr.bf16.mxu0 %v1773_v4  ;;  %v1781_v12 = vld [vmem:[%s2336_s1 + $0x58] sm:$0xff]   ;;  %v1785_v16 = vld [vmem:[%s2336_s1 + $0x60] sm:$0xff]   ;;  %v1789_v20 = vld [vmem:[%s2336_s1 + $0x68] sm:$0xff]  }
   0x6   :  { %1579 = vmatprep.subr.bf16.mxu1 %v1774_v5  ;;  %v1782_v13 = vld [vmem:[%s2336_s1 + $0xd8] sm:$0xff]   ;;  %v1786_v17 = vld [vmem:[%s2336_s1 + $0xe0] sm:$0xff]   ;;  %v1790_v21 = vld [vmem:[%s2336_s1 + $0xe8] sm:$0xff]  }
   0x7   :  { %v1783_v14 = vld [vmem:[%s2336_s1 + $0x18] sm:$0xff]   ;;  %v1787_v18 = vld [vmem:[%s2336_s1 + $0x20] sm:$0xff]   ;;  %v1791_v22 = vld [vmem:[%s2336_s1 + $0x28] sm:$0xff]  }
   0x8   :  { %1516 = vmatpush3.bf16.msra.mxu0 %v1775_v6  ;;  %v1784_v15 = vld [vmem:[%s2336_s1 + $0x98] sm:$0xff]   ;;  %v1788_v19 = vld [vmem:[%s2336_s1 + $0xa0] sm:$0xff]   ;;  %v1792_v23 = vld [vmem:[%s2336_s1 + $0xa8] sm:$0xff]  }
   0x9   :  { %1580 = vmatpush3.bf16.msra.mxu1 %v1776_v7  ;;  %1517 = vmatprep.subr.bf16.mxu0 %v1777_v8  ;;  %v1793_v24 = vld [vmem:[%s2336_s1 + $0x70] sm:$0xff]   ;;  %v1797_v28 = vld [vmem:[%s2336_s1 + $0x78] sm:$0xff]   ;;  %v14_v32 = vld [vmem:[%s2337_s0] sm:$0xff] }
   0xa   :  { %1581 = vmatprep.subr.bf16.mxu1 %v1778_v9  ;;  %v1794_v25 = vld [vmem:[%s2336_s1 + $0xf0] sm:$0xff]   ;;  %v1798_v29 = vld [vmem:[%s2336_s1 + $0xf8] sm:$0xff]   ;;  %v18_v33 = vld [vmem:[%s2337_s0 + $0x20] sm:$0xff] }
   0xb   :  { %v1795_v26 = vld [vmem:[%s2336_s1 + $0x30] sm:$0xff]   ;;  %v1799_v30 = vld [vmem:[%s2336_s1 + $0x38] sm:$0xff]   ;;  %v15_v34 = vld [vmem:[%s2337_s0 + $0x8] sm:$0xff]  ;;  %v1385_v35 = vcombine.low %v14_v32, %v18_v33  ;;  %v1386_v36 = vcombine.high %v14_v32, %v18_v33 }
   0xc   :  { %1518 = vmatpush3.bf16.msra.mxu0 %v1779_v10  ;;  %v1796_v27 = vld [vmem:[%s2336_s1 + $0xb0] sm:$0xff]   ;;  %v1800_v31 = vld [vmem:[%s2336_s1 + $0xb8] sm:$0xff]   ;;  %v19_v37 = vld [vmem:[%s2337_s0 + $0x28] sm:$0xff] }
   0xd   :  { %1582 = vmatpush3.bf16.msra.mxu1 %v1780_v11  ;;  %1519 = vmatprep.subr.bf16.mxu0 %v1781_v12  ;;  %v1387_v38 = vcombine.low %v15_v34, %v19_v37  ;;  %v1388_v39 = vcombine.high %v15_v34, %v19_v37  ;;  %v1801_v40 = vld [vmem:[%s2336_s1 + $0x140] sm:$0xff]   ;;  %v23_v47 = vld [vmem:[%s2337_s0 + $0x48] sm:$0xff]  ;;  %v1809_v62 = vld [vmem:[%s2336_s1 + $0x150] sm:$0xff]  }
   0xe   :  { %1583 = vmatprep.subr.bf16.mxu1 %v1782_v13  ;;  %942 = vmatprep.mubr.bf16.mxu0 %v1386_v36  ;;  %v1802_v41 = vld [vmem:[%s2336_s1 + $0x100] sm:$0xff]   ;;  %v27_v48 = vld [vmem:[%s2337_s0 + $0x68] sm:$0xff]  ;;  %v1810_v63 = vld [vmem:[%s2336_s1 + $0x110] sm:$0xff]  }
   0xf   :  { %1039 = vmatprep.mubr.bf16.mxu1 %v1388_v39  ;;  %v1803_v42 = vld [vmem:[%s2336_s1 + $0x1c0] sm:$0xff]   ;;  %v1396_v49 = vcombine.high %v23_v47, %v27_v48  ;;  %v1805_v50 = vld [vmem:[%s2336_s1 + $0x148] sm:$0xff]   ;;  %v1395_v53 = vcombine.low %v23_v47, %v27_v48  ;;  %v1811_v0 = vld [vmem:[%s2336_s1 + $0x1d0] sm:$0xff]  }
  0x10   :  { %1520 = vmatpush3.bf16.msra.mxu0 %v1783_v14  ;;  %v1804_v43 = vld [vmem:[%s2336_s1 + $0x180] sm:$0xff]   ;;  %v1806_v52 = vld [vmem:[%s2336_s1 + $0x108] sm:$0xff]   ;;  %v1812_v1 = vld [vmem:[%s2336_s1 + $0x190] sm:$0xff]  }
  0x11   :  { %1584 = vmatpush3.bf16.msra.mxu1 %v1784_v15  ;;  %1521 = vmatprep.subr.bf16.mxu0 %v1785_v16  ;;  %v22_v44 = vld [vmem:[%s2337_s0 + $0x40] sm:$0xff]  ;;  %v1807_v54 = vld [vmem:[%s2336_s1 + $0x1c8] sm:$0xff]   ;;  %v1813_v10 = vld [vmem:[%s2336_s1 + $0x158] sm:$0xff]  }
  0x12   :  { %1585 = vmatprep.subr.bf16.mxu1 %v1786_v17  ;;  %v26_v45 = vld [vmem:[%s2337_s0 + $0x60] sm:$0xff]  ;;  %v1808_v55 = vld [vmem:[%s2336_s1 + $0x188] sm:$0xff]   ;;  %v1814_v11 = vld [vmem:[%s2336_s1 + $0x118] sm:$0xff]  }
  0x13   :  { %v1394_v46 = vcombine.high %v22_v44, %v26_v45  ;;  %v1393_v51 = vcombine.low %v22_v44, %v26_v45  ;;  %v30_v56 = vld [vmem:[%s2337_s0 + $0x80] sm:$0xff]  ;;  %v31_v58 = vld [vmem:[%s2337_s0 + $0x88] sm:$0xff]  ;;  %v1815_v12 = vld [vmem:[%s2336_s1 + $0x1d8] sm:$0xff]  }
  0x14   :  { %1522 = vmatpush3.bf16.msra.mxu0 %v1787_v18  ;;  %v34_v57 = vld [vmem:[%s2337_s0 + $0xa0] sm:$0xff]  ;;  %v35_v59 = vld [vmem:[%s2337_s0 + $0xa8] sm:$0xff]  ;;  %v1816_v13 = vld [vmem:[%s2336_s1 + $0x198] sm:$0xff]  }
  0x15   :  { %1586 = vmatpush3.bf16.msra.mxu1 %v1788_v19  ;;  %1523 = vmatprep.subr.bf16.mxu0 %v1789_v20  ;;  %v1402_v60 = vcombine.high %v30_v56, %v34_v57  ;;  %v1404_v61 = vcombine.high %v31_v58, %v35_v59  ;;  %v1401_v2 = vcombine.low %v30_v56, %v34_v57  ;;  %v38_v3 = vld [vmem:[%s2337_s0 + $0xc0] sm:$0xff]  ;;  %v39_v5 = vld [vmem:[%s2337_s0 + $0xc8] sm:$0xff]  ;;  %v1826_v39 = vld [vmem:[%s2336_s1 + $0x130] sm:$0xff]  }
  0x16   :  { %1587 = vmatprep.subr.bf16.mxu1 %v1790_v21  ;;  %v42_v4 = vld [vmem:[%s2337_s0 + $0xe0] sm:$0xff]  ;;  %v1403_v6 = vcombine.low %v31_v58, %v35_v59  ;;  %v43_v8 = vld [vmem:[%s2337_s0 + $0xe8] sm:$0xff]  ;;  %v1830_v48 = vld [vmem:[%s2336_s1 + $0x138] sm:$0xff]  }
  0x17   :  { %v1410_v7 = vcombine.high %v38_v3, %v42_v4  ;;  %v1412_v9 = vcombine.high %v39_v5, %v43_v8  ;;  %v46_v14 = vld [vmem:[%s2337_s0 + $0x100] sm:$0xff]  ;;  %v47_v16 = vld [vmem:[%s2337_s0 + $0x108] sm:$0xff]  ;;  %v1409_v19 = vcombine.low %v38_v3, %v42_v4  ;;  %v1411_v21 = vcombine.low %v39_v5, %v43_v8  ;;  %v25_v8 = vld [vmem:[%s2337_s0 + $0x58] sm:$0xff] }
  0x18   :  { %1524 = vmatpush3.bf16.msra.mxu0 %v1791_v22  ;;  %v50_v15 = vld [vmem:[%s2337_s0 + $0x120] sm:$0xff]  ;;  %v51_v17 = vld [vmem:[%s2337_s0 + $0x128] sm:$0xff] }
  0x19   :  { %1588 = vmatpush3.bf16.msra.mxu1 %v1792_v23  ;;  %1525 = vmatprep.subr.bf16.mxu0 %v1793_v24  ;;  %v1817_v18 = vld [vmem:[%s2336_s1 + $0x160] sm:$0xff]   ;;  %v1418_v22 = vcombine.high %v46_v14, %v50_v15  ;;  %v1420_v24 = vcombine.high %v47_v16, %v51_v17  ;;  %v1823_v32 = vld [vmem:[%s2336_s1 + $0x1e8] sm:$0xff]   ;;  %v1417_v34 = vcombine.low %v46_v14, %v50_v15  ;;  %v32_v14 = vld [vmem:[%s2337_s0 + $0x90] sm:$0xff] }
  0x1a   :  { %1589 = vmatprep.subr.bf16.mxu1 %v1794_v25  ;;  %v1818_v20 = vld [vmem:[%s2336_s1 + $0x120] sm:$0xff]   ;;  %v1824_v33 = vld [vmem:[%s2336_s1 + $0x1a8] sm:$0xff]   ;;  %v36_v15 = vld [vmem:[%s2337_s0 + $0xb0] sm:$0xff] }
  0x1b   :  { %v1819_v23 = vld [vmem:[%s2336_s1 + $0x1e0] sm:$0xff]   ;;  %v63_v44 = vld [vmem:[%s2337_s0 + $0x188] sm:$0xff] }
  0x1c   :  { %1526 = vmatpush3.bf16.msra.mxu0 %v1795_v26  ;;  %v1820_v25 = vld [vmem:[%s2336_s1 + $0x1a0] sm:$0xff]   ;;  %v67_v45 = vld [vmem:[%s2337_s0 + $0x1a8] sm:$0xff] }
  0x1d   :  { %1590 = vmatpush3.bf16.msra.mxu1 %v1796_v27  ;;  %1527 = vmatprep.subr.bf16.mxu0 %v1797_v28  ;;  %v54_v26 = vld [vmem:[%s2337_s0 + $0x140] sm:$0xff]  ;;  %v1821_v28 = vld [vmem:[%s2336_s1 + $0x168] sm:$0xff]   ;;  %v1435_v59 = vcombine.low %v63_v44, %v67_v45 }
  0x1e   :  { %1591 = vmatprep.subr.bf16.mxu1 %v1798_v29  ;;  %v58_v27 = vld [vmem:[%s2337_s0 + $0x160] sm:$0xff]  ;;  %v55_v29 = vld [vmem:[%s2337_s0 + $0x148] sm:$0xff] }
  0x1f   :  { %v1426_v36 = vcombine.high %v54_v26, %v58_v27  ;;  %v1425_v47 = vcombine.low %v54_v26, %v58_v27  ;;  %v71_v56 = vld [vmem:[%s2337_s0 + $0x1c8] sm:$0xff]  ;;  %v1405_v26 = vcombine.low %v32_v14, %v36_v15 }
  0x20   :  { %1528 = vmatpush3.bf16.msra.mxu0 %v1799_v30  ;;  %v59_v30 = vld [vmem:[%s2337_s0 + $0x168] sm:$0xff] }
  0x21   :  { %1592 = vmatpush3.bf16.msra.mxu1 %v1800_v31  ;;  %1641 = vmatprep.subr.bf16.mxu0 %v1801_v40  ;;  %v1822_v31 = vld [vmem:[%s2336_s1 + $0x128] sm:$0xff]   ;;  %v1428_v37 = vcombine.high %v55_v29, %v59_v30  ;;  %v1827_v40 = vld [vmem:[%s2336_s1 + $0x1f0] sm:$0xff]  }
  0x22   :  { %1705 = vmatprep.subr.bf16.mxu1 %v1803_v42  ;;  %v66_v42 = vld [vmem:[%s2337_s0 + $0x1a0] sm:$0xff]  ;;  %v75_v57 = vld [vmem:[%s2337_s0 + $0x1e8] sm:$0xff] }
  0x23   :  { %943 = vmatmul.mubr.bf16.vlgmr.msra.gmra.mrb[0].mxu0 %v1385_v35  ;;  %v1419_v35 = vcombine.low %v47_v16, %v51_v17  ;;  %v1443_v3 = vcombine.low %v71_v56, %v75_v57  ;;  %v33_v16 = vld [vmem:[%s2337_s0 + $0x98] sm:$0xff] }
  0x24   :  { %1040 = vmatmul.mubr.bf16.vlgmr.msra.gmra.mrb[0].mxu1 %v1387_v38  ;;  %1642 = vmatpush3.bf16.msra.mxu0 %v1802_v41  ;;  %v1825_v38 = vld [vmem:[%s2336_s1 + $0x170] sm:$0xff]   ;;  %v62_v41 = vld [vmem:[%s2337_s0 + $0x180] sm:$0xff]  ;;  %v37_v17 = vld [vmem:[%s2337_s0 + $0xb8] sm:$0xff] }
  0x25   :  { %1706 = vmatpush3.bf16.msra.mxu1 %v1804_v43  ;;  %950 = vmatprep.mubr.bf16.mxu0 %v1394_v46  ;;  %v1828_v43 = vld [vmem:[%s2336_s1 + $0x1b0] sm:$0xff]   ;;  %v1829_v46 = vld [vmem:[%s2336_s1 + $0x178] sm:$0xff]   ;;  %v1433_v58 = vcombine.low %v62_v41, %v66_v42  ;;  %v1407_v27 = vcombine.low %v33_v16, %v37_v17 }
  0x26   :  { %1047 = vmatprep.mubr.bf16.mxu1 %v1396_v49  ;;  %1643 = vmatprep.subr.bf16.mxu0 %v1805_v50  ;;  %v1427_v49 = vcombine.low %v55_v29, %v59_v30  ;;  %v1434_v50 = vcombine.high %v62_v41, %v66_v42  ;;  %v48_v30 = vld [vmem:[%s2337_s0 + $0x110] sm:$0xff]  ;;  %v61_v41 = vld [vmem:[%s2337_s0 + $0x178] sm:$0xff] }
  0x27   :  { %1707 = vmatprep.subr.bf16.mxu1 %v1807_v54  ;;  %v70_v54 = vld [vmem:[%s2337_s0 + $0x1c0] sm:$0xff] }
  0x28   :  { %1644 = vmatpush3.bf16.msra.mxu0 %v1806_v52  ;;  %v1436_v52 = vcombine.high %v63_v44, %v67_v45 }
  0x29   :  { %1708 = vmatpush3.bf16.msra.mxu1 %v1808_v55  ;;  %1645 = vmatprep.subr.bf16.mxu0 %v1809_v62  ;;  %v74_v55 = vld [vmem:[%s2337_s0 + $0x1e0] sm:$0xff]  ;;  %v16_v62 = vld [vmem:[%s2337_s0 + $0x10] sm:$0xff] }
  0x2a   :  { %1709 = vmatprep.subr.bf16.mxu1 %v1811_v0  ;;  %v17_v0 = vld [vmem:[%s2337_s0 + $0x18] sm:$0xff] }
  0x2b   :  { %951 = vmatmul.mubr.bf16.gmra.mrb[4].mxu0 %v1393_v51  ;;  %v1831_v51 = vld [vmem:[%s2336_s1 + $0x1f8] sm:$0xff]  }
  0x2c   :  { %1048 = vmatmul.mubr.bf16.gmra.mrb[4].mxu1 %v1395_v53  ;;  %958 = vmatprep.mubr.bf16.mxu0 %v1402_v60  ;;  %v1832_v53 = vld [vmem:[%s2336_s1 + $0x1b8] sm:$0xff]   ;;  %v1442_v60 = vcombine.high %v70_v54, %v74_v55 }
  0x2d   :  { %1055 = vmatprep.mubr.bf16.mxu1 %v1404_v61  ;;  %1646 = vmatpush3.bf16.msra.mxu0 %v1810_v63  ;;  %v1444_v61 = vcombine.high %v71_v56, %v75_v57  ;;  %v20_v63 = vld [vmem:[%s2337_s0 + $0x30] sm:$0xff]  ;;  %v73_v56 = vld [vmem:[%s2337_s0 + $0x1d8] sm:$0xff] }
  0x2e   :  { %1710 = vmatpush3.bf16.msra.mxu1 %v1812_v1  ;;  %1647 = vmatprep.subr.bf16.mxu0 %v1813_v10  ;;  %v21_v1 = vld [vmem:[%s2337_s0 + $0x38] sm:$0xff]  ;;  %v1390_v4 = vcombine.high %v16_v62, %v20_v63  ;;  %v1389_v10 = vcombine.low %v16_v62, %v20_v63 }
  0x2f   :  { %1711 = vmatprep.subr.bf16.mxu1 %v1815_v12  ;;  %v1392_v5 = vcombine.high %v17_v0, %v21_v1  ;;  %v77_v57 = vld [vmem:[%s2337_s0 + $0x1f8] sm:$0xff] }
  0x30   :  { %v1447_v63 = vcombine.low %v73_v56, %v77_v57 }
  0x31   :  { %1648 = vmatpush3.bf16.msra.mxu0 %v1814_v11  ;;  %v1391_v11 = vcombine.low %v17_v0, %v21_v1 }
  0x32   :  { %1712 = vmatpush3.bf16.msra.mxu1 %v1816_v13  ;;  %1649 = vmatprep.subr.bf16.mxu0 %v1817_v18 }
  0x33   :  { %959 = vmatmul.mubr.bf16.gmra.mrb[8].mxu0 %v1401_v2  ;;  %1713 = vmatprep.subr.bf16.mxu1 %v1819_v23  ;;  %v1441_v2 = vcombine.low %v70_v54, %v74_v55  ;;  %v44_v23 = vld [vmem:[%s2337_s0 + $0xf0] sm:$0xff] }
  0x34   :  { %1056 = vmatmul.mubr.bf16.gmra.mrb[8].mxu1 %v1403_v6  ;;  %966 = vmatprep.mubr.bf16.mxu0 %v1410_v7  ;;  %v24_v6 = vld [vmem:[%s2337_s0 + $0x50] sm:$0xff] }
  0x35   :  { %1063 = vmatprep.mubr.bf16.mxu1 %v1412_v9  ;;  %1650 = vmatpush3.bf16.msra.mxu0 %v1818_v20  ;;  %v28_v7 = vld [vmem:[%s2337_s0 + $0x70] sm:$0xff]  ;;  %v29_v9 = vld [vmem:[%s2337_s0 + $0x78] sm:$0xff]  ;;  %v1406_v20 = vcombine.high %v32_v14, %v36_v15 }
  0x36   :  { %1714 = vmatpush3.bf16.msra.mxu1 %v1820_v25  ;;  %1651 = vmatprep.subr.bf16.mxu0 %v1821_v28  ;;  %v1398_v12 = vcombine.high %v24_v6, %v28_v7  ;;  %v1400_v13 = vcombine.high %v25_v8, %v29_v9  ;;  %v1397_v18 = vcombine.low %v24_v6, %v28_v7  ;;  %v45_v25 = vld [vmem:[%s2337_s0 + $0xf8] sm:$0xff]  ;;  %v72_v54 = vld [vmem:[%s2337_s0 + $0x1d0] sm:$0xff] }
  0x37   :  { %1715 = vmatprep.subr.bf16.mxu1 %v1823_v32  ;;  %v49_v32 = vld [vmem:[%s2337_s0 + $0x118] sm:$0xff]  ;;  %v76_v55 = vld [vmem:[%s2337_s0 + $0x1f0] sm:$0xff] }
  0x38   :  { %v1445_v62 = vcombine.low %v72_v54, %v76_v55 }
  0x39   :  { %1652 = vmatpush3.bf16.msra.mxu0 %v1822_v31  ;;  %v52_v31 = vld [vmem:[%s2337_s0 + $0x130] sm:$0xff] }
  0x3a   :  { %1716 = vmatpush3.bf16.msra.mxu1 %v1824_v33  ;;  %1653 = vmatprep.subr.bf16.mxu0 %v1825_v38  ;;  %v53_v33 = vld [vmem:[%s2337_s0 + $0x138] sm:$0xff]  ;;  %v56_v38 = vld [vmem:[%s2337_s0 + $0x150] sm:$0xff]  ;;  %v1421_v42 = vcombine.low %v48_v30, %v52_v31 }
  0x3b   :  { %967 = vmatmul.mubr.bf16.gmra.mrb[12].mxu0 %v1409_v19  ;;  %1717 = vmatprep.subr.bf16.mxu1 %v1827_v40  ;;  %v1399_v19 = vcombine.low %v25_v8, %v29_v9  ;;  %v57_v40 = vld [vmem:[%s2337_s0 + $0x158] sm:$0xff] }
  0x3c   :  { %1064 = vmatmul.mubr.bf16.gmra.mrb[12].mxu1 %v1411_v21  ;;  %974 = vmatprep.mubr.bf16.mxu0 %v1418_v22  ;;  %v1408_v21 = vcombine.high %v33_v16, %v37_v17  ;;  %v40_v22 = vld [vmem:[%s2337_s0 + $0xd0] sm:$0xff]  ;;  %v1432_v45 = vcombine.high %v57_v40, %v61_v41 }
  0x3d   :  { %1071 = vmatprep.mubr.bf16.mxu1 %v1420_v24  ;;  %1654 = vmatpush3.bf16.msra.mxu0 %v1826_v39  ;;  %v41_v24 = vld [vmem:[%s2337_s0 + $0xd8] sm:$0xff]  ;;  %v1414_v28 = vcombine.high %v40_v22, %v44_v23  ;;  %v60_v39 = vld [vmem:[%s2337_s0 + $0x170] sm:$0xff] }
  0x3e   :  { %1718 = vmatpush3.bf16.msra.mxu1 %v1828_v43  ;;  %1655 = vmatprep.subr.bf16.mxu0 %v1829_v46  ;;  %v1416_v29 = vcombine.high %v41_v24, %v45_v25  ;;  %v1423_v43 = vcombine.low %v49_v32, %v53_v33  ;;  %v1430_v44 = vcombine.high %v56_v38, %v60_v39  ;;  %v64_v46 = vld [vmem:[%s2337_s0 + $0x190] sm:$0xff] }
  0x3f   :  { %1719 = vmatprep.subr.bf16.mxu1 %v1831_v51  ;;  %v1431_v51 = vcombine.low %v57_v40, %v61_v41 }
  0x41   :  { %1656 = vmatpush3.bf16.msra.mxu0 %v1830_v48  ;;  %v65_v48 = vld [vmem:[%s2337_s0 + $0x198] sm:$0xff] }
  0x42   :  { %1720 = vmatpush3.bf16.msra.mxu1 %v1832_v53 }
  0x43   :  { %975 = vmatmul.mubr.bf16.gmra.mrb[16].mxu0 %v1417_v34  ;;  %v1413_v34 = vcombine.low %v40_v22, %v44_v23 }
  0x44   :  { %1072 = vmatmul.mubr.bf16.gmra.mrb[16].mxu1 %v1419_v35  ;;  %982 = vmatprep.mubr.bf16.mxu0 %v1426_v36  ;;  %v1415_v35 = vcombine.low %v41_v24, %v45_v25  ;;  %v1422_v36 = vcombine.high %v48_v30, %v52_v31 }
  0x45   :  { %1079 = vmatprep.mubr.bf16.mxu1 %v1428_v37  ;;  %v1424_v37 = vcombine.high %v49_v32, %v53_v33 }
  0x4b   :  { %983 = vmatmul.mubr.bf16.gmra.mrb[20].mxu0 %v1425_v47  ;;  %v68_v47 = vld [vmem:[%s2337_s0 + $0x1b0] sm:$0xff] }
  0x4c   :  { %1080 = vmatmul.mubr.bf16.gmra.mrb[20].mxu1 %v1427_v49  ;;  %990 = vmatprep.mubr.bf16.mxu0 %v1434_v50  ;;  %v69_v49 = vld [vmem:[%s2337_s0 + $0x1b8] sm:$0xff]  ;;  %v1429_v50 = vcombine.low %v56_v38, %v60_v39 }
  0x4d   :  { %1087 = vmatprep.mubr.bf16.mxu1 %v1436_v52  ;;  %v1438_v52 = vcombine.high %v64_v46, %v68_v47  ;;  %v1440_v53 = vcombine.high %v65_v48, %v69_v49 }
  0x53   :  { %991 = vmatmul.mubr.bf16.gmra.mrb[24].mxu0 %v1433_v58  ;;  %v1437_v58 = vcombine.low %v64_v46, %v68_v47 }
  0x54   :  { %1088 = vmatmul.mubr.bf16.gmra.mrb[24].mxu1 %v1435_v59  ;;  %998 = vmatprep.mubr.bf16.mxu0 %v1442_v60  ;;  %v1439_v59 = vcombine.low %v65_v48, %v69_v49  ;;  %v1446_v60 = vcombine.high %v72_v54, %v76_v55 }
  0x55   :  { %1095 = vmatprep.mubr.bf16.mxu1 %v1444_v61  ;;  %v1448_v61 = vcombine.high %v73_v56, %v77_v57 }
  0x5b   :  { %999 = vmatmul.mubr.bf16.gmra.mrb[28].mxu0 %v1441_v2 }
  0x5c   :  { %1096 = vmatmul.mubr.bf16.gmra.mrb[28].mxu1 %v1443_v3  ;;  %1136 = vmatprep.mubr.bf16.mxu0 %v1390_v4 }
  0x5d   :  { %1233 = vmatprep.mubr.bf16.mxu1 %v1392_v5 }
  0x63   :  { %1137 = vmatmul.mubr.bf16.vlgmr.msra.gmra.mrb[32].mxu0 %v1389_v10 }
  0x64   :  { %1234 = vmatmul.mubr.bf16.vlgmr.msra.gmra.mrb[32].mxu1 %v1391_v11  ;;  %1144 = vmatprep.mubr.bf16.mxu0 %v1398_v12 }
  0x65   :  { %1241 = vmatprep.mubr.bf16.mxu1 %v1400_v13 }
  0x6b   :  { %1145 = vmatmul.mubr.bf16.gmra.mrb[36].mxu0 %v1397_v18 }
  0x6c   :  { %1242 = vmatmul.mubr.bf16.gmra.mrb[36].mxu1 %v1399_v19  ;;  %1152 = vmatprep.mubr.bf16.mxu0 %v1406_v20 }
  0x6d   :  { %1249 = vmatprep.mubr.bf16.mxu1 %v1408_v21 }
  0x73   :  { %1153 = vmatmul.mubr.bf16.gmra.mrb[40].mxu0 %v1405_v26 }
  0x74   :  { %1250 = vmatmul.mubr.bf16.gmra.mrb[40].mxu1 %v1407_v27  ;;  %1160 = vmatprep.mubr.bf16.mxu0 %v1414_v28 }
  0x75   :  { %1257 = vmatprep.mubr.bf16.mxu1 %v1416_v29 }
  0x7b   :  { %1161 = vmatmul.mubr.bf16.gmra.mrb[44].mxu0 %v1413_v34 }
  0x7c   :  { %1258 = vmatmul.mubr.bf16.gmra.mrb[44].mxu1 %v1415_v35  ;;  %1168 = vmatprep.mubr.bf16.mxu0 %v1422_v36 }
  0x7d   :  { %1265 = vmatprep.mubr.bf16.mxu1 %v1424_v37 }
  0x83   :  { %1169 = vmatmul.mubr.bf16.gmra.mrb[48].mxu0 %v1421_v42 }
  0x84   :  { %1266 = vmatmul.mubr.bf16.gmra.mrb[48].mxu1 %v1423_v43  ;;  %1176 = vmatprep.mubr.bf16.mxu0 %v1430_v44 }
  0x85   :  { %1273 = vmatprep.mubr.bf16.mxu1 %v1432_v45 }
  0x8b   :  { %1177 = vmatmul.mubr.bf16.gmra.mrb[52].mxu0 %v1429_v50 }
  0x8c   :  { %1274 = vmatmul.mubr.bf16.gmra.mrb[52].mxu1 %v1431_v51  ;;  %1184 = vmatprep.mubr.bf16.mxu0 %v1438_v52 }
  0x8d   :  { %1281 = vmatprep.mubr.bf16.mxu1 %v1440_v53 }
  0x93   :  { %1185 = vmatmul.mubr.bf16.gmra.mrb[56].mxu0 %v1437_v58 }
  0x94   :  { %1282 = vmatmul.mubr.bf16.gmra.mrb[56].mxu1 %v1439_v59  ;;  %1192 = vmatprep.mubr.bf16.mxu0 %v1446_v60 }
  0x95   :  { %1289 = vmatprep.mubr.bf16.mxu1 %v1448_v61 }
  0x9b   :  { %1193 = vmatmul.mubr.bf16.gmra.mrb[60].mxu0 %v1445_v62 }
  0x9c   :  { %1290 = vmatmul.mubr.bf16.gmra.mrb[60].mxu1 %v1447_v63 }
  0xf6   :  { %v1529_v0 = vpop.f32.mrb[0].mxu0 }
  0xf7   :  { %v1593_v1 = vpop.f32.mrb[0].mxu1  ;;  %v1530_v2 = vpop.f32.mrb[1].mxu0 }
  0xf8   :  { %v1531_v3 = vadd.f32 %v1530_v2, %v1529_v0  ;;  %v1594_v4 = vpop.f32.mrb[1].mxu1  ;;  %v1532_v5 = vpop.f32.mrb[2].mxu0 }
  0xf9   :  { %v1595_v6 = vadd.f32 %v1594_v4, %v1593_v1  ;;  %v1596_v7 = vpop.f32.mrb[2].mxu1  ;;  %v1533_v8 = vpop.f32.mrb[3].mxu0 }
  0xfa   :  { %v1534_v9 = vadd.f32 %v1533_v8, %v1532_v5  ;;  %v1597_v10 = vpop.f32.mrb[3].mxu1 }
  0xfb   :  { %v2237_v11 = vadd.f32 %v1595_v6, %v1531_v3  ;;  %v1598_v12 = vadd.f32 %v1597_v10, %v1596_v7 }
  0xfd   :  { %v2239_v13 = vadd.f32 %v1598_v12, %v1534_v9 }
  0xfe   :  { %v1535_v14 = vpop.f32.mrb[4].mxu0 }
  0xff   :  { %v1599_v15 = vpop.f32.mrb[4].mxu1  ;;  %v1536_v16 = vpop.f32.mrb[5].mxu0 }
 0x100   :  { %v1537_v17 = vadd.f32 %v1536_v16, %v1535_v14  ;;  %v1600_v18 = vpop.f32.mrb[5].mxu1  ;;  %v1538_v19 = vpop.f32.mrb[6].mxu0 }
 0x101   :  { %v1601_v20 = vadd.f32 %v1600_v18, %v1599_v15  ;;  %v1602_v21 = vpop.f32.mrb[6].mxu1  ;;  %v1539_v22 = vpop.f32.mrb[7].mxu0 }
 0x102   :  { %v1540_v23 = vadd.f32 %v1539_v22, %v1538_v19  ;;  %v1603_v24 = vpop.f32.mrb[7].mxu1 }
 0x103   :  { %v2241_v25 = vadd.f32 %v1601_v20, %v1537_v17  ;;  %v1604_v26 = vadd.f32 %v1603_v24, %v1602_v21 }
 0x105   :  { %v2243_v27 = vadd.f32 %v1604_v26, %v1540_v23 }
 0x106   :  { %v1541_v28 = vpop.f32.mrb[8].mxu0 }
 0x107   :  { %v1605_v29 = vpop.f32.mrb[8].mxu1  ;;  %v1542_v30 = vpop.f32.mrb[9].mxu0 }
 0x108   :  { %v1543_v31 = vadd.f32 %v1542_v30, %v1541_v28  ;;  %v1606_v32 = vpop.f32.mrb[9].mxu1  ;;  %v1544_v33 = vpop.f32.mrb[10].mxu0 }
 0x109   :  { %v1607_v34 = vadd.f32 %v1606_v32, %v1605_v29  ;;  %v1608_v35 = vpop.f32.mrb[10].mxu1  ;;  %v1545_v36 = vpop.f32.mrb[11].mxu0 }
 0x10a   :  { %v1546_v37 = vadd.f32 %v1545_v36, %v1544_v33  ;;  %v1609_v38 = vpop.f32.mrb[11].mxu1 }
 0x10b   :  { %v2245_v39 = vadd.f32 %v1607_v34, %v1543_v31  ;;  %v1610_v40 = vadd.f32 %v1609_v38, %v1608_v35 }
 0x10d   :  { %v2247_v41 = vadd.f32 %v1610_v40, %v1546_v37 }
 0x10e   :  { %v1547_v42 = vpop.f32.mrb[12].mxu0 }
 0x10f   :  { %v1611_v43 = vpop.f32.mrb[12].mxu1  ;;  %v1548_v44 = vpop.f32.mrb[13].mxu0 }
 0x110   :  { %v1549_v45 = vadd.f32 %v1548_v44, %v1547_v42  ;;  %v1612_v46 = vpop.f32.mrb[13].mxu1  ;;  %v1550_v47 = vpop.f32.mrb[14].mxu0 }
 0x111   :  { %v1613_v48 = vadd.f32 %v1612_v46, %v1611_v43  ;;  %v1614_v49 = vpop.f32.mrb[14].mxu1  ;;  %v1551_v50 = vpop.f32.mrb[15].mxu0 }
 0x112   :  { %v1552_v51 = vadd.f32 %v1551_v50, %v1550_v47  ;;  %v1615_v52 = vpop.f32.mrb[15].mxu1 }
 0x113   :  { %v2249_v53 = vadd.f32 %v1613_v48, %v1549_v45  ;;  %v1616_v54 = vadd.f32 %v1615_v52, %v1614_v49 }
 0x115   :  { %v2251_v55 = vadd.f32 %v1616_v54, %v1552_v51 }
 0x116   :  { %v1553_v56 = vpop.f32.mrb[16].mxu0 }
 0x117   :  { %v1617_v57 = vpop.f32.mrb[16].mxu1  ;;  %v1554_v58 = vpop.f32.mrb[17].mxu0 }
 0x118   :  { %v1555_v59 = vadd.f32 %v1554_v58, %v1553_v56  ;;  %v1618_v60 = vpop.f32.mrb[17].mxu1  ;;  %v1556_v61 = vpop.f32.mrb[18].mxu0 }
 0x119   :  { %v1619_v62 = vadd.f32 %v1618_v60, %v1617_v57  ;;  %v1620_v63 = vpop.f32.mrb[18].mxu1  ;;  %v1557_v0 = vpop.f32.mrb[19].mxu0 }
 0x11a   :  { %v1558_v1 = vadd.f32 %v1557_v0, %v1556_v61  ;;  %v1621_v2 = vpop.f32.mrb[19].mxu1 }
 0x11b   :  { %v2253_v3 = vadd.f32 %v1619_v62, %v1555_v59  ;;  %v1622_v4 = vadd.f32 %v1621_v2, %v1620_v63 }
 0x11d   :  { %v2255_v5 = vadd.f32 %v1622_v4, %v1558_v1 }
 0x11e   :  { %v1559_v6 = vpop.f32.mrb[20].mxu0 }
 0x11f   :  { %v1623_v7 = vpop.f32.mrb[20].mxu1  ;;  %v1560_v8 = vpop.f32.mrb[21].mxu0 }
 0x120   :  { %v1561_v9 = vadd.f32 %v1560_v8, %v1559_v6  ;;  %v1624_v10 = vpop.f32.mrb[21].mxu1  ;;  %v1562_v12 = vpop.f32.mrb[22].mxu0 }
 0x121   :  { %v1625_v14 = vadd.f32 %v1624_v10, %v1623_v7  ;;  %v1626_v15 = vpop.f32.mrb[22].mxu1  ;;  %v1563_v16 = vpop.f32.mrb[23].mxu0 }
 0x122   :  { %v1564_v17 = vadd.f32 %v1563_v16, %v1562_v12  ;;  %v1627_v18 = vpop.f32.mrb[23].mxu1 }
 0x123   :  { %v2257_v19 = vadd.f32 %v1625_v14, %v1561_v9  ;;  %v1628_v20 = vadd.f32 %v1627_v18, %v1626_v15 }
 0x125   :  { %v2259_v21 = vadd.f32 %v1628_v20, %v1564_v17 }
 0x126   :  { %v1565_v22 = vpop.f32.mrb[24].mxu0 }
 0x127   :  { %v1629_v23 = vpop.f32.mrb[24].mxu1  ;;  %v1566_v24 = vpop.f32.mrb[25].mxu0 }
 0x128   :  { %v1567_v26 = vadd.f32 %v1566_v24, %v1565_v22  ;;  %v1630_v28 = vpop.f32.mrb[25].mxu1  ;;  %v1568_v29 = vpop.f32.mrb[26].mxu0 }
 0x129   :  { %v1631_v30 = vadd.f32 %v1630_v28, %v1629_v23  ;;  %v1632_v31 = vpop.f32.mrb[26].mxu1  ;;  %v1569_v32 = vpop.f32.mrb[27].mxu0 }
 0x12a   :  { %v1570_v33 = vadd.f32 %v1569_v32, %v1568_v29  ;;  %v1633_v34 = vpop.f32.mrb[27].mxu1 }
 0x12b   :  { %v2261_v35 = vadd.f32 %v1631_v30, %v1567_v26  ;;  %v1634_v36 = vadd.f32 %v1633_v34, %v1632_v31 }
 0x12d   :  { %v2263_v37 = vadd.f32 %v1634_v36, %v1570_v33 }
 0x12e   :  { %v1571_v38 = vpop.f32.mrb[28].mxu0 }
 0x12f   :  { %v1635_v40 = vpop.f32.mrb[28].mxu1  ;;  %v1572_v42 = vpop.f32.mrb[29].mxu0 }
 0x130   :  { %v1573_v43 = vadd.f32 %v1572_v42, %v1571_v38  ;;  %v1636_v44 = vpop.f32.mrb[29].mxu1  ;;  %v1574_v45 = vpop.f32.mrb[30].mxu0 }
 0x131   :  { %v1637_v46 = vadd.f32 %v1636_v44, %v1635_v40  ;;  %v1638_v47 = vpop.f32.mrb[30].mxu1  ;;  %v1575_v48 = vpop.f32.mrb[31].mxu0 }
 0x132   :  { %v1576_v49 = vadd.f32 %v1575_v48, %v1574_v45  ;;  %v1639_v50 = vpop.f32.mrb[31].mxu1 }
 0x133   :  { %v2265_v51 = vadd.f32 %v1637_v46, %v1573_v43  ;;  %v1640_v52 = vadd.f32 %v1639_v50, %v1638_v47 }
 0x135   :  { %v2267_v54 = vadd.f32 %v1640_v52, %v1576_v49 }
 0x136   :  { %v1657_v56 = vpop.f32.mrb[32].mxu0 }
 0x137   :  { %v1721_v57 = vpop.f32.mrb[32].mxu1  ;;  %v1658_v58 = vpop.f32.mrb[33].mxu0 }
 0x138   :  { %v1659_v59 = vadd.f32 %v1658_v58, %v1657_v56  ;;  %v1722_v60 = vpop.f32.mrb[33].mxu1  ;;  %v1660_v61 = vpop.f32.mrb[34].mxu0 }
 0x139   :  { %v1723_v62 = vadd.f32 %v1722_v60, %v1721_v57  ;;  %v1724_v63 = vpop.f32.mrb[34].mxu1  ;;  %v1661_v0 = vpop.f32.mrb[35].mxu0 }
 0x13a   :  { %v1139_v1 = vadd.f32 %v1659_v59, %v2237_v11  ;;  %v1662_v2 = vadd.f32 %v1661_v0, %v1660_v61  ;;  %v1725_v4 = vpop.f32.mrb[35].mxu1 }
 0x13b   :  { %v1726_v6 = vadd.f32 %v1725_v4, %v1724_v63 }
 0x13c   :  { %v1236_v7 = vadd.f32 %v1723_v62, %v1139_v1  ;;  %v1142_v8 = vadd.f32 %v1662_v2, %v2239_v13 }
 0x13e   :  { %1298 = vst [vmem:[%s2338_s2] sm:$0xff] %v1236_v7  ;;  %v1239_v9 = vadd.f32 %v1726_v6, %v1142_v8  ;;  %v1663_v10 = vpop.f32.mrb[36].mxu0  ;;  %v1335_v15 = vmul.f32 %v1236_v7, %v1236_v7 }
 0x13f   :  { %v1727_v12 = vpop.f32.mrb[36].mxu1  ;;  %v1664_v14 = vpop.f32.mrb[37].mxu0 }
 0x140   :  { %1299 = vst [vmem:[%s2338_s2 + $0x8] sm:$0xff] %v1239_v9  ;;  %v1314_v11 = vadd.f32 %v1239_v9, %v1236_v7  ;;  %v1336_v16 = vmul.f32 %v1239_v9, %v1239_v9  ;;  %v1665_v17 = vadd.f32 %v1664_v14, %v1663_v10  ;;  %v1728_v18 = vpop.f32.mrb[37].mxu1  ;;  %v1666_v20 = vpop.f32.mrb[38].mxu0 }
 0x141   :  { %v1729_v22 = vadd.f32 %v1728_v18, %v1727_v12  ;;  %v1730_v13 = vpop.f32.mrb[38].mxu1  ;;  %v1667_v23 = vpop.f32.mrb[39].mxu0 }
 0x142   :  { %v1351_v24 = vadd.f32 %v1336_v16, %v1335_v15  ;;  %v1147_v26 = vadd.f32 %v1665_v17, %v2241_v25  ;;  %v1668_v28 = vadd.f32 %v1667_v23, %v1666_v20  ;;  %v1731_v29 = vpop.f32.mrb[39].mxu1 }
 0x143   :  { %v1732_v30 = vadd.f32 %v1731_v29, %v1730_v13 }
 0x144   :  { %v1244_v31 = vadd.f32 %v1729_v22, %v1147_v26  ;;  %v1150_v32 = vadd.f32 %v1668_v28, %v2243_v27 }
 0x146   :  { %1300 = vst [vmem:[%s2338_s2 + $0x10] sm:$0xff] %v1244_v31  ;;  %v1315_v33 = vadd.f32 %v1314_v11, %v1244_v31  ;;  %v1337_v34 = vmul.f32 %v1244_v31, %v1244_v31  ;;  %v1247_v36 = vadd.f32 %v1732_v30, %v1150_v32  ;;  %v1669_v38 = vpop.f32.mrb[40].mxu0 }
 0x147   :  { %v1733_v40 = vpop.f32.mrb[40].mxu1  ;;  %v1670_v42 = vpop.f32.mrb[41].mxu0 }
 0x148   :  { %v1352_v43 = vadd.f32 %v1351_v24, %v1337_v34  ;;  %1301 = vst [vmem:[%s2338_s2 + $0x18] sm:$0xff] %v1247_v36  ;;  %v1316_v25 = vadd.f32 %v1315_v33, %v1247_v36  ;;  %v1338_v44 = vmul.f32 %v1247_v36, %v1247_v36  ;;  %v1671_v45 = vadd.f32 %v1670_v42, %v1669_v38  ;;  %v1734_v46 = vpop.f32.mrb[41].mxu1  ;;  %v1672_v27 = vpop.f32.mrb[42].mxu0 }
 0x149   :  { %v1735_v47 = vadd.f32 %v1734_v46, %v1733_v40  ;;  %v1736_v48 = vpop.f32.mrb[42].mxu1  ;;  %v1673_v49 = vpop.f32.mrb[43].mxu0 }
 0x14a   :  { %v1353_v50 = vadd.f32 %v1352_v43, %v1338_v44  ;;  %v1155_v52 = vadd.f32 %v1671_v45, %v2245_v39  ;;  %v1674_v56 = vadd.f32 %v1673_v49, %v1672_v27  ;;  %v1737_v57 = vpop.f32.mrb[43].mxu1 }
 0x14b   :  { %v1738_v58 = vadd.f32 %v1737_v57, %v1736_v48 }
 0x14c   :  { %v1252_v59 = vadd.f32 %v1735_v47, %v1155_v52  ;;  %v1158_v60 = vadd.f32 %v1674_v56, %v2247_v41 }
 0x14e   :  { %1302 = vst [vmem:[%s2338_s2 + $0x20] sm:$0xff] %v1252_v59  ;;  %v1317_v61 = vadd.f32 %v1316_v25, %v1252_v59  ;;  %v1339_v62 = vmul.f32 %v1252_v59, %v1252_v59  ;;  %v1255_v63 = vadd.f32 %v1738_v58, %v1158_v60  ;;  %v1675_v0 = vpop.f32.mrb[44].mxu0 }
 0x14f   :  { %v1739_v1 = vpop.f32.mrb[44].mxu1  ;;  %v1676_v2 = vpop.f32.mrb[45].mxu0 }
 0x150   :  { %v1354_v4 = vadd.f32 %v1353_v50, %v1339_v62  ;;  %1303 = vst [vmem:[%s2338_s2 + $0x28] sm:$0xff] %v1255_v63  ;;  %v1318_v39 = vadd.f32 %v1317_v61, %v1255_v63  ;;  %v1340_v6 = vmul.f32 %v1255_v63, %v1255_v63  ;;  %v1677_v7 = vadd.f32 %v1676_v2, %v1675_v0  ;;  %v1740_v8 = vpop.f32.mrb[45].mxu1  ;;  %v1678_v41 = vpop.f32.mrb[46].mxu0 }
 0x151   :  { %v1741_v9 = vadd.f32 %v1740_v8, %v1739_v1  ;;  %v1742_v10 = vpop.f32.mrb[46].mxu1  ;;  %v1679_v12 = vpop.f32.mrb[47].mxu0 }
 0x152   :  { %v1355_v14 = vadd.f32 %v1354_v4, %v1340_v6  ;;  %v1163_v15 = vadd.f32 %v1677_v7, %v2249_v53  ;;  %v1680_v11 = vadd.f32 %v1679_v12, %v1678_v41  ;;  %v1743_v16 = vpop.f32.mrb[47].mxu1 }
 0x153   :  { %v1744_v17 = vadd.f32 %v1743_v16, %v1742_v10 }
 0x154   :  { %v1260_v18 = vadd.f32 %v1741_v9, %v1163_v15  ;;  %v1166_v20 = vadd.f32 %v1680_v11, %v2251_v55 }
 0x156   :  { %1304 = vst [vmem:[%s2338_s2 + $0x30] sm:$0xff] %v1260_v18  ;;  %v1319_v22 = vadd.f32 %v1318_v39, %v1260_v18  ;;  %v1341_v13 = vmul.f32 %v1260_v18, %v1260_v18  ;;  %v1263_v23 = vadd.f32 %v1744_v17, %v1166_v20  ;;  %v1681_v24 = vpop.f32.mrb[48].mxu0 }
 0x157   :  { %v1745_v26 = vpop.f32.mrb[48].mxu1  ;;  %v1682_v28 = vpop.f32.mrb[49].mxu0 }
 0x158   :  { %v1356_v29 = vadd.f32 %v1355_v14, %v1341_v13  ;;  %1305 = vst [vmem:[%s2338_s2 + $0x38] sm:$0xff] %v1263_v23  ;;  %v1320_v53 = vadd.f32 %v1319_v22, %v1263_v23  ;;  %v1342_v30 = vmul.f32 %v1263_v23, %v1263_v23  ;;  %v1683_v31 = vadd.f32 %v1682_v28, %v1681_v24  ;;  %v1746_v32 = vpop.f32.mrb[49].mxu1  ;;  %v1684_v55 = vpop.f32.mrb[50].mxu0 }
 0x159   :  { %v1747_v33 = vadd.f32 %v1746_v32, %v1745_v26  ;;  %v1748_v34 = vpop.f32.mrb[50].mxu1  ;;  %v1685_v36 = vpop.f32.mrb[51].mxu0 }
 0x15a   :  { %v1357_v38 = vadd.f32 %v1356_v29, %v1342_v30  ;;  %v1171_v40 = vadd.f32 %v1683_v31, %v2253_v3  ;;  %v1686_v42 = vadd.f32 %v1685_v36, %v1684_v55  ;;  %v1749_v43 = vpop.f32.mrb[51].mxu1 }
 0x15b   :  { %v1750_v25 = vadd.f32 %v1749_v43, %v1748_v34 }
 0x15c   :  { %v1268_v44 = vadd.f32 %v1747_v33, %v1171_v40  ;;  %v1174_v45 = vadd.f32 %v1686_v42, %v2255_v5 }
 0x15e   :  { %1306 = vst [vmem:[%s2338_s2 + $0x40] sm:$0xff] %v1268_v44  ;;  %v1321_v46 = vadd.f32 %v1320_v53, %v1268_v44  ;;  %v1343_v27 = vmul.f32 %v1268_v44, %v1268_v44  ;;  %v1271_v47 = vadd.f32 %v1750_v25, %v1174_v45  ;;  %v1687_v48 = vpop.f32.mrb[52].mxu0 }
 0x15f   :  { %v1751_v49 = vpop.f32.mrb[52].mxu1  ;;  %v1688_v50 = vpop.f32.mrb[53].mxu0 }
 0x160   :  { %v1358_v52 = vadd.f32 %v1357_v38, %v1343_v27  ;;  %1307 = vst [vmem:[%s2338_s2 + $0x48] sm:$0xff] %v1271_v47  ;;  %v1322_v3 = vadd.f32 %v1321_v46, %v1271_v47  ;;  %v1344_v56 = vmul.f32 %v1271_v47, %v1271_v47  ;;  %v1689_v57 = vadd.f32 %v1688_v50, %v1687_v48  ;;  %v1752_v58 = vpop.f32.mrb[53].mxu1  ;;  %v1690_v5 = vpop.f32.mrb[54].mxu0 }
 0x161   :  { %v1753_v59 = vadd.f32 %v1752_v58, %v1751_v49  ;;  %v1754_v60 = vpop.f32.mrb[54].mxu1  ;;  %v1691_v61 = vpop.f32.mrb[55].mxu0 }
 0x162   :  { %v1359_v62 = vadd.f32 %v1358_v52, %v1344_v56  ;;  %v1179_v63 = vadd.f32 %v1689_v57, %v2257_v19  ;;  %v1692_v0 = vadd.f32 %v1691_v61, %v1690_v5  ;;  %v1755_v1 = vpop.f32.mrb[55].mxu1 }
 0x163   :  { %v1756_v2 = vadd.f32 %v1755_v1, %v1754_v60 }
 0x164   :  { %v1276_v4 = vadd.f32 %v1753_v59, %v1179_v63  ;;  %v1182_v39 = vadd.f32 %v1692_v0, %v2259_v21 }
 0x166   :  { %1308 = vst [vmem:[%s2338_s2 + $0x50] sm:$0xff] %v1276_v4  ;;  %v1323_v6 = vadd.f32 %v1322_v3, %v1276_v4  ;;  %v1345_v7 = vmul.f32 %v1276_v4, %v1276_v4  ;;  %v1279_v8 = vadd.f32 %v1756_v2, %v1182_v39  ;;  %v1693_v41 = vpop.f32.mrb[56].mxu0 }
 0x167   :  { %v1757_v9 = vpop.f32.mrb[56].mxu1  ;;  %v1694_v10 = vpop.f32.mrb[57].mxu0 }
 0x168   :  { %v1360_v12 = vadd.f32 %v1359_v62, %v1345_v7  ;;  %1309 = vst [vmem:[%s2338_s2 + $0x58] sm:$0xff] %v1279_v8  ;;  %v1324_v19 = vadd.f32 %v1323_v6, %v1279_v8  ;;  %v1346_v14 = vmul.f32 %v1279_v8, %v1279_v8  ;;  %v1695_v15 = vadd.f32 %v1694_v10, %v1693_v41  ;;  %v1758_v11 = vpop.f32.mrb[57].mxu1  ;;  %v1696_v21 = vpop.f32.mrb[58].mxu0 }
 0x169   :  { %v1759_v16 = vadd.f32 %v1758_v11, %v1757_v9  ;;  %v1760_v17 = vpop.f32.mrb[58].mxu1  ;;  %v1697_v18 = vpop.f32.mrb[59].mxu0 }
 0x16a   :  { %v1361_v20 = vadd.f32 %v1360_v12, %v1346_v14  ;;  %v1187_v22 = vadd.f32 %v1695_v15, %v2261_v35  ;;  %v1698_v13 = vadd.f32 %v1697_v18, %v1696_v21  ;;  %v1761_v23 = vpop.f32.mrb[59].mxu1 }
 0x16b   :  { %v1762_v24 = vadd.f32 %v1761_v23, %v1760_v17 }
 0x16c   :  { %v1284_v26 = vadd.f32 %v1759_v16, %v1187_v22  ;;  %v1190_v28 = vadd.f32 %v1698_v13, %v2263_v37 }
 0x16e   :  { %1310 = vst [vmem:[%s2338_s2 + $0x60] sm:$0xff] %v1284_v26  ;;  %v1325_v29 = vadd.f32 %v1324_v19, %v1284_v26  ;;  %v1347_v53 = vmul.f32 %v1284_v26, %v1284_v26  ;;  %v1287_v30 = vadd.f32 %v1762_v24, %v1190_v28  ;;  %v1699_v31 = vpop.f32.mrb[60].mxu0 }
 0x16f   :  { %v1763_v32 = vpop.f32.mrb[60].mxu1  ;;  %v1700_v55 = vpop.f32.mrb[61].mxu0 }
 0x170   :  { %v1362_v33 = vadd.f32 %v1361_v20, %v1347_v53  ;;  %1311 = vst [vmem:[%s2338_s2 + $0x68] sm:$0xff] %v1287_v30  ;;  %v1326_v35 = vadd.f32 %v1325_v29, %v1287_v30  ;;  %v1348_v34 = vmul.f32 %v1287_v30, %v1287_v30  ;;  %v1701_v36 = vadd.f32 %v1700_v55, %v1699_v31  ;;  %v1764_v38 = vpop.f32.mrb[61].mxu1  ;;  %v1702_v37 = vpop.f32.mrb[62].mxu0 }
 0x171   :  { %v1765_v40 = vadd.f32 %v1764_v38, %v1763_v32  ;;  %v1766_v42 = vpop.f32.mrb[62].mxu1  ;;  %v1703_v43 = vpop.f32.mrb[63].mxu0 }
 0x172   :  { %v1363_v25 = vadd.f32 %v1362_v33, %v1348_v34  ;;  %v1195_v44 = vadd.f32 %v1701_v36, %v2265_v51  ;;  %v1704_v45 = vadd.f32 %v1703_v43, %v1702_v37  ;;  %v1767_v46 = vpop.f32.mrb[63].mxu1 }
 0x173   :  { %v1768_v27 = vadd.f32 %v1767_v46, %v1766_v42 }
 0x174   :  { %v1292_v47 = vadd.f32 %v1765_v40, %v1195_v44  ;;  %v1198_v48 = vadd.f32 %v1704_v45, %v2267_v54 }
 0x176   :  { %1312 = vst [vmem:[%s2338_s2 + $0x70] sm:$0xff] %v1292_v47  ;;  %v1327_v49 = vadd.f32 %v1326_v35, %v1292_v47  ;;  %v1349_v50 = vmul.f32 %v1292_v47, %v1292_v47  ;;  %v1295_v52 = vadd.f32 %v1768_v27, %v1198_v48 }
 0x178   :  { %v1364_v3 = vadd.f32 %v1363_v25, %v1349_v50  ;;  %1313 = vst [vmem:[%s2338_s2 + $0x78] sm:$0xff] %v1295_v52  ;;  %v1328_v56 = vadd.f32 %v1327_v49, %v1295_v52  ;;  %v1350_v51 = vmul.f32 %v1295_v52, %v1295_v52 }
 0x17a   :  { %v1329_v57 = vrot.slane %v1328_v56, 4  ;;  %v1365_v58 = vadd.f32 %v1364_v3, %v1350_v51 }
 0x17c   :  { %v1330_v5 = vadd.f32 %v1329_v57, %v1328_v56  ;;  %v1366_v59 = vrot.slane %v1365_v58, 4 }
 0x17e   :  { %v1331_v60 = vrot.slane %v1330_v5, 2  ;;  %v1367_v54 = vadd.f32 %v1366_v59, %v1365_v58 }
 0x180   :  { %v1332_v61 = vadd.f32 %v1331_v60, %v1330_v5  ;;  %v1368_v62 = vrot.slane %v1367_v54, 2 }
 0x182   :  { %v1333_v63 = vrot.slane %v1332_v61, 1  ;;  %v1369_v0 = vadd.f32 %v1368_v62, %v1367_v54 }
 0x184   :  { %v1370_v1 = vrot.slane %v1369_v0, 1  ;;  %v1334_v2 = vadd.f32 %v1333_v63, %v1332_v61 }
 0x186   :  { %v1371_v4 = vadd.f32 %v1370_v1, %v1369_v0 }
 0x188   :  { %v1373_v39 = vsel %vm1372_vm0, %v1334_v2, %v1371_v4 }
 0x189   :  { %v1375_v6 = vsel %vm1374_vm1, %v1373_v39, 0.0 }
 0x18a   :  { %1376 = vst [vmem:[%s2339_s3] sm:$0xff] %v1375_v6 }

// kernel: discriminator_forward.10
= control target key start
LH: loop header
LB: loop body
LE: loop exit
PB: predicated region body
PF: predicated region fallthrough
CT: control target
= control target key end

     0   :  { %s305_s0 = inlined_call_operand.vmem [shape: f32[128,128], index: 0, kind: input, shape index: {}]   ;;  %s306_s1 = inlined_call_operand.vmem [shape: f32[1,128], index: 1, kind: input, shape index: {}]   ;;  %s307_s2 = inlined_call_operand.vmem [shape: f32[1,128], index: 2, kind: input, shape index: {}]   ;;  %s308_s3 = inlined_call_operand.vmem [shape: f32[128,128], index: 3, kind: output, shape index: {}]  }
   0x1   :  { %v14_v0 = vld [vmem:[%s305_s0] sm:$0xff]  ;;  %v15_v4 = vld [vmem:[%s305_s0 + $0x8] sm:$0xff]  ;;  %v16_v5 = vld [vmem:[%s305_s0 + $0x10] sm:$0xff] }
   0x2   :  { %v172_v1 = vld [vmem:[%s306_s1] ss:$0 sm:$0xff]  ;;  %v17_v6 = vld [vmem:[%s305_s0 + $0x18] sm:$0xff]  ;;  %v19_v11 = vld [vmem:[%s305_s0 + $0x28] sm:$0xff] }
   0x3   :  { %v177_v2 = vld [vmem:[%s307_s2] ss:$0 sm:$0xff]  ;;  %v37_v3 = vmul.f32 %v172_v1, %v14_v0  ;;  %v38_v7 = vmul.f32 %v172_v1, %v15_v4  ;;  %v39_v8 = vmul.f32 %v172_v1, %v16_v5  ;;  %v40_v9 = vmul.f32 %v172_v1, %v17_v6  ;;  %v20_v12 = vld [vmem:[%s305_s0 + $0x30] sm:$0xff]  ;;  %v21_v17 = vld [vmem:[%s305_s0 + $0x38] sm:$0xff] }
   0x4   :  { %v18_v10 = vld [vmem:[%s305_s0 + $0x20] sm:$0xff]  ;;  %v42_v15 = vmul.f32 %v172_v1, %v19_v11  ;;  %v43_v16 = vmul.f32 %v172_v1, %v20_v12  ;;  %v44_v21 = vmul.f32 %v172_v1, %v21_v17  ;;  %v23_v30 = vld [vmem:[%s305_s0 + $0x48] sm:$0xff]  ;;  %v24_v31 = vld [vmem:[%s305_s0 + $0x50] sm:$0xff] }
   0x5   :  { %v60_v13 = vadd.f32 %v177_v2, %v37_v3  ;;  %v41_v14 = vmul.f32 %v172_v1, %v18_v10  ;;  %v61_v18 = vadd.f32 %v177_v2, %v38_v7  ;;  %v62_v19 = vadd.f32 %v177_v2, %v39_v8  ;;  %v22_v25 = vld [vmem:[%s305_s0 + $0x40] sm:$0xff]  ;;  %v25_v43 = vld [vmem:[%s305_s0 + $0x58] sm:$0xff]  ;;  %v27_v45 = vld [vmem:[%s305_s0 + $0x68] sm:$0xff] }
   0x6   :  { %v63_v20 = vadd.f32 %v177_v2, %v40_v9  ;;  %v65_v24 = vadd.f32 %v177_v2, %v42_v15  ;;  %v66_v37 = vadd.f32 %v177_v2, %v43_v16  ;;  %v67_v38 = vadd.f32 %v177_v2, %v44_v21  ;;  %v26_v44 = vld [vmem:[%s305_s0 + $0x60] sm:$0xff]  ;;  %v28_v56 = vld [vmem:[%s305_s0 + $0x70] sm:$0xff]  ;;  %v29_v4 = vld [vmem:[%s305_s0 + $0x78] sm:$0xff] }
   0x7   :  { %vm76_vm0 = vcmp.ge.f32.partialorder %v60_v13, 0.0  ;;  %v92_v22 = vmul.f32 0.2, %v60_v13  ;;  %v64_v23 = vadd.f32 %v177_v2, %v41_v14  ;;  %vm77_vm1 = vcmp.ge.f32.partialorder %v61_v18, 0.0 }
   0x8   :  { %v93_v26 = vmul.f32 0.2, %v61_v18  ;;  %vm78_vm2 = vcmp.ge.f32.partialorder %v62_v19, 0.0  ;;  %v94_v27 = vmul.f32 0.2, %v62_v19  ;;  %vm79_vm3 = vcmp.ge.f32.partialorder %v63_v20, 0.0 }
   0x9   :  { %v108_v28 = vsel %vm76_vm0, %v60_v13, %v92_v22  ;;  %v95_v29 = vmul.f32 0.2, %v63_v20  ;;  %vm80_vm4 = vcmp.ge.f32.partialorder %v64_v23, 0.0  ;;  %v96_v34 = vmul.f32 0.2, %v64_v23 }
   0xa   :  { %124 = vst [vmem:[%s308_s3] sm:$0xff] %v108_v28  ;;  %v109_v32 = vsel %vm77_vm1, %v61_v18, %v93_v26  ;;  %v110_v33 = vsel %vm78_vm2, %v62_v19, %v94_v27  ;;  %vm81_vm5 = vcmp.ge.f32.partialorder %v65_v24, 0.0  ;;  %v97_v36 = vmul.f32 0.2, %v65_v24 }
   0xb   :  { %125 = vst [vmem:[%s308_s3 + $0x8] sm:$0xff] %v109_v32  ;;  %126 = vst [vmem:[%s308_s3 + $0x10] sm:$0xff] %v110_v33  ;;  %v111_v35 = vsel %vm79_vm3, %v63_v20, %v95_v29  ;;  %v112_v39 = vsel %vm80_vm4, %v64_v23, %v96_v34  ;;  %v45_v40 = vmul.f32 %v172_v1, %v22_v25  ;;  %vm82_vm6 = vcmp.ge.f32.partialorder %v66_v37, 0.0 }
   0xc   :  { %127 = vst [vmem:[%s308_s3 + $0x18] sm:$0xff] %v111_v35  ;;  %v46_v41 = vmul.f32 %v172_v1, %v23_v30  ;;  %v47_v42 = vmul.f32 %v172_v1, %v24_v31  ;;  %128 = vst [vmem:[%s308_s3 + $0x20] sm:$0xff] %v112_v39  ;;  %v113_v46 = vsel %vm81_vm5, %v65_v24, %v97_v36  ;;  %v98_v47 = vmul.f32 0.2, %v66_v37 }
   0xd   :  { %vm83_vm7 = vcmp.ge.f32.partialorder %v67_v38, 0.0  ;;  %129 = vst [vmem:[%s308_s3 + $0x28] sm:$0xff] %v113_v46  ;;  %v99_v48 = vmul.f32 0.2, %v67_v38  ;;  %v68_v49 = vadd.f32 %v177_v2, %v45_v40  ;;  %v48_v53 = vmul.f32 %v172_v1, %v25_v43 }
   0xe   :  { %v69_v50 = vadd.f32 %v177_v2, %v46_v41  ;;  %v70_v51 = vadd.f32 %v177_v2, %v47_v42  ;;  %v114_v52 = vsel %vm82_vm6, %v66_v37, %v98_v47  ;;  %v49_v54 = vmul.f32 %v172_v1, %v26_v44 }
   0xf   :  { %v50_v55 = vmul.f32 %v172_v1, %v27_v45  ;;  %130 = vst [vmem:[%s308_s3 + $0x30] sm:$0xff] %v114_v52  ;;  %v115_v57 = vsel %vm83_vm7, %v67_v38, %v99_v48  ;;  %vm84_vm8 = vcmp.ge.f32.partialorder %v68_v49, 0.0  ;;  %v100_v58 = vmul.f32 0.2, %v68_v49 }
  0x10   :  { %vm85_vm9 = vcmp.ge.f32.partialorder %v69_v50, 0.0  ;;  %131 = vst [vmem:[%s308_s3 + $0x38] sm:$0xff] %v115_v57  ;;  %v101_v59 = vmul.f32 0.2, %v69_v50  ;;  %vm86_vm10 = vcmp.ge.f32.partialorder %v70_v51, 0.0  ;;  %v71_v61 = vadd.f32 %v177_v2, %v48_v53 }
  0x11   :  { %v102_v60 = vmul.f32 0.2, %v70_v51  ;;  %v116_v62 = vsel %vm84_vm8, %v68_v49, %v100_v58  ;;  %v72_v63 = vadd.f32 %v177_v2, %v49_v54  ;;  %v73_v0 = vadd.f32 %v177_v2, %v50_v55 }
  0x12   :  { %v51_v3 = vmul.f32 %v172_v1, %v28_v56  ;;  %132 = vst [vmem:[%s308_s3 + $0x40] sm:$0xff] %v116_v62  ;;  %v117_v5 = vsel %vm85_vm9, %v69_v50, %v101_v59  ;;  %vm87_vm11 = vcmp.ge.f32.partialorder %v71_v61, 0.0  ;;  %v103_v7 = vmul.f32 0.2, %v71_v61 }
  0x13   :  { %v118_v6 = vsel %vm86_vm10, %v70_v51, %v102_v60  ;;  %133 = vst [vmem:[%s308_s3 + $0x48] sm:$0xff] %v117_v5  ;;  %vm88_vm12 = vcmp.ge.f32.partialorder %v72_v63, 0.0  ;;  %v104_v8 = vmul.f32 0.2, %v72_v63  ;;  %vm89_vm13 = vcmp.ge.f32.partialorder %v73_v0, 0.0 }
  0x14   :  { %134 = vst [vmem:[%s308_s3 + $0x50] sm:$0xff] %v118_v6  ;;  %v105_v9 = vmul.f32 0.2, %v73_v0  ;;  %v119_v10 = vsel %vm87_vm11, %v71_v61, %v103_v7  ;;  %v74_v11 = vadd.f32 %v177_v2, %v51_v3  ;;  %v52_v12 = vmul.f32 %v172_v1, %v29_v4 }
  0x15   :  { %135 = vst [vmem:[%s308_s3 + $0x58] sm:$0xff] %v119_v10  ;;  %v120_v13 = vsel %vm88_vm12, %v72_v63, %v104_v8 }
  0x16   :  { %v121_v14 = vsel %vm89_vm13, %v73_v0, %v105_v9  ;;  %136 = vst [vmem:[%s308_s3 + $0x60] sm:$0xff] %v120_v13  ;;  %vm90_vm14 = vcmp.ge.f32.partialorder %v74_v11, 0.0  ;;  %v106_v15 = vmul.f32 0.2, %v74_v11  ;;  %v75_v16 = vadd.f32 %v177_v2, %v52_v12 }
  0x17   :  { %137 = vst [vmem:[%s308_s3 + $0x68] sm:$0xff] %v121_v14 }
  0x18   :  { %v122_v17 = vsel %vm90_vm14, %v74_v11, %v106_v15  ;;  %vm91_vm15 = vcmp.ge.f32.partialorder %v75_v16, 0.0  ;;  %v107_v1 = vmul.f32 0.2, %v75_v16 }
  0x19   :  { %138 = vst [vmem:[%s308_s3 + $0x70] sm:$0xff] %v122_v17 }
  0x1a   :  { %v123_v18 = vsel %vm91_vm15, %v75_v16, %v107_v1 }
  0x1b   :  { %139 = vst [vmem:[%s308_s3 + $0x78] sm:$0xff] %v123_v18 }

// kernel: discriminator_forward.11
= control target key start
LH: loop header
LB: loop body
LE: loop exit
PB: predicated region body
PF: predicated region fallthrough
CT: control target
= control target key end

     0   :  { %vm2217_vm0 = vcmask 1040384   ;;  %vm2220_vm1 = vcmask 1041408   ;;  %s3923_s1 = inlined_call_operand.vmem [shape: bf16[2048,256], index: 1, kind: input, shape index: {}]   ;;  %s3924_s0 = inlined_call_operand.vmem [shape: bf16[32,2048], index: 0, kind: input, shape index: {}]   ;;  %s3925_s2 = inlined_call_operand.vmem [shape: f32[32,256], index: 2, kind: output, shape index: {0}]   ;;  %s3926_s3 = inlined_call_operand.vmem [shape: f32[1,8,256], index: 3, kind: output, shape index: {1}]  }
   0x1   :  { %v2577_v0 = vld [vmem:[%s3923_s1 + $0x4] ss:$8 sps:$4 sm:$0xff]   ;;  %v2581_v2 = vld [vmem:[%s3923_s1] ss:$8 sps:$4 sm:$0xff]   ;;  %v2583_v4 = vld [vmem:[%s3923_s1 + $0x14] ss:$8 sps:$4 sm:$0xff]  }
   0x2   :  { %v2579_v1 = vld [vmem:[%s3923_s1 + $0x404] ss:$8 sps:$4 sm:$0xff]   ;;  %1741 = vmatprep.subr.bf16.mxu1 %v2577_v0  ;;  %v2582_v3 = vld [vmem:[%s3923_s1 + $0x400] ss:$8 sps:$4 sm:$0xff]   ;;  %v2585_v5 = vld [vmem:[%s3923_s1 + $0x414] ss:$8 sps:$4 sm:$0xff]  }
   0x3   :  { %1953 = vmatprep.subr.bf16.mxu0 %v2579_v1  ;;  %1742 = vmatpush1.bf16.msra.mxu1 %v2581_v2  ;;  %v2587_v6 = vld [vmem:[%s3923_s1 + $0x10] ss:$8 sps:$4 sm:$0xff]   ;;  %v2589_v8 = vld [vmem:[%s3923_s1 + $0x24] ss:$8 sps:$4 sm:$0xff]   ;;  %v2593_v10 = vld [vmem:[%s3923_s1 + $0x20] ss:$8 sps:$4 sm:$0xff]  }
   0x4   :  { %1954 = vmatpush1.bf16.msra.mxu0 %v2582_v3  ;;  %1743 = vmatprep.subr.bf16.mxu1 %v2583_v4  ;;  %v2588_v7 = vld [vmem:[%s3923_s1 + $0x410] ss:$8 sps:$4 sm:$0xff]   ;;  %v2591_v9 = vld [vmem:[%s3923_s1 + $0x424] ss:$8 sps:$4 sm:$0xff]   ;;  %v2594_v11 = vld [vmem:[%s3923_s1 + $0x420] ss:$8 sps:$4 sm:$0xff]  }
   0x5   :  { %1955 = vmatprep.subr.bf16.mxu0 %v2585_v5  ;;  %v2595_v12 = vld [vmem:[%s3923_s1 + $0x34] ss:$8 sps:$4 sm:$0xff]   ;;  %v2599_v14 = vld [vmem:[%s3923_s1 + $0x30] ss:$8 sps:$4 sm:$0xff]   ;;  %v2601_v16 = vld [vmem:[%s3923_s1 + $0x44] ss:$8 sps:$4 sm:$0xff]  }
   0x6   :  { %v2597_v13 = vld [vmem:[%s3923_s1 + $0x434] ss:$8 sps:$4 sm:$0xff]   ;;  %v2600_v15 = vld [vmem:[%s3923_s1 + $0x430] ss:$8 sps:$4 sm:$0xff]   ;;  %v2603_v17 = vld [vmem:[%s3923_s1 + $0x444] ss:$8 sps:$4 sm:$0xff]  }
   0x7   :  { %1744 = vmatpush1.bf16.msra.mxu1 %v2587_v6  ;;  %v2605_v18 = vld [vmem:[%s3923_s1 + $0x40] ss:$8 sps:$4 sm:$0xff]   ;;  %v2607_v20 = vld [vmem:[%s3923_s1 + $0x54] ss:$8 sps:$4 sm:$0xff]   ;;  %v2611_v22 = vld [vmem:[%s3923_s1 + $0x50] ss:$8 sps:$4 sm:$0xff]  }
   0x8   :  { %1956 = vmatpush1.bf16.msra.mxu0 %v2588_v7  ;;  %1745 = vmatprep.subr.bf16.mxu1 %v2589_v8  ;;  %v2606_v19 = vld [vmem:[%s3923_s1 + $0x440] ss:$8 sps:$4 sm:$0xff]   ;;  %v2609_v21 = vld [vmem:[%s3923_s1 + $0x454] ss:$8 sps:$4 sm:$0xff]   ;;  %v2612_v23 = vld [vmem:[%s3923_s1 + $0x450] ss:$8 sps:$4 sm:$0xff]  }
   0x9   :  { %1957 = vmatprep.subr.bf16.mxu0 %v2591_v9  ;;  %v2613_v24 = vld [vmem:[%s3923_s1 + $0x64] ss:$8 sps:$4 sm:$0xff]   ;;  %v2617_v26 = vld [vmem:[%s3923_s1 + $0x60] ss:$8 sps:$4 sm:$0xff]   ;;  %v2619_v28 = vld [vmem:[%s3923_s1 + $0x74] ss:$8 sps:$4 sm:$0xff]  }
   0xa   :  { %v2615_v25 = vld [vmem:[%s3923_s1 + $0x464] ss:$8 sps:$4 sm:$0xff]   ;;  %v2618_v27 = vld [vmem:[%s3923_s1 + $0x460] ss:$8 sps:$4 sm:$0xff]   ;;  %v2621_v29 = vld [vmem:[%s3923_s1 + $0x474] ss:$8 sps:$4 sm:$0xff]  }
   0xb   :  { %1746 = vmatpush1.bf16.msra.mxu1 %v2593_v10  ;;  %v2623_v30 = vld [vmem:[%s3923_s1 + $0x70] ss:$8 sps:$4 sm:$0xff]   ;;  %v2625_v32 = vld [vmem:[%s3923_s1 + $0x84] ss:$8 sps:$4 sm:$0xff]   ;;  %v2629_v34 = vld [vmem:[%s3923_s1 + $0x80] ss:$8 sps:$4 sm:$0xff]  }
   0xc   :  { %1958 = vmatpush1.bf16.msra.mxu0 %v2594_v11  ;;  %1747 = vmatprep.subr.bf16.mxu1 %v2595_v12  ;;  %v2624_v31 = vld [vmem:[%s3923_s1 + $0x470] ss:$8 sps:$4 sm:$0xff]   ;;  %v2627_v33 = vld [vmem:[%s3923_s1 + $0x484] ss:$8 sps:$4 sm:$0xff]   ;;  %v2630_v35 = vld [vmem:[%s3923_s1 + $0x480] ss:$8 sps:$4 sm:$0xff]  }
   0xd   :  { %1959 = vmatprep.subr.bf16.mxu0 %v2597_v13  ;;  %v2631_v36 = vld [vmem:[%s3923_s1 + $0x94] ss:$8 sps:$4 sm:$0xff]   ;;  %v2635_v38 = vld [vmem:[%s3923_s1 + $0x90] ss:$8 sps:$4 sm:$0xff]   ;;  %v2637_v40 = vld [vmem:[%s3923_s1 + $0xa4] ss:$8 sps:$4 sm:$0xff]  }
   0xe   :  { %v2633_v37 = vld [vmem:[%s3923_s1 + $0x494] ss:$8 sps:$4 sm:$0xff]   ;;  %v2636_v39 = vld [vmem:[%s3923_s1 + $0x490] ss:$8 sps:$4 sm:$0xff]   ;;  %v2639_v41 = vld [vmem:[%s3923_s1 + $0x4a4] ss:$8 sps:$4 sm:$0xff]  }
   0xf   :  { %1748 = vmatpush1.bf16.msra.mxu1 %v2599_v14  ;;  %v2641_v42 = vld [vmem:[%s3923_s1 + $0xa0] ss:$8 sps:$4 sm:$0xff]   ;;  %v2643_v44 = vld [vmem:[%s3923_s1 + $0xb4] ss:$8 sps:$4 sm:$0xff]   ;;  %v2647_v46 = vld [vmem:[%s3923_s1 + $0xb0] ss:$8 sps:$4 sm:$0xff]  }
  0x10   :  { %1960 = vmatpush1.bf16.msra.mxu0 %v2600_v15  ;;  %1749 = vmatprep.subr.bf16.mxu1 %v2601_v16  ;;  %v2642_v43 = vld [vmem:[%s3923_s1 + $0x4a0] ss:$8 sps:$4 sm:$0xff]   ;;  %v2645_v45 = vld [vmem:[%s3923_s1 + $0x4b4] ss:$8 sps:$4 sm:$0xff]   ;;  %v2648_v47 = vld [vmem:[%s3923_s1 + $0x4b0] ss:$8 sps:$4 sm:$0xff]  }
  0x11   :  { %1961 = vmatprep.subr.bf16.mxu0 %v2603_v17  ;;  %v13_v48 = vld [vmem:[%s3924_s0] sm:$0xff]  ;;  %v2655_v58 = vld [vmem:[%s3923_s1 + $0xd4] ss:$8 sps:$4 sm:$0xff]   ;;  %v2659_v60 = vld [vmem:[%s3923_s1 + $0xd0] ss:$8 sps:$4 sm:$0xff]  }
  0x12   :  { %v21_v49 = vld [vmem:[%s3924_s0 + $0x40] sm:$0xff]  ;;  %v2657_v59 = vld [vmem:[%s3923_s1 + $0x4d4] ss:$8 sps:$4 sm:$0xff]   ;;  %v2660_v61 = vld [vmem:[%s3923_s1 + $0x4d0] ss:$8 sps:$4 sm:$0xff]  }
  0x13   :  { %1750 = vmatpush1.bf16.msra.mxu1 %v2605_v18  ;;  %v2649_v50 = vld [vmem:[%s3923_s1 + $0xc4] ss:$8 sps:$4 sm:$0xff]   ;;  %v2234_v52 = vcombine.high %v13_v48, %v21_v49  ;;  %v2653_v56 = vld [vmem:[%s3923_s1 + $0xc0] ss:$8 sps:$4 sm:$0xff]   ;;  %v2667_v2 = vld [vmem:[%s3923_s1 + $0xf4] ss:$8 sps:$4 sm:$0xff]   ;;  %v2233_v8 = vcombine.low %v13_v48, %v21_v49 }
  0x14   :  { %1962 = vmatpush1.bf16.msra.mxu0 %v2606_v19  ;;  %1751 = vmatprep.subr.bf16.mxu1 %v2607_v20  ;;  %v2651_v51 = vld [vmem:[%s3923_s1 + $0x4c4] ss:$8 sps:$4 sm:$0xff]   ;;  %v2654_v57 = vld [vmem:[%s3923_s1 + $0x4c0] ss:$8 sps:$4 sm:$0xff]   ;;  %v2669_v3 = vld [vmem:[%s3923_s1 + $0x4f4] ss:$8 sps:$4 sm:$0xff]  }
  0x15   :  { %1963 = vmatprep.subr.bf16.mxu0 %v2609_v21  ;;  %v17_v53 = vld [vmem:[%s3924_s0 + $0x20] sm:$0xff]  ;;  %1773 = vmatprep.mubr.bf16.mxu1 %v2234_v52  ;;  %v2671_v4 = vld [vmem:[%s3923_s1 + $0xf0] ss:$8 sps:$4 sm:$0xff]   ;;  %v2681_v12 = vld [vmem:[%s3923_s1 + $0x114] ss:$8 sps:$4 sm:$0xff]  }
  0x16   :  { %v25_v54 = vld [vmem:[%s3924_s0 + $0x60] sm:$0xff]  ;;  %v2672_v5 = vld [vmem:[%s3923_s1 + $0x4f0] ss:$8 sps:$4 sm:$0xff]   ;;  %v2684_v13 = vld [vmem:[%s3923_s1 + $0x514] ss:$8 sps:$4 sm:$0xff]  }
  0x17   :  { %1752 = vmatpush1.bf16.msra.mxu1 %v2611_v22  ;;  %v2242_v55 = vcombine.high %v17_v53, %v25_v54  ;;  %v2661_v62 = vld [vmem:[%s3923_s1 + $0xe4] ss:$8 sps:$4 sm:$0xff]   ;;  %v2665_v0 = vld [vmem:[%s3923_s1 + $0xe0] ss:$8 sps:$4 sm:$0xff]   ;;  %v2241_v10 = vcombine.low %v17_v53, %v25_v54  ;;  %v2679_v14 = vld [vmem:[%s3923_s1 + $0x110] ss:$8 sps:$4 sm:$0xff]  }
  0x18   :  { %1964 = vmatpush1.bf16.msra.mxu0 %v2612_v23  ;;  %1753 = vmatprep.subr.bf16.mxu1 %v2613_v24  ;;  %v2663_v63 = vld [vmem:[%s3923_s1 + $0x4e4] ss:$8 sps:$4 sm:$0xff]   ;;  %v2666_v1 = vld [vmem:[%s3923_s1 + $0x4e0] ss:$8 sps:$4 sm:$0xff]   ;;  %v2682_v15 = vld [vmem:[%s3923_s1 + $0x510] ss:$8 sps:$4 sm:$0xff]  }
  0x19   :  { %1965 = vmatprep.subr.bf16.mxu0 %v2615_v25  ;;  %1985 = vmatprep.mubr.bf16.mxu0 %v2242_v55  ;;  %v2675_v6 = vld [vmem:[%s3923_s1 + $0x104] ss:$8 sps:$4 sm:$0xff]   ;;  %v2673_v9 = vld [vmem:[%s3923_s1 + $0x100] ss:$8 sps:$4 sm:$0xff]   ;;  %v2693_v20 = vld [vmem:[%s3923_s1 + $0x134] ss:$8 sps:$4 sm:$0xff]  }
  0x1a   :  { %v2678_v7 = vld [vmem:[%s3923_s1 + $0x504] ss:$8 sps:$4 sm:$0xff]   ;;  %v2676_v11 = vld [vmem:[%s3923_s1 + $0x500] ss:$8 sps:$4 sm:$0xff]   ;;  %v2696_v21 = vld [vmem:[%s3923_s1 + $0x534] ss:$8 sps:$4 sm:$0xff]  }
  0x1b   :  { %1754 = vmatpush1.bf16.msra.mxu1 %v2617_v26  ;;  %v2687_v16 = vld [vmem:[%s3923_s1 + $0x124] ss:$8 sps:$4 sm:$0xff]   ;;  %v2685_v18 = vld [vmem:[%s3923_s1 + $0x120] ss:$8 sps:$4 sm:$0xff]   ;;  %v2691_v22 = vld [vmem:[%s3923_s1 + $0x130] ss:$8 sps:$4 sm:$0xff]  }
  0x1c   :  { %1966 = vmatpush1.bf16.msra.mxu0 %v2618_v27  ;;  %1755 = vmatprep.subr.bf16.mxu1 %v2619_v28  ;;  %v2690_v17 = vld [vmem:[%s3923_s1 + $0x524] ss:$8 sps:$4 sm:$0xff]   ;;  %v2688_v19 = vld [vmem:[%s3923_s1 + $0x520] ss:$8 sps:$4 sm:$0xff]   ;;  %v2694_v23 = vld [vmem:[%s3923_s1 + $0x530] ss:$8 sps:$4 sm:$0xff]  }
  0x1d   :  { %1967 = vmatprep.subr.bf16.mxu0 %v2621_v29  ;;  %v2699_v24 = vld [vmem:[%s3923_s1 + $0x144] ss:$8 sps:$4 sm:$0xff]   ;;  %v2697_v26 = vld [vmem:[%s3923_s1 + $0x140] ss:$8 sps:$4 sm:$0xff]   ;;  %v2705_v28 = vld [vmem:[%s3923_s1 + $0x154] ss:$8 sps:$4 sm:$0xff]  }
  0x1e   :  { %v2702_v25 = vld [vmem:[%s3923_s1 + $0x544] ss:$8 sps:$4 sm:$0xff]   ;;  %v2700_v27 = vld [vmem:[%s3923_s1 + $0x540] ss:$8 sps:$4 sm:$0xff]   ;;  %v2708_v29 = vld [vmem:[%s3923_s1 + $0x554] ss:$8 sps:$4 sm:$0xff]  }
  0x1f   :  { %1756 = vmatpush1.bf16.msra.mxu1 %v2623_v30  ;;  %v29_v30 = vld [vmem:[%s3924_s0 + $0x80] sm:$0xff]  ;;  %v3302_v49 = vld [vmem:[%s3924_s0 + $0x28] sm:$0xff]  ;;  %v2718_v52 = vld [vmem:[%s3923_s1 + $0x570] ss:$8 sps:$4 sm:$0xff]  }
  0x20   :  { %1968 = vmatpush1.bf16.msra.mxu0 %v2624_v31  ;;  %1757 = vmatprep.subr.bf16.mxu1 %v2625_v32  ;;  %v37_v31 = vld [vmem:[%s3924_s0 + $0xc0] sm:$0xff]  ;;  %v2703_v32 = vld [vmem:[%s3923_s1 + $0x150] ss:$8 sps:$4 sm:$0xff]  }
  0x21   :  { %1969 = vmatprep.subr.bf16.mxu0 %v2627_v33  ;;  %v2250_v33 = vcombine.high %v29_v30, %v37_v31  ;;  %v2723_v54 = vld [vmem:[%s3923_s1 + $0x184] ss:$8 sps:$4 sm:$0xff]  }
  0x22   :  { %v2726_v55 = vld [vmem:[%s3923_s1 + $0x584] ss:$8 sps:$4 sm:$0xff]  }
  0x23   :  { %1758 = vmatpush1.bf16.msra.mxu1 %v2629_v34  ;;  %v2706_v34 = vld [vmem:[%s3923_s1 + $0x550] ss:$8 sps:$4 sm:$0xff]  }
  0x24   :  { %1970 = vmatpush1.bf16.msra.mxu0 %v2630_v35  ;;  %1759 = vmatprep.subr.bf16.mxu1 %v2631_v36  ;;  %v33_v35 = vld [vmem:[%s3924_s0 + $0xa0] sm:$0xff] }
  0x25   :  { %1971 = vmatprep.subr.bf16.mxu0 %v2633_v37  ;;  %v41_v36 = vld [vmem:[%s3924_s0 + $0xe0] sm:$0xff]  ;;  %v2249_v37 = vcombine.low %v29_v30, %v37_v31  ;;  %v2777_v30 = vld [vmem:[%s3923_s1 + $0x214] ss:$8 sps:$4 sm:$0xff]  }
  0x26   :  { %v2780_v31 = vld [vmem:[%s3923_s1 + $0x614] ss:$8 sps:$4 sm:$0xff]  }
  0x27   :  { %1760 = vmatpush1.bf16.msra.mxu1 %v2635_v38  ;;  %v2711_v38 = vld [vmem:[%s3923_s1 + $0x164] ss:$8 sps:$4 sm:$0xff]  }
  0x28   :  { %1972 = vmatpush1.bf16.msra.mxu0 %v2636_v39  ;;  %1761 = vmatprep.subr.bf16.mxu1 %v2637_v40  ;;  %v2258_v39 = vcombine.high %v33_v35, %v41_v36  ;;  %v2257_v40 = vcombine.low %v33_v35, %v41_v36  ;;  %v2775_v36 = vld [vmem:[%s3923_s1 + $0x210] ss:$8 sps:$4 sm:$0xff]  }
  0x29   :  { %1973 = vmatprep.subr.bf16.mxu0 %v2639_v41  ;;  %v2714_v41 = vld [vmem:[%s3923_s1 + $0x564] ss:$8 sps:$4 sm:$0xff]  }
  0x2b   :  { %1762 = vmatpush1.bf16.msra.mxu1 %v2641_v42  ;;  %v2709_v42 = vld [vmem:[%s3923_s1 + $0x160] ss:$8 sps:$4 sm:$0xff]  }
  0x2c   :  { %1974 = vmatpush1.bf16.msra.mxu0 %v2642_v43  ;;  %1763 = vmatprep.subr.bf16.mxu1 %v2643_v44  ;;  %v2712_v43 = vld [vmem:[%s3923_s1 + $0x560] ss:$8 sps:$4 sm:$0xff]  }
  0x2d   :  { %1975 = vmatprep.subr.bf16.mxu0 %v2645_v45  ;;  %v3284_v44 = vld [vmem:[%s3924_s0 + $0x8] sm:$0xff] }
  0x2e   :  { %v3289_v45 = vld [vmem:[%s3924_s0 + $0x48] sm:$0xff] }
  0x2f   :  { %1764 = vmatpush1.bf16.msra.mxu1 %v2647_v46  ;;  %v2717_v46 = vld [vmem:[%s3923_s1 + $0x174] ss:$8 sps:$4 sm:$0xff]   ;;  %v2236_v48 = vcombine.high %v3284_v44, %v3289_v45 }
  0x30   :  { %1976 = vmatpush1.bf16.msra.mxu0 %v2648_v47  ;;  %1765 = vmatprep.subr.bf16.mxu1 %v2649_v50  ;;  %v2720_v47 = vld [vmem:[%s3923_s1 + $0x574] ss:$8 sps:$4 sm:$0xff]   ;;  %v3307_v50 = vld [vmem:[%s3924_s0 + $0x68] sm:$0xff] }
  0x31   :  { %1977 = vmatprep.subr.bf16.mxu0 %v2651_v51  ;;  %v2715_v51 = vld [vmem:[%s3923_s1 + $0x170] ss:$8 sps:$4 sm:$0xff]   ;;  %v2244_v53 = vcombine.high %v3302_v49, %v3307_v50 }
  0x33   :  { %1766 = vmatpush1.bf16.msra.mxu1 %v2653_v56  ;;  %v2721_v56 = vld [vmem:[%s3923_s1 + $0x180] ss:$8 sps:$4 sm:$0xff]  }
  0x34   :  { %1978 = vmatpush1.bf16.msra.mxu0 %v2654_v57  ;;  %1767 = vmatprep.subr.bf16.mxu1 %v2655_v58  ;;  %v2724_v57 = vld [vmem:[%s3923_s1 + $0x580] ss:$8 sps:$4 sm:$0xff]   ;;  %v2729_v58 = vld [vmem:[%s3923_s1 + $0x194] ss:$8 sps:$4 sm:$0xff]  }
  0x35   :  { %1979 = vmatprep.subr.bf16.mxu0 %v2657_v59  ;;  %v2732_v59 = vld [vmem:[%s3923_s1 + $0x594] ss:$8 sps:$4 sm:$0xff]  }
  0x37   :  { %1768 = vmatpush1.bf16.msra.mxu1 %v2659_v60  ;;  %v2727_v60 = vld [vmem:[%s3923_s1 + $0x190] ss:$8 sps:$4 sm:$0xff]  }
  0x38   :  { %1980 = vmatpush1.bf16.msra.mxu0 %v2660_v61  ;;  %1769 = vmatprep.subr.bf16.mxu1 %v2661_v62  ;;  %v2730_v61 = vld [vmem:[%s3923_s1 + $0x590] ss:$8 sps:$4 sm:$0xff]   ;;  %v2735_v62 = vld [vmem:[%s3923_s1 + $0x1a4] ss:$8 sps:$4 sm:$0xff]  }
  0x39   :  { %1981 = vmatprep.subr.bf16.mxu0 %v2663_v63  ;;  %v2738_v63 = vld [vmem:[%s3923_s1 + $0x5a4] ss:$8 sps:$4 sm:$0xff]  }
  0x3b   :  { %1770 = vmatpush1.bf16.msra.mxu1 %v2665_v0  ;;  %v2733_v0 = vld [vmem:[%s3923_s1 + $0x1a0] ss:$8 sps:$4 sm:$0xff]  }
  0x3c   :  { %1982 = vmatpush1.bf16.msra.mxu0 %v2666_v1  ;;  %1771 = vmatprep.subr.bf16.mxu1 %v2667_v2  ;;  %v2736_v1 = vld [vmem:[%s3923_s1 + $0x5a0] ss:$8 sps:$4 sm:$0xff]   ;;  %v2741_v2 = vld [vmem:[%s3923_s1 + $0x1b4] ss:$8 sps:$4 sm:$0xff]  }
  0x3d   :  { %1983 = vmatprep.subr.bf16.mxu0 %v2669_v3  ;;  %v2744_v3 = vld [vmem:[%s3923_s1 + $0x5b4] ss:$8 sps:$4 sm:$0xff]  }
  0x3f   :  { %1772 = vmatpush1.bf16.msra.mxu1 %v2671_v4  ;;  %v2739_v4 = vld [vmem:[%s3923_s1 + $0x1b0] ss:$8 sps:$4 sm:$0xff]  }
  0x40   :  { %1984 = vmatpush1.bf16.msra.mxu0 %v2672_v5  ;;  %1794 = vmatprep.subr.bf16.mxu1 %v2675_v6  ;;  %v2742_v5 = vld [vmem:[%s3923_s1 + $0x5b0] ss:$8 sps:$4 sm:$0xff]   ;;  %v2747_v6 = vld [vmem:[%s3923_s1 + $0x1c4] ss:$8 sps:$4 sm:$0xff]  }
  0x41   :  { %2006 = vmatprep.subr.bf16.mxu0 %v2678_v7  ;;  %v2750_v7 = vld [vmem:[%s3923_s1 + $0x5c4] ss:$8 sps:$4 sm:$0xff]  }
  0x42   :  { %1774 = vmatmul.mubr.bf16.vlgmr.msra.gmra.mrb[0].mxu1 %v2233_v8  ;;  %v2745_v8 = vld [vmem:[%s3923_s1 + $0x1c0] ss:$8 sps:$4 sm:$0xff]  }
  0x43   :  { %1986 = vmatmul.mubr.bf16.vlgmr.msra.gmra.mrb[0].mxu0 %v2241_v10  ;;  %1795 = vmatpush1.bf16.msra.mxu1 %v2673_v9  ;;  %v2748_v9 = vld [vmem:[%s3923_s1 + $0x5c0] ss:$8 sps:$4 sm:$0xff]   ;;  %v2753_v10 = vld [vmem:[%s3923_s1 + $0x1d4] ss:$8 sps:$4 sm:$0xff]  }
  0x44   :  { %2007 = vmatpush1.bf16.msra.mxu0 %v2676_v11  ;;  %1796 = vmatprep.subr.bf16.mxu1 %v2681_v12  ;;  %v2756_v11 = vld [vmem:[%s3923_s1 + $0x5d4] ss:$8 sps:$4 sm:$0xff]   ;;  %v2751_v12 = vld [vmem:[%s3923_s1 + $0x1d0] ss:$8 sps:$4 sm:$0xff]  }
  0x45   :  { %2008 = vmatprep.subr.bf16.mxu0 %v2684_v13  ;;  %1783 = vmatprep.mubr.bf16.mxu1 %v2250_v33  ;;  %v2754_v13 = vld [vmem:[%s3923_s1 + $0x5d0] ss:$8 sps:$4 sm:$0xff]   ;;  %v42_v33 = vld [vmem:[%s3924_s0 + $0xe8] sm:$0xff] }
  0x46   :  { %1995 = vmatprep.mubr.bf16.mxu0 %v2258_v39  ;;  %v2786_v39 = vld [vmem:[%s3923_s1 + $0x624] ss:$8 sps:$4 sm:$0xff]  }
  0x47   :  { %1797 = vmatpush1.bf16.msra.mxu1 %v2679_v14  ;;  %v2759_v14 = vld [vmem:[%s3923_s1 + $0x1e4] ss:$8 sps:$4 sm:$0xff]  }
  0x48   :  { %2009 = vmatpush1.bf16.msra.mxu0 %v2682_v15  ;;  %1798 = vmatprep.subr.bf16.mxu1 %v2687_v16  ;;  %v2762_v15 = vld [vmem:[%s3923_s1 + $0x5e4] ss:$8 sps:$4 sm:$0xff]   ;;  %v2757_v16 = vld [vmem:[%s3923_s1 + $0x1e0] ss:$8 sps:$4 sm:$0xff]  }
  0x49   :  { %2010 = vmatprep.subr.bf16.mxu0 %v2690_v17  ;;  %v2760_v17 = vld [vmem:[%s3923_s1 + $0x5e0] ss:$8 sps:$4 sm:$0xff]  }
  0x4a   :  { %1784 = vmatmul.mubr.bf16.gmra.mrb[4].mxu1 %v2249_v37  ;;  %v2778_v37 = vld [vmem:[%s3923_s1 + $0x610] ss:$8 sps:$4 sm:$0xff]  }
  0x4b   :  { %1799 = vmatpush1.bf16.msra.mxu1 %v2685_v18  ;;  %1996 = vmatmul.mubr.bf16.gmra.mrb[4].mxu0 %v2257_v40  ;;  %v2765_v18 = vld [vmem:[%s3923_s1 + $0x1f4] ss:$8 sps:$4 sm:$0xff]   ;;  %v2781_v40 = vld [vmem:[%s3923_s1 + $0x220] ss:$8 sps:$4 sm:$0xff]  }
  0x4c   :  { %2011 = vmatpush1.bf16.msra.mxu0 %v2688_v19  ;;  %1800 = vmatprep.subr.bf16.mxu1 %v2693_v20  ;;  %v2768_v19 = vld [vmem:[%s3923_s1 + $0x5f4] ss:$8 sps:$4 sm:$0xff]   ;;  %v2763_v20 = vld [vmem:[%s3923_s1 + $0x1f0] ss:$8 sps:$4 sm:$0xff]  }
  0x4d   :  { %2012 = vmatprep.subr.bf16.mxu0 %v2696_v21  ;;  %1826 = vmatprep.mubr.bf16.mxu1 %v2236_v48  ;;  %v2766_v21 = vld [vmem:[%s3923_s1 + $0x5f0] ss:$8 sps:$4 sm:$0xff]   ;;  %v2789_v48 = vld [vmem:[%s3923_s1 + $0x234] ss:$8 sps:$4 sm:$0xff]  }
  0x4e   :  { %2038 = vmatprep.mubr.bf16.mxu0 %v2244_v53  ;;  %v2790_v53 = vld [vmem:[%s3923_s1 + $0x630] ss:$8 sps:$4 sm:$0xff]  }
  0x4f   :  { %1801 = vmatpush1.bf16.msra.mxu1 %v2691_v22  ;;  %v2771_v22 = vld [vmem:[%s3923_s1 + $0x204] ss:$8 sps:$4 sm:$0xff]  }
  0x50   :  { %2013 = vmatpush1.bf16.msra.mxu0 %v2694_v23  ;;  %1802 = vmatprep.subr.bf16.mxu1 %v2699_v24  ;;  %v2774_v23 = vld [vmem:[%s3923_s1 + $0x604] ss:$8 sps:$4 sm:$0xff]   ;;  %v2769_v24 = vld [vmem:[%s3923_s1 + $0x200] ss:$8 sps:$4 sm:$0xff]  }
  0x51   :  { %2014 = vmatprep.subr.bf16.mxu0 %v2702_v25  ;;  %v2772_v25 = vld [vmem:[%s3923_s1 + $0x600] ss:$8 sps:$4 sm:$0xff]  }
  0x53   :  { %1803 = vmatpush1.bf16.msra.mxu1 %v2697_v26  ;;  %v30_v26 = vld [vmem:[%s3924_s0 + $0x88] sm:$0xff] }
  0x54   :  { %2015 = vmatpush1.bf16.msra.mxu0 %v2700_v27  ;;  %1804 = vmatprep.subr.bf16.mxu1 %v2705_v28  ;;  %v2235_v27 = vcombine.low %v3284_v44, %v3289_v45  ;;  %v2243_v28 = vcombine.low %v3302_v49, %v3307_v50  ;;  %v3473_v45 = vld [vmem:[%s3924_s0 + $0x50] sm:$0xff] }
  0x55   :  { %2016 = vmatprep.subr.bf16.mxu0 %v2708_v29  ;;  %v38_v29 = vld [vmem:[%s3924_s0 + $0xc8] sm:$0xff]  ;;  %v2792_v49 = vld [vmem:[%s3923_s1 + $0x634] ss:$8 sps:$4 sm:$0xff]  }
  0x57   :  { %1805 = vmatpush1.bf16.msra.mxu1 %v2703_v32  ;;  %v34_v32 = vld [vmem:[%s3924_s0 + $0xa8] sm:$0xff] }
  0x58   :  { %2017 = vmatpush1.bf16.msra.mxu0 %v2706_v34  ;;  %1806 = vmatprep.subr.bf16.mxu1 %v2711_v38  ;;  %v2252_v34 = vcombine.high %v30_v26, %v38_v29  ;;  %v2260_v35 = vcombine.high %v34_v32, %v42_v33  ;;  %v2783_v38 = vld [vmem:[%s3923_s1 + $0x224] ss:$8 sps:$4 sm:$0xff]   ;;  %v2259_v44 = vcombine.low %v34_v32, %v42_v33  ;;  %v2853_v32 = vld [vmem:[%s3923_s1 + $0x2e0] ss:$8 sps:$4 sm:$0xff]  }
  0x59   :  { %2018 = vmatprep.subr.bf16.mxu0 %v2714_v41  ;;  %v2784_v41 = vld [vmem:[%s3923_s1 + $0x620] ss:$8 sps:$4 sm:$0xff]  }
  0x5a   :  { %v2856_v33 = vld [vmem:[%s3923_s1 + $0x6e0] ss:$8 sps:$4 sm:$0xff]  }
  0x5b   :  { %1807 = vmatpush1.bf16.msra.mxu1 %v2709_v42  ;;  %v3468_v42 = vld [vmem:[%s3924_s0 + $0x10] sm:$0xff] }
  0x5c   :  { %2019 = vmatpush1.bf16.msra.mxu0 %v2712_v43  ;;  %1808 = vmatprep.subr.bf16.mxu1 %v2717_v46  ;;  %v2251_v43 = vcombine.low %v30_v26, %v38_v29  ;;  %v3478_v46 = vld [vmem:[%s3924_s0 + $0x30] sm:$0xff]  ;;  %v2238_v50 = vcombine.high %v3468_v42, %v3473_v45 }
  0x5d   :  { %2020 = vmatprep.subr.bf16.mxu0 %v2720_v47  ;;  %v3483_v47 = vld [vmem:[%s3924_s0 + $0x70] sm:$0xff] }
  0x5e   :  { %v2849_v26 = vld [vmem:[%s3923_s1 + $0x2d4] ss:$8 sps:$4 sm:$0xff]   ;;  %v2850_v29 = vld [vmem:[%s3923_s1 + $0x6d0] ss:$8 sps:$4 sm:$0xff]  }
  0x5f   :  { %1809 = vmatpush1.bf16.msra.mxu1 %v2715_v51  ;;  %v2246_v51 = vcombine.high %v3478_v46, %v3483_v47 }
  0x60   :  { %2021 = vmatpush1.bf16.msra.mxu0 %v2718_v52  ;;  %1810 = vmatprep.subr.bf16.mxu1 %v2723_v54  ;;  %v2787_v52 = vld [vmem:[%s3923_s1 + $0x230] ss:$8 sps:$4 sm:$0xff]   ;;  %v2795_v54 = vld [vmem:[%s3923_s1 + $0x244] ss:$8 sps:$4 sm:$0xff]  }
  0x61   :  { %2022 = vmatprep.subr.bf16.mxu0 %v2726_v55  ;;  %v2798_v55 = vld [vmem:[%s3923_s1 + $0x644] ss:$8 sps:$4 sm:$0xff]  }
  0x63   :  { %1811 = vmatpush1.bf16.msra.mxu1 %v2721_v56  ;;  %v2793_v56 = vld [vmem:[%s3923_s1 + $0x240] ss:$8 sps:$4 sm:$0xff]  }
  0x64   :  { %2023 = vmatpush1.bf16.msra.mxu0 %v2724_v57  ;;  %1812 = vmatprep.subr.bf16.mxu1 %v2729_v58  ;;  %v2796_v57 = vld [vmem:[%s3923_s1 + $0x640] ss:$8 sps:$4 sm:$0xff]   ;;  %v2801_v58 = vld [vmem:[%s3923_s1 + $0x254] ss:$8 sps:$4 sm:$0xff]  }
  0x65   :  { %2024 = vmatprep.subr.bf16.mxu0 %v2732_v59  ;;  %v2804_v59 = vld [vmem:[%s3923_s1 + $0x654] ss:$8 sps:$4 sm:$0xff]  }
  0x67   :  { %1813 = vmatpush1.bf16.msra.mxu1 %v2727_v60  ;;  %v2799_v60 = vld [vmem:[%s3923_s1 + $0x250] ss:$8 sps:$4 sm:$0xff]  }
  0x68   :  { %2025 = vmatpush1.bf16.msra.mxu0 %v2730_v61  ;;  %1814 = vmatprep.subr.bf16.mxu1 %v2735_v62  ;;  %v2802_v61 = vld [vmem:[%s3923_s1 + $0x650] ss:$8 sps:$4 sm:$0xff]   ;;  %v2807_v62 = vld [vmem:[%s3923_s1 + $0x264] ss:$8 sps:$4 sm:$0xff]  }
  0x69   :  { %2026 = vmatprep.subr.bf16.mxu0 %v2738_v63  ;;  %v2810_v63 = vld [vmem:[%s3923_s1 + $0x664] ss:$8 sps:$4 sm:$0xff]  }
  0x6b   :  { %1815 = vmatpush1.bf16.msra.mxu1 %v2733_v0  ;;  %v2805_v0 = vld [vmem:[%s3923_s1 + $0x260] ss:$8 sps:$4 sm:$0xff]  }
  0x6c   :  { %2027 = vmatpush1.bf16.msra.mxu0 %v2736_v1  ;;  %1816 = vmatprep.subr.bf16.mxu1 %v2741_v2  ;;  %v2808_v1 = vld [vmem:[%s3923_s1 + $0x660] ss:$8 sps:$4 sm:$0xff]   ;;  %v2813_v2 = vld [vmem:[%s3923_s1 + $0x274] ss:$8 sps:$4 sm:$0xff]  }
  0x6d   :  { %2028 = vmatprep.subr.bf16.mxu0 %v2744_v3  ;;  %v2816_v3 = vld [vmem:[%s3923_s1 + $0x674] ss:$8 sps:$4 sm:$0xff]  }
  0x6f   :  { %1817 = vmatpush1.bf16.msra.mxu1 %v2739_v4  ;;  %v2811_v4 = vld [vmem:[%s3923_s1 + $0x270] ss:$8 sps:$4 sm:$0xff]  }
  0x70   :  { %2029 = vmatpush1.bf16.msra.mxu0 %v2742_v5  ;;  %1818 = vmatprep.subr.bf16.mxu1 %v2747_v6  ;;  %v2814_v5 = vld [vmem:[%s3923_s1 + $0x670] ss:$8 sps:$4 sm:$0xff]   ;;  %v2819_v6 = vld [vmem:[%s3923_s1 + $0x284] ss:$8 sps:$4 sm:$0xff]  }
  0x71   :  { %2030 = vmatprep.subr.bf16.mxu0 %v2750_v7  ;;  %v2822_v7 = vld [vmem:[%s3923_s1 + $0x684] ss:$8 sps:$4 sm:$0xff]  }
  0x73   :  { %1819 = vmatpush1.bf16.msra.mxu1 %v2745_v8  ;;  %v2817_v8 = vld [vmem:[%s3923_s1 + $0x280] ss:$8 sps:$4 sm:$0xff]  }
  0x74   :  { %2031 = vmatpush1.bf16.msra.mxu0 %v2748_v9  ;;  %1820 = vmatprep.subr.bf16.mxu1 %v2753_v10  ;;  %v2820_v9 = vld [vmem:[%s3923_s1 + $0x680] ss:$8 sps:$4 sm:$0xff]   ;;  %v2825_v10 = vld [vmem:[%s3923_s1 + $0x294] ss:$8 sps:$4 sm:$0xff]  }
  0x75   :  { %2032 = vmatprep.subr.bf16.mxu0 %v2756_v11  ;;  %v2828_v11 = vld [vmem:[%s3923_s1 + $0x694] ss:$8 sps:$4 sm:$0xff]  }
  0x77   :  { %1821 = vmatpush1.bf16.msra.mxu1 %v2751_v12  ;;  %v2823_v12 = vld [vmem:[%s3923_s1 + $0x290] ss:$8 sps:$4 sm:$0xff]  }
  0x78   :  { %2033 = vmatpush1.bf16.msra.mxu0 %v2754_v13  ;;  %1822 = vmatprep.subr.bf16.mxu1 %v2759_v14  ;;  %v2826_v13 = vld [vmem:[%s3923_s1 + $0x690] ss:$8 sps:$4 sm:$0xff]   ;;  %v2831_v14 = vld [vmem:[%s3923_s1 + $0x2a4] ss:$8 sps:$4 sm:$0xff]  }
  0x79   :  { %2034 = vmatprep.subr.bf16.mxu0 %v2762_v15  ;;  %v2834_v15 = vld [vmem:[%s3923_s1 + $0x6a4] ss:$8 sps:$4 sm:$0xff]  }
  0x7b   :  { %1823 = vmatpush1.bf16.msra.mxu1 %v2757_v16  ;;  %v2829_v16 = vld [vmem:[%s3923_s1 + $0x2a0] ss:$8 sps:$4 sm:$0xff]  }
  0x7c   :  { %2035 = vmatpush1.bf16.msra.mxu0 %v2760_v17  ;;  %1824 = vmatprep.subr.bf16.mxu1 %v2765_v18  ;;  %v2832_v17 = vld [vmem:[%s3923_s1 + $0x6a0] ss:$8 sps:$4 sm:$0xff]   ;;  %v2837_v18 = vld [vmem:[%s3923_s1 + $0x2b4] ss:$8 sps:$4 sm:$0xff]  }
  0x7d   :  { %2036 = vmatprep.subr.bf16.mxu0 %v2768_v19  ;;  %v2840_v19 = vld [vmem:[%s3923_s1 + $0x6b4] ss:$8 sps:$4 sm:$0xff]  }
  0x7f   :  { %1825 = vmatpush1.bf16.msra.mxu1 %v2763_v20  ;;  %v2835_v20 = vld [vmem:[%s3923_s1 + $0x2b0] ss:$8 sps:$4 sm:$0xff]  }
  0x80   :  { %2037 = vmatpush1.bf16.msra.mxu0 %v2766_v21  ;;  %1847 = vmatprep.subr.bf16.mxu1 %v2771_v22  ;;  %v2838_v21 = vld [vmem:[%s3923_s1 + $0x6b0] ss:$8 sps:$4 sm:$0xff]   ;;  %v2843_v22 = vld [vmem:[%s3923_s1 + $0x2c4] ss:$8 sps:$4 sm:$0xff]  }
  0x81   :  { %2059 = vmatprep.subr.bf16.mxu0 %v2774_v23  ;;  %v2846_v23 = vld [vmem:[%s3923_s1 + $0x6c4] ss:$8 sps:$4 sm:$0xff]  }
  0x82   :  { %1827 = vmatmul.mubr.bf16.vlgmr.msra.gmra.mrb[0].mxu1 %v2235_v27  ;;  %v2852_v27 = vld [vmem:[%s3923_s1 + $0x6d4] ss:$8 sps:$4 sm:$0xff]  }
  0x83   :  { %2039 = vmatmul.mubr.bf16.vlgmr.msra.gmra.mrb[0].mxu0 %v2243_v28  ;;  %1848 = vmatpush1.bf16.msra.mxu1 %v2769_v24  ;;  %v2841_v24 = vld [vmem:[%s3923_s1 + $0x2c0] ss:$8 sps:$4 sm:$0xff]   ;;  %v2847_v28 = vld [vmem:[%s3923_s1 + $0x2d0] ss:$8 sps:$4 sm:$0xff]  }
  0x84   :  { %2060 = vmatpush1.bf16.msra.mxu0 %v2772_v25  ;;  %1849 = vmatprep.subr.bf16.mxu1 %v2777_v30  ;;  %v2844_v25 = vld [vmem:[%s3923_s1 + $0x6c0] ss:$8 sps:$4 sm:$0xff]   ;;  %v2855_v30 = vld [vmem:[%s3923_s1 + $0x2e4] ss:$8 sps:$4 sm:$0xff]  }
  0x85   :  { %2061 = vmatprep.subr.bf16.mxu0 %v2780_v31  ;;  %1836 = vmatprep.mubr.bf16.mxu1 %v2252_v34  ;;  %v2858_v31 = vld [vmem:[%s3923_s1 + $0x6e4] ss:$8 sps:$4 sm:$0xff]   ;;  %v2861_v34 = vld [vmem:[%s3923_s1 + $0x2f4] ss:$8 sps:$4 sm:$0xff]  }
  0x86   :  { %2048 = vmatprep.mubr.bf16.mxu0 %v2260_v35  ;;  %v2864_v35 = vld [vmem:[%s3923_s1 + $0x6f4] ss:$8 sps:$4 sm:$0xff]  }
  0x87   :  { %1850 = vmatpush1.bf16.msra.mxu1 %v2775_v36  ;;  %v2859_v36 = vld [vmem:[%s3923_s1 + $0x2f0] ss:$8 sps:$4 sm:$0xff]  }
  0x88   :  { %2062 = vmatpush1.bf16.msra.mxu0 %v2778_v37  ;;  %1851 = vmatprep.subr.bf16.mxu1 %v2783_v38  ;;  %v2862_v37 = vld [vmem:[%s3923_s1 + $0x6f0] ss:$8 sps:$4 sm:$0xff]   ;;  %v2867_v38 = vld [vmem:[%s3923_s1 + $0x304] ss:$8 sps:$4 sm:$0xff]  }
  0x89   :  { %2063 = vmatprep.subr.bf16.mxu0 %v2786_v39  ;;  %v2870_v39 = vld [vmem:[%s3923_s1 + $0x704] ss:$8 sps:$4 sm:$0xff]  }
  0x8a   :  { %1837 = vmatmul.mubr.bf16.gmra.mrb[4].mxu1 %v2251_v43  ;;  %v2245_v43 = vcombine.low %v3478_v46, %v3483_v47  ;;  %v2873_v46 = vld [vmem:[%s3923_s1 + $0x314] ss:$8 sps:$4 sm:$0xff]  }
  0x8b   :  { %2049 = vmatmul.mubr.bf16.gmra.mrb[4].mxu0 %v2259_v44  ;;  %1852 = vmatpush1.bf16.msra.mxu1 %v2781_v40  ;;  %v31_v40 = vld [vmem:[%s3924_s0 + $0x90] sm:$0xff] }
  0x8c   :  { %2064 = vmatpush1.bf16.msra.mxu0 %v2784_v41  ;;  %1853 = vmatprep.subr.bf16.mxu1 %v2789_v48  ;;  %v2237_v41 = vcombine.low %v3468_v42, %v3473_v45  ;;  %v39_v44 = vld [vmem:[%s3924_s0 + $0xd0] sm:$0xff]  ;;  %v2865_v42 = vld [vmem:[%s3923_s1 + $0x300] ss:$8 sps:$4 sm:$0xff]  }
  0x8d   :  { %2065 = vmatprep.subr.bf16.mxu0 %v2792_v49  ;;  %1879 = vmatprep.mubr.bf16.mxu1 %v2238_v50  ;;  %v35_v48 = vld [vmem:[%s3924_s0 + $0xb0] sm:$0xff]  ;;  %v2868_v45 = vld [vmem:[%s3923_s1 + $0x700] ss:$8 sps:$4 sm:$0xff]   ;;  %v2254_v50 = vcombine.high %v31_v40, %v39_v44 }
  0x8e   :  { %2091 = vmatprep.mubr.bf16.mxu0 %v2246_v51  ;;  %v43_v49 = vld [vmem:[%s3924_s0 + $0xf0] sm:$0xff] }
  0x8f   :  { %1854 = vmatpush1.bf16.msra.mxu1 %v2787_v52  ;;  %v2876_v47 = vld [vmem:[%s3923_s1 + $0x714] ss:$8 sps:$4 sm:$0xff]   ;;  %v2262_v51 = vcombine.high %v35_v48, %v43_v49  ;;  %v2871_v52 = vld [vmem:[%s3923_s1 + $0x310] ss:$8 sps:$4 sm:$0xff]  }
  0x90   :  { %2066 = vmatpush1.bf16.msra.mxu0 %v2790_v53  ;;  %1855 = vmatprep.subr.bf16.mxu1 %v2795_v54  ;;  %v2874_v53 = vld [vmem:[%s3923_s1 + $0x710] ss:$8 sps:$4 sm:$0xff]   ;;  %v2879_v54 = vld [vmem:[%s3923_s1 + $0x324] ss:$8 sps:$4 sm:$0xff]  }
  0x91   :  { %2067 = vmatprep.subr.bf16.mxu0 %v2798_v55  ;;  %v2882_v55 = vld [vmem:[%s3923_s1 + $0x724] ss:$8 sps:$4 sm:$0xff]  }
  0x93   :  { %1856 = vmatpush1.bf16.msra.mxu1 %v2793_v56  ;;  %v3694_v56 = vld [vmem:[%s3924_s0 + $0x18] sm:$0xff] }
  0x94   :  { %2068 = vmatpush1.bf16.msra.mxu0 %v2796_v57  ;;  %1857 = vmatprep.subr.bf16.mxu1 %v2801_v58  ;;  %v2253_v57 = vcombine.low %v31_v40, %v39_v44  ;;  %v2261_v58 = vcombine.low %v35_v48, %v43_v49  ;;  %v2937_v40 = vld [vmem:[%s3923_s1 + $0x3c0] ss:$8 sps:$4 sm:$0xff]   ;;  %v2948_v44 = vld [vmem:[%s3923_s1 + $0x7d4] ss:$8 sps:$4 sm:$0xff]   ;;  %v2943_v48 = vld [vmem:[%s3923_s1 + $0x3d0] ss:$8 sps:$4 sm:$0xff]  }
  0x95   :  { %2069 = vmatprep.subr.bf16.mxu0 %v2804_v59  ;;  %v3699_v59 = vld [vmem:[%s3924_s0 + $0x58] sm:$0xff] }
  0x96   :  { %v2946_v49 = vld [vmem:[%s3923_s1 + $0x7d0] ss:$8 sps:$4 sm:$0xff]  }
  0x97   :  { %1858 = vmatpush1.bf16.msra.mxu1 %v2799_v60  ;;  %v3704_v60 = vld [vmem:[%s3924_s0 + $0x38] sm:$0xff] }
  0x98   :  { %2070 = vmatpush1.bf16.msra.mxu0 %v2802_v61  ;;  %1859 = vmatprep.subr.bf16.mxu1 %v2807_v62  ;;  %v3709_v61 = vld [vmem:[%s3924_s0 + $0x78] sm:$0xff]  ;;  %v2877_v62 = vld [vmem:[%s3923_s1 + $0x320] ss:$8 sps:$4 sm:$0xff]  }
  0x99   :  { %2071 = vmatprep.subr.bf16.mxu0 %v2810_v63  ;;  %v2880_v63 = vld [vmem:[%s3923_s1 + $0x720] ss:$8 sps:$4 sm:$0xff]  }
  0x9b   :  { %1860 = vmatpush1.bf16.msra.mxu1 %v2805_v0  ;;  %v2885_v0 = vld [vmem:[%s3923_s1 + $0x334] ss:$8 sps:$4 sm:$0xff]  }
  0x9c   :  { %2072 = vmatpush1.bf16.msra.mxu0 %v2808_v1  ;;  %1861 = vmatprep.subr.bf16.mxu1 %v2813_v2  ;;  %v2888_v1 = vld [vmem:[%s3923_s1 + $0x734] ss:$8 sps:$4 sm:$0xff]   ;;  %v2240_v2 = vcombine.high %v3694_v56, %v3699_v59 }
  0x9d   :  { %2073 = vmatprep.subr.bf16.mxu0 %v2816_v3  ;;  %v2248_v3 = vcombine.high %v3704_v60, %v3709_v61 }
  0x9f   :  { %1862 = vmatpush1.bf16.msra.mxu1 %v2811_v4  ;;  %v2883_v4 = vld [vmem:[%s3923_s1 + $0x330] ss:$8 sps:$4 sm:$0xff]  }
  0xa0   :  { %2074 = vmatpush1.bf16.msra.mxu0 %v2814_v5  ;;  %1863 = vmatprep.subr.bf16.mxu1 %v2819_v6  ;;  %v2886_v5 = vld [vmem:[%s3923_s1 + $0x730] ss:$8 sps:$4 sm:$0xff]   ;;  %v2891_v6 = vld [vmem:[%s3923_s1 + $0x344] ss:$8 sps:$4 sm:$0xff]  }
  0xa1   :  { %2075 = vmatprep.subr.bf16.mxu0 %v2822_v7  ;;  %v2894_v7 = vld [vmem:[%s3923_s1 + $0x744] ss:$8 sps:$4 sm:$0xff]  }
  0xa3   :  { %1864 = vmatpush1.bf16.msra.mxu1 %v2817_v8  ;;  %v2889_v8 = vld [vmem:[%s3923_s1 + $0x340] ss:$8 sps:$4 sm:$0xff]  }
  0xa4   :  { %2076 = vmatpush1.bf16.msra.mxu0 %v2820_v9  ;;  %1865 = vmatprep.subr.bf16.mxu1 %v2825_v10  ;;  %v2892_v9 = vld [vmem:[%s3923_s1 + $0x740] ss:$8 sps:$4 sm:$0xff]   ;;  %v2897_v10 = vld [vmem:[%s3923_s1 + $0x354] ss:$8 sps:$4 sm:$0xff]  }
  0xa5   :  { %2077 = vmatprep.subr.bf16.mxu0 %v2828_v11  ;;  %v2900_v11 = vld [vmem:[%s3923_s1 + $0x754] ss:$8 sps:$4 sm:$0xff]  }
  0xa7   :  { %1866 = vmatpush1.bf16.msra.mxu1 %v2823_v12  ;;  %v2895_v12 = vld [vmem:[%s3923_s1 + $0x350] ss:$8 sps:$4 sm:$0xff]  }
  0xa8   :  { %2078 = vmatpush1.bf16.msra.mxu0 %v2826_v13  ;;  %1867 = vmatprep.subr.bf16.mxu1 %v2831_v14  ;;  %v2898_v13 = vld [vmem:[%s3923_s1 + $0x750] ss:$8 sps:$4 sm:$0xff]   ;;  %v2903_v14 = vld [vmem:[%s3923_s1 + $0x364] ss:$8 sps:$4 sm:$0xff]  }
  0xa9   :  { %2079 = vmatprep.subr.bf16.mxu0 %v2834_v15  ;;  %v2906_v15 = vld [vmem:[%s3923_s1 + $0x764] ss:$8 sps:$4 sm:$0xff]  }
  0xab   :  { %1868 = vmatpush1.bf16.msra.mxu1 %v2829_v16  ;;  %v2901_v16 = vld [vmem:[%s3923_s1 + $0x360] ss:$8 sps:$4 sm:$0xff]  }
  0xac   :  { %2080 = vmatpush1.bf16.msra.mxu0 %v2832_v17  ;;  %1869 = vmatprep.subr.bf16.mxu1 %v2837_v18  ;;  %v2904_v17 = vld [vmem:[%s3923_s1 + $0x760] ss:$8 sps:$4 sm:$0xff]   ;;  %v2909_v18 = vld [vmem:[%s3923_s1 + $0x374] ss:$8 sps:$4 sm:$0xff]  }
  0xad   :  { %2081 = vmatprep.subr.bf16.mxu0 %v2840_v19  ;;  %v2912_v19 = vld [vmem:[%s3923_s1 + $0x774] ss:$8 sps:$4 sm:$0xff]  }
  0xaf   :  { %1870 = vmatpush1.bf16.msra.mxu1 %v2835_v20  ;;  %v2907_v20 = vld [vmem:[%s3923_s1 + $0x370] ss:$8 sps:$4 sm:$0xff]  }
  0xb0   :  { %2082 = vmatpush1.bf16.msra.mxu0 %v2838_v21  ;;  %1871 = vmatprep.subr.bf16.mxu1 %v2843_v22  ;;  %v2910_v21 = vld [vmem:[%s3923_s1 + $0x770] ss:$8 sps:$4 sm:$0xff]   ;;  %v2915_v22 = vld [vmem:[%s3923_s1 + $0x384] ss:$8 sps:$4 sm:$0xff]  }
  0xb1   :  { %2083 = vmatprep.subr.bf16.mxu0 %v2846_v23  ;;  %v2918_v23 = vld [vmem:[%s3923_s1 + $0x784] ss:$8 sps:$4 sm:$0xff]  }
  0xb3   :  { %1872 = vmatpush1.bf16.msra.mxu1 %v2841_v24  ;;  %v2913_v24 = vld [vmem:[%s3923_s1 + $0x380] ss:$8 sps:$4 sm:$0xff]  }
  0xb4   :  { %2084 = vmatpush1.bf16.msra.mxu0 %v2844_v25  ;;  %1873 = vmatprep.subr.bf16.mxu1 %v2849_v26  ;;  %v2916_v25 = vld [vmem:[%s3923_s1 + $0x780] ss:$8 sps:$4 sm:$0xff]   ;;  %v2921_v26 = vld [vmem:[%s3923_s1 + $0x394] ss:$8 sps:$4 sm:$0xff]  }
  0xb5   :  { %2085 = vmatprep.subr.bf16.mxu0 %v2852_v27  ;;  %v2924_v27 = vld [vmem:[%s3923_s1 + $0x794] ss:$8 sps:$4 sm:$0xff]  }
  0xb7   :  { %1874 = vmatpush1.bf16.msra.mxu1 %v2847_v28  ;;  %v2919_v28 = vld [vmem:[%s3923_s1 + $0x390] ss:$8 sps:$4 sm:$0xff]  }
  0xb8   :  { %2086 = vmatpush1.bf16.msra.mxu0 %v2850_v29  ;;  %1875 = vmatprep.subr.bf16.mxu1 %v2855_v30  ;;  %v2922_v29 = vld [vmem:[%s3923_s1 + $0x790] ss:$8 sps:$4 sm:$0xff]   ;;  %v2927_v30 = vld [vmem:[%s3923_s1 + $0x3a4] ss:$8 sps:$4 sm:$0xff]  }
  0xb9   :  { %2087 = vmatprep.subr.bf16.mxu0 %v2858_v31  ;;  %v2930_v31 = vld [vmem:[%s3923_s1 + $0x7a4] ss:$8 sps:$4 sm:$0xff]  }
  0xbb   :  { %1876 = vmatpush1.bf16.msra.mxu1 %v2853_v32  ;;  %v2925_v32 = vld [vmem:[%s3923_s1 + $0x3a0] ss:$8 sps:$4 sm:$0xff]  }
  0xbc   :  { %2088 = vmatpush1.bf16.msra.mxu0 %v2856_v33  ;;  %1877 = vmatprep.subr.bf16.mxu1 %v2861_v34  ;;  %v2928_v33 = vld [vmem:[%s3923_s1 + $0x7a0] ss:$8 sps:$4 sm:$0xff]   ;;  %v2933_v34 = vld [vmem:[%s3923_s1 + $0x3b4] ss:$8 sps:$4 sm:$0xff]  }
  0xbd   :  { %2089 = vmatprep.subr.bf16.mxu0 %v2864_v35  ;;  %v2936_v35 = vld [vmem:[%s3923_s1 + $0x7b4] ss:$8 sps:$4 sm:$0xff]  }
  0xbf   :  { %1878 = vmatpush1.bf16.msra.mxu1 %v2859_v36  ;;  %v2931_v36 = vld [vmem:[%s3923_s1 + $0x3b0] ss:$8 sps:$4 sm:$0xff]  }
  0xc0   :  { %2090 = vmatpush1.bf16.msra.mxu0 %v2862_v37  ;;  %1900 = vmatprep.subr.bf16.mxu1 %v2867_v38  ;;  %v2934_v37 = vld [vmem:[%s3923_s1 + $0x7b0] ss:$8 sps:$4 sm:$0xff]   ;;  %v2939_v38 = vld [vmem:[%s3923_s1 + $0x3c4] ss:$8 sps:$4 sm:$0xff]  }
  0xc1   :  { %2112 = vmatprep.subr.bf16.mxu0 %v2870_v39  ;;  %v2942_v39 = vld [vmem:[%s3923_s1 + $0x7c4] ss:$8 sps:$4 sm:$0xff]  }
  0xc2   :  { %1880 = vmatmul.mubr.bf16.vlgmr.msra.gmra.mrb[0].mxu1 %v2237_v41  ;;  %v2940_v41 = vld [vmem:[%s3923_s1 + $0x7c0] ss:$8 sps:$4 sm:$0xff]  }
  0xc3   :  { %2092 = vmatmul.mubr.bf16.vlgmr.msra.gmra.mrb[0].mxu0 %v2245_v43  ;;  %1901 = vmatpush1.bf16.msra.mxu1 %v2865_v42  ;;  %v2945_v43 = vld [vmem:[%s3923_s1 + $0x3d4] ss:$8 sps:$4 sm:$0xff]   ;;  %v2951_v42 = vld [vmem:[%s3923_s1 + $0x3e4] ss:$8 sps:$4 sm:$0xff]  }
  0xc4   :  { %2113 = vmatpush1.bf16.msra.mxu0 %v2868_v45  ;;  %1902 = vmatprep.subr.bf16.mxu1 %v2873_v46  ;;  %v2954_v45 = vld [vmem:[%s3923_s1 + $0x7e4] ss:$8 sps:$4 sm:$0xff]   ;;  %v2949_v46 = vld [vmem:[%s3923_s1 + $0x3e0] ss:$8 sps:$4 sm:$0xff]  }
  0xc5   :  { %2114 = vmatprep.subr.bf16.mxu0 %v2876_v47  ;;  %1889 = vmatprep.mubr.bf16.mxu1 %v2254_v50  ;;  %v2952_v47 = vld [vmem:[%s3923_s1 + $0x7e0] ss:$8 sps:$4 sm:$0xff]   ;;  %v2957_v50 = vld [vmem:[%s3923_s1 + $0x3f4] ss:$8 sps:$4 sm:$0xff]  }
  0xc6   :  { %2101 = vmatprep.mubr.bf16.mxu0 %v2262_v51  ;;  %v2960_v51 = vld [vmem:[%s3923_s1 + $0x7f4] ss:$8 sps:$4 sm:$0xff]  }
  0xc7   :  { %1903 = vmatpush1.bf16.msra.mxu1 %v2871_v52  ;;  %v2955_v52 = vld [vmem:[%s3923_s1 + $0x3f0] ss:$8 sps:$4 sm:$0xff]  }
  0xc8   :  { %2115 = vmatpush1.bf16.msra.mxu0 %v2874_v53  ;;  %1904 = vmatprep.subr.bf16.mxu1 %v2879_v54  ;;  %v2958_v53 = vld [vmem:[%s3923_s1 + $0x7f0] ss:$8 sps:$4 sm:$0xff]  }
  0xc9   :  { %2116 = vmatprep.subr.bf16.mxu0 %v2882_v55  ;;  %v32_v54 = vld [vmem:[%s3924_s0 + $0x98] sm:$0xff] }
  0xca   :  { %1890 = vmatmul.mubr.bf16.gmra.mrb[4].mxu1 %v2253_v57  ;;  %v40_v55 = vld [vmem:[%s3924_s0 + $0xd8] sm:$0xff] }
  0xcb   :  { %2102 = vmatmul.mubr.bf16.gmra.mrb[4].mxu0 %v2261_v58  ;;  %1905 = vmatpush1.bf16.msra.mxu1 %v2877_v62  ;;  %v36_v57 = vld [vmem:[%s3924_s0 + $0xb8] sm:$0xff]  ;;  %v2239_v62 = vcombine.low %v3694_v56, %v3699_v59 }
  0xcc   :  { %2117 = vmatpush1.bf16.msra.mxu0 %v2880_v63  ;;  %1906 = vmatprep.subr.bf16.mxu1 %v2885_v0  ;;  %v44_v58 = vld [vmem:[%s3924_s0 + $0xf8] sm:$0xff]  ;;  %v2247_v63 = vcombine.low %v3704_v60, %v3709_v61  ;;  %v2256_v0 = vcombine.high %v32_v54, %v40_v55 }
  0xcd   :  { %2118 = vmatprep.subr.bf16.mxu0 %v2888_v1  ;;  %1932 = vmatprep.mubr.bf16.mxu1 %v2240_v2  ;;  %v2264_v1 = vcombine.high %v36_v57, %v44_v58  ;;  %v2255_v2 = vcombine.low %v32_v54, %v40_v55 }
  0xce   :  { %2144 = vmatprep.mubr.bf16.mxu0 %v2248_v3  ;;  %v2263_v3 = vcombine.low %v36_v57, %v44_v58 }
  0xcf   :  { %1907 = vmatpush1.bf16.msra.mxu1 %v2883_v4 }
  0xd0   :  { %2119 = vmatpush1.bf16.msra.mxu0 %v2886_v5  ;;  %1908 = vmatprep.subr.bf16.mxu1 %v2891_v6 }
  0xd1   :  { %2120 = vmatprep.subr.bf16.mxu0 %v2894_v7 }
  0xd3   :  { %1909 = vmatpush1.bf16.msra.mxu1 %v2889_v8 }
  0xd4   :  { %2121 = vmatpush1.bf16.msra.mxu0 %v2892_v9  ;;  %1910 = vmatprep.subr.bf16.mxu1 %v2897_v10 }
  0xd5   :  { %2122 = vmatprep.subr.bf16.mxu0 %v2900_v11 }
  0xd7   :  { %1911 = vmatpush1.bf16.msra.mxu1 %v2895_v12 }
  0xd8   :  { %2123 = vmatpush1.bf16.msra.mxu0 %v2898_v13  ;;  %1912 = vmatprep.subr.bf16.mxu1 %v2903_v14 }
  0xd9   :  { %2124 = vmatprep.subr.bf16.mxu0 %v2906_v15 }
  0xdb   :  { %1913 = vmatpush1.bf16.msra.mxu1 %v2901_v16 }
  0xdc   :  { %2125 = vmatpush1.bf16.msra.mxu0 %v2904_v17  ;;  %1914 = vmatprep.subr.bf16.mxu1 %v2909_v18 }
  0xdd   :  { %2126 = vmatprep.subr.bf16.mxu0 %v2912_v19 }
  0xdf   :  { %1915 = vmatpush1.bf16.msra.mxu1 %v2907_v20 }
  0xe0   :  { %2127 = vmatpush1.bf16.msra.mxu0 %v2910_v21  ;;  %1916 = vmatprep.subr.bf16.mxu1 %v2915_v22 }
  0xe1   :  { %2128 = vmatprep.subr.bf16.mxu0 %v2918_v23 }
  0xe3   :  { %1917 = vmatpush1.bf16.msra.mxu1 %v2913_v24 }
  0xe4   :  { %2129 = vmatpush1.bf16.msra.mxu0 %v2916_v25  ;;  %1918 = vmatprep.subr.bf16.mxu1 %v2921_v26 }
  0xe5   :  { %2130 = vmatprep.subr.bf16.mxu0 %v2924_v27 }
  0xe7   :  { %1919 = vmatpush1.bf16.msra.mxu1 %v2919_v28 }
  0xe8   :  { %2131 = vmatpush1.bf16.msra.mxu0 %v2922_v29  ;;  %1920 = vmatprep.subr.bf16.mxu1 %v2927_v30 }
  0xe9   :  { %2132 = vmatprep.subr.bf16.mxu0 %v2930_v31 }
  0xeb   :  { %1921 = vmatpush1.bf16.msra.mxu1 %v2925_v32 }
  0xec   :  { %2133 = vmatpush1.bf16.msra.mxu0 %v2928_v33  ;;  %1922 = vmatprep.subr.bf16.mxu1 %v2933_v34 }
  0xed   :  { %2134 = vmatprep.subr.bf16.mxu0 %v2936_v35 }
  0xef   :  { %1923 = vmatpush1.bf16.msra.mxu1 %v2931_v36 }
  0xf0   :  { %2135 = vmatpush1.bf16.msra.mxu0 %v2934_v37  ;;  %1924 = vmatprep.subr.bf16.mxu1 %v2939_v38 }
  0xf1   :  { %2136 = vmatprep.subr.bf16.mxu0 %v2942_v39 }
  0xf3   :  { %1925 = vmatpush1.bf16.msra.mxu1 %v2937_v40 }
  0xf4   :  { %2137 = vmatpush1.bf16.msra.mxu0 %v2940_v41  ;;  %1926 = vmatprep.subr.bf16.mxu1 %v2945_v43 }
  0xf5   :  { %2138 = vmatprep.subr.bf16.mxu0 %v2948_v44 }
  0xf7   :  { %1927 = vmatpush1.bf16.msra.mxu1 %v2943_v48 }
  0xf8   :  { %2139 = vmatpush1.bf16.msra.mxu0 %v2946_v49  ;;  %1928 = vmatprep.subr.bf16.mxu1 %v2951_v42 }
  0xf9   :  { %2140 = vmatprep.subr.bf16.mxu0 %v2954_v45 }
  0xfb   :  { %1929 = vmatpush1.bf16.msra.mxu1 %v2949_v46 }
  0xfc   :  { %2141 = vmatpush1.bf16.msra.mxu0 %v2952_v47  ;;  %1930 = vmatprep.subr.bf16.mxu1 %v2957_v50 }
  0xfd   :  { %2142 = vmatprep.subr.bf16.mxu0 %v2960_v51 }
  0xff   :  { %1931 = vmatpush1.bf16.msra.mxu1 %v2955_v52 }
 0x100   :  { %2143 = vmatpush1.bf16.msra.mxu0 %v2958_v53 }
 0x102   :  { %1933 = vmatmul.mubr.bf16.vlgmr.msra.gmra.mrb[0].mxu1 %v2239_v62 }
 0x103   :  { %2145 = vmatmul.mubr.bf16.vlgmr.msra.gmra.mrb[0].mxu0 %v2247_v63  ;;  %1942 = vmatprep.mubr.bf16.mxu1 %v2256_v0 }
 0x104   :  { %2154 = vmatprep.mubr.bf16.mxu0 %v2264_v1 }
 0x10a   :  { %1943 = vmatmul.mubr.bf16.gmra.mrb[4].mxu1 %v2255_v2 }
 0x10b   :  { %2155 = vmatmul.mubr.bf16.gmra.mrb[4].mxu0 %v2263_v3 }
 0x1d5   :  { %v1934_v4 = vpop.f32.mrb[0].mxu1 }
 0x1d6   :  { %v2146_v5 = vpop.f32.mrb[0].mxu0  ;;  %v1936_v7 = vpop.f32.mrb[1].mxu1 }
 0x1d7   :  { %v2521_v6 = vadd.f32 %v2146_v5, %v1934_v4  ;;  %v2148_v56 = vpop.f32.mrb[1].mxu0  ;;  %v1938_v8 = vpop.f32.mrb[2].mxu1 }
 0x1d8   :  { %v2522_v59 = vadd.f32 %v2148_v56, %v1936_v7  ;;  %v2150_v60 = vpop.f32.mrb[2].mxu0  ;;  %v1940_v9 = vpop.f32.mrb[3].mxu1 }
 0x1d9   :  { %2165 = vst [vmem:[%s3925_s2] sm:$0xff] %v2521_v6  ;;  %v2523_v61 = vadd.f32 %v2150_v60, %v1938_v8  ;;  %v2152_v10 = vpop.f32.mrb[3].mxu0  ;;  %v2191_v12 = vmul.f32 %v2521_v6, %v2521_v6 }
 0x1da   :  { %2166 = vst [vmem:[%s3925_s2 + $0x8] sm:$0xff] %v2522_v59  ;;  %v2524_v11 = vadd.f32 %v2152_v10, %v1940_v9  ;;  %v2192_v15 = vmul.f32 %v2522_v59, %v2522_v59 }
 0x1db   :  { %2167 = vst [vmem:[%s3925_s2 + $0x10] sm:$0xff] %v2523_v61  ;;  %v2173_v13 = vadd.f32 %v2523_v61, %v2521_v6  ;;  %v2193_v14 = vmul.f32 %v2523_v61, %v2523_v61 }
 0x1dc   :  { %2168 = vst [vmem:[%s3925_s2 + $0x18] sm:$0xff] %v2524_v11  ;;  %v2182_v16 = vadd.f32 %v2524_v11, %v2522_v59  ;;  %v2194_v17 = vmul.f32 %v2524_v11, %v2524_v11 }
 0x1dd   :  { %v2199_v18 = vadd.f32 %v2193_v14, %v2191_v12  ;;  %v1944_v20 = vpop.f32.mrb[4].mxu1 }
 0x1de   :  { %v2208_v19 = vadd.f32 %v2194_v17, %v2192_v15  ;;  %v2156_v21 = vpop.f32.mrb[4].mxu0  ;;  %v1946_v23 = vpop.f32.mrb[5].mxu1 }
 0x1df   :  { %v2525_v22 = vadd.f32 %v2156_v21, %v1944_v20  ;;  %v2158_v24 = vpop.f32.mrb[5].mxu0  ;;  %v1948_v26 = vpop.f32.mrb[6].mxu1 }
 0x1e0   :  { %v2526_v25 = vadd.f32 %v2158_v24, %v1946_v23  ;;  %v2160_v27 = vpop.f32.mrb[6].mxu0  ;;  %v1950_v31 = vpop.f32.mrb[7].mxu1 }
 0x1e1   :  { %2169 = vst [vmem:[%s3925_s2 + $0x20] sm:$0xff] %v2525_v22  ;;  %v2174_v28 = vadd.f32 %v2525_v22, %v2173_v13  ;;  %v2195_v29 = vmul.f32 %v2525_v22, %v2525_v22  ;;  %v2527_v30 = vadd.f32 %v2160_v27, %v1948_v26  ;;  %v2162_v32 = vpop.f32.mrb[7].mxu0 }
 0x1e2   :  { %2170 = vst [vmem:[%s3925_s2 + $0x28] sm:$0xff] %v2526_v25  ;;  %v2183_v33 = vadd.f32 %v2526_v25, %v2182_v16  ;;  %v2196_v34 = vmul.f32 %v2526_v25, %v2526_v25  ;;  %v2528_v35 = vadd.f32 %v2162_v32, %v1950_v31 }
 0x1e3   :  { %v2200_v36 = vadd.f32 %v2199_v18, %v2195_v29  ;;  %2171 = vst [vmem:[%s3925_s2 + $0x30] sm:$0xff] %v2527_v30  ;;  %v2175_v37 = vadd.f32 %v2527_v30, %v2174_v28  ;;  %v2197_v38 = vmul.f32 %v2527_v30, %v2527_v30 }
 0x1e4   :  { %v2209_v39 = vadd.f32 %v2208_v19, %v2196_v34  ;;  %2172 = vst [vmem:[%s3925_s2 + $0x38] sm:$0xff] %v2528_v35  ;;  %v2184_v40 = vadd.f32 %v2528_v35, %v2183_v33  ;;  %v2198_v41 = vmul.f32 %v2528_v35, %v2528_v35 }
 0x1e5   :  { %v2176_v43 = vrot.slane %v2175_v37, 4  ;;  %v2201_v44 = vadd.f32 %v2200_v36, %v2197_v38 }
 0x1e6   :  { %v2185_v48 = vrot.slane %v2184_v40, 4  ;;  %v2210_v49 = vadd.f32 %v2209_v39, %v2198_v41 }
 0x1e7   :  { %v2177_v42 = vadd.f32 %v2176_v43, %v2175_v37  ;;  %v2202_v45 = vrot.slane %v2201_v44, 4 }
 0x1e8   :  { %v2186_v46 = vadd.f32 %v2185_v48, %v2184_v40  ;;  %v2211_v47 = vrot.slane %v2210_v49, 4 }
 0x1e9   :  { %v2178_v50 = vrot.slane %v2177_v42, 2  ;;  %v2203_v51 = vadd.f32 %v2202_v45, %v2201_v44 }
 0x1ea   :  { %v2187_v52 = vrot.slane %v2186_v46, 2  ;;  %v2212_v53 = vadd.f32 %v2211_v47, %v2210_v49 }
 0x1eb   :  { %v2179_v54 = vadd.f32 %v2178_v50, %v2177_v42  ;;  %v2204_v55 = vrot.slane %v2203_v51, 2 }
 0x1ec   :  { %v2188_v57 = vadd.f32 %v2187_v52, %v2186_v46  ;;  %v2213_v58 = vrot.slane %v2212_v53, 2 }
 0x1ed   :  { %v2180_v62 = vrot.slane %v2179_v54, 1  ;;  %v2205_v63 = vadd.f32 %v2204_v55, %v2203_v51 }
 0x1ee   :  { %v2189_v0 = vrot.slane %v2188_v57, 1  ;;  %v2214_v1 = vadd.f32 %v2213_v58, %v2212_v53 }
 0x1ef   :  { %v2206_v2 = vrot.slane %v2205_v63, 1  ;;  %v2181_v4 = vadd.f32 %v2180_v62, %v2179_v54 }
 0x1f0   :  { %v2215_v3 = vrot.slane %v2214_v1, 1  ;;  %v2190_v6 = vadd.f32 %v2189_v0, %v2188_v57 }
 0x1f1   :  { %v2207_v5 = vadd.f32 %v2206_v2, %v2205_v63 }
 0x1f2   :  { %v2216_v7 = vadd.f32 %v2215_v3, %v2214_v1 }
 0x1f3   :  { %v2218_v56 = vsel %vm2217_vm0, %v2181_v4, %v2207_v5 }
 0x1f4   :  { %v2221_v59 = vsel %vm2220_vm1, %v2218_v56, 0.0  ;;  %v2219_v8 = vsel %vm2217_vm0, %v2190_v6, %v2216_v7 }
 0x1f5   :  { %2223 = vst [vmem:[%s3926_s3] sm:$0xff] %v2221_v59  ;;  %v2222_v60 = vsel %vm2220_vm1, %v2219_v8, 0.0 }
 0x1f6   :  { %2224 = vst [vmem:[%s3926_s3 + $0x8] sm:$0xff] %v2222_v60 }

// kernel: discriminator_forward.12
= control target key start
LH: loop header
LB: loop body
LE: loop exit
PB: predicated region body
PF: predicated region fallthrough
CT: control target
= control target key end

     0   :  { %v24_v0 = vlaneseq  ;;  %s172_s1 = inlined_call_operand.vmem [shape: f32[1,256], index: 1, kind: input, shape index: {}]   ;;  %s173_s2 = inlined_call_operand.vmem [shape: f32[1,256], index: 2, kind: input, shape index: {}]   ;;  %s174_s0 = inlined_call_operand.vmem [shape: f32[32,256], index: 0, kind: input, shape index: {}]   ;;  %s175_s3 = inlined_call_operand.vmem [shape: f32[32,256], index: 3, kind: output, shape index: {}]  }
   0x1   :  { %v22_v2 = vld [vmem:[%s172_s1] sm:$0x3]  ;;  %v15_v6 = vld [vmem:[%s174_s0 + $0x8] sm:$0xff]  ;;  %v16_v8 = vld [vmem:[%s174_s0 + $0x10] sm:$0xff] }
   0x2   :  { %v25_v1 = vshrl.u32 %v24_v0, 7  ;;  %v42_v3 = vld [vmem:[%s173_s2] sm:$0x3]  ;;  %v17_v9 = vld [vmem:[%s174_s0 + $0x18] sm:$0xff]  ;;  %v19_v15 = vld [vmem:[%s174_s0 + $0x28] sm:$0xff] }
   0x3   :  { %v14_v4 = vld [vmem:[%s174_s0] sm:$0xff]  ;;  %v20_v16 = vld [vmem:[%s174_s0 + $0x30] sm:$0xff]  ;;  %v21_v17 = vld [vmem:[%s174_s0 + $0x38] sm:$0xff] }
   0x4   :  { %v26_v5 = vsub.s32 0, %v25_v1  ;;  %v30_v7 = vsub.s32 1, %v25_v1  ;;  %v18_v10 = vld [vmem:[%s174_s0 + $0x20] sm:$0xff] }
   0x6   :  { %v27_v11 = vrot.slane %v22_v2, %v26_v5  ;;  %v47_v12 = vrot.slane %v42_v3, %v26_v5  ;;  %v31_v13 = vrot.slane %v22_v2, %v30_v7  ;;  %v51_v14 = vrot.slane %v42_v3, %v30_v7 }
   0x8   :  { %v34_v18 = vmul.f32 %v27_v11, %v14_v4  ;;  %v35_v19 = vmul.f32 %v31_v13, %v15_v6  ;;  %v36_v20 = vmul.f32 %v27_v11, %v16_v8  ;;  %v37_v21 = vmul.f32 %v31_v13, %v17_v9 }
   0x9   :  { %v38_v22 = vmul.f32 %v27_v11, %v18_v10  ;;  %v39_v23 = vmul.f32 %v31_v13, %v19_v15  ;;  %v40_v24 = vmul.f32 %v27_v11, %v20_v16  ;;  %v41_v25 = vmul.f32 %v31_v13, %v21_v17 }
   0xa   :  { %v54_v26 = vadd.f32 %v47_v12, %v34_v18  ;;  %v55_v27 = vadd.f32 %v51_v14, %v35_v19  ;;  %v56_v28 = vadd.f32 %v47_v12, %v36_v20  ;;  %v57_v29 = vadd.f32 %v51_v14, %v37_v21 }
   0xb   :  { %v58_v30 = vadd.f32 %v47_v12, %v38_v22  ;;  %v59_v31 = vadd.f32 %v51_v14, %v39_v23  ;;  %v60_v32 = vadd.f32 %v47_v12, %v40_v24  ;;  %v61_v33 = vadd.f32 %v51_v14, %v41_v25 }
   0xc   :  { %vm62_vm0 = vcmp.ge.f32.partialorder %v54_v26, 0.0  ;;  %v70_v34 = vmul.f32 0.2, %v54_v26  ;;  %vm63_vm1 = vcmp.ge.f32.partialorder %v55_v27, 0.0  ;;  %v71_v35 = vmul.f32 0.2, %v55_v27 }
   0xd   :  { %vm64_vm2 = vcmp.ge.f32.partialorder %v56_v28, 0.0  ;;  %v72_v36 = vmul.f32 0.2, %v56_v28  ;;  %vm65_vm3 = vcmp.ge.f32.partialorder %v57_v29, 0.0  ;;  %v73_v37 = vmul.f32 0.2, %v57_v29 }
   0xe   :  { %v78_v38 = vsel %vm62_vm0, %v54_v26, %v70_v34  ;;  %v79_v39 = vsel %vm63_vm1, %v55_v27, %v71_v35  ;;  %vm66_vm4 = vcmp.ge.f32.partialorder %v58_v30, 0.0  ;;  %v74_v40 = vmul.f32 0.2, %v58_v30 }
   0xf   :  { %86 = vst [vmem:[%s175_s3] sm:$0xff] %v78_v38  ;;  %87 = vst [vmem:[%s175_s3 + $0x8] sm:$0xff] %v79_v39  ;;  %v80_v41 = vsel %vm64_vm2, %v56_v28, %v72_v36  ;;  %v81_v42 = vsel %vm65_vm3, %v57_v29, %v73_v37  ;;  %vm67_vm5 = vcmp.ge.f32.partialorder %v59_v31, 0.0  ;;  %v75_v43 = vmul.f32 0.2, %v59_v31 }
  0x10   :  { %88 = vst [vmem:[%s175_s3 + $0x10] sm:$0xff] %v80_v41  ;;  %89 = vst [vmem:[%s175_s3 + $0x18] sm:$0xff] %v81_v42  ;;  %v82_v44 = vsel %vm66_vm4, %v58_v30, %v74_v40  ;;  %vm68_vm6 = vcmp.ge.f32.partialorder %v60_v32, 0.0  ;;  %v76_v45 = vmul.f32 0.2, %v60_v32  ;;  %vm69_vm7 = vcmp.ge.f32.partialorder %v61_v33, 0.0 }
  0x11   :  { %90 = vst [vmem:[%s175_s3 + $0x20] sm:$0xff] %v82_v44  ;;  %v83_v46 = vsel %vm67_vm5, %v59_v31, %v75_v43  ;;  %v77_v47 = vmul.f32 0.2, %v61_v33 }
  0x12   :  { %91 = vst [vmem:[%s175_s3 + $0x28] sm:$0xff] %v83_v46  ;;  %v84_v48 = vsel %vm68_vm6, %v60_v32, %v76_v45 }
  0x13   :  { %92 = vst [vmem:[%s175_s3 + $0x30] sm:$0xff] %v84_v48  ;;  %v85_v49 = vsel %vm69_vm7, %v61_v33, %v77_v47 }
  0x14   :  { %93 = vst [vmem:[%s175_s3 + $0x38] sm:$0xff] %v85_v49 }

// kernel: discriminator_forward.14
= control target key start
LH: loop header
LB: loop body
LE: loop exit
PB: predicated region body
PF: predicated region fallthrough
CT: control target
= control target key end

     0   :  { %v20_v0 = vlaneseq  ;;  %s140_s1 = inlined_call_operand.vmem [shape: f32[1,512], index: 1, kind: input, shape index: {}]   ;;  %s141_s2 = inlined_call_operand.vmem [shape: f32[1,512], index: 2, kind: input, shape index: {}]   ;;  %s142_s0 = inlined_call_operand.vmem [shape: f32[8,512], index: 0, kind: input, shape index: {}]   ;;  %s143_s3 = inlined_call_operand.vmem [shape: f32[8,512], index: 3, kind: output, shape index: {}]  }
   0x1   :  { %v18_v2 = vld [vmem:[%s140_s1] sm:$0xf]  ;;  %v15_v9 = vld [vmem:[%s142_s0 + $0x8] sm:$0xff]  ;;  %v16_v14 = vld [vmem:[%s142_s0 + $0x10] sm:$0xff] }
   0x2   :  { %v21_v1 = vshrl.u32 %v20_v0, 7  ;;  %v44_v3 = vld [vmem:[%s141_s2] sm:$0xf]  ;;  %v17_v15 = vld [vmem:[%s142_s0 + $0x18] sm:$0xff] }
   0x3   :  { %v14_v8 = vld [vmem:[%s142_s0] sm:$0xff] }
   0x4   :  { %v22_v4 = vsub.s32 0, %v21_v1  ;;  %v26_v5 = vsub.s32 1, %v21_v1  ;;  %v30_v6 = vsub.s32 2, %v21_v1  ;;  %v34_v7 = vsub.s32 3, %v21_v1 }
   0x6   :  { %v23_v10 = vrot.slane %v18_v2, %v22_v4  ;;  %v49_v11 = vrot.slane %v44_v3, %v22_v4  ;;  %v27_v12 = vrot.slane %v18_v2, %v26_v5  ;;  %v53_v13 = vrot.slane %v44_v3, %v26_v5 }
   0x7   :  { %v31_v16 = vrot.slane %v18_v2, %v30_v6  ;;  %v57_v17 = vrot.slane %v44_v3, %v30_v6  ;;  %v35_v18 = vrot.slane %v18_v2, %v34_v7  ;;  %v61_v19 = vrot.slane %v44_v3, %v34_v7 }
   0x8   :  { %v40_v20 = vmul.f32 %v23_v10, %v14_v8  ;;  %v41_v21 = vmul.f32 %v27_v12, %v15_v9 }
   0x9   :  { %v42_v22 = vmul.f32 %v31_v16, %v16_v14  ;;  %v43_v23 = vmul.f32 %v35_v18, %v17_v15 }
   0xa   :  { %v66_v24 = vadd.f32 %v49_v11, %v40_v20  ;;  %v67_v25 = vadd.f32 %v53_v13, %v41_v21 }
   0xb   :  { %v68_v26 = vadd.f32 %v57_v17, %v42_v22  ;;  %v69_v27 = vadd.f32 %v61_v19, %v43_v23 }
   0xc   :  { %vm70_vm0 = vcmp.ge.f32.partialorder %v66_v24, 0.0  ;;  %v74_v28 = vmul.f32 0.2, %v66_v24  ;;  %vm71_vm1 = vcmp.ge.f32.partialorder %v67_v25, 0.0  ;;  %v75_v29 = vmul.f32 0.2, %v67_v25 }
   0xd   :  { %vm72_vm2 = vcmp.ge.f32.partialorder %v68_v26, 0.0  ;;  %v76_v30 = vmul.f32 0.2, %v68_v26  ;;  %vm73_vm3 = vcmp.ge.f32.partialorder %v69_v27, 0.0  ;;  %v77_v31 = vmul.f32 0.2, %v69_v27 }
   0xe   :  { %v78_v32 = vsel %vm70_vm0, %v66_v24, %v74_v28  ;;  %v79_v33 = vsel %vm71_vm1, %v67_v25, %v75_v29 }
   0xf   :  { %82 = vst [vmem:[%s143_s3] sm:$0xff] %v78_v32  ;;  %83 = vst [vmem:[%s143_s3 + $0x8] sm:$0xff] %v79_v33  ;;  %v80_v34 = vsel %vm72_vm2, %v68_v26, %v76_v30  ;;  %v81_v35 = vsel %vm73_vm3, %v69_v27, %v77_v31 }
  0x10   :  { %84 = vst [vmem:[%s143_s3 + $0x10] sm:$0xff] %v80_v34  ;;  %85 = vst [vmem:[%s143_s3 + $0x18] sm:$0xff] %v81_v35 }

// kernel: discriminator_forward.13
= control target key start
LH: loop header
LB: loop body
LE: loop exit
PB: predicated region body
PF: predicated region fallthrough
CT: control target
= control target key end

     0   :  { %vm7653_vm0 = vcmask 1040384   ;;  %vm7658_vm1 = vcmask 1041408   ;;  %s13681_s1 = inlined_call_operand.vmem [shape: bf16[4096,512], index: 1, kind: input, shape index: {}]   ;;  %s13682_s0 = inlined_call_operand.vmem [shape: bf16[8,4096], index: 0, kind: input, shape index: {}]   ;;  %s13683_s2 = inlined_call_operand.vmem [shape: f32[8,512], index: 2, kind: output, shape index: {0}]   ;;  %s13684_s3 = inlined_call_operand.vmem [shape: f32[1,8,512], index: 3, kind: output, shape index: {1}]  }
   0x1   :  { %v8851_v0 = vld [vmem:[%s13681_s1 + $0x4] ss:$16 sps:$4 sm:$0xff]   ;;  %v8853_v1 = vld [vmem:[%s13681_s1 + $0xc] ss:$16 sps:$4 sm:$0xff]   ;;  %v8855_v2 = vld [vmem:[%s13681_s1] ss:$16 sps:$4 sm:$0xff]  }
   0x2   :  { %6285 = vmatprep.subr.bf16.mxu0 %v8851_v0  ;;  %v8856_v3 = vld [vmem:[%s13681_s1 + $0x8] ss:$16 sps:$4 sm:$0xff]   ;;  %6941 = vmatprep.subr.bf16.mxu1 %v8853_v1  ;;  %v8857_v4 = vld [vmem:[%s13681_s1 + $0x24] ss:$16 sps:$4 sm:$0xff]   ;;  %v8859_v5 = vld [vmem:[%s13681_s1 + $0x2c] ss:$16 sps:$4 sm:$0xff]  }
   0x3   :  { %6286 = vmatpush1.bf16.msra.mxu0 %v8855_v2  ;;  %6942 = vmatpush1.bf16.msra.mxu1 %v8856_v3  ;;  %v8861_v6 = vld [vmem:[%s13681_s1 + $0x20] ss:$16 sps:$4 sm:$0xff]   ;;  %v8862_v7 = vld [vmem:[%s13681_s1 + $0x28] ss:$16 sps:$4 sm:$0xff]   ;;  %v8863_v8 = vld [vmem:[%s13681_s1 + $0x44] ss:$16 sps:$4 sm:$0xff]  }
   0x4   :  { %6287 = vmatprep.subr.bf16.mxu0 %v8857_v4  ;;  %6943 = vmatprep.subr.bf16.mxu1 %v8859_v5  ;;  %v8865_v9 = vld [vmem:[%s13681_s1 + $0x4c] ss:$16 sps:$4 sm:$0xff]   ;;  %v8867_v10 = vld [vmem:[%s13681_s1 + $0x40] ss:$16 sps:$4 sm:$0xff]   ;;  %v8868_v11 = vld [vmem:[%s13681_s1 + $0x48] ss:$16 sps:$4 sm:$0xff]  }
   0x5   :  { %v8869_v12 = vld [vmem:[%s13681_s1 + $0x64] ss:$16 sps:$4 sm:$0xff]   ;;  %v8871_v13 = vld [vmem:[%s13681_s1 + $0x6c] ss:$16 sps:$4 sm:$0xff]   ;;  %v8873_v14 = vld [vmem:[%s13681_s1 + $0x60] ss:$16 sps:$4 sm:$0xff]  }
   0x6   :  { %v8874_v15 = vld [vmem:[%s13681_s1 + $0x68] ss:$16 sps:$4 sm:$0xff]   ;;  %v8875_v16 = vld [vmem:[%s13681_s1 + $0x84] ss:$16 sps:$4 sm:$0xff]   ;;  %v8877_v17 = vld [vmem:[%s13681_s1 + $0x8c] ss:$16 sps:$4 sm:$0xff]  }
   0x7   :  { %6288 = vmatpush1.bf16.msra.mxu0 %v8861_v6  ;;  %6944 = vmatpush1.bf16.msra.mxu1 %v8862_v7  ;;  %v8879_v18 = vld [vmem:[%s13681_s1 + $0x80] ss:$16 sps:$4 sm:$0xff]   ;;  %v8880_v19 = vld [vmem:[%s13681_s1 + $0x88] ss:$16 sps:$4 sm:$0xff]   ;;  %v8881_v20 = vld [vmem:[%s13681_s1 + $0xa4] ss:$16 sps:$4 sm:$0xff]  }
   0x8   :  { %6289 = vmatprep.subr.bf16.mxu0 %v8863_v8  ;;  %6945 = vmatprep.subr.bf16.mxu1 %v8865_v9  ;;  %v8883_v21 = vld [vmem:[%s13681_s1 + $0xac] ss:$16 sps:$4 sm:$0xff]   ;;  %v8885_v22 = vld [vmem:[%s13681_s1 + $0xa0] ss:$16 sps:$4 sm:$0xff]   ;;  %v8886_v23 = vld [vmem:[%s13681_s1 + $0xa8] ss:$16 sps:$4 sm:$0xff]  }
   0x9   :  { %v8887_v24 = vld [vmem:[%s13681_s1 + $0xc4] ss:$16 sps:$4 sm:$0xff]   ;;  %v8889_v25 = vld [vmem:[%s13681_s1 + $0xcc] ss:$16 sps:$4 sm:$0xff]   ;;  %v8891_v26 = vld [vmem:[%s13681_s1 + $0xc0] ss:$16 sps:$4 sm:$0xff]  }
   0xa   :  { %v8892_v27 = vld [vmem:[%s13681_s1 + $0xc8] ss:$16 sps:$4 sm:$0xff]   ;;  %v8893_v28 = vld [vmem:[%s13681_s1 + $0xe4] ss:$16 sps:$4 sm:$0xff]   ;;  %v8895_v29 = vld [vmem:[%s13681_s1 + $0xec] ss:$16 sps:$4 sm:$0xff]  }
   0xb   :  { %6290 = vmatpush1.bf16.msra.mxu0 %v8867_v10  ;;  %6946 = vmatpush1.bf16.msra.mxu1 %v8868_v11  ;;  %v8897_v30 = vld [vmem:[%s13681_s1 + $0xe0] ss:$16 sps:$4 sm:$0xff]   ;;  %v8898_v31 = vld [vmem:[%s13681_s1 + $0xe8] ss:$16 sps:$4 sm:$0xff]   ;;  %v8899_v32 = vld [vmem:[%s13681_s1 + $0x104] ss:$16 sps:$4 sm:$0xff]  }
   0xc   :  { %6291 = vmatprep.subr.bf16.mxu0 %v8869_v12  ;;  %6947 = vmatprep.subr.bf16.mxu1 %v8871_v13  ;;  %v8901_v33 = vld [vmem:[%s13681_s1 + $0x10c] ss:$16 sps:$4 sm:$0xff]   ;;  %v8903_v34 = vld [vmem:[%s13681_s1 + $0x100] ss:$16 sps:$4 sm:$0xff]   ;;  %v8904_v35 = vld [vmem:[%s13681_s1 + $0x108] ss:$16 sps:$4 sm:$0xff]  }
   0xd   :  { %v8905_v36 = vld [vmem:[%s13681_s1 + $0x124] ss:$16 sps:$4 sm:$0xff]   ;;  %v8907_v37 = vld [vmem:[%s13681_s1 + $0x12c] ss:$16 sps:$4 sm:$0xff]   ;;  %v8909_v38 = vld [vmem:[%s13681_s1 + $0x120] ss:$16 sps:$4 sm:$0xff]  }
   0xe   :  { %v8910_v39 = vld [vmem:[%s13681_s1 + $0x128] ss:$16 sps:$4 sm:$0xff]   ;;  %v8911_v40 = vld [vmem:[%s13681_s1 + $0x144] ss:$16 sps:$4 sm:$0xff]   ;;  %v8913_v41 = vld [vmem:[%s13681_s1 + $0x14c] ss:$16 sps:$4 sm:$0xff]  }
   0xf   :  { %6292 = vmatpush1.bf16.msra.mxu0 %v8873_v14  ;;  %6948 = vmatpush1.bf16.msra.mxu1 %v8874_v15  ;;  %v8915_v42 = vld [vmem:[%s13681_s1 + $0x140] ss:$16 sps:$4 sm:$0xff]   ;;  %v8916_v43 = vld [vmem:[%s13681_s1 + $0x148] ss:$16 sps:$4 sm:$0xff]   ;;  %v8917_v44 = vld [vmem:[%s13681_s1 + $0x164] ss:$16 sps:$4 sm:$0xff]  }
  0x10   :  { %6293 = vmatprep.subr.bf16.mxu0 %v8875_v16  ;;  %6949 = vmatprep.subr.bf16.mxu1 %v8877_v17  ;;  %v8919_v45 = vld [vmem:[%s13681_s1 + $0x16c] ss:$16 sps:$4 sm:$0xff]   ;;  %v13_v46 = vld [vmem:[%s13682_s0] sm:$0xff]  ;;  %v8922_v49 = vld [vmem:[%s13681_s1 + $0x168] ss:$16 sps:$4 sm:$0xff]  }
  0x11   :  { %v8921_v47 = vld [vmem:[%s13681_s1 + $0x160] ss:$16 sps:$4 sm:$0xff]   ;;  %v7676_v48 = vcombine.high %v13_v46, %v13_v46  ;;  %v8923_v50 = vld [vmem:[%s13681_s1 + $0x184] ss:$16 sps:$4 sm:$0xff]   ;;  %v8925_v51 = vld [vmem:[%s13681_s1 + $0x18c] ss:$16 sps:$4 sm:$0xff]   ;;  %v7675_v4 = vcombine.low %v13_v46, %v13_v46 }
  0x12   :  { %v8927_v52 = vld [vmem:[%s13681_s1 + $0x180] ss:$16 sps:$4 sm:$0xff]   ;;  %v8928_v53 = vld [vmem:[%s13681_s1 + $0x188] ss:$16 sps:$4 sm:$0xff]   ;;  %v8929_v54 = vld [vmem:[%s13681_s1 + $0x1a4] ss:$16 sps:$4 sm:$0xff]  }
  0x13   :  { %6294 = vmatpush1.bf16.msra.mxu0 %v8879_v18  ;;  %6950 = vmatpush1.bf16.msra.mxu1 %v8880_v19  ;;  %v8931_v55 = vld [vmem:[%s13681_s1 + $0x1ac] ss:$16 sps:$4 sm:$0xff]   ;;  %v8933_v56 = vld [vmem:[%s13681_s1 + $0x1a0] ss:$16 sps:$4 sm:$0xff]   ;;  %v8934_v57 = vld [vmem:[%s13681_s1 + $0x1a8] ss:$16 sps:$4 sm:$0xff]  }
  0x14   :  { %6295 = vmatprep.subr.bf16.mxu0 %v8881_v20  ;;  %6951 = vmatprep.subr.bf16.mxu1 %v8883_v21  ;;  %v8935_v58 = vld [vmem:[%s13681_s1 + $0x1c4] ss:$16 sps:$4 sm:$0xff]   ;;  %v8937_v59 = vld [vmem:[%s13681_s1 + $0x1cc] ss:$16 sps:$4 sm:$0xff]   ;;  %v8939_v60 = vld [vmem:[%s13681_s1 + $0x1c0] ss:$16 sps:$4 sm:$0xff]  }
  0x15   :  { %6317 = vmatprep.mubr.bf16.mxu0 %v7676_v48  ;;  %6973 = vmatprep.mubr.bf16.mxu1 %v7676_v48  ;;  %v8940_v61 = vld [vmem:[%s13681_s1 + $0x1c8] ss:$16 sps:$4 sm:$0xff]   ;;  %v8941_v62 = vld [vmem:[%s13681_s1 + $0x1e4] ss:$16 sps:$4 sm:$0xff]   ;;  %v8943_v63 = vld [vmem:[%s13681_s1 + $0x1ec] ss:$16 sps:$4 sm:$0xff]  }
  0x16   :  { %v8945_v0 = vld [vmem:[%s13681_s1 + $0x1e0] ss:$16 sps:$4 sm:$0xff]   ;;  %v8946_v1 = vld [vmem:[%s13681_s1 + $0x1e8] ss:$16 sps:$4 sm:$0xff]   ;;  %v8951_v2 = vld [vmem:[%s13681_s1 + $0x204] ss:$16 sps:$4 sm:$0xff]  }
  0x17   :  { %6296 = vmatpush1.bf16.msra.mxu0 %v8885_v22  ;;  %6952 = vmatpush1.bf16.msra.mxu1 %v8886_v23  ;;  %v8954_v3 = vld [vmem:[%s13681_s1 + $0x20c] ss:$16 sps:$4 sm:$0xff]   ;;  %v8949_v5 = vld [vmem:[%s13681_s1 + $0x200] ss:$16 sps:$4 sm:$0xff]   ;;  %v8952_v6 = vld [vmem:[%s13681_s1 + $0x208] ss:$16 sps:$4 sm:$0xff]  }
  0x18   :  { %6297 = vmatprep.subr.bf16.mxu0 %v8887_v24  ;;  %6953 = vmatprep.subr.bf16.mxu1 %v8889_v25  ;;  %v8957_v7 = vld [vmem:[%s13681_s1 + $0x224] ss:$16 sps:$4 sm:$0xff]   ;;  %v8960_v8 = vld [vmem:[%s13681_s1 + $0x22c] ss:$16 sps:$4 sm:$0xff]   ;;  %v8955_v9 = vld [vmem:[%s13681_s1 + $0x220] ss:$16 sps:$4 sm:$0xff]  }
  0x19   :  { %v8958_v10 = vld [vmem:[%s13681_s1 + $0x228] ss:$16 sps:$4 sm:$0xff]   ;;  %v8963_v11 = vld [vmem:[%s13681_s1 + $0x244] ss:$16 sps:$4 sm:$0xff]   ;;  %v8966_v12 = vld [vmem:[%s13681_s1 + $0x24c] ss:$16 sps:$4 sm:$0xff]  }
  0x1a   :  { %v8961_v13 = vld [vmem:[%s13681_s1 + $0x240] ss:$16 sps:$4 sm:$0xff]   ;;  %v8964_v14 = vld [vmem:[%s13681_s1 + $0x248] ss:$16 sps:$4 sm:$0xff]   ;;  %v8969_v15 = vld [vmem:[%s13681_s1 + $0x264] ss:$16 sps:$4 sm:$0xff]  }
  0x1b   :  { %6298 = vmatpush1.bf16.msra.mxu0 %v8891_v26  ;;  %6954 = vmatpush1.bf16.msra.mxu1 %v8892_v27  ;;  %v8972_v16 = vld [vmem:[%s13681_s1 + $0x26c] ss:$16 sps:$4 sm:$0xff]   ;;  %v8967_v17 = vld [vmem:[%s13681_s1 + $0x260] ss:$16 sps:$4 sm:$0xff]   ;;  %v8970_v18 = vld [vmem:[%s13681_s1 + $0x268] ss:$16 sps:$4 sm:$0xff]  }
  0x1c   :  { %6299 = vmatprep.subr.bf16.mxu0 %v8893_v28  ;;  %6955 = vmatprep.subr.bf16.mxu1 %v8895_v29  ;;  %v8975_v19 = vld [vmem:[%s13681_s1 + $0x284] ss:$16 sps:$4 sm:$0xff]   ;;  %v8978_v20 = vld [vmem:[%s13681_s1 + $0x28c] ss:$16 sps:$4 sm:$0xff]   ;;  %v8973_v21 = vld [vmem:[%s13681_s1 + $0x280] ss:$16 sps:$4 sm:$0xff]  }
  0x1d   :  { %v8976_v22 = vld [vmem:[%s13681_s1 + $0x288] ss:$16 sps:$4 sm:$0xff]   ;;  %v8981_v23 = vld [vmem:[%s13681_s1 + $0x2a4] ss:$16 sps:$4 sm:$0xff]   ;;  %v8984_v24 = vld [vmem:[%s13681_s1 + $0x2ac] ss:$16 sps:$4 sm:$0xff]  }
  0x1e   :  { %v8979_v25 = vld [vmem:[%s13681_s1 + $0x2a0] ss:$16 sps:$4 sm:$0xff]   ;;  %v8982_v26 = vld [vmem:[%s13681_s1 + $0x2a8] ss:$16 sps:$4 sm:$0xff]   ;;  %v8987_v27 = vld [vmem:[%s13681_s1 + $0x2c4] ss:$16 sps:$4 sm:$0xff]  }
  0x1f   :  { %6300 = vmatpush1.bf16.msra.mxu0 %v8897_v30  ;;  %6956 = vmatpush1.bf16.msra.mxu1 %v8898_v31  ;;  %v8990_v28 = vld [vmem:[%s13681_s1 + $0x2cc] ss:$16 sps:$4 sm:$0xff]   ;;  %v8985_v31 = vld [vmem:[%s13681_s1 + $0x2c0] ss:$16 sps:$4 sm:$0xff]   ;;  %v9012_v48 = vld [vmem:[%s13681_s1 + $0x348] ss:$16 sps:$4 sm:$0xff]  }
  0x20   :  { %6301 = vmatprep.subr.bf16.mxu0 %v8899_v32  ;;  %6957 = vmatprep.subr.bf16.mxu1 %v8901_v33  ;;  %v10715_v29 = vld [vmem:[%s13682_s0 + $0x8] sm:$0xff]  ;;  %v8993_v33 = vld [vmem:[%s13681_s1 + $0x2e4] ss:$16 sps:$4 sm:$0xff]  }
  0x21   :  { %v7678_v30 = vcombine.high %v10715_v29, %v10715_v29  ;;  %v8988_v32 = vld [vmem:[%s13681_s1 + $0x2c8] ss:$16 sps:$4 sm:$0xff]   ;;  %v9014_v46 = vld [vmem:[%s13681_s1 + $0x34c] ss:$16 sps:$4 sm:$0xff]  }
  0x23   :  { %6302 = vmatpush1.bf16.msra.mxu0 %v8903_v34  ;;  %6958 = vmatpush1.bf16.msra.mxu1 %v8904_v35  ;;  %v8996_v34 = vld [vmem:[%s13681_s1 + $0x2ec] ss:$16 sps:$4 sm:$0xff]   ;;  %v8991_v35 = vld [vmem:[%s13681_s1 + $0x2e0] ss:$16 sps:$4 sm:$0xff]  }
  0x24   :  { %6303 = vmatprep.subr.bf16.mxu0 %v8905_v36  ;;  %6959 = vmatprep.subr.bf16.mxu1 %v8907_v37  ;;  %v8994_v36 = vld [vmem:[%s13681_s1 + $0x2e8] ss:$16 sps:$4 sm:$0xff]   ;;  %v8999_v37 = vld [vmem:[%s13681_s1 + $0x304] ss:$16 sps:$4 sm:$0xff]  }
  0x27   :  { %6304 = vmatpush1.bf16.msra.mxu0 %v8909_v38  ;;  %6960 = vmatpush1.bf16.msra.mxu1 %v8910_v39  ;;  %v9002_v38 = vld [vmem:[%s13681_s1 + $0x30c] ss:$16 sps:$4 sm:$0xff]   ;;  %v8997_v39 = vld [vmem:[%s13681_s1 + $0x300] ss:$16 sps:$4 sm:$0xff]  }
  0x28   :  { %6305 = vmatprep.subr.bf16.mxu0 %v8911_v40  ;;  %6961 = vmatprep.subr.bf16.mxu1 %v8913_v41  ;;  %v9000_v40 = vld [vmem:[%s13681_s1 + $0x308] ss:$16 sps:$4 sm:$0xff]   ;;  %v9005_v41 = vld [vmem:[%s13681_s1 + $0x324] ss:$16 sps:$4 sm:$0xff]  }
  0x2b   :  { %6306 = vmatpush1.bf16.msra.mxu0 %v8915_v42  ;;  %6962 = vmatpush1.bf16.msra.mxu1 %v8916_v43  ;;  %v9008_v42 = vld [vmem:[%s13681_s1 + $0x32c] ss:$16 sps:$4 sm:$0xff]   ;;  %v9003_v43 = vld [vmem:[%s13681_s1 + $0x320] ss:$16 sps:$4 sm:$0xff]  }
  0x2c   :  { %6307 = vmatprep.subr.bf16.mxu0 %v8917_v44  ;;  %6963 = vmatprep.subr.bf16.mxu1 %v8919_v45  ;;  %v9006_v44 = vld [vmem:[%s13681_s1 + $0x328] ss:$16 sps:$4 sm:$0xff]   ;;  %v9011_v45 = vld [vmem:[%s13681_s1 + $0x344] ss:$16 sps:$4 sm:$0xff]  }
  0x2f   :  { %6308 = vmatpush1.bf16.msra.mxu0 %v8921_v47  ;;  %6964 = vmatpush1.bf16.msra.mxu1 %v8922_v49  ;;  %v9009_v47 = vld [vmem:[%s13681_s1 + $0x340] ss:$16 sps:$4 sm:$0xff]   ;;  %v9017_v49 = vld [vmem:[%s13681_s1 + $0x364] ss:$16 sps:$4 sm:$0xff]  }
  0x30   :  { %6309 = vmatprep.subr.bf16.mxu0 %v8923_v50  ;;  %6965 = vmatprep.subr.bf16.mxu1 %v8925_v51  ;;  %v9020_v50 = vld [vmem:[%s13681_s1 + $0x36c] ss:$16 sps:$4 sm:$0xff]   ;;  %v9015_v51 = vld [vmem:[%s13681_s1 + $0x360] ss:$16 sps:$4 sm:$0xff]  }
  0x33   :  { %6310 = vmatpush1.bf16.msra.mxu0 %v8927_v52  ;;  %6966 = vmatpush1.bf16.msra.mxu1 %v8928_v53  ;;  %v9018_v52 = vld [vmem:[%s13681_s1 + $0x368] ss:$16 sps:$4 sm:$0xff]   ;;  %v9023_v53 = vld [vmem:[%s13681_s1 + $0x384] ss:$16 sps:$4 sm:$0xff]  }
  0x34   :  { %6311 = vmatprep.subr.bf16.mxu0 %v8929_v54  ;;  %6967 = vmatprep.subr.bf16.mxu1 %v8931_v55  ;;  %v9026_v54 = vld [vmem:[%s13681_s1 + $0x38c] ss:$16 sps:$4 sm:$0xff]   ;;  %v9021_v55 = vld [vmem:[%s13681_s1 + $0x380] ss:$16 sps:$4 sm:$0xff]  }
  0x37   :  { %6312 = vmatpush1.bf16.msra.mxu0 %v8933_v56  ;;  %6968 = vmatpush1.bf16.msra.mxu1 %v8934_v57  ;;  %v9024_v56 = vld [vmem:[%s13681_s1 + $0x388] ss:$16 sps:$4 sm:$0xff]   ;;  %v9029_v57 = vld [vmem:[%s13681_s1 + $0x3a4] ss:$16 sps:$4 sm:$0xff]  }
  0x38   :  { %6313 = vmatprep.subr.bf16.mxu0 %v8935_v58  ;;  %6969 = vmatprep.subr.bf16.mxu1 %v8937_v59  ;;  %v9032_v58 = vld [vmem:[%s13681_s1 + $0x3ac] ss:$16 sps:$4 sm:$0xff]   ;;  %v9027_v59 = vld [vmem:[%s13681_s1 + $0x3a0] ss:$16 sps:$4 sm:$0xff]  }
  0x3b   :  { %6314 = vmatpush1.bf16.msra.mxu0 %v8939_v60  ;;  %6970 = vmatpush1.bf16.msra.mxu1 %v8940_v61  ;;  %v9030_v60 = vld [vmem:[%s13681_s1 + $0x3a8] ss:$16 sps:$4 sm:$0xff]   ;;  %v9035_v61 = vld [vmem:[%s13681_s1 + $0x3c4] ss:$16 sps:$4 sm:$0xff]  }
  0x3c   :  { %6315 = vmatprep.subr.bf16.mxu0 %v8941_v62  ;;  %6971 = vmatprep.subr.bf16.mxu1 %v8943_v63  ;;  %v9038_v62 = vld [vmem:[%s13681_s1 + $0x3cc] ss:$16 sps:$4 sm:$0xff]   ;;  %v9033_v63 = vld [vmem:[%s13681_s1 + $0x3c0] ss:$16 sps:$4 sm:$0xff]  }
  0x3f   :  { %6316 = vmatpush1.bf16.msra.mxu0 %v8945_v0  ;;  %6972 = vmatpush1.bf16.msra.mxu1 %v8946_v1  ;;  %v9036_v0 = vld [vmem:[%s13681_s1 + $0x3c8] ss:$16 sps:$4 sm:$0xff]   ;;  %v9041_v1 = vld [vmem:[%s13681_s1 + $0x3e4] ss:$16 sps:$4 sm:$0xff]  }
  0x40   :  { %6326 = vmatprep.subr.bf16.mxu0 %v8951_v2  ;;  %6982 = vmatprep.subr.bf16.mxu1 %v8954_v3  ;;  %v9044_v2 = vld [vmem:[%s13681_s1 + $0x3ec] ss:$16 sps:$4 sm:$0xff]   ;;  %v9039_v3 = vld [vmem:[%s13681_s1 + $0x3e0] ss:$16 sps:$4 sm:$0xff]  }
  0x42   :  { %6318 = vmatmul.mubr.bf16.vlgmr.msra.gmra.mrb[0].mxu0 %v7675_v4  ;;  %6974 = vmatmul.mubr.bf16.vlgmr.msra.gmra.mrb[0].mxu1 %v7675_v4  ;;  %v9042_v4 = vld [vmem:[%s13681_s1 + $0x3e8] ss:$16 sps:$4 sm:$0xff]  }
  0x43   :  { %6327 = vmatpush1.bf16.msra.mxu0 %v8949_v5  ;;  %6983 = vmatpush1.bf16.msra.mxu1 %v8952_v6  ;;  %v9049_v5 = vld [vmem:[%s13681_s1 + $0x404] ss:$16 sps:$4 sm:$0xff]   ;;  %v9052_v6 = vld [vmem:[%s13681_s1 + $0x40c] ss:$16 sps:$4 sm:$0xff]  }
  0x44   :  { %6328 = vmatprep.subr.bf16.mxu0 %v8957_v7  ;;  %6984 = vmatprep.subr.bf16.mxu1 %v8960_v8  ;;  %v7677_v7 = vcombine.low %v10715_v29, %v10715_v29  ;;  %v9047_v8 = vld [vmem:[%s13681_s1 + $0x400] ss:$16 sps:$4 sm:$0xff]   ;;  %v9082_v29 = vld [vmem:[%s13681_s1 + $0x4ac] ss:$16 sps:$4 sm:$0xff]  }
  0x45   :  { %6358 = vmatprep.mubr.bf16.mxu0 %v7678_v30  ;;  %7014 = vmatprep.mubr.bf16.mxu1 %v7678_v30  ;;  %v9077_v30 = vld [vmem:[%s13681_s1 + $0x4a0] ss:$16 sps:$4 sm:$0xff]  }
  0x47   :  { %6329 = vmatpush1.bf16.msra.mxu0 %v8955_v9  ;;  %6985 = vmatpush1.bf16.msra.mxu1 %v8958_v10  ;;  %v9050_v9 = vld [vmem:[%s13681_s1 + $0x408] ss:$16 sps:$4 sm:$0xff]   ;;  %v9055_v10 = vld [vmem:[%s13681_s1 + $0x424] ss:$16 sps:$4 sm:$0xff]  }
  0x48   :  { %6330 = vmatprep.subr.bf16.mxu0 %v8963_v11  ;;  %6986 = vmatprep.subr.bf16.mxu1 %v8966_v12  ;;  %v10853_v11 = vld [vmem:[%s13682_s0 + $0x10] sm:$0xff]  ;;  %v9058_v12 = vld [vmem:[%s13681_s1 + $0x42c] ss:$16 sps:$4 sm:$0xff]  }
  0x4b   :  { %6331 = vmatpush1.bf16.msra.mxu0 %v8961_v13  ;;  %6987 = vmatpush1.bf16.msra.mxu1 %v8964_v14  ;;  %v7680_v13 = vcombine.high %v10853_v11, %v10853_v11  ;;  %v9053_v14 = vld [vmem:[%s13681_s1 + $0x420] ss:$16 sps:$4 sm:$0xff]  }
  0x4c   :  { %6332 = vmatprep.subr.bf16.mxu0 %v8969_v15  ;;  %6988 = vmatprep.subr.bf16.mxu1 %v8972_v16  ;;  %v9056_v15 = vld [vmem:[%s13681_s1 + $0x428] ss:$16 sps:$4 sm:$0xff]   ;;  %v9061_v16 = vld [vmem:[%s13681_s1 + $0x444] ss:$16 sps:$4 sm:$0xff]  }
  0x4f   :  { %6333 = vmatpush1.bf16.msra.mxu0 %v8967_v17  ;;  %6989 = vmatpush1.bf16.msra.mxu1 %v8970_v18  ;;  %v9064_v17 = vld [vmem:[%s13681_s1 + $0x44c] ss:$16 sps:$4 sm:$0xff]   ;;  %v9059_v18 = vld [vmem:[%s13681_s1 + $0x440] ss:$16 sps:$4 sm:$0xff]  }
  0x50   :  { %6334 = vmatprep.subr.bf16.mxu0 %v8975_v19  ;;  %6990 = vmatprep.subr.bf16.mxu1 %v8978_v20  ;;  %v9062_v19 = vld [vmem:[%s13681_s1 + $0x448] ss:$16 sps:$4 sm:$0xff]   ;;  %v9067_v20 = vld [vmem:[%s13681_s1 + $0x464] ss:$16 sps:$4 sm:$0xff]  }
  0x53   :  { %6335 = vmatpush1.bf16.msra.mxu0 %v8973_v21  ;;  %6991 = vmatpush1.bf16.msra.mxu1 %v8976_v22  ;;  %v9070_v21 = vld [vmem:[%s13681_s1 + $0x46c] ss:$16 sps:$4 sm:$0xff]   ;;  %v9065_v22 = vld [vmem:[%s13681_s1 + $0x460] ss:$16 sps:$4 sm:$0xff]  }
  0x54   :  { %6336 = vmatprep.subr.bf16.mxu0 %v8981_v23  ;;  %6992 = vmatprep.subr.bf16.mxu1 %v8984_v24  ;;  %v9068_v23 = vld [vmem:[%s13681_s1 + $0x468] ss:$16 sps:$4 sm:$0xff]   ;;  %v9073_v24 = vld [vmem:[%s13681_s1 + $0x484] ss:$16 sps:$4 sm:$0xff]  }
  0x57   :  { %6337 = vmatpush1.bf16.msra.mxu0 %v8979_v25  ;;  %6993 = vmatpush1.bf16.msra.mxu1 %v8982_v26  ;;  %v9076_v25 = vld [vmem:[%s13681_s1 + $0x48c] ss:$16 sps:$4 sm:$0xff]   ;;  %v9071_v26 = vld [vmem:[%s13681_s1 + $0x480] ss:$16 sps:$4 sm:$0xff]  }
  0x58   :  { %6338 = vmatprep.subr.bf16.mxu0 %v8987_v27  ;;  %6994 = vmatprep.subr.bf16.mxu1 %v8990_v28  ;;  %v9074_v27 = vld [vmem:[%s13681_s1 + $0x488] ss:$16 sps:$4 sm:$0xff]   ;;  %v9079_v28 = vld [vmem:[%s13681_s1 + $0x4a4] ss:$16 sps:$4 sm:$0xff]  }
  0x5b   :  { %6339 = vmatpush1.bf16.msra.mxu0 %v8985_v31  ;;  %6995 = vmatpush1.bf16.msra.mxu1 %v8988_v32  ;;  %v9080_v31 = vld [vmem:[%s13681_s1 + $0x4a8] ss:$16 sps:$4 sm:$0xff]   ;;  %v9085_v32 = vld [vmem:[%s13681_s1 + $0x4c4] ss:$16 sps:$4 sm:$0xff]  }
  0x5c   :  { %6340 = vmatprep.subr.bf16.mxu0 %v8993_v33  ;;  %6996 = vmatprep.subr.bf16.mxu1 %v8996_v34  ;;  %v9088_v33 = vld [vmem:[%s13681_s1 + $0x4cc] ss:$16 sps:$4 sm:$0xff]   ;;  %v9083_v34 = vld [vmem:[%s13681_s1 + $0x4c0] ss:$16 sps:$4 sm:$0xff]  }
  0x5f   :  { %6341 = vmatpush1.bf16.msra.mxu0 %v8991_v35  ;;  %6997 = vmatpush1.bf16.msra.mxu1 %v8994_v36  ;;  %v9086_v35 = vld [vmem:[%s13681_s1 + $0x4c8] ss:$16 sps:$4 sm:$0xff]   ;;  %v9091_v36 = vld [vmem:[%s13681_s1 + $0x4e4] ss:$16 sps:$4 sm:$0xff]  }
  0x60   :  { %6342 = vmatprep.subr.bf16.mxu0 %v8999_v37  ;;  %6998 = vmatprep.subr.bf16.mxu1 %v9002_v38  ;;  %v9094_v37 = vld [vmem:[%s13681_s1 + $0x4ec] ss:$16 sps:$4 sm:$0xff]   ;;  %v9089_v38 = vld [vmem:[%s13681_s1 + $0x4e0] ss:$16 sps:$4 sm:$0xff]  }
  0x63   :  { %6343 = vmatpush1.bf16.msra.mxu0 %v8997_v39  ;;  %6999 = vmatpush1.bf16.msra.mxu1 %v9000_v40  ;;  %v9092_v39 = vld [vmem:[%s13681_s1 + $0x4e8] ss:$16 sps:$4 sm:$0xff]   ;;  %v9097_v40 = vld [vmem:[%s13681_s1 + $0x504] ss:$16 sps:$4 sm:$0xff]  }
  0x64   :  { %6344 = vmatprep.subr.bf16.mxu0 %v9005_v41  ;;  %7000 = vmatprep.subr.bf16.mxu1 %v9008_v42  ;;  %v9100_v41 = vld [vmem:[%s13681_s1 + $0x50c] ss:$16 sps:$4 sm:$0xff]   ;;  %v9095_v42 = vld [vmem:[%s13681_s1 + $0x500] ss:$16 sps:$4 sm:$0xff]  }
  0x67   :  { %6345 = vmatpush1.bf16.msra.mxu0 %v9003_v43  ;;  %7001 = vmatpush1.bf16.msra.mxu1 %v9006_v44  ;;  %v9098_v43 = vld [vmem:[%s13681_s1 + $0x508] ss:$16 sps:$4 sm:$0xff]   ;;  %v9103_v44 = vld [vmem:[%s13681_s1 + $0x524] ss:$16 sps:$4 sm:$0xff]  }
  0x68   :  { %6346 = vmatprep.subr.bf16.mxu0 %v9011_v45  ;;  %7002 = vmatprep.subr.bf16.mxu1 %v9014_v46  ;;  %v9106_v45 = vld [vmem:[%s13681_s1 + $0x52c] ss:$16 sps:$4 sm:$0xff]   ;;  %v9101_v46 = vld [vmem:[%s13681_s1 + $0x520] ss:$16 sps:$4 sm:$0xff]  }
  0x6b   :  { %6347 = vmatpush1.bf16.msra.mxu0 %v9009_v47  ;;  %7003 = vmatpush1.bf16.msra.mxu1 %v9012_v48  ;;  %v9104_v47 = vld [vmem:[%s13681_s1 + $0x528] ss:$16 sps:$4 sm:$0xff]   ;;  %v9109_v48 = vld [vmem:[%s13681_s1 + $0x544] ss:$16 sps:$4 sm:$0xff]  }
  0x6c   :  { %6348 = vmatprep.subr.bf16.mxu0 %v9017_v49  ;;  %7004 = vmatprep.subr.bf16.mxu1 %v9020_v50  ;;  %v9112_v49 = vld [vmem:[%s13681_s1 + $0x54c] ss:$16 sps:$4 sm:$0xff]   ;;  %v9107_v50 = vld [vmem:[%s13681_s1 + $0x540] ss:$16 sps:$4 sm:$0xff]  }
  0x6f   :  { %6349 = vmatpush1.bf16.msra.mxu0 %v9015_v51  ;;  %7005 = vmatpush1.bf16.msra.mxu1 %v9018_v52  ;;  %v9110_v51 = vld [vmem:[%s13681_s1 + $0x548] ss:$16 sps:$4 sm:$0xff]   ;;  %v9115_v52 = vld [vmem:[%s13681_s1 + $0x564] ss:$16 sps:$4 sm:$0xff]  }
  0x70   :  { %6350 = vmatprep.subr.bf16.mxu0 %v9023_v53  ;;  %7006 = vmatprep.subr.bf16.mxu1 %v9026_v54  ;;  %v9118_v53 = vld [vmem:[%s13681_s1 + $0x56c] ss:$16 sps:$4 sm:$0xff]   ;;  %v9113_v54 = vld [vmem:[%s13681_s1 + $0x560] ss:$16 sps:$4 sm:$0xff]  }
  0x73   :  { %6351 = vmatpush1.bf16.msra.mxu0 %v9021_v55  ;;  %7007 = vmatpush1.bf16.msra.mxu1 %v9024_v56  ;;  %v9116_v55 = vld [vmem:[%s13681_s1 + $0x568] ss:$16 sps:$4 sm:$0xff]   ;;  %v9121_v56 = vld [vmem:[%s13681_s1 + $0x584] ss:$16 sps:$4 sm:$0xff]  }
  0x74   :  { %6352 = vmatprep.subr.bf16.mxu0 %v9029_v57  ;;  %7008 = vmatprep.subr.bf16.mxu1 %v9032_v58  ;;  %v9124_v57 = vld [vmem:[%s13681_s1 + $0x58c] ss:$16 sps:$4 sm:$0xff]   ;;  %v9119_v58 = vld [vmem:[%s13681_s1 + $0x580] ss:$16 sps:$4 sm:$0xff]  }
  0x77   :  { %6353 = vmatpush1.bf16.msra.mxu0 %v9027_v59  ;;  %7009 = vmatpush1.bf16.msra.mxu1 %v9030_v60  ;;  %v9122_v59 = vld [vmem:[%s13681_s1 + $0x588] ss:$16 sps:$4 sm:$0xff]   ;;  %v9127_v60 = vld [vmem:[%s13681_s1 + $0x5a4] ss:$16 sps:$4 sm:$0xff]  }
  0x78   :  { %6354 = vmatprep.subr.bf16.mxu0 %v9035_v61  ;;  %7010 = vmatprep.subr.bf16.mxu1 %v9038_v62  ;;  %v9130_v61 = vld [vmem:[%s13681_s1 + $0x5ac] ss:$16 sps:$4 sm:$0xff]   ;;  %v9125_v62 = vld [vmem:[%s13681_s1 + $0x5a0] ss:$16 sps:$4 sm:$0xff]  }
  0x7b   :  { %6355 = vmatpush1.bf16.msra.mxu0 %v9033_v63  ;;  %7011 = vmatpush1.bf16.msra.mxu1 %v9036_v0  ;;  %v9128_v63 = vld [vmem:[%s13681_s1 + $0x5a8] ss:$16 sps:$4 sm:$0xff]   ;;  %v9133_v0 = vld [vmem:[%s13681_s1 + $0x5c4] ss:$16 sps:$4 sm:$0xff]  }
  0x7c   :  { %6356 = vmatprep.subr.bf16.mxu0 %v9041_v1  ;;  %7012 = vmatprep.subr.bf16.mxu1 %v9044_v2  ;;  %v9136_v1 = vld [vmem:[%s13681_s1 + $0x5cc] ss:$16 sps:$4 sm:$0xff]   ;;  %v9131_v2 = vld [vmem:[%s13681_s1 + $0x5c0] ss:$16 sps:$4 sm:$0xff]  }
  0x7f   :  { %6357 = vmatpush1.bf16.msra.mxu0 %v9039_v3  ;;  %7013 = vmatpush1.bf16.msra.mxu1 %v9042_v4  ;;  %v9134_v3 = vld [vmem:[%s13681_s1 + $0x5c8] ss:$16 sps:$4 sm:$0xff]   ;;  %v9139_v4 = vld [vmem:[%s13681_s1 + $0x5e4] ss:$16 sps:$4 sm:$0xff]  }
  0x80   :  { %6367 = vmatprep.subr.bf16.mxu0 %v9049_v5  ;;  %7023 = vmatprep.subr.bf16.mxu1 %v9052_v6  ;;  %v9142_v5 = vld [vmem:[%s13681_s1 + $0x5ec] ss:$16 sps:$4 sm:$0xff]   ;;  %v9137_v6 = vld [vmem:[%s13681_s1 + $0x5e0] ss:$16 sps:$4 sm:$0xff]  }
  0x82   :  { %6359 = vmatmul.mubr.bf16.vlgmr.msra.gmra.mrb[0].mxu0 %v7677_v7  ;;  %7015 = vmatmul.mubr.bf16.vlgmr.msra.gmra.mrb[0].mxu1 %v7677_v7  ;;  %v9140_v7 = vld [vmem:[%s13681_s1 + $0x5e8] ss:$16 sps:$4 sm:$0xff]  }
  0x83   :  { %6368 = vmatpush1.bf16.msra.mxu0 %v9047_v8  ;;  %7024 = vmatpush1.bf16.msra.mxu1 %v9050_v9  ;;  %v9147_v8 = vld [vmem:[%s13681_s1 + $0x604] ss:$16 sps:$4 sm:$0xff]   ;;  %v9150_v9 = vld [vmem:[%s13681_s1 + $0x60c] ss:$16 sps:$4 sm:$0xff]  }
  0x84   :  { %6369 = vmatprep.subr.bf16.mxu0 %v9055_v10  ;;  %7025 = vmatprep.subr.bf16.mxu1 %v9058_v12  ;;  %v9145_v10 = vld [vmem:[%s13681_s1 + $0x600] ss:$16 sps:$4 sm:$0xff]   ;;  %v7679_v12 = vcombine.low %v10853_v11, %v10853_v11  ;;  %v9156_v11 = vld [vmem:[%s13681_s1 + $0x62c] ss:$16 sps:$4 sm:$0xff]  }
  0x85   :  { %6399 = vmatprep.mubr.bf16.mxu0 %v7680_v13  ;;  %7055 = vmatprep.mubr.bf16.mxu1 %v7680_v13  ;;  %v9148_v13 = vld [vmem:[%s13681_s1 + $0x608] ss:$16 sps:$4 sm:$0xff]  }
  0x87   :  { %6370 = vmatpush1.bf16.msra.mxu0 %v9053_v14  ;;  %7026 = vmatpush1.bf16.msra.mxu1 %v9056_v15  ;;  %v11051_v14 = vld [vmem:[%s13682_s0 + $0x18] sm:$0xff]  ;;  %v9153_v15 = vld [vmem:[%s13681_s1 + $0x624] ss:$16 sps:$4 sm:$0xff]  }
  0x88   :  { %6371 = vmatprep.subr.bf16.mxu0 %v9061_v16  ;;  %7027 = vmatprep.subr.bf16.mxu1 %v9064_v17  ;;  %v7682_v16 = vcombine.high %v11051_v14, %v11051_v14  ;;  %v9151_v17 = vld [vmem:[%s13681_s1 + $0x620] ss:$16 sps:$4 sm:$0xff]  }
  0x8b   :  { %6372 = vmatpush1.bf16.msra.mxu0 %v9059_v18  ;;  %7028 = vmatpush1.bf16.msra.mxu1 %v9062_v19  ;;  %v9154_v18 = vld [vmem:[%s13681_s1 + $0x628] ss:$16 sps:$4 sm:$0xff]   ;;  %v9159_v19 = vld [vmem:[%s13681_s1 + $0x644] ss:$16 sps:$4 sm:$0xff]  }
  0x8c   :  { %6373 = vmatprep.subr.bf16.mxu0 %v9067_v20  ;;  %7029 = vmatprep.subr.bf16.mxu1 %v9070_v21  ;;  %v9162_v20 = vld [vmem:[%s13681_s1 + $0x64c] ss:$16 sps:$4 sm:$0xff]   ;;  %v9157_v21 = vld [vmem:[%s13681_s1 + $0x640] ss:$16 sps:$4 sm:$0xff]  }
  0x8f   :  { %6374 = vmatpush1.bf16.msra.mxu0 %v9065_v22  ;;  %7030 = vmatpush1.bf16.msra.mxu1 %v9068_v23  ;;  %v9160_v22 = vld [vmem:[%s13681_s1 + $0x648] ss:$16 sps:$4 sm:$0xff]   ;;  %v9165_v23 = vld [vmem:[%s13681_s1 + $0x664] ss:$16 sps:$4 sm:$0xff]  }
  0x90   :  { %6375 = vmatprep.subr.bf16.mxu0 %v9073_v24  ;;  %7031 = vmatprep.subr.bf16.mxu1 %v9076_v25  ;;  %v9168_v24 = vld [vmem:[%s13681_s1 + $0x66c] ss:$16 sps:$4 sm:$0xff]   ;;  %v9163_v25 = vld [vmem:[%s13681_s1 + $0x660] ss:$16 sps:$4 sm:$0xff]  }
  0x93   :  { %6376 = vmatpush1.bf16.msra.mxu0 %v9071_v26  ;;  %7032 = vmatpush1.bf16.msra.mxu1 %v9074_v27  ;;  %v9166_v26 = vld [vmem:[%s13681_s1 + $0x668] ss:$16 sps:$4 sm:$0xff]   ;;  %v9171_v27 = vld [vmem:[%s13681_s1 + $0x684] ss:$16 sps:$4 sm:$0xff]  }
  0x94   :  { %6377 = vmatprep.subr.bf16.mxu0 %v9079_v28  ;;  %7033 = vmatprep.subr.bf16.mxu1 %v9082_v29  ;;  %v9174_v28 = vld [vmem:[%s13681_s1 + $0x68c] ss:$16 sps:$4 sm:$0xff]   ;;  %v9169_v29 = vld [vmem:[%s13681_s1 + $0x680] ss:$16 sps:$4 sm:$0xff]  }
  0x97   :  { %6378 = vmatpush1.bf16.msra.mxu0 %v9077_v30  ;;  %7034 = vmatpush1.bf16.msra.mxu1 %v9080_v31  ;;  %v9172_v30 = vld [vmem:[%s13681_s1 + $0x688] ss:$16 sps:$4 sm:$0xff]   ;;  %v9177_v31 = vld [vmem:[%s13681_s1 + $0x6a4] ss:$16 sps:$4 sm:$0xff]  }
  0x98   :  { %6379 = vmatprep.subr.bf16.mxu0 %v9085_v32  ;;  %7035 = vmatprep.subr.bf16.mxu1 %v9088_v33  ;;  %v9180_v32 = vld [vmem:[%s13681_s1 + $0x6ac] ss:$16 sps:$4 sm:$0xff]   ;;  %v9175_v33 = vld [vmem:[%s13681_s1 + $0x6a0] ss:$16 sps:$4 sm:$0xff]  }
  0x9b   :  { %6380 = vmatpush1.bf16.msra.mxu0 %v9083_v34  ;;  %7036 = vmatpush1.bf16.msra.mxu1 %v9086_v35  ;;  %v9178_v34 = vld [vmem:[%s13681_s1 + $0x6a8] ss:$16 sps:$4 sm:$0xff]   ;;  %v9183_v35 = vld [vmem:[%s13681_s1 + $0x6c4] ss:$16 sps:$4 sm:$0xff]  }
  0x9c   :  { %6381 = vmatprep.subr.bf16.mxu0 %v9091_v36  ;;  %7037 = vmatprep.subr.bf16.mxu1 %v9094_v37  ;;  %v9186_v36 = vld [vmem:[%s13681_s1 + $0x6cc] ss:$16 sps:$4 sm:$0xff]   ;;  %v9181_v37 = vld [vmem:[%s13681_s1 + $0x6c0] ss:$16 sps:$4 sm:$0xff]  }
  0x9f   :  { %6382 = vmatpush1.bf16.msra.mxu0 %v9089_v38  ;;  %7038 = vmatpush1.bf16.msra.mxu1 %v9092_v39  ;;  %v9184_v38 = vld [vmem:[%s13681_s1 + $0x6c8] ss:$16 sps:$4 sm:$0xff]   ;;  %v9189_v39 = vld [vmem:[%s13681_s1 + $0x6e4] ss:$16 sps:$4 sm:$0xff]  }
  0xa0   :  { %6383 = vmatprep.subr.bf16.mxu0 %v9097_v40  ;;  %7039 = vmatprep.subr.bf16.mxu1 %v9100_v41  ;;  %v9192_v40 = vld [vmem:[%s13681_s1 + $0x6ec] ss:$16 sps:$4 sm:$0xff]   ;;  %v9187_v41 = vld [vmem:[%s13681_s1 + $0x6e0] ss:$16 sps:$4 sm:$0xff]  }
  0xa3   :  { %6384 = vmatpush1.bf16.msra.mxu0 %v9095_v42  ;;  %7040 = vmatpush1.bf16.msra.mxu1 %v9098_v43  ;;  %v9190_v42 = vld [vmem:[%s13681_s1 + $0x6e8] ss:$16 sps:$4 sm:$0xff]   ;;  %v9195_v43 = vld [vmem:[%s13681_s1 + $0x704] ss:$16 sps:$4 sm:$0xff]  }
  0xa4   :  { %6385 = vmatprep.subr.bf16.mxu0 %v9103_v44  ;;  %7041 = vmatprep.subr.bf16.mxu1 %v9106_v45  ;;  %v9198_v44 = vld [vmem:[%s13681_s1 + $0x70c] ss:$16 sps:$4 sm:$0xff]   ;;  %v9193_v45 = vld [vmem:[%s13681_s1 + $0x700] ss:$16 sps:$4 sm:$0xff]  }
  0xa7   :  { %6386 = vmatpush1.bf16.msra.mxu0 %v9101_v46  ;;  %7042 = vmatpush1.bf16.msra.mxu1 %v9104_v47  ;;  %v9196_v46 = vld [vmem:[%s13681_s1 + $0x708] ss:$16 sps:$4 sm:$0xff]   ;;  %v9201_v47 = vld [vmem:[%s13681_s1 + $0x724] ss:$16 sps:$4 sm:$0xff]  }
  0xa8   :  { %6387 = vmatprep.subr.bf16.mxu0 %v9109_v48  ;;  %7043 = vmatprep.subr.bf16.mxu1 %v9112_v49  ;;  %v9204_v48 = vld [vmem:[%s13681_s1 + $0x72c] ss:$16 sps:$4 sm:$0xff]   ;;  %v9199_v49 = vld [vmem:[%s13681_s1 + $0x720] ss:$16 sps:$4 sm:$0xff]  }
  0xab   :  { %6388 = vmatpush1.bf16.msra.mxu0 %v9107_v50  ;;  %7044 = vmatpush1.bf16.msra.mxu1 %v9110_v51  ;;  %v9202_v50 = vld [vmem:[%s13681_s1 + $0x728] ss:$16 sps:$4 sm:$0xff]   ;;  %v9207_v51 = vld [vmem:[%s13681_s1 + $0x744] ss:$16 sps:$4 sm:$0xff]  }
  0xac   :  { %6389 = vmatprep.subr.bf16.mxu0 %v9115_v52  ;;  %7045 = vmatprep.subr.bf16.mxu1 %v9118_v53  ;;  %v9210_v52 = vld [vmem:[%s13681_s1 + $0x74c] ss:$16 sps:$4 sm:$0xff]   ;;  %v9205_v53 = vld [vmem:[%s13681_s1 + $0x740] ss:$16 sps:$4 sm:$0xff]  }
  0xaf   :  { %6390 = vmatpush1.bf16.msra.mxu0 %v9113_v54  ;;  %7046 = vmatpush1.bf16.msra.mxu1 %v9116_v55  ;;  %v9208_v54 = vld [vmem:[%s13681_s1 + $0x748] ss:$16 sps:$4 sm:$0xff]   ;;  %v9213_v55 = vld [vmem:[%s13681_s1 + $0x764] ss:$16 sps:$4 sm:$0xff]  }
  0xb0   :  { %6391 = vmatprep.subr.bf16.mxu0 %v9121_v56  ;;  %7047 = vmatprep.subr.bf16.mxu1 %v9124_v57  ;;  %v9216_v56 = vld [vmem:[%s13681_s1 + $0x76c] ss:$16 sps:$4 sm:$0xff]   ;;  %v9211_v57 = vld [vmem:[%s13681_s1 + $0x760] ss:$16 sps:$4 sm:$0xff]  }
  0xb3   :  { %6392 = vmatpush1.bf16.msra.mxu0 %v9119_v58  ;;  %7048 = vmatpush1.bf16.msra.mxu1 %v9122_v59  ;;  %v9214_v58 = vld [vmem:[%s13681_s1 + $0x768] ss:$16 sps:$4 sm:$0xff]   ;;  %v9219_v59 = vld [vmem:[%s13681_s1 + $0x784] ss:$16 sps:$4 sm:$0xff]  }
  0xb4   :  { %6393 = vmatprep.subr.bf16.mxu0 %v9127_v60  ;;  %7049 = vmatprep.subr.bf16.mxu1 %v9130_v61  ;;  %v9222_v60 = vld [vmem:[%s13681_s1 + $0x78c] ss:$16 sps:$4 sm:$0xff]   ;;  %v9217_v61 = vld [vmem:[%s13681_s1 + $0x780] ss:$16 sps:$4 sm:$0xff]  }
  0xb7   :  { %6394 = vmatpush1.bf16.msra.mxu0 %v9125_v62  ;;  %7050 = vmatpush1.bf16.msra.mxu1 %v9128_v63  ;;  %v9220_v62 = vld [vmem:[%s13681_s1 + $0x788] ss:$16 sps:$4 sm:$0xff]   ;;  %v9225_v63 = vld [vmem:[%s13681_s1 + $0x7a4] ss:$16 sps:$4 sm:$0xff]  }
  0xb8   :  { %6395 = vmatprep.subr.bf16.mxu0 %v9133_v0  ;;  %7051 = vmatprep.subr.bf16.mxu1 %v9136_v1  ;;  %v9228_v0 = vld [vmem:[%s13681_s1 + $0x7ac] ss:$16 sps:$4 sm:$0xff]   ;;  %v9223_v1 = vld [vmem:[%s13681_s1 + $0x7a0] ss:$16 sps:$4 sm:$0xff]  }
  0xbb   :  { %6396 = vmatpush1.bf16.msra.mxu0 %v9131_v2  ;;  %7052 = vmatpush1.bf16.msra.mxu1 %v9134_v3  ;;  %v9226_v2 = vld [vmem:[%s13681_s1 + $0x7a8] ss:$16 sps:$4 sm:$0xff]   ;;  %v9231_v3 = vld [vmem:[%s13681_s1 + $0x7c4] ss:$16 sps:$4 sm:$0xff]  }
  0xbc   :  { %6397 = vmatprep.subr.bf16.mxu0 %v9139_v4  ;;  %7053 = vmatprep.subr.bf16.mxu1 %v9142_v5  ;;  %v9234_v4 = vld [vmem:[%s13681_s1 + $0x7cc] ss:$16 sps:$4 sm:$0xff]   ;;  %v9229_v5 = vld [vmem:[%s13681_s1 + $0x7c0] ss:$16 sps:$4 sm:$0xff]  }
  0xbf   :  { %6398 = vmatpush1.bf16.msra.mxu0 %v9137_v6  ;;  %7054 = vmatpush1.bf16.msra.mxu1 %v9140_v7  ;;  %v9232_v6 = vld [vmem:[%s13681_s1 + $0x7c8] ss:$16 sps:$4 sm:$0xff]   ;;  %v9237_v7 = vld [vmem:[%s13681_s1 + $0x7e4] ss:$16 sps:$4 sm:$0xff]  }
  0xc0   :  { %6408 = vmatprep.subr.bf16.mxu0 %v9147_v8  ;;  %7064 = vmatprep.subr.bf16.mxu1 %v9150_v9  ;;  %v9240_v8 = vld [vmem:[%s13681_s1 + $0x7ec] ss:$16 sps:$4 sm:$0xff]   ;;  %v9235_v9 = vld [vmem:[%s13681_s1 + $0x7e0] ss:$16 sps:$4 sm:$0xff]  }
  0xc2   :  { %6400 = vmatmul.mubr.bf16.vlgmr.msra.gmra.mrb[0].mxu0 %v7679_v12  ;;  %7056 = vmatmul.mubr.bf16.vlgmr.msra.gmra.mrb[0].mxu1 %v7679_v12  ;;  %v9245_v12 = vld [vmem:[%s13681_s1 + $0x804] ss:$16 sps:$4 sm:$0xff]  }
  0xc3   :  { %6409 = vmatpush1.bf16.msra.mxu0 %v9145_v10  ;;  %7065 = vmatpush1.bf16.msra.mxu1 %v9148_v13  ;;  %v9238_v10 = vld [vmem:[%s13681_s1 + $0x7e8] ss:$16 sps:$4 sm:$0xff]   ;;  %v9248_v13 = vld [vmem:[%s13681_s1 + $0x80c] ss:$16 sps:$4 sm:$0xff]  }
  0xc4   :  { %6410 = vmatprep.subr.bf16.mxu0 %v9153_v15  ;;  %7066 = vmatprep.subr.bf16.mxu1 %v9156_v11  ;;  %v9243_v15 = vld [vmem:[%s13681_s1 + $0x800] ss:$16 sps:$4 sm:$0xff]   ;;  %v7681_v11 = vcombine.low %v11051_v14, %v11051_v14  ;;  %v9254_v14 = vld [vmem:[%s13681_s1 + $0x82c] ss:$16 sps:$4 sm:$0xff]  }
  0xc5   :  { %6440 = vmatprep.mubr.bf16.mxu0 %v7682_v16  ;;  %7096 = vmatprep.mubr.bf16.mxu1 %v7682_v16  ;;  %v11249_v16 = vld [vmem:[%s13682_s0 + $0x20] sm:$0xff] }
  0xc7   :  { %6411 = vmatpush1.bf16.msra.mxu0 %v9151_v17  ;;  %7067 = vmatpush1.bf16.msra.mxu1 %v9154_v18  ;;  %v9246_v17 = vld [vmem:[%s13681_s1 + $0x808] ss:$16 sps:$4 sm:$0xff]   ;;  %v9251_v18 = vld [vmem:[%s13681_s1 + $0x824] ss:$16 sps:$4 sm:$0xff]  }
  0xc8   :  { %6412 = vmatprep.subr.bf16.mxu0 %v9159_v19  ;;  %7068 = vmatprep.subr.bf16.mxu1 %v9162_v20  ;;  %v7684_v19 = vcombine.high %v11249_v16, %v11249_v16  ;;  %v9249_v20 = vld [vmem:[%s13681_s1 + $0x820] ss:$16 sps:$4 sm:$0xff]  }
  0xcb   :  { %6413 = vmatpush1.bf16.msra.mxu0 %v9157_v21  ;;  %7069 = vmatpush1.bf16.msra.mxu1 %v9160_v22  ;;  %v9252_v21 = vld [vmem:[%s13681_s1 + $0x828] ss:$16 sps:$4 sm:$0xff]   ;;  %v9257_v22 = vld [vmem:[%s13681_s1 + $0x844] ss:$16 sps:$4 sm:$0xff]  }
  0xcc   :  { %6414 = vmatprep.subr.bf16.mxu0 %v9165_v23  ;;  %7070 = vmatprep.subr.bf16.mxu1 %v9168_v24  ;;  %v9260_v23 = vld [vmem:[%s13681_s1 + $0x84c] ss:$16 sps:$4 sm:$0xff]   ;;  %v9255_v24 = vld [vmem:[%s13681_s1 + $0x840] ss:$16 sps:$4 sm:$0xff]  }
  0xcf   :  { %6415 = vmatpush1.bf16.msra.mxu0 %v9163_v25  ;;  %7071 = vmatpush1.bf16.msra.mxu1 %v9166_v26  ;;  %v9258_v25 = vld [vmem:[%s13681_s1 + $0x848] ss:$16 sps:$4 sm:$0xff]   ;;  %v9263_v26 = vld [vmem:[%s13681_s1 + $0x864] ss:$16 sps:$4 sm:$0xff]  }
  0xd0   :  { %6416 = vmatprep.subr.bf16.mxu0 %v9171_v27  ;;  %7072 = vmatprep.subr.bf16.mxu1 %v9174_v28  ;;  %v9266_v27 = vld [vmem:[%s13681_s1 + $0x86c] ss:$16 sps:$4 sm:$0xff]   ;;  %v9261_v28 = vld [vmem:[%s13681_s1 + $0x860] ss:$16 sps:$4 sm:$0xff]  }
  0xd3   :  { %6417 = vmatpush1.bf16.msra.mxu0 %v9169_v29  ;;  %7073 = vmatpush1.bf16.msra.mxu1 %v9172_v30  ;;  %v9264_v29 = vld [vmem:[%s13681_s1 + $0x868] ss:$16 sps:$4 sm:$0xff]   ;;  %v9269_v30 = vld [vmem:[%s13681_s1 + $0x884] ss:$16 sps:$4 sm:$0xff]  }
  0xd4   :  { %6418 = vmatprep.subr.bf16.mxu0 %v9177_v31  ;;  %7074 = vmatprep.subr.bf16.mxu1 %v9180_v32  ;;  %v9272_v31 = vld [vmem:[%s13681_s1 + $0x88c] ss:$16 sps:$4 sm:$0xff]   ;;  %v9267_v32 = vld [vmem:[%s13681_s1 + $0x880] ss:$16 sps:$4 sm:$0xff]  }
  0xd7   :  { %6419 = vmatpush1.bf16.msra.mxu0 %v9175_v33  ;;  %7075 = vmatpush1.bf16.msra.mxu1 %v9178_v34  ;;  %v9270_v33 = vld [vmem:[%s13681_s1 + $0x888] ss:$16 sps:$4 sm:$0xff]   ;;  %v9275_v34 = vld [vmem:[%s13681_s1 + $0x8a4] ss:$16 sps:$4 sm:$0xff]  }
  0xd8   :  { %6420 = vmatprep.subr.bf16.mxu0 %v9183_v35  ;;  %7076 = vmatprep.subr.bf16.mxu1 %v9186_v36  ;;  %v9278_v35 = vld [vmem:[%s13681_s1 + $0x8ac] ss:$16 sps:$4 sm:$0xff]   ;;  %v9273_v36 = vld [vmem:[%s13681_s1 + $0x8a0] ss:$16 sps:$4 sm:$0xff]  }
  0xdb   :  { %6421 = vmatpush1.bf16.msra.mxu0 %v9181_v37  ;;  %7077 = vmatpush1.bf16.msra.mxu1 %v9184_v38  ;;  %v9276_v37 = vld [vmem:[%s13681_s1 + $0x8a8] ss:$16 sps:$4 sm:$0xff]   ;;  %v9281_v38 = vld [vmem:[%s13681_s1 + $0x8c4] ss:$16 sps:$4 sm:$0xff]  }
  0xdc   :  { %6422 = vmatprep.subr.bf16.mxu0 %v9189_v39  ;;  %7078 = vmatprep.subr.bf16.mxu1 %v9192_v40  ;;  %v9284_v39 = vld [vmem:[%s13681_s1 + $0x8cc] ss:$16 sps:$4 sm:$0xff]   ;;  %v9279_v40 = vld [vmem:[%s13681_s1 + $0x8c0] ss:$16 sps:$4 sm:$0xff]  }
  0xdf   :  { %6423 = vmatpush1.bf16.msra.mxu0 %v9187_v41  ;;  %7079 = vmatpush1.bf16.msra.mxu1 %v9190_v42  ;;  %v9282_v41 = vld [vmem:[%s13681_s1 + $0x8c8] ss:$16 sps:$4 sm:$0xff]   ;;  %v9287_v42 = vld [vmem:[%s13681_s1 + $0x8e4] ss:$16 sps:$4 sm:$0xff]  }
  0xe0   :  { %6424 = vmatprep.subr.bf16.mxu0 %v9195_v43  ;;  %7080 = vmatprep.subr.bf16.mxu1 %v9198_v44  ;;  %v9290_v43 = vld [vmem:[%s13681_s1 + $0x8ec] ss:$16 sps:$4 sm:$0xff]   ;;  %v9285_v44 = vld [vmem:[%s13681_s1 + $0x8e0] ss:$16 sps:$4 sm:$0xff]  }
  0xe3   :  { %6425 = vmatpush1.bf16.msra.mxu0 %v9193_v45  ;;  %7081 = vmatpush1.bf16.msra.mxu1 %v9196_v46  ;;  %v9288_v45 = vld [vmem:[%s13681_s1 + $0x8e8] ss:$16 sps:$4 sm:$0xff]   ;;  %v9293_v46 = vld [vmem:[%s13681_s1 + $0x904] ss:$16 sps:$4 sm:$0xff]  }
  0xe4   :  { %6426 = vmatprep.subr.bf16.mxu0 %v9201_v47  ;;  %7082 = vmatprep.subr.bf16.mxu1 %v9204_v48  ;;  %v9296_v47 = vld [vmem:[%s13681_s1 + $0x90c] ss:$16 sps:$4 sm:$0xff]   ;;  %v9291_v48 = vld [vmem:[%s13681_s1 + $0x900] ss:$16 sps:$4 sm:$0xff]  }
  0xe7   :  { %6427 = vmatpush1.bf16.msra.mxu0 %v9199_v49  ;;  %7083 = vmatpush1.bf16.msra.mxu1 %v9202_v50  ;;  %v9294_v49 = vld [vmem:[%s13681_s1 + $0x908] ss:$16 sps:$4 sm:$0xff]   ;;  %v9299_v50 = vld [vmem:[%s13681_s1 + $0x924] ss:$16 sps:$4 sm:$0xff]  }
  0xe8   :  { %6428 = vmatprep.subr.bf16.mxu0 %v9207_v51  ;;  %7084 = vmatprep.subr.bf16.mxu1 %v9210_v52  ;;  %v9302_v51 = vld [vmem:[%s13681_s1 + $0x92c] ss:$16 sps:$4 sm:$0xff]   ;;  %v9297_v52 = vld [vmem:[%s13681_s1 + $0x920] ss:$16 sps:$4 sm:$0xff]  }
  0xeb   :  { %6429 = vmatpush1.bf16.msra.mxu0 %v9205_v53  ;;  %7085 = vmatpush1.bf16.msra.mxu1 %v9208_v54  ;;  %v9300_v53 = vld [vmem:[%s13681_s1 + $0x928] ss:$16 sps:$4 sm:$0xff]   ;;  %v9305_v54 = vld [vmem:[%s13681_s1 + $0x944] ss:$16 sps:$4 sm:$0xff]  }
  0xec   :  { %6430 = vmatprep.subr.bf16.mxu0 %v9213_v55  ;;  %7086 = vmatprep.subr.bf16.mxu1 %v9216_v56  ;;  %v9308_v55 = vld [vmem:[%s13681_s1 + $0x94c] ss:$16 sps:$4 sm:$0xff]   ;;  %v9303_v56 = vld [vmem:[%s13681_s1 + $0x940] ss:$16 sps:$4 sm:$0xff]  }
  0xef   :  { %6431 = vmatpush1.bf16.msra.mxu0 %v9211_v57  ;;  %7087 = vmatpush1.bf16.msra.mxu1 %v9214_v58  ;;  %v9306_v57 = vld [vmem:[%s13681_s1 + $0x948] ss:$16 sps:$4 sm:$0xff]   ;;  %v9311_v58 = vld [vmem:[%s13681_s1 + $0x964] ss:$16 sps:$4 sm:$0xff]  }
  0xf0   :  { %6432 = vmatprep.subr.bf16.mxu0 %v9219_v59  ;;  %7088 = vmatprep.subr.bf16.mxu1 %v9222_v60  ;;  %v9314_v59 = vld [vmem:[%s13681_s1 + $0x96c] ss:$16 sps:$4 sm:$0xff]   ;;  %v9309_v60 = vld [vmem:[%s13681_s1 + $0x960] ss:$16 sps:$4 sm:$0xff]  }
  0xf3   :  { %6433 = vmatpush1.bf16.msra.mxu0 %v9217_v61  ;;  %7089 = vmatpush1.bf16.msra.mxu1 %v9220_v62  ;;  %v9312_v61 = vld [vmem:[%s13681_s1 + $0x968] ss:$16 sps:$4 sm:$0xff]   ;;  %v9317_v62 = vld [vmem:[%s13681_s1 + $0x984] ss:$16 sps:$4 sm:$0xff]  }
  0xf4   :  { %6434 = vmatprep.subr.bf16.mxu0 %v9225_v63  ;;  %7090 = vmatprep.subr.bf16.mxu1 %v9228_v0  ;;  %v9320_v63 = vld [vmem:[%s13681_s1 + $0x98c] ss:$16 sps:$4 sm:$0xff]   ;;  %v9315_v0 = vld [vmem:[%s13681_s1 + $0x980] ss:$16 sps:$4 sm:$0xff]  }
  0xf7   :  { %6435 = vmatpush1.bf16.msra.mxu0 %v9223_v1  ;;  %7091 = vmatpush1.bf16.msra.mxu1 %v9226_v2  ;;  %v9318_v1 = vld [vmem:[%s13681_s1 + $0x988] ss:$16 sps:$4 sm:$0xff]   ;;  %v9323_v2 = vld [vmem:[%s13681_s1 + $0x9a4] ss:$16 sps:$4 sm:$0xff]  }
  0xf8   :  { %6436 = vmatprep.subr.bf16.mxu0 %v9231_v3  ;;  %7092 = vmatprep.subr.bf16.mxu1 %v9234_v4  ;;  %v9326_v3 = vld [vmem:[%s13681_s1 + $0x9ac] ss:$16 sps:$4 sm:$0xff]   ;;  %v9321_v4 = vld [vmem:[%s13681_s1 + $0x9a0] ss:$16 sps:$4 sm:$0xff]  }
  0xfb   :  { %6437 = vmatpush1.bf16.msra.mxu0 %v9229_v5  ;;  %7093 = vmatpush1.bf16.msra.mxu1 %v9232_v6  ;;  %v9324_v5 = vld [vmem:[%s13681_s1 + $0x9a8] ss:$16 sps:$4 sm:$0xff]   ;;  %v9329_v6 = vld [vmem:[%s13681_s1 + $0x9c4] ss:$16 sps:$4 sm:$0xff]  }
  0xfc   :  { %6438 = vmatprep.subr.bf16.mxu0 %v9237_v7  ;;  %7094 = vmatprep.subr.bf16.mxu1 %v9240_v8  ;;  %v9332_v7 = vld [vmem:[%s13681_s1 + $0x9cc] ss:$16 sps:$4 sm:$0xff]   ;;  %v9327_v8 = vld [vmem:[%s13681_s1 + $0x9c0] ss:$16 sps:$4 sm:$0xff]  }
  0xff   :  { %6439 = vmatpush1.bf16.msra.mxu0 %v9235_v9  ;;  %7095 = vmatpush1.bf16.msra.mxu1 %v9238_v10  ;;  %v9330_v9 = vld [vmem:[%s13681_s1 + $0x9c8] ss:$16 sps:$4 sm:$0xff]   ;;  %v9335_v10 = vld [vmem:[%s13681_s1 + $0x9e4] ss:$16 sps:$4 sm:$0xff]  }
 0x100   :  { %6449 = vmatprep.subr.bf16.mxu0 %v9245_v12  ;;  %7105 = vmatprep.subr.bf16.mxu1 %v9248_v13  ;;  %v9338_v12 = vld [vmem:[%s13681_s1 + $0x9ec] ss:$16 sps:$4 sm:$0xff]   ;;  %v9333_v13 = vld [vmem:[%s13681_s1 + $0x9e0] ss:$16 sps:$4 sm:$0xff]  }
 0x102   :  { %6441 = vmatmul.mubr.bf16.vlgmr.msra.gmra.mrb[0].mxu0 %v7681_v11  ;;  %7097 = vmatmul.mubr.bf16.vlgmr.msra.gmra.mrb[0].mxu1 %v7681_v11  ;;  %v9343_v11 = vld [vmem:[%s13681_s1 + $0xa04] ss:$16 sps:$4 sm:$0xff]  }
 0x103   :  { %6450 = vmatpush1.bf16.msra.mxu0 %v9243_v15  ;;  %7106 = vmatpush1.bf16.msra.mxu1 %v9246_v17  ;;  %v9336_v15 = vld [vmem:[%s13681_s1 + $0x9e8] ss:$16 sps:$4 sm:$0xff]   ;;  %v9346_v17 = vld [vmem:[%s13681_s1 + $0xa0c] ss:$16 sps:$4 sm:$0xff]  }
 0x104   :  { %6451 = vmatprep.subr.bf16.mxu0 %v9251_v18  ;;  %7107 = vmatprep.subr.bf16.mxu1 %v9254_v14  ;;  %v11445_v18 = vld [vmem:[%s13682_s0 + $0x28] sm:$0xff]  ;;  %v7683_v14 = vcombine.low %v11249_v16, %v11249_v16 }
 0x105   :  { %6481 = vmatprep.mubr.bf16.mxu0 %v7684_v19  ;;  %7137 = vmatprep.mubr.bf16.mxu1 %v7684_v19  ;;  %v9341_v19 = vld [vmem:[%s13681_s1 + $0xa00] ss:$16 sps:$4 sm:$0xff]   ;;  %v9352_v16 = vld [vmem:[%s13681_s1 + $0xa2c] ss:$16 sps:$4 sm:$0xff]  }
 0x107   :  { %6452 = vmatpush1.bf16.msra.mxu0 %v9249_v20  ;;  %7108 = vmatpush1.bf16.msra.mxu1 %v9252_v21  ;;  %v9344_v20 = vld [vmem:[%s13681_s1 + $0xa08] ss:$16 sps:$4 sm:$0xff]   ;;  %v9349_v21 = vld [vmem:[%s13681_s1 + $0xa24] ss:$16 sps:$4 sm:$0xff]  }
 0x108   :  { %6453 = vmatprep.subr.bf16.mxu0 %v9257_v22  ;;  %7109 = vmatprep.subr.bf16.mxu1 %v9260_v23  ;;  %v7686_v22 = vcombine.high %v11445_v18, %v11445_v18  ;;  %v9347_v23 = vld [vmem:[%s13681_s1 + $0xa20] ss:$16 sps:$4 sm:$0xff]  }
 0x10b   :  { %6454 = vmatpush1.bf16.msra.mxu0 %v9255_v24  ;;  %7110 = vmatpush1.bf16.msra.mxu1 %v9258_v25  ;;  %v9350_v24 = vld [vmem:[%s13681_s1 + $0xa28] ss:$16 sps:$4 sm:$0xff]   ;;  %v9355_v25 = vld [vmem:[%s13681_s1 + $0xa44] ss:$16 sps:$4 sm:$0xff]  }
 0x10c   :  { %6455 = vmatprep.subr.bf16.mxu0 %v9263_v26  ;;  %7111 = vmatprep.subr.bf16.mxu1 %v9266_v27  ;;  %v9358_v26 = vld [vmem:[%s13681_s1 + $0xa4c] ss:$16 sps:$4 sm:$0xff]   ;;  %v9353_v27 = vld [vmem:[%s13681_s1 + $0xa40] ss:$16 sps:$4 sm:$0xff]  }
 0x10f   :  { %6456 = vmatpush1.bf16.msra.mxu0 %v9261_v28  ;;  %7112 = vmatpush1.bf16.msra.mxu1 %v9264_v29  ;;  %v9356_v28 = vld [vmem:[%s13681_s1 + $0xa48] ss:$16 sps:$4 sm:$0xff]   ;;  %v9361_v29 = vld [vmem:[%s13681_s1 + $0xa64] ss:$16 sps:$4 sm:$0xff]  }
 0x110   :  { %6457 = vmatprep.subr.bf16.mxu0 %v9269_v30  ;;  %7113 = vmatprep.subr.bf16.mxu1 %v9272_v31  ;;  %v9364_v30 = vld [vmem:[%s13681_s1 + $0xa6c] ss:$16 sps:$4 sm:$0xff]   ;;  %v9359_v31 = vld [vmem:[%s13681_s1 + $0xa60] ss:$16 sps:$4 sm:$0xff]  }
 0x113   :  { %6458 = vmatpush1.bf16.msra.mxu0 %v9267_v32  ;;  %7114 = vmatpush1.bf16.msra.mxu1 %v9270_v33  ;;  %v9362_v32 = vld [vmem:[%s13681_s1 + $0xa68] ss:$16 sps:$4 sm:$0xff]   ;;  %v9367_v33 = vld [vmem:[%s13681_s1 + $0xa84] ss:$16 sps:$4 sm:$0xff]  }
 0x114   :  { %6459 = vmatprep.subr.bf16.mxu0 %v9275_v34  ;;  %7115 = vmatprep.subr.bf16.mxu1 %v9278_v35  ;;  %v9370_v34 = vld [vmem:[%s13681_s1 + $0xa8c] ss:$16 sps:$4 sm:$0xff]   ;;  %v9365_v35 = vld [vmem:[%s13681_s1 + $0xa80] ss:$16 sps:$4 sm:$0xff]  }
 0x117   :  { %6460 = vmatpush1.bf16.msra.mxu0 %v9273_v36  ;;  %7116 = vmatpush1.bf16.msra.mxu1 %v9276_v37  ;;  %v9368_v36 = vld [vmem:[%s13681_s1 + $0xa88] ss:$16 sps:$4 sm:$0xff]   ;;  %v9373_v37 = vld [vmem:[%s13681_s1 + $0xaa4] ss:$16 sps:$4 sm:$0xff]  }
 0x118   :  { %6461 = vmatprep.subr.bf16.mxu0 %v9281_v38  ;;  %7117 = vmatprep.subr.bf16.mxu1 %v9284_v39  ;;  %v9376_v38 = vld [vmem:[%s13681_s1 + $0xaac] ss:$16 sps:$4 sm:$0xff]   ;;  %v9371_v39 = vld [vmem:[%s13681_s1 + $0xaa0] ss:$16 sps:$4 sm:$0xff]  }
 0x11b   :  { %6462 = vmatpush1.bf16.msra.mxu0 %v9279_v40  ;;  %7118 = vmatpush1.bf16.msra.mxu1 %v9282_v41  ;;  %v9374_v40 = vld [vmem:[%s13681_s1 + $0xaa8] ss:$16 sps:$4 sm:$0xff]   ;;  %v9379_v41 = vld [vmem:[%s13681_s1 + $0xac4] ss:$16 sps:$4 sm:$0xff]  }
 0x11c   :  { %6463 = vmatprep.subr.bf16.mxu0 %v9287_v42  ;;  %7119 = vmatprep.subr.bf16.mxu1 %v9290_v43  ;;  %v9382_v42 = vld [vmem:[%s13681_s1 + $0xacc] ss:$16 sps:$4 sm:$0xff]   ;;  %v9377_v43 = vld [vmem:[%s13681_s1 + $0xac0] ss:$16 sps:$4 sm:$0xff]  }
 0x11f   :  { %6464 = vmatpush1.bf16.msra.mxu0 %v9285_v44  ;;  %7120 = vmatpush1.bf16.msra.mxu1 %v9288_v45  ;;  %v9380_v44 = vld [vmem:[%s13681_s1 + $0xac8] ss:$16 sps:$4 sm:$0xff]   ;;  %v9385_v45 = vld [vmem:[%s13681_s1 + $0xae4] ss:$16 sps:$4 sm:$0xff]  }
 0x120   :  { %6465 = vmatprep.subr.bf16.mxu0 %v9293_v46  ;;  %7121 = vmatprep.subr.bf16.mxu1 %v9296_v47  ;;  %v9388_v46 = vld [vmem:[%s13681_s1 + $0xaec] ss:$16 sps:$4 sm:$0xff]   ;;  %v9383_v47 = vld [vmem:[%s13681_s1 + $0xae0] ss:$16 sps:$4 sm:$0xff]  }
 0x123   :  { %6466 = vmatpush1.bf16.msra.mxu0 %v9291_v48  ;;  %7122 = vmatpush1.bf16.msra.mxu1 %v9294_v49  ;;  %v9386_v48 = vld [vmem:[%s13681_s1 + $0xae8] ss:$16 sps:$4 sm:$0xff]   ;;  %v9391_v49 = vld [vmem:[%s13681_s1 + $0xb04] ss:$16 sps:$4 sm:$0xff]  }
 0x124   :  { %6467 = vmatprep.subr.bf16.mxu0 %v9299_v50  ;;  %7123 = vmatprep.subr.bf16.mxu1 %v9302_v51  ;;  %v9394_v50 = vld [vmem:[%s13681_s1 + $0xb0c] ss:$16 sps:$4 sm:$0xff]   ;;  %v9389_v51 = vld [vmem:[%s13681_s1 + $0xb00] ss:$16 sps:$4 sm:$0xff]  }
 0x127   :  { %6468 = vmatpush1.bf16.msra.mxu0 %v9297_v52  ;;  %7124 = vmatpush1.bf16.msra.mxu1 %v9300_v53  ;;  %v9392_v52 = vld [vmem:[%s13681_s1 + $0xb08] ss:$16 sps:$4 sm:$0xff]   ;;  %v9397_v53 = vld [vmem:[%s13681_s1 + $0xb24] ss:$16 sps:$4 sm:$0xff]  }
 0x128   :  { %6469 = vmatprep.subr.bf16.mxu0 %v9305_v54  ;;  %7125 = vmatprep.subr.bf16.mxu1 %v9308_v55  ;;  %v9400_v54 = vld [vmem:[%s13681_s1 + $0xb2c] ss:$16 sps:$4 sm:$0xff]   ;;  %v9395_v55 = vld [vmem:[%s13681_s1 + $0xb20] ss:$16 sps:$4 sm:$0xff]  }
 0x12b   :  { %6470 = vmatpush1.bf16.msra.mxu0 %v9303_v56  ;;  %7126 = vmatpush1.bf16.msra.mxu1 %v9306_v57  ;;  %v9398_v56 = vld [vmem:[%s13681_s1 + $0xb28] ss:$16 sps:$4 sm:$0xff]   ;;  %v9403_v57 = vld [vmem:[%s13681_s1 + $0xb44] ss:$16 sps:$4 sm:$0xff]  }
 0x12c   :  { %6471 = vmatprep.subr.bf16.mxu0 %v9311_v58  ;;  %7127 = vmatprep.subr.bf16.mxu1 %v9314_v59  ;;  %v9406_v58 = vld [vmem:[%s13681_s1 + $0xb4c] ss:$16 sps:$4 sm:$0xff]   ;;  %v9401_v59 = vld [vmem:[%s13681_s1 + $0xb40] ss:$16 sps:$4 sm:$0xff]  }
 0x12f   :  { %6472 = vmatpush1.bf16.msra.mxu0 %v9309_v60  ;;  %7128 = vmatpush1.bf16.msra.mxu1 %v9312_v61  ;;  %v9404_v60 = vld [vmem:[%s13681_s1 + $0xb48] ss:$16 sps:$4 sm:$0xff]   ;;  %v9409_v61 = vld [vmem:[%s13681_s1 + $0xb64] ss:$16 sps:$4 sm:$0xff]  }
 0x130   :  { %6473 = vmatprep.subr.bf16.mxu0 %v9317_v62  ;;  %7129 = vmatprep.subr.bf16.mxu1 %v9320_v63  ;;  %v9412_v62 = vld [vmem:[%s13681_s1 + $0xb6c] ss:$16 sps:$4 sm:$0xff]   ;;  %v9407_v63 = vld [vmem:[%s13681_s1 + $0xb60] ss:$16 sps:$4 sm:$0xff]  }
 0x133   :  { %6474 = vmatpush1.bf16.msra.mxu0 %v9315_v0  ;;  %7130 = vmatpush1.bf16.msra.mxu1 %v9318_v1  ;;  %v9410_v0 = vld [vmem:[%s13681_s1 + $0xb68] ss:$16 sps:$4 sm:$0xff]   ;;  %v9415_v1 = vld [vmem:[%s13681_s1 + $0xb84] ss:$16 sps:$4 sm:$0xff]  }
 0x134   :  { %6475 = vmatprep.subr.bf16.mxu0 %v9323_v2  ;;  %7131 = vmatprep.subr.bf16.mxu1 %v9326_v3  ;;  %v9418_v2 = vld [vmem:[%s13681_s1 + $0xb8c] ss:$16 sps:$4 sm:$0xff]   ;;  %v9413_v3 = vld [vmem:[%s13681_s1 + $0xb80] ss:$16 sps:$4 sm:$0xff]  }
 0x137   :  { %6476 = vmatpush1.bf16.msra.mxu0 %v9321_v4  ;;  %7132 = vmatpush1.bf16.msra.mxu1 %v9324_v5  ;;  %v9416_v4 = vld [vmem:[%s13681_s1 + $0xb88] ss:$16 sps:$4 sm:$0xff]   ;;  %v9421_v5 = vld [vmem:[%s13681_s1 + $0xba4] ss:$16 sps:$4 sm:$0xff]  }
 0x138   :  { %6477 = vmatprep.subr.bf16.mxu0 %v9329_v6  ;;  %7133 = vmatprep.subr.bf16.mxu1 %v9332_v7  ;;  %v9424_v6 = vld [vmem:[%s13681_s1 + $0xbac] ss:$16 sps:$4 sm:$0xff]   ;;  %v9419_v7 = vld [vmem:[%s13681_s1 + $0xba0] ss:$16 sps:$4 sm:$0xff]  }
 0x13b   :  { %6478 = vmatpush1.bf16.msra.mxu0 %v9327_v8  ;;  %7134 = vmatpush1.bf16.msra.mxu1 %v9330_v9  ;;  %v9422_v8 = vld [vmem:[%s13681_s1 + $0xba8] ss:$16 sps:$4 sm:$0xff]   ;;  %v9427_v9 = vld [vmem:[%s13681_s1 + $0xbc4] ss:$16 sps:$4 sm:$0xff]  }
 0x13c   :  { %6479 = vmatprep.subr.bf16.mxu0 %v9335_v10  ;;  %7135 = vmatprep.subr.bf16.mxu1 %v9338_v12  ;;  %v9430_v10 = vld [vmem:[%s13681_s1 + $0xbcc] ss:$16 sps:$4 sm:$0xff]   ;;  %v9425_v12 = vld [vmem:[%s13681_s1 + $0xbc0] ss:$16 sps:$4 sm:$0xff]  }
 0x13f   :  { %6480 = vmatpush1.bf16.msra.mxu0 %v9333_v13  ;;  %7136 = vmatpush1.bf16.msra.mxu1 %v9336_v15  ;;  %v9428_v13 = vld [vmem:[%s13681_s1 + $0xbc8] ss:$16 sps:$4 sm:$0xff]   ;;  %v9433_v15 = vld [vmem:[%s13681_s1 + $0xbe4] ss:$16 sps:$4 sm:$0xff]  }
 0x140   :  { %6490 = vmatprep.subr.bf16.mxu0 %v9343_v11  ;;  %7146 = vmatprep.subr.bf16.mxu1 %v9346_v17  ;;  %v9436_v11 = vld [vmem:[%s13681_s1 + $0xbec] ss:$16 sps:$4 sm:$0xff]   ;;  %v9431_v17 = vld [vmem:[%s13681_s1 + $0xbe0] ss:$16 sps:$4 sm:$0xff]  }
 0x142   :  { %6482 = vmatmul.mubr.bf16.vlgmr.msra.gmra.mrb[0].mxu0 %v7683_v14  ;;  %7138 = vmatmul.mubr.bf16.vlgmr.msra.gmra.mrb[0].mxu1 %v7683_v14  ;;  %v9434_v14 = vld [vmem:[%s13681_s1 + $0xbe8] ss:$16 sps:$4 sm:$0xff]  }
 0x143   :  { %6491 = vmatpush1.bf16.msra.mxu0 %v9341_v19  ;;  %7147 = vmatpush1.bf16.msra.mxu1 %v9344_v20  ;;  %v9441_v19 = vld [vmem:[%s13681_s1 + $0xc04] ss:$16 sps:$4 sm:$0xff]   ;;  %v9444_v20 = vld [vmem:[%s13681_s1 + $0xc0c] ss:$16 sps:$4 sm:$0xff]  }
 0x144   :  { %6492 = vmatprep.subr.bf16.mxu0 %v9349_v21  ;;  %7148 = vmatprep.subr.bf16.mxu1 %v9352_v16  ;;  %v11646_v21 = vld [vmem:[%s13682_s0 + $0x30] sm:$0xff]  ;;  %v7685_v16 = vcombine.low %v11445_v18, %v11445_v18  ;;  %v9450_v18 = vld [vmem:[%s13681_s1 + $0xc2c] ss:$16 sps:$4 sm:$0xff]  }
 0x145   :  { %6522 = vmatprep.mubr.bf16.mxu0 %v7686_v22  ;;  %7178 = vmatprep.mubr.bf16.mxu1 %v7686_v22  ;;  %v9439_v22 = vld [vmem:[%s13681_s1 + $0xc00] ss:$16 sps:$4 sm:$0xff]  }
 0x147   :  { %6493 = vmatpush1.bf16.msra.mxu0 %v9347_v23  ;;  %7149 = vmatpush1.bf16.msra.mxu1 %v9350_v24  ;;  %v9442_v23 = vld [vmem:[%s13681_s1 + $0xc08] ss:$16 sps:$4 sm:$0xff]   ;;  %v9447_v24 = vld [vmem:[%s13681_s1 + $0xc24] ss:$16 sps:$4 sm:$0xff]  }
 0x148   :  { %6494 = vmatprep.subr.bf16.mxu0 %v9355_v25  ;;  %7150 = vmatprep.subr.bf16.mxu1 %v9358_v26  ;;  %v7688_v25 = vcombine.high %v11646_v21, %v11646_v21  ;;  %v9445_v26 = vld [vmem:[%s13681_s1 + $0xc20] ss:$16 sps:$4 sm:$0xff]  }
 0x14b   :  { %6495 = vmatpush1.bf16.msra.mxu0 %v9353_v27  ;;  %7151 = vmatpush1.bf16.msra.mxu1 %v9356_v28  ;;  %v9448_v27 = vld [vmem:[%s13681_s1 + $0xc28] ss:$16 sps:$4 sm:$0xff]   ;;  %v9453_v28 = vld [vmem:[%s13681_s1 + $0xc44] ss:$16 sps:$4 sm:$0xff]  }
 0x14c   :  { %6496 = vmatprep.subr.bf16.mxu0 %v9361_v29  ;;  %7152 = vmatprep.subr.bf16.mxu1 %v9364_v30  ;;  %v9456_v29 = vld [vmem:[%s13681_s1 + $0xc4c] ss:$16 sps:$4 sm:$0xff]   ;;  %v9451_v30 = vld [vmem:[%s13681_s1 + $0xc40] ss:$16 sps:$4 sm:$0xff]  }
 0x14f   :  { %6497 = vmatpush1.bf16.msra.mxu0 %v9359_v31  ;;  %7153 = vmatpush1.bf16.msra.mxu1 %v9362_v32  ;;  %v9454_v31 = vld [vmem:[%s13681_s1 + $0xc48] ss:$16 sps:$4 sm:$0xff]   ;;  %v9459_v32 = vld [vmem:[%s13681_s1 + $0xc64] ss:$16 sps:$4 sm:$0xff]  }
 0x150   :  { %6498 = vmatprep.subr.bf16.mxu0 %v9367_v33  ;;  %7154 = vmatprep.subr.bf16.mxu1 %v9370_v34  ;;  %v9462_v33 = vld [vmem:[%s13681_s1 + $0xc6c] ss:$16 sps:$4 sm:$0xff]   ;;  %v9457_v34 = vld [vmem:[%s13681_s1 + $0xc60] ss:$16 sps:$4 sm:$0xff]  }
 0x153   :  { %6499 = vmatpush1.bf16.msra.mxu0 %v9365_v35  ;;  %7155 = vmatpush1.bf16.msra.mxu1 %v9368_v36  ;;  %v9460_v35 = vld [vmem:[%s13681_s1 + $0xc68] ss:$16 sps:$4 sm:$0xff]   ;;  %v9465_v36 = vld [vmem:[%s13681_s1 + $0xc84] ss:$16 sps:$4 sm:$0xff]  }
 0x154   :  { %6500 = vmatprep.subr.bf16.mxu0 %v9373_v37  ;;  %7156 = vmatprep.subr.bf16.mxu1 %v9376_v38  ;;  %v9468_v37 = vld [vmem:[%s13681_s1 + $0xc8c] ss:$16 sps:$4 sm:$0xff]   ;;  %v9463_v38 = vld [vmem:[%s13681_s1 + $0xc80] ss:$16 sps:$4 sm:$0xff]  }
 0x157   :  { %6501 = vmatpush1.bf16.msra.mxu0 %v9371_v39  ;;  %7157 = vmatpush1.bf16.msra.mxu1 %v9374_v40  ;;  %v9466_v39 = vld [vmem:[%s13681_s1 + $0xc88] ss:$16 sps:$4 sm:$0xff]   ;;  %v9471_v40 = vld [vmem:[%s13681_s1 + $0xca4] ss:$16 sps:$4 sm:$0xff]  }
 0x158   :  { %6502 = vmatprep.subr.bf16.mxu0 %v9379_v41  ;;  %7158 = vmatprep.subr.bf16.mxu1 %v9382_v42  ;;  %v9474_v41 = vld [vmem:[%s13681_s1 + $0xcac] ss:$16 sps:$4 sm:$0xff]   ;;  %v9469_v42 = vld [vmem:[%s13681_s1 + $0xca0] ss:$16 sps:$4 sm:$0xff]  }
 0x15b   :  { %6503 = vmatpush1.bf16.msra.mxu0 %v9377_v43  ;;  %7159 = vmatpush1.bf16.msra.mxu1 %v9380_v44  ;;  %v9472_v43 = vld [vmem:[%s13681_s1 + $0xca8] ss:$16 sps:$4 sm:$0xff]   ;;  %v9477_v44 = vld [vmem:[%s13681_s1 + $0xcc4] ss:$16 sps:$4 sm:$0xff]  }
 0x15c   :  { %6504 = vmatprep.subr.bf16.mxu0 %v9385_v45  ;;  %7160 = vmatprep.subr.bf16.mxu1 %v9388_v46  ;;  %v9480_v45 = vld [vmem:[%s13681_s1 + $0xccc] ss:$16 sps:$4 sm:$0xff]   ;;  %v9475_v46 = vld [vmem:[%s13681_s1 + $0xcc0] ss:$16 sps:$4 sm:$0xff]  }
 0x15f   :  { %6505 = vmatpush1.bf16.msra.mxu0 %v9383_v47  ;;  %7161 = vmatpush1.bf16.msra.mxu1 %v9386_v48  ;;  %v9478_v47 = vld [vmem:[%s13681_s1 + $0xcc8] ss:$16 sps:$4 sm:$0xff]   ;;  %v9483_v48 = vld [vmem:[%s13681_s1 + $0xce4] ss:$16 sps:$4 sm:$0xff]  }
 0x160   :  { %6506 = vmatprep.subr.bf16.mxu0 %v9391_v49  ;;  %7162 = vmatprep.subr.bf16.mxu1 %v9394_v50  ;;  %v9486_v49 = vld [vmem:[%s13681_s1 + $0xcec] ss:$16 sps:$4 sm:$0xff]   ;;  %v9481_v50 = vld [vmem:[%s13681_s1 + $0xce0] ss:$16 sps:$4 sm:$0xff]  }
 0x163   :  { %6507 = vmatpush1.bf16.msra.mxu0 %v9389_v51  ;;  %7163 = vmatpush1.bf16.msra.mxu1 %v9392_v52  ;;  %v9484_v51 = vld [vmem:[%s13681_s1 + $0xce8] ss:$16 sps:$4 sm:$0xff]   ;;  %v9489_v52 = vld [vmem:[%s13681_s1 + $0xd04] ss:$16 sps:$4 sm:$0xff]  }
 0x164   :  { %6508 = vmatprep.subr.bf16.mxu0 %v9397_v53  ;;  %7164 = vmatprep.subr.bf16.mxu1 %v9400_v54  ;;  %v9492_v53 = vld [vmem:[%s13681_s1 + $0xd0c] ss:$16 sps:$4 sm:$0xff]   ;;  %v9487_v54 = vld [vmem:[%s13681_s1 + $0xd00] ss:$16 sps:$4 sm:$0xff]  }
 0x167   :  { %6509 = vmatpush1.bf16.msra.mxu0 %v9395_v55  ;;  %7165 = vmatpush1.bf16.msra.mxu1 %v9398_v56  ;;  %v9490_v55 = vld [vmem:[%s13681_s1 + $0xd08] ss:$16 sps:$4 sm:$0xff]   ;;  %v9495_v56 = vld [vmem:[%s13681_s1 + $0xd24] ss:$16 sps:$4 sm:$0xff]  }
 0x168   :  { %6510 = vmatprep.subr.bf16.mxu0 %v9403_v57  ;;  %7166 = vmatprep.subr.bf16.mxu1 %v9406_v58  ;;  %v9498_v57 = vld [vmem:[%s13681_s1 + $0xd2c] ss:$16 sps:$4 sm:$0xff]   ;;  %v9493_v58 = vld [vmem:[%s13681_s1 + $0xd20] ss:$16 sps:$4 sm:$0xff]  }
 0x16b   :  { %6511 = vmatpush1.bf16.msra.mxu0 %v9401_v59  ;;  %7167 = vmatpush1.bf16.msra.mxu1 %v9404_v60  ;;  %v9496_v59 = vld [vmem:[%s13681_s1 + $0xd28] ss:$16 sps:$4 sm:$0xff]   ;;  %v9501_v60 = vld [vmem:[%s13681_s1 + $0xd44] ss:$16 sps:$4 sm:$0xff]  }
 0x16c   :  { %6512 = vmatprep.subr.bf16.mxu0 %v9409_v61  ;;  %7168 = vmatprep.subr.bf16.mxu1 %v9412_v62  ;;  %v9504_v61 = vld [vmem:[%s13681_s1 + $0xd4c] ss:$16 sps:$4 sm:$0xff]   ;;  %v9499_v62 = vld [vmem:[%s13681_s1 + $0xd40] ss:$16 sps:$4 sm:$0xff]  }
 0x16f   :  { %6513 = vmatpush1.bf16.msra.mxu0 %v9407_v63  ;;  %7169 = vmatpush1.bf16.msra.mxu1 %v9410_v0  ;;  %v9502_v63 = vld [vmem:[%s13681_s1 + $0xd48] ss:$16 sps:$4 sm:$0xff]   ;;  %v9507_v0 = vld [vmem:[%s13681_s1 + $0xd64] ss:$16 sps:$4 sm:$0xff]  }
 0x170   :  { %6514 = vmatprep.subr.bf16.mxu0 %v9415_v1  ;;  %7170 = vmatprep.subr.bf16.mxu1 %v9418_v2  ;;  %v9510_v1 = vld [vmem:[%s13681_s1 + $0xd6c] ss:$16 sps:$4 sm:$0xff]   ;;  %v9505_v2 = vld [vmem:[%s13681_s1 + $0xd60] ss:$16 sps:$4 sm:$0xff]  }
 0x173   :  { %6515 = vmatpush1.bf16.msra.mxu0 %v9413_v3  ;;  %7171 = vmatpush1.bf16.msra.mxu1 %v9416_v4  ;;  %v9508_v3 = vld [vmem:[%s13681_s1 + $0xd68] ss:$16 sps:$4 sm:$0xff]   ;;  %v9513_v4 = vld [vmem:[%s13681_s1 + $0xd84] ss:$16 sps:$4 sm:$0xff]  }
 0x174   :  { %6516 = vmatprep.subr.bf16.mxu0 %v9421_v5  ;;  %7172 = vmatprep.subr.bf16.mxu1 %v9424_v6  ;;  %v9516_v5 = vld [vmem:[%s13681_s1 + $0xd8c] ss:$16 sps:$4 sm:$0xff]   ;;  %v9511_v6 = vld [vmem:[%s13681_s1 + $0xd80] ss:$16 sps:$4 sm:$0xff]  }
 0x177   :  { %6517 = vmatpush1.bf16.msra.mxu0 %v9419_v7  ;;  %7173 = vmatpush1.bf16.msra.mxu1 %v9422_v8  ;;  %v9514_v7 = vld [vmem:[%s13681_s1 + $0xd88] ss:$16 sps:$4 sm:$0xff]   ;;  %v9519_v8 = vld [vmem:[%s13681_s1 + $0xda4] ss:$16 sps:$4 sm:$0xff]  }
 0x178   :  { %6518 = vmatprep.subr.bf16.mxu0 %v9427_v9  ;;  %7174 = vmatprep.subr.bf16.mxu1 %v9430_v10  ;;  %v9522_v9 = vld [vmem:[%s13681_s1 + $0xdac] ss:$16 sps:$4 sm:$0xff]   ;;  %v9517_v10 = vld [vmem:[%s13681_s1 + $0xda0] ss:$16 sps:$4 sm:$0xff]  }
 0x17b   :  { %6519 = vmatpush1.bf16.msra.mxu0 %v9425_v12  ;;  %7175 = vmatpush1.bf16.msra.mxu1 %v9428_v13  ;;  %v9520_v12 = vld [vmem:[%s13681_s1 + $0xda8] ss:$16 sps:$4 sm:$0xff]   ;;  %v9525_v13 = vld [vmem:[%s13681_s1 + $0xdc4] ss:$16 sps:$4 sm:$0xff]  }
 0x17c   :  { %6520 = vmatprep.subr.bf16.mxu0 %v9433_v15  ;;  %7176 = vmatprep.subr.bf16.mxu1 %v9436_v11  ;;  %v9528_v15 = vld [vmem:[%s13681_s1 + $0xdcc] ss:$16 sps:$4 sm:$0xff]   ;;  %v9523_v11 = vld [vmem:[%s13681_s1 + $0xdc0] ss:$16 sps:$4 sm:$0xff]  }
 0x17f   :  { %6521 = vmatpush1.bf16.msra.mxu0 %v9431_v17  ;;  %7177 = vmatpush1.bf16.msra.mxu1 %v9434_v14  ;;  %v9526_v17 = vld [vmem:[%s13681_s1 + $0xdc8] ss:$16 sps:$4 sm:$0xff]   ;;  %v9531_v14 = vld [vmem:[%s13681_s1 + $0xde4] ss:$16 sps:$4 sm:$0xff]  }
 0x180   :  { %6531 = vmatprep.subr.bf16.mxu0 %v9441_v19  ;;  %7187 = vmatprep.subr.bf16.mxu1 %v9444_v20  ;;  %v9534_v19 = vld [vmem:[%s13681_s1 + $0xdec] ss:$16 sps:$4 sm:$0xff]   ;;  %v9529_v20 = vld [vmem:[%s13681_s1 + $0xde0] ss:$16 sps:$4 sm:$0xff]  }
 0x182   :  { %6523 = vmatmul.mubr.bf16.vlgmr.msra.gmra.mrb[0].mxu0 %v7685_v16  ;;  %7179 = vmatmul.mubr.bf16.vlgmr.msra.gmra.mrb[0].mxu1 %v7685_v16  ;;  %v9532_v16 = vld [vmem:[%s13681_s1 + $0xde8] ss:$16 sps:$4 sm:$0xff]  }
 0x183   :  { %6532 = vmatpush1.bf16.msra.mxu0 %v9439_v22  ;;  %7188 = vmatpush1.bf16.msra.mxu1 %v9442_v23  ;;  %v9539_v22 = vld [vmem:[%s13681_s1 + $0xe04] ss:$16 sps:$4 sm:$0xff]   ;;  %v9542_v23 = vld [vmem:[%s13681_s1 + $0xe0c] ss:$16 sps:$4 sm:$0xff]  }
 0x184   :  { %6533 = vmatprep.subr.bf16.mxu0 %v9447_v24  ;;  %7189 = vmatprep.subr.bf16.mxu1 %v9450_v18  ;;  %v11847_v24 = vld [vmem:[%s13682_s0 + $0x38] sm:$0xff]  ;;  %v7687_v18 = vcombine.low %v11646_v21, %v11646_v21 }
 0x185   :  { %6563 = vmatprep.mubr.bf16.mxu0 %v7688_v25  ;;  %7219 = vmatprep.mubr.bf16.mxu1 %v7688_v25  ;;  %v9537_v25 = vld [vmem:[%s13681_s1 + $0xe00] ss:$16 sps:$4 sm:$0xff]   ;;  %v9548_v21 = vld [vmem:[%s13681_s1 + $0xe2c] ss:$16 sps:$4 sm:$0xff]  }
 0x187   :  { %6534 = vmatpush1.bf16.msra.mxu0 %v9445_v26  ;;  %7190 = vmatpush1.bf16.msra.mxu1 %v9448_v27  ;;  %v9540_v26 = vld [vmem:[%s13681_s1 + $0xe08] ss:$16 sps:$4 sm:$0xff]   ;;  %v9545_v27 = vld [vmem:[%s13681_s1 + $0xe24] ss:$16 sps:$4 sm:$0xff]  }
 0x188   :  { %6535 = vmatprep.subr.bf16.mxu0 %v9453_v28  ;;  %7191 = vmatprep.subr.bf16.mxu1 %v9456_v29  ;;  %v7690_v28 = vcombine.high %v11847_v24, %v11847_v24  ;;  %v9543_v29 = vld [vmem:[%s13681_s1 + $0xe20] ss:$16 sps:$4 sm:$0xff]  }
 0x18b   :  { %6536 = vmatpush1.bf16.msra.mxu0 %v9451_v30  ;;  %7192 = vmatpush1.bf16.msra.mxu1 %v9454_v31  ;;  %v9546_v30 = vld [vmem:[%s13681_s1 + $0xe28] ss:$16 sps:$4 sm:$0xff]   ;;  %v9551_v31 = vld [vmem:[%s13681_s1 + $0xe44] ss:$16 sps:$4 sm:$0xff]  }
 0x18c   :  { %6537 = vmatprep.subr.bf16.mxu0 %v9459_v32  ;;  %7193 = vmatprep.subr.bf16.mxu1 %v9462_v33  ;;  %v9554_v32 = vld [vmem:[%s13681_s1 + $0xe4c] ss:$16 sps:$4 sm:$0xff]   ;;  %v9549_v33 = vld [vmem:[%s13681_s1 + $0xe40] ss:$16 sps:$4 sm:$0xff]  }
 0x18f   :  { %6538 = vmatpush1.bf16.msra.mxu0 %v9457_v34  ;;  %7194 = vmatpush1.bf16.msra.mxu1 %v9460_v35  ;;  %v9552_v34 = vld [vmem:[%s13681_s1 + $0xe48] ss:$16 sps:$4 sm:$0xff]   ;;  %v9557_v35 = vld [vmem:[%s13681_s1 + $0xe64] ss:$16 sps:$4 sm:$0xff]  }
 0x190   :  { %6539 = vmatprep.subr.bf16.mxu0 %v9465_v36  ;;  %7195 = vmatprep.subr.bf16.mxu1 %v9468_v37  ;;  %v9560_v36 = vld [vmem:[%s13681_s1 + $0xe6c] ss:$16 sps:$4 sm:$0xff]   ;;  %v9555_v37 = vld [vmem:[%s13681_s1 + $0xe60] ss:$16 sps:$4 sm:$0xff]  }
 0x193   :  { %6540 = vmatpush1.bf16.msra.mxu0 %v9463_v38  ;;  %7196 = vmatpush1.bf16.msra.mxu1 %v9466_v39  ;;  %v9558_v38 = vld [vmem:[%s13681_s1 + $0xe68] ss:$16 sps:$4 sm:$0xff]   ;;  %v9563_v39 = vld [vmem:[%s13681_s1 + $0xe84] ss:$16 sps:$4 sm:$0xff]  }
 0x194   :  { %6541 = vmatprep.subr.bf16.mxu0 %v9471_v40  ;;  %7197 = vmatprep.subr.bf16.mxu1 %v9474_v41  ;;  %v9566_v40 = vld [vmem:[%s13681_s1 + $0xe8c] ss:$16 sps:$4 sm:$0xff]   ;;  %v9561_v41 = vld [vmem:[%s13681_s1 + $0xe80] ss:$16 sps:$4 sm:$0xff]  }
 0x197   :  { %6542 = vmatpush1.bf16.msra.mxu0 %v9469_v42  ;;  %7198 = vmatpush1.bf16.msra.mxu1 %v9472_v43  ;;  %v9564_v42 = vld [vmem:[%s13681_s1 + $0xe88] ss:$16 sps:$4 sm:$0xff]   ;;  %v9569_v43 = vld [vmem:[%s13681_s1 + $0xea4] ss:$16 sps:$4 sm:$0xff]  }
 0x198   :  { %6543 = vmatprep.subr.bf16.mxu0 %v9477_v44  ;;  %7199 = vmatprep.subr.bf16.mxu1 %v9480_v45  ;;  %v9572_v44 = vld [vmem:[%s13681_s1 + $0xeac] ss:$16 sps:$4 sm:$0xff]   ;;  %v9567_v45 = vld [vmem:[%s13681_s1 + $0xea0] ss:$16 sps:$4 sm:$0xff]  }
 0x19b   :  { %6544 = vmatpush1.bf16.msra.mxu0 %v9475_v46  ;;  %7200 = vmatpush1.bf16.msra.mxu1 %v9478_v47  ;;  %v9570_v46 = vld [vmem:[%s13681_s1 + $0xea8] ss:$16 sps:$4 sm:$0xff]   ;;  %v9575_v47 = vld [vmem:[%s13681_s1 + $0xec4] ss:$16 sps:$4 sm:$0xff]  }
 0x19c   :  { %6545 = vmatprep.subr.bf16.mxu0 %v9483_v48  ;;  %7201 = vmatprep.subr.bf16.mxu1 %v9486_v49  ;;  %v9578_v48 = vld [vmem:[%s13681_s1 + $0xecc] ss:$16 sps:$4 sm:$0xff]   ;;  %v9573_v49 = vld [vmem:[%s13681_s1 + $0xec0] ss:$16 sps:$4 sm:$0xff]  }
 0x19f   :  { %6546 = vmatpush1.bf16.msra.mxu0 %v9481_v50  ;;  %7202 = vmatpush1.bf16.msra.mxu1 %v9484_v51  ;;  %v9576_v50 = vld [vmem:[%s13681_s1 + $0xec8] ss:$16 sps:$4 sm:$0xff]   ;;  %v9581_v51 = vld [vmem:[%s13681_s1 + $0xee4] ss:$16 sps:$4 sm:$0xff]  }
 0x1a0   :  { %6547 = vmatprep.subr.bf16.mxu0 %v9489_v52  ;;  %7203 = vmatprep.subr.bf16.mxu1 %v9492_v53  ;;  %v9584_v52 = vld [vmem:[%s13681_s1 + $0xeec] ss:$16 sps:$4 sm:$0xff]   ;;  %v9579_v53 = vld [vmem:[%s13681_s1 + $0xee0] ss:$16 sps:$4 sm:$0xff]  }
 0x1a3   :  { %6548 = vmatpush1.bf16.msra.mxu0 %v9487_v54  ;;  %7204 = vmatpush1.bf16.msra.mxu1 %v9490_v55  ;;  %v9582_v54 = vld [vmem:[%s13681_s1 + $0xee8] ss:$16 sps:$4 sm:$0xff]   ;;  %v9587_v55 = vld [vmem:[%s13681_s1 + $0xf04] ss:$16 sps:$4 sm:$0xff]  }
 0x1a4   :  { %6549 = vmatprep.subr.bf16.mxu0 %v9495_v56  ;;  %7205 = vmatprep.subr.bf16.mxu1 %v9498_v57  ;;  %v9590_v56 = vld [vmem:[%s13681_s1 + $0xf0c] ss:$16 sps:$4 sm:$0xff]   ;;  %v9585_v57 = vld [vmem:[%s13681_s1 + $0xf00] ss:$16 sps:$4 sm:$0xff]  }
 0x1a7   :  { %6550 = vmatpush1.bf16.msra.mxu0 %v9493_v58  ;;  %7206 = vmatpush1.bf16.msra.mxu1 %v9496_v59  ;;  %v9588_v58 = vld [vmem:[%s13681_s1 + $0xf08] ss:$16 sps:$4 sm:$0xff]   ;;  %v9593_v59 = vld [vmem:[%s13681_s1 + $0xf24] ss:$16 sps:$4 sm:$0xff]  }
 0x1a8   :  { %6551 = vmatprep.subr.bf16.mxu0 %v9501_v60  ;;  %7207 = vmatprep.subr.bf16.mxu1 %v9504_v61  ;;  %v9596_v60 = vld [vmem:[%s13681_s1 + $0xf2c] ss:$16 sps:$4 sm:$0xff]   ;;  %v9591_v61 = vld [vmem:[%s13681_s1 + $0xf20] ss:$16 sps:$4 sm:$0xff]  }
 0x1ab   :  { %6552 = vmatpush1.bf16.msra.mxu0 %v9499_v62  ;;  %7208 = vmatpush1.bf16.msra.mxu1 %v9502_v63  ;;  %v9594_v62 = vld [vmem:[%s13681_s1 + $0xf28] ss:$16 sps:$4 sm:$0xff]   ;;  %v9599_v63 = vld [vmem:[%s13681_s1 + $0xf44] ss:$16 sps:$4 sm:$0xff]  }
 0x1ac   :  { %6553 = vmatprep.subr.bf16.mxu0 %v9507_v0  ;;  %7209 = vmatprep.subr.bf16.mxu1 %v9510_v1  ;;  %v9602_v0 = vld [vmem:[%s13681_s1 + $0xf4c] ss:$16 sps:$4 sm:$0xff]   ;;  %v9597_v1 = vld [vmem:[%s13681_s1 + $0xf40] ss:$16 sps:$4 sm:$0xff]  }
 0x1af   :  { %6554 = vmatpush1.bf16.msra.mxu0 %v9505_v2  ;;  %7210 = vmatpush1.bf16.msra.mxu1 %v9508_v3  ;;  %v9600_v2 = vld [vmem:[%s13681_s1 + $0xf48] ss:$16 sps:$4 sm:$0xff]   ;;  %v9605_v3 = vld [vmem:[%s13681_s1 + $0xf64] ss:$16 sps:$4 sm:$0xff]  }
 0x1b0   :  { %6555 = vmatprep.subr.bf16.mxu0 %v9513_v4  ;;  %7211 = vmatprep.subr.bf16.mxu1 %v9516_v5  ;;  %v9608_v4 = vld [vmem:[%s13681_s1 + $0xf6c] ss:$16 sps:$4 sm:$0xff]   ;;  %v9603_v5 = vld [vmem:[%s13681_s1 + $0xf60] ss:$16 sps:$4 sm:$0xff]  }
 0x1b3   :  { %6556 = vmatpush1.bf16.msra.mxu0 %v9511_v6  ;;  %7212 = vmatpush1.bf16.msra.mxu1 %v9514_v7  ;;  %v9606_v6 = vld [vmem:[%s13681_s1 + $0xf68] ss:$16 sps:$4 sm:$0xff]   ;;  %v9611_v7 = vld [vmem:[%s13681_s1 + $0xf84] ss:$16 sps:$4 sm:$0xff]  }
 0x1b4   :  { %6557 = vmatprep.subr.bf16.mxu0 %v9519_v8  ;;  %7213 = vmatprep.subr.bf16.mxu1 %v9522_v9  ;;  %v9614_v8 = vld [vmem:[%s13681_s1 + $0xf8c] ss:$16 sps:$4 sm:$0xff]   ;;  %v9609_v9 = vld [vmem:[%s13681_s1 + $0xf80] ss:$16 sps:$4 sm:$0xff]  }
 0x1b7   :  { %6558 = vmatpush1.bf16.msra.mxu0 %v9517_v10  ;;  %7214 = vmatpush1.bf16.msra.mxu1 %v9520_v12  ;;  %v9612_v10 = vld [vmem:[%s13681_s1 + $0xf88] ss:$16 sps:$4 sm:$0xff]   ;;  %v9617_v12 = vld [vmem:[%s13681_s1 + $0xfa4] ss:$16 sps:$4 sm:$0xff]  }
 0x1b8   :  { %6559 = vmatprep.subr.bf16.mxu0 %v9525_v13  ;;  %7215 = vmatprep.subr.bf16.mxu1 %v9528_v15  ;;  %v9620_v13 = vld [vmem:[%s13681_s1 + $0xfac] ss:$16 sps:$4 sm:$0xff]   ;;  %v9615_v15 = vld [vmem:[%s13681_s1 + $0xfa0] ss:$16 sps:$4 sm:$0xff]  }
 0x1bb   :  { %6560 = vmatpush1.bf16.msra.mxu0 %v9523_v11  ;;  %7216 = vmatpush1.bf16.msra.mxu1 %v9526_v17  ;;  %v9618_v11 = vld [vmem:[%s13681_s1 + $0xfa8] ss:$16 sps:$4 sm:$0xff]   ;;  %v9623_v17 = vld [vmem:[%s13681_s1 + $0xfc4] ss:$16 sps:$4 sm:$0xff]  }
 0x1bc   :  { %6561 = vmatprep.subr.bf16.mxu0 %v9531_v14  ;;  %7217 = vmatprep.subr.bf16.mxu1 %v9534_v19  ;;  %v9626_v14 = vld [vmem:[%s13681_s1 + $0xfcc] ss:$16 sps:$4 sm:$0xff]   ;;  %v9621_v19 = vld [vmem:[%s13681_s1 + $0xfc0] ss:$16 sps:$4 sm:$0xff]  }
 0x1bf   :  { %6562 = vmatpush1.bf16.msra.mxu0 %v9529_v20  ;;  %7218 = vmatpush1.bf16.msra.mxu1 %v9532_v16  ;;  %v9624_v20 = vld [vmem:[%s13681_s1 + $0xfc8] ss:$16 sps:$4 sm:$0xff]   ;;  %v9629_v16 = vld [vmem:[%s13681_s1 + $0xfe4] ss:$16 sps:$4 sm:$0xff]  }
 0x1c0   :  { %6572 = vmatprep.subr.bf16.mxu0 %v9539_v22  ;;  %7228 = vmatprep.subr.bf16.mxu1 %v9542_v23  ;;  %v9632_v22 = vld [vmem:[%s13681_s1 + $0xfec] ss:$16 sps:$4 sm:$0xff]   ;;  %v9627_v23 = vld [vmem:[%s13681_s1 + $0xfe0] ss:$16 sps:$4 sm:$0xff]  }
 0x1c2   :  { %6564 = vmatmul.mubr.bf16.vlgmr.msra.gmra.mrb[0].mxu0 %v7687_v18  ;;  %7220 = vmatmul.mubr.bf16.vlgmr.msra.gmra.mrb[0].mxu1 %v7687_v18  ;;  %v9630_v18 = vld [vmem:[%s13681_s1 + $0xfe8] ss:$16 sps:$4 sm:$0xff]  }
 0x1c3   :  { %6573 = vmatpush1.bf16.msra.mxu0 %v9537_v25  ;;  %7229 = vmatpush1.bf16.msra.mxu1 %v9540_v26  ;;  %v9637_v25 = vld [vmem:[%s13681_s1 + $0x1004] ss:$16 sps:$4 sm:$0xff]   ;;  %v9640_v26 = vld [vmem:[%s13681_s1 + $0x100c] ss:$16 sps:$4 sm:$0xff]  }
 0x1c4   :  { %6574 = vmatprep.subr.bf16.mxu0 %v9545_v27  ;;  %7230 = vmatprep.subr.bf16.mxu1 %v9548_v21  ;;  %v12048_v27 = vld [vmem:[%s13682_s0 + $0x40] sm:$0xff]  ;;  %v7689_v21 = vcombine.low %v11847_v24, %v11847_v24  ;;  %v9646_v24 = vld [vmem:[%s13681_s1 + $0x102c] ss:$16 sps:$4 sm:$0xff]  }
 0x1c5   :  { %6604 = vmatprep.mubr.bf16.mxu0 %v7690_v28  ;;  %7260 = vmatprep.mubr.bf16.mxu1 %v7690_v28  ;;  %v9635_v28 = vld [vmem:[%s13681_s1 + $0x1000] ss:$16 sps:$4 sm:$0xff]  }
 0x1c7   :  { %6575 = vmatpush1.bf16.msra.mxu0 %v9543_v29  ;;  %7231 = vmatpush1.bf16.msra.mxu1 %v9546_v30  ;;  %v9638_v29 = vld [vmem:[%s13681_s1 + $0x1008] ss:$16 sps:$4 sm:$0xff]   ;;  %v9643_v30 = vld [vmem:[%s13681_s1 + $0x1024] ss:$16 sps:$4 sm:$0xff]  }
 0x1c8   :  { %6576 = vmatprep.subr.bf16.mxu0 %v9551_v31  ;;  %7232 = vmatprep.subr.bf16.mxu1 %v9554_v32  ;;  %v7692_v31 = vcombine.high %v12048_v27, %v12048_v27  ;;  %v9641_v32 = vld [vmem:[%s13681_s1 + $0x1020] ss:$16 sps:$4 sm:$0xff]  }
 0x1cb   :  { %6577 = vmatpush1.bf16.msra.mxu0 %v9549_v33  ;;  %7233 = vmatpush1.bf16.msra.mxu1 %v9552_v34  ;;  %v9644_v33 = vld [vmem:[%s13681_s1 + $0x1028] ss:$16 sps:$4 sm:$0xff]   ;;  %v9649_v34 = vld [vmem:[%s13681_s1 + $0x1044] ss:$16 sps:$4 sm:$0xff]  }
 0x1cc   :  { %6578 = vmatprep.subr.bf16.mxu0 %v9557_v35  ;;  %7234 = vmatprep.subr.bf16.mxu1 %v9560_v36  ;;  %v9652_v35 = vld [vmem:[%s13681_s1 + $0x104c] ss:$16 sps:$4 sm:$0xff]   ;;  %v9647_v36 = vld [vmem:[%s13681_s1 + $0x1040] ss:$16 sps:$4 sm:$0xff]  }
 0x1cf   :  { %6579 = vmatpush1.bf16.msra.mxu0 %v9555_v37  ;;  %7235 = vmatpush1.bf16.msra.mxu1 %v9558_v38  ;;  %v9650_v37 = vld [vmem:[%s13681_s1 + $0x1048] ss:$16 sps:$4 sm:$0xff]   ;;  %v9655_v38 = vld [vmem:[%s13681_s1 + $0x1064] ss:$16 sps:$4 sm:$0xff]  }
 0x1d0   :  { %6580 = vmatprep.subr.bf16.mxu0 %v9563_v39  ;;  %7236 = vmatprep.subr.bf16.mxu1 %v9566_v40  ;;  %v9658_v39 = vld [vmem:[%s13681_s1 + $0x106c] ss:$16 sps:$4 sm:$0xff]   ;;  %v9653_v40 = vld [vmem:[%s13681_s1 + $0x1060] ss:$16 sps:$4 sm:$0xff]  }
 0x1d3   :  { %6581 = vmatpush1.bf16.msra.mxu0 %v9561_v41  ;;  %7237 = vmatpush1.bf16.msra.mxu1 %v9564_v42  ;;  %v9656_v41 = vld [vmem:[%s13681_s1 + $0x1068] ss:$16 sps:$4 sm:$0xff]   ;;  %v9661_v42 = vld [vmem:[%s13681_s1 + $0x1084] ss:$16 sps:$4 sm:$0xff]  }
 0x1d4   :  { %6582 = vmatprep.subr.bf16.mxu0 %v9569_v43  ;;  %7238 = vmatprep.subr.bf16.mxu1 %v9572_v44  ;;  %v9664_v43 = vld [vmem:[%s13681_s1 + $0x108c] ss:$16 sps:$4 sm:$0xff]   ;;  %v9659_v44 = vld [vmem:[%s13681_s1 + $0x1080] ss:$16 sps:$4 sm:$0xff]  }
 0x1d7   :  { %6583 = vmatpush1.bf16.msra.mxu0 %v9567_v45  ;;  %7239 = vmatpush1.bf16.msra.mxu1 %v9570_v46  ;;  %v9662_v45 = vld [vmem:[%s13681_s1 + $0x1088] ss:$16 sps:$4 sm:$0xff]   ;;  %v9667_v46 = vld [vmem:[%s13681_s1 + $0x10a4] ss:$16 sps:$4 sm:$0xff]  }
 0x1d8   :  { %6584 = vmatprep.subr.bf16.mxu0 %v9575_v47  ;;  %7240 = vmatprep.subr.bf16.mxu1 %v9578_v48  ;;  %v9670_v47 = vld [vmem:[%s13681_s1 + $0x10ac] ss:$16 sps:$4 sm:$0xff]   ;;  %v9665_v48 = vld [vmem:[%s13681_s1 + $0x10a0] ss:$16 sps:$4 sm:$0xff]  }
 0x1db   :  { %6585 = vmatpush1.bf16.msra.mxu0 %v9573_v49  ;;  %7241 = vmatpush1.bf16.msra.mxu1 %v9576_v50  ;;  %v9668_v49 = vld [vmem:[%s13681_s1 + $0x10a8] ss:$16 sps:$4 sm:$0xff]   ;;  %v9673_v50 = vld [vmem:[%s13681_s1 + $0x10c4] ss:$16 sps:$4 sm:$0xff]  }
 0x1dc   :  { %6586 = vmatprep.subr.bf16.mxu0 %v9581_v51  ;;  %7242 = vmatprep.subr.bf16.mxu1 %v9584_v52  ;;  %v9676_v51 = vld [vmem:[%s13681_s1 + $0x10cc] ss:$16 sps:$4 sm:$0xff]   ;;  %v9671_v52 = vld [vmem:[%s13681_s1 + $0x10c0] ss:$16 sps:$4 sm:$0xff]  }
 0x1df   :  { %6587 = vmatpush1.bf16.msra.mxu0 %v9579_v53  ;;  %7243 = vmatpush1.bf16.msra.mxu1 %v9582_v54  ;;  %v9674_v53 = vld [vmem:[%s13681_s1 + $0x10c8] ss:$16 sps:$4 sm:$0xff]   ;;  %v9679_v54 = vld [vmem:[%s13681_s1 + $0x10e4] ss:$16 sps:$4 sm:$0xff]  }
 0x1e0   :  { %6588 = vmatprep.subr.bf16.mxu0 %v9587_v55  ;;  %7244 = vmatprep.subr.bf16.mxu1 %v9590_v56  ;;  %v9682_v55 = vld [vmem:[%s13681_s1 + $0x10ec] ss:$16 sps:$4 sm:$0xff]   ;;  %v9677_v56 = vld [vmem:[%s13681_s1 + $0x10e0] ss:$16 sps:$4 sm:$0xff]  }
 0x1e3   :  { %6589 = vmatpush1.bf16.msra.mxu0 %v9585_v57  ;;  %7245 = vmatpush1.bf16.msra.mxu1 %v9588_v58  ;;  %v9680_v57 = vld [vmem:[%s13681_s1 + $0x10e8] ss:$16 sps:$4 sm:$0xff]   ;;  %v9685_v58 = vld [vmem:[%s13681_s1 + $0x1104] ss:$16 sps:$4 sm:$0xff]  }
 0x1e4   :  { %6590 = vmatprep.subr.bf16.mxu0 %v9593_v59  ;;  %7246 = vmatprep.subr.bf16.mxu1 %v9596_v60  ;;  %v9688_v59 = vld [vmem:[%s13681_s1 + $0x110c] ss:$16 sps:$4 sm:$0xff]   ;;  %v9683_v60 = vld [vmem:[%s13681_s1 + $0x1100] ss:$16 sps:$4 sm:$0xff]  }
 0x1e7   :  { %6591 = vmatpush1.bf16.msra.mxu0 %v9591_v61  ;;  %7247 = vmatpush1.bf16.msra.mxu1 %v9594_v62  ;;  %v9686_v61 = vld [vmem:[%s13681_s1 + $0x1108] ss:$16 sps:$4 sm:$0xff]   ;;  %v9691_v62 = vld [vmem:[%s13681_s1 + $0x1124] ss:$16 sps:$4 sm:$0xff]  }
 0x1e8   :  { %6592 = vmatprep.subr.bf16.mxu0 %v9599_v63  ;;  %7248 = vmatprep.subr.bf16.mxu1 %v9602_v0  ;;  %v9694_v63 = vld [vmem:[%s13681_s1 + $0x112c] ss:$16 sps:$4 sm:$0xff]   ;;  %v9689_v0 = vld [vmem:[%s13681_s1 + $0x1120] ss:$16 sps:$4 sm:$0xff]  }
 0x1eb   :  { %6593 = vmatpush1.bf16.msra.mxu0 %v9597_v1  ;;  %7249 = vmatpush1.bf16.msra.mxu1 %v9600_v2  ;;  %v9692_v1 = vld [vmem:[%s13681_s1 + $0x1128] ss:$16 sps:$4 sm:$0xff]   ;;  %v9697_v2 = vld [vmem:[%s13681_s1 + $0x1144] ss:$16 sps:$4 sm:$0xff]  }
 0x1ec   :  { %6594 = vmatprep.subr.bf16.mxu0 %v9605_v3  ;;  %7250 = vmatprep.subr.bf16.mxu1 %v9608_v4  ;;  %v9700_v3 = vld [vmem:[%s13681_s1 + $0x114c] ss:$16 sps:$4 sm:$0xff]   ;;  %v9695_v4 = vld [vmem:[%s13681_s1 + $0x1140] ss:$16 sps:$4 sm:$0xff]  }
 0x1ef   :  { %6595 = vmatpush1.bf16.msra.mxu0 %v9603_v5  ;;  %7251 = vmatpush1.bf16.msra.mxu1 %v9606_v6  ;;  %v9698_v5 = vld [vmem:[%s13681_s1 + $0x1148] ss:$16 sps:$4 sm:$0xff]   ;;  %v9703_v6 = vld [vmem:[%s13681_s1 + $0x1164] ss:$16 sps:$4 sm:$0xff]  }
 0x1f0   :  { %6596 = vmatprep.subr.bf16.mxu0 %v9611_v7  ;;  %7252 = vmatprep.subr.bf16.mxu1 %v9614_v8  ;;  %v9706_v7 = vld [vmem:[%s13681_s1 + $0x116c] ss:$16 sps:$4 sm:$0xff]   ;;  %v9701_v8 = vld [vmem:[%s13681_s1 + $0x1160] ss:$16 sps:$4 sm:$0xff]  }
 0x1f3   :  { %6597 = vmatpush1.bf16.msra.mxu0 %v9609_v9  ;;  %7253 = vmatpush1.bf16.msra.mxu1 %v9612_v10  ;;  %v9704_v9 = vld [vmem:[%s13681_s1 + $0x1168] ss:$16 sps:$4 sm:$0xff]   ;;  %v9709_v10 = vld [vmem:[%s13681_s1 + $0x1184] ss:$16 sps:$4 sm:$0xff]  }
 0x1f4   :  { %6598 = vmatprep.subr.bf16.mxu0 %v9617_v12  ;;  %7254 = vmatprep.subr.bf16.mxu1 %v9620_v13  ;;  %v9712_v12 = vld [vmem:[%s13681_s1 + $0x118c] ss:$16 sps:$4 sm:$0xff]   ;;  %v9707_v13 = vld [vmem:[%s13681_s1 + $0x1180] ss:$16 sps:$4 sm:$0xff]  }
 0x1f7   :  { %6599 = vmatpush1.bf16.msra.mxu0 %v9615_v15  ;;  %7255 = vmatpush1.bf16.msra.mxu1 %v9618_v11  ;;  %v9710_v15 = vld [vmem:[%s13681_s1 + $0x1188] ss:$16 sps:$4 sm:$0xff]   ;;  %v9715_v11 = vld [vmem:[%s13681_s1 + $0x11a4] ss:$16 sps:$4 sm:$0xff]  }
 0x1f8   :  { %6600 = vmatprep.subr.bf16.mxu0 %v9623_v17  ;;  %7256 = vmatprep.subr.bf16.mxu1 %v9626_v14  ;;  %v9718_v17 = vld [vmem:[%s13681_s1 + $0x11ac] ss:$16 sps:$4 sm:$0xff]   ;;  %v9713_v14 = vld [vmem:[%s13681_s1 + $0x11a0] ss:$16 sps:$4 sm:$0xff]  }
 0x1fb   :  { %6601 = vmatpush1.bf16.msra.mxu0 %v9621_v19  ;;  %7257 = vmatpush1.bf16.msra.mxu1 %v9624_v20  ;;  %v9716_v19 = vld [vmem:[%s13681_s1 + $0x11a8] ss:$16 sps:$4 sm:$0xff]   ;;  %v9721_v20 = vld [vmem:[%s13681_s1 + $0x11c4] ss:$16 sps:$4 sm:$0xff]  }
 0x1fc   :  { %6602 = vmatprep.subr.bf16.mxu0 %v9629_v16  ;;  %7258 = vmatprep.subr.bf16.mxu1 %v9632_v22  ;;  %v9724_v16 = vld [vmem:[%s13681_s1 + $0x11cc] ss:$16 sps:$4 sm:$0xff]   ;;  %v9719_v22 = vld [vmem:[%s13681_s1 + $0x11c0] ss:$16 sps:$4 sm:$0xff]  }
 0x1ff   :  { %6603 = vmatpush1.bf16.msra.mxu0 %v9627_v23  ;;  %7259 = vmatpush1.bf16.msra.mxu1 %v9630_v18  ;;  %v9722_v23 = vld [vmem:[%s13681_s1 + $0x11c8] ss:$16 sps:$4 sm:$0xff]   ;;  %v9727_v18 = vld [vmem:[%s13681_s1 + $0x11e4] ss:$16 sps:$4 sm:$0xff]  }
 0x200   :  { %6613 = vmatprep.subr.bf16.mxu0 %v9637_v25  ;;  %7269 = vmatprep.subr.bf16.mxu1 %v9640_v26  ;;  %v9730_v25 = vld [vmem:[%s13681_s1 + $0x11ec] ss:$16 sps:$4 sm:$0xff]   ;;  %v9725_v26 = vld [vmem:[%s13681_s1 + $0x11e0] ss:$16 sps:$4 sm:$0xff]  }
 0x202   :  { %6605 = vmatmul.mubr.bf16.vlgmr.msra.gmra.mrb[0].mxu0 %v7689_v21  ;;  %7261 = vmatmul.mubr.bf16.vlgmr.msra.gmra.mrb[0].mxu1 %v7689_v21  ;;  %v9728_v21 = vld [vmem:[%s13681_s1 + $0x11e8] ss:$16 sps:$4 sm:$0xff]  }
 0x203   :  { %6614 = vmatpush1.bf16.msra.mxu0 %v9635_v28  ;;  %7270 = vmatpush1.bf16.msra.mxu1 %v9638_v29  ;;  %v9735_v28 = vld [vmem:[%s13681_s1 + $0x1204] ss:$16 sps:$4 sm:$0xff]   ;;  %v9738_v29 = vld [vmem:[%s13681_s1 + $0x120c] ss:$16 sps:$4 sm:$0xff]  }
 0x204   :  { %6615 = vmatprep.subr.bf16.mxu0 %v9643_v30  ;;  %7271 = vmatprep.subr.bf16.mxu1 %v9646_v24  ;;  %v12249_v30 = vld [vmem:[%s13682_s0 + $0x48] sm:$0xff]  ;;  %v7691_v24 = vcombine.low %v12048_v27, %v12048_v27 }
 0x205   :  { %6645 = vmatprep.mubr.bf16.mxu0 %v7692_v31  ;;  %7301 = vmatprep.mubr.bf16.mxu1 %v7692_v31  ;;  %v9733_v31 = vld [vmem:[%s13681_s1 + $0x1200] ss:$16 sps:$4 sm:$0xff]   ;;  %v9744_v27 = vld [vmem:[%s13681_s1 + $0x122c] ss:$16 sps:$4 sm:$0xff]  }
 0x207   :  { %6616 = vmatpush1.bf16.msra.mxu0 %v9641_v32  ;;  %7272 = vmatpush1.bf16.msra.mxu1 %v9644_v33  ;;  %v9736_v32 = vld [vmem:[%s13681_s1 + $0x1208] ss:$16 sps:$4 sm:$0xff]   ;;  %v9741_v33 = vld [vmem:[%s13681_s1 + $0x1224] ss:$16 sps:$4 sm:$0xff]  }
 0x208   :  { %6617 = vmatprep.subr.bf16.mxu0 %v9649_v34  ;;  %7273 = vmatprep.subr.bf16.mxu1 %v9652_v35  ;;  %v7694_v34 = vcombine.high %v12249_v30, %v12249_v30  ;;  %v9739_v35 = vld [vmem:[%s13681_s1 + $0x1220] ss:$16 sps:$4 sm:$0xff]  }
 0x20b   :  { %6618 = vmatpush1.bf16.msra.mxu0 %v9647_v36  ;;  %7274 = vmatpush1.bf16.msra.mxu1 %v9650_v37  ;;  %v9742_v36 = vld [vmem:[%s13681_s1 + $0x1228] ss:$16 sps:$4 sm:$0xff]   ;;  %v9747_v37 = vld [vmem:[%s13681_s1 + $0x1244] ss:$16 sps:$4 sm:$0xff]  }
 0x20c   :  { %6619 = vmatprep.subr.bf16.mxu0 %v9655_v38  ;;  %7275 = vmatprep.subr.bf16.mxu1 %v9658_v39  ;;  %v9750_v38 = vld [vmem:[%s13681_s1 + $0x124c] ss:$16 sps:$4 sm:$0xff]   ;;  %v9745_v39 = vld [vmem:[%s13681_s1 + $0x1240] ss:$16 sps:$4 sm:$0xff]  }
 0x20f   :  { %6620 = vmatpush1.bf16.msra.mxu0 %v9653_v40  ;;  %7276 = vmatpush1.bf16.msra.mxu1 %v9656_v41  ;;  %v9748_v40 = vld [vmem:[%s13681_s1 + $0x1248] ss:$16 sps:$4 sm:$0xff]   ;;  %v9753_v41 = vld [vmem:[%s13681_s1 + $0x1264] ss:$16 sps:$4 sm:$0xff]  }
 0x210   :  { %6621 = vmatprep.subr.bf16.mxu0 %v9661_v42  ;;  %7277 = vmatprep.subr.bf16.mxu1 %v9664_v43  ;;  %v9756_v42 = vld [vmem:[%s13681_s1 + $0x126c] ss:$16 sps:$4 sm:$0xff]   ;;  %v9751_v43 = vld [vmem:[%s13681_s1 + $0x1260] ss:$16 sps:$4 sm:$0xff]  }
 0x213   :  { %6622 = vmatpush1.bf16.msra.mxu0 %v9659_v44  ;;  %7278 = vmatpush1.bf16.msra.mxu1 %v9662_v45  ;;  %v9754_v44 = vld [vmem:[%s13681_s1 + $0x1268] ss:$16 sps:$4 sm:$0xff]   ;;  %v9759_v45 = vld [vmem:[%s13681_s1 + $0x1284] ss:$16 sps:$4 sm:$0xff]  }
 0x214   :  { %6623 = vmatprep.subr.bf16.mxu0 %v9667_v46  ;;  %7279 = vmatprep.subr.bf16.mxu1 %v9670_v47  ;;  %v9762_v46 = vld [vmem:[%s13681_s1 + $0x128c] ss:$16 sps:$4 sm:$0xff]   ;;  %v9757_v47 = vld [vmem:[%s13681_s1 + $0x1280] ss:$16 sps:$4 sm:$0xff]  }
 0x217   :  { %6624 = vmatpush1.bf16.msra.mxu0 %v9665_v48  ;;  %7280 = vmatpush1.bf16.msra.mxu1 %v9668_v49  ;;  %v9760_v48 = vld [vmem:[%s13681_s1 + $0x1288] ss:$16 sps:$4 sm:$0xff]   ;;  %v9765_v49 = vld [vmem:[%s13681_s1 + $0x12a4] ss:$16 sps:$4 sm:$0xff]  }
 0x218   :  { %6625 = vmatprep.subr.bf16.mxu0 %v9673_v50  ;;  %7281 = vmatprep.subr.bf16.mxu1 %v9676_v51  ;;  %v9768_v50 = vld [vmem:[%s13681_s1 + $0x12ac] ss:$16 sps:$4 sm:$0xff]   ;;  %v9763_v51 = vld [vmem:[%s13681_s1 + $0x12a0] ss:$16 sps:$4 sm:$0xff]  }
 0x21b   :  { %6626 = vmatpush1.bf16.msra.mxu0 %v9671_v52  ;;  %7282 = vmatpush1.bf16.msra.mxu1 %v9674_v53  ;;  %v9766_v52 = vld [vmem:[%s13681_s1 + $0x12a8] ss:$16 sps:$4 sm:$0xff]   ;;  %v9771_v53 = vld [vmem:[%s13681_s1 + $0x12c4] ss:$16 sps:$4 sm:$0xff]  }
 0x21c   :  { %6627 = vmatprep.subr.bf16.mxu0 %v9679_v54  ;;  %7283 = vmatprep.subr.bf16.mxu1 %v9682_v55  ;;  %v9774_v54 = vld [vmem:[%s13681_s1 + $0x12cc] ss:$16 sps:$4 sm:$0xff]   ;;  %v9769_v55 = vld [vmem:[%s13681_s1 + $0x12c0] ss:$16 sps:$4 sm:$0xff]  }
 0x21f   :  { %6628 = vmatpush1.bf16.msra.mxu0 %v9677_v56  ;;  %7284 = vmatpush1.bf16.msra.mxu1 %v9680_v57  ;;  %v9772_v56 = vld [vmem:[%s13681_s1 + $0x12c8] ss:$16 sps:$4 sm:$0xff]   ;;  %v9777_v57 = vld [vmem:[%s13681_s1 + $0x12e4] ss:$16 sps:$4 sm:$0xff]  }
 0x220   :  { %6629 = vmatprep.subr.bf16.mxu0 %v9685_v58  ;;  %7285 = vmatprep.subr.bf16.mxu1 %v9688_v59  ;;  %v9780_v58 = vld [vmem:[%s13681_s1 + $0x12ec] ss:$16 sps:$4 sm:$0xff]   ;;  %v9775_v59 = vld [vmem:[%s13681_s1 + $0x12e0] ss:$16 sps:$4 sm:$0xff]  }
 0x223   :  { %6630 = vmatpush1.bf16.msra.mxu0 %v9683_v60  ;;  %7286 = vmatpush1.bf16.msra.mxu1 %v9686_v61  ;;  %v9778_v60 = vld [vmem:[%s13681_s1 + $0x12e8] ss:$16 sps:$4 sm:$0xff]   ;;  %v9783_v61 = vld [vmem:[%s13681_s1 + $0x1304] ss:$16 sps:$4 sm:$0xff]  }
 0x224   :  { %6631 = vmatprep.subr.bf16.mxu0 %v9691_v62  ;;  %7287 = vmatprep.subr.bf16.mxu1 %v9694_v63  ;;  %v9786_v62 = vld [vmem:[%s13681_s1 + $0x130c] ss:$16 sps:$4 sm:$0xff]   ;;  %v9781_v63 = vld [vmem:[%s13681_s1 + $0x1300] ss:$16 sps:$4 sm:$0xff]  }
 0x227   :  { %6632 = vmatpush1.bf16.msra.mxu0 %v9689_v0  ;;  %7288 = vmatpush1.bf16.msra.mxu1 %v9692_v1  ;;  %v9784_v0 = vld [vmem:[%s13681_s1 + $0x1308] ss:$16 sps:$4 sm:$0xff]   ;;  %v9789_v1 = vld [vmem:[%s13681_s1 + $0x1324] ss:$16 sps:$4 sm:$0xff]  }
 0x228   :  { %6633 = vmatprep.subr.bf16.mxu0 %v9697_v2  ;;  %7289 = vmatprep.subr.bf16.mxu1 %v9700_v3  ;;  %v9792_v2 = vld [vmem:[%s13681_s1 + $0x132c] ss:$16 sps:$4 sm:$0xff]   ;;  %v9787_v3 = vld [vmem:[%s13681_s1 + $0x1320] ss:$16 sps:$4 sm:$0xff]  }
 0x22b   :  { %6634 = vmatpush1.bf16.msra.mxu0 %v9695_v4  ;;  %7290 = vmatpush1.bf16.msra.mxu1 %v9698_v5  ;;  %v9790_v4 = vld [vmem:[%s13681_s1 + $0x1328] ss:$16 sps:$4 sm:$0xff]   ;;  %v9795_v5 = vld [vmem:[%s13681_s1 + $0x1344] ss:$16 sps:$4 sm:$0xff]  }
 0x22c   :  { %6635 = vmatprep.subr.bf16.mxu0 %v9703_v6  ;;  %7291 = vmatprep.subr.bf16.mxu1 %v9706_v7  ;;  %v9798_v6 = vld [vmem:[%s13681_s1 + $0x134c] ss:$16 sps:$4 sm:$0xff]   ;;  %v9793_v7 = vld [vmem:[%s13681_s1 + $0x1340] ss:$16 sps:$4 sm:$0xff]  }
 0x22f   :  { %6636 = vmatpush1.bf16.msra.mxu0 %v9701_v8  ;;  %7292 = vmatpush1.bf16.msra.mxu1 %v9704_v9  ;;  %v9796_v8 = vld [vmem:[%s13681_s1 + $0x1348] ss:$16 sps:$4 sm:$0xff]   ;;  %v9801_v9 = vld [vmem:[%s13681_s1 + $0x1364] ss:$16 sps:$4 sm:$0xff]  }
 0x230   :  { %6637 = vmatprep.subr.bf16.mxu0 %v9709_v10  ;;  %7293 = vmatprep.subr.bf16.mxu1 %v9712_v12  ;;  %v9804_v10 = vld [vmem:[%s13681_s1 + $0x136c] ss:$16 sps:$4 sm:$0xff]   ;;  %v9799_v12 = vld [vmem:[%s13681_s1 + $0x1360] ss:$16 sps:$4 sm:$0xff]  }
 0x233   :  { %6638 = vmatpush1.bf16.msra.mxu0 %v9707_v13  ;;  %7294 = vmatpush1.bf16.msra.mxu1 %v9710_v15  ;;  %v9802_v13 = vld [vmem:[%s13681_s1 + $0x1368] ss:$16 sps:$4 sm:$0xff]   ;;  %v9807_v15 = vld [vmem:[%s13681_s1 + $0x1384] ss:$16 sps:$4 sm:$0xff]  }
 0x234   :  { %6639 = vmatprep.subr.bf16.mxu0 %v9715_v11  ;;  %7295 = vmatprep.subr.bf16.mxu1 %v9718_v17  ;;  %v9810_v11 = vld [vmem:[%s13681_s1 + $0x138c] ss:$16 sps:$4 sm:$0xff]   ;;  %v9805_v17 = vld [vmem:[%s13681_s1 + $0x1380] ss:$16 sps:$4 sm:$0xff]  }
 0x237   :  { %6640 = vmatpush1.bf16.msra.mxu0 %v9713_v14  ;;  %7296 = vmatpush1.bf16.msra.mxu1 %v9716_v19  ;;  %v9808_v14 = vld [vmem:[%s13681_s1 + $0x1388] ss:$16 sps:$4 sm:$0xff]   ;;  %v9813_v19 = vld [vmem:[%s13681_s1 + $0x13a4] ss:$16 sps:$4 sm:$0xff]  }
 0x238   :  { %6641 = vmatprep.subr.bf16.mxu0 %v9721_v20  ;;  %7297 = vmatprep.subr.bf16.mxu1 %v9724_v16  ;;  %v9816_v20 = vld [vmem:[%s13681_s1 + $0x13ac] ss:$16 sps:$4 sm:$0xff]   ;;  %v9811_v16 = vld [vmem:[%s13681_s1 + $0x13a0] ss:$16 sps:$4 sm:$0xff]  }
 0x23b   :  { %6642 = vmatpush1.bf16.msra.mxu0 %v9719_v22  ;;  %7298 = vmatpush1.bf16.msra.mxu1 %v9722_v23  ;;  %v9814_v22 = vld [vmem:[%s13681_s1 + $0x13a8] ss:$16 sps:$4 sm:$0xff]   ;;  %v9819_v23 = vld [vmem:[%s13681_s1 + $0x13c4] ss:$16 sps:$4 sm:$0xff]  }
 0x23c   :  { %6643 = vmatprep.subr.bf16.mxu0 %v9727_v18  ;;  %7299 = vmatprep.subr.bf16.mxu1 %v9730_v25  ;;  %v9822_v18 = vld [vmem:[%s13681_s1 + $0x13cc] ss:$16 sps:$4 sm:$0xff]   ;;  %v9817_v25 = vld [vmem:[%s13681_s1 + $0x13c0] ss:$16 sps:$4 sm:$0xff]  }
 0x23f   :  { %6644 = vmatpush1.bf16.msra.mxu0 %v9725_v26  ;;  %7300 = vmatpush1.bf16.msra.mxu1 %v9728_v21  ;;  %v9820_v26 = vld [vmem:[%s13681_s1 + $0x13c8] ss:$16 sps:$4 sm:$0xff]   ;;  %v9825_v21 = vld [vmem:[%s13681_s1 + $0x13e4] ss:$16 sps:$4 sm:$0xff]  }
 0x240   :  { %6654 = vmatprep.subr.bf16.mxu0 %v9735_v28  ;;  %7310 = vmatprep.subr.bf16.mxu1 %v9738_v29  ;;  %v9828_v28 = vld [vmem:[%s13681_s1 + $0x13ec] ss:$16 sps:$4 sm:$0xff]   ;;  %v9823_v29 = vld [vmem:[%s13681_s1 + $0x13e0] ss:$16 sps:$4 sm:$0xff]  }
 0x242   :  { %6646 = vmatmul.mubr.bf16.vlgmr.msra.gmra.mrb[0].mxu0 %v7691_v24  ;;  %7302 = vmatmul.mubr.bf16.vlgmr.msra.gmra.mrb[0].mxu1 %v7691_v24  ;;  %v9826_v24 = vld [vmem:[%s13681_s1 + $0x13e8] ss:$16 sps:$4 sm:$0xff]  }
 0x243   :  { %6655 = vmatpush1.bf16.msra.mxu0 %v9733_v31  ;;  %7311 = vmatpush1.bf16.msra.mxu1 %v9736_v32  ;;  %v9833_v31 = vld [vmem:[%s13681_s1 + $0x1404] ss:$16 sps:$4 sm:$0xff]   ;;  %v9836_v32 = vld [vmem:[%s13681_s1 + $0x140c] ss:$16 sps:$4 sm:$0xff]  }
 0x244   :  { %6656 = vmatprep.subr.bf16.mxu0 %v9741_v33  ;;  %7312 = vmatprep.subr.bf16.mxu1 %v9744_v27  ;;  %v7693_v33 = vcombine.low %v12249_v30, %v12249_v30  ;;  %v12452_v27 = vld [vmem:[%s13682_s0 + $0x50] sm:$0xff] }
 0x245   :  { %6686 = vmatprep.mubr.bf16.mxu0 %v7694_v34  ;;  %7342 = vmatprep.mubr.bf16.mxu1 %v7694_v34  ;;  %v9831_v34 = vld [vmem:[%s13681_s1 + $0x1400] ss:$16 sps:$4 sm:$0xff]   ;;  %v9839_v30 = vld [vmem:[%s13681_s1 + $0x1424] ss:$16 sps:$4 sm:$0xff]  }
 0x247   :  { %6657 = vmatpush1.bf16.msra.mxu0 %v9739_v35  ;;  %7313 = vmatpush1.bf16.msra.mxu1 %v9742_v36  ;;  %v9834_v35 = vld [vmem:[%s13681_s1 + $0x1408] ss:$16 sps:$4 sm:$0xff]   ;;  %v9842_v36 = vld [vmem:[%s13681_s1 + $0x142c] ss:$16 sps:$4 sm:$0xff]  }
 0x248   :  { %6658 = vmatprep.subr.bf16.mxu0 %v9747_v37  ;;  %7314 = vmatprep.subr.bf16.mxu1 %v9750_v38  ;;  %v7696_v37 = vcombine.high %v12452_v27, %v12452_v27  ;;  %v9837_v38 = vld [vmem:[%s13681_s1 + $0x1420] ss:$16 sps:$4 sm:$0xff]  }
 0x24b   :  { %6659 = vmatpush1.bf16.msra.mxu0 %v9745_v39  ;;  %7315 = vmatpush1.bf16.msra.mxu1 %v9748_v40  ;;  %v9840_v39 = vld [vmem:[%s13681_s1 + $0x1428] ss:$16 sps:$4 sm:$0xff]   ;;  %v9845_v40 = vld [vmem:[%s13681_s1 + $0x1444] ss:$16 sps:$4 sm:$0xff]  }
 0x24c   :  { %6660 = vmatprep.subr.bf16.mxu0 %v9753_v41  ;;  %7316 = vmatprep.subr.bf16.mxu1 %v9756_v42  ;;  %v9848_v41 = vld [vmem:[%s13681_s1 + $0x144c] ss:$16 sps:$4 sm:$0xff]   ;;  %v9843_v42 = vld [vmem:[%s13681_s1 + $0x1440] ss:$16 sps:$4 sm:$0xff]  }
 0x24f   :  { %6661 = vmatpush1.bf16.msra.mxu0 %v9751_v43  ;;  %7317 = vmatpush1.bf16.msra.mxu1 %v9754_v44  ;;  %v9846_v43 = vld [vmem:[%s13681_s1 + $0x1448] ss:$16 sps:$4 sm:$0xff]   ;;  %v9851_v44 = vld [vmem:[%s13681_s1 + $0x1464] ss:$16 sps:$4 sm:$0xff]  }
 0x250   :  { %6662 = vmatprep.subr.bf16.mxu0 %v9759_v45  ;;  %7318 = vmatprep.subr.bf16.mxu1 %v9762_v46  ;;  %v9854_v45 = vld [vmem:[%s13681_s1 + $0x146c] ss:$16 sps:$4 sm:$0xff]   ;;  %v9849_v46 = vld [vmem:[%s13681_s1 + $0x1460] ss:$16 sps:$4 sm:$0xff]  }
 0x253   :  { %6663 = vmatpush1.bf16.msra.mxu0 %v9757_v47  ;;  %7319 = vmatpush1.bf16.msra.mxu1 %v9760_v48  ;;  %v9852_v47 = vld [vmem:[%s13681_s1 + $0x1468] ss:$16 sps:$4 sm:$0xff]   ;;  %v9857_v48 = vld [vmem:[%s13681_s1 + $0x1484] ss:$16 sps:$4 sm:$0xff]  }
 0x254   :  { %6664 = vmatprep.subr.bf16.mxu0 %v9765_v49  ;;  %7320 = vmatprep.subr.bf16.mxu1 %v9768_v50  ;;  %v9860_v49 = vld [vmem:[%s13681_s1 + $0x148c] ss:$16 sps:$4 sm:$0xff]   ;;  %v9855_v50 = vld [vmem:[%s13681_s1 + $0x1480] ss:$16 sps:$4 sm:$0xff]  }
 0x257   :  { %6665 = vmatpush1.bf16.msra.mxu0 %v9763_v51  ;;  %7321 = vmatpush1.bf16.msra.mxu1 %v9766_v52  ;;  %v9858_v51 = vld [vmem:[%s13681_s1 + $0x1488] ss:$16 sps:$4 sm:$0xff]   ;;  %v9863_v52 = vld [vmem:[%s13681_s1 + $0x14a4] ss:$16 sps:$4 sm:$0xff]  }
 0x258   :  { %6666 = vmatprep.subr.bf16.mxu0 %v9771_v53  ;;  %7322 = vmatprep.subr.bf16.mxu1 %v9774_v54  ;;  %v9866_v53 = vld [vmem:[%s13681_s1 + $0x14ac] ss:$16 sps:$4 sm:$0xff]   ;;  %v9861_v54 = vld [vmem:[%s13681_s1 + $0x14a0] ss:$16 sps:$4 sm:$0xff]  }
 0x25b   :  { %6667 = vmatpush1.bf16.msra.mxu0 %v9769_v55  ;;  %7323 = vmatpush1.bf16.msra.mxu1 %v9772_v56  ;;  %v9864_v55 = vld [vmem:[%s13681_s1 + $0x14a8] ss:$16 sps:$4 sm:$0xff]   ;;  %v9869_v56 = vld [vmem:[%s13681_s1 + $0x14c4] ss:$16 sps:$4 sm:$0xff]  }
 0x25c   :  { %6668 = vmatprep.subr.bf16.mxu0 %v9777_v57  ;;  %7324 = vmatprep.subr.bf16.mxu1 %v9780_v58  ;;  %v9872_v57 = vld [vmem:[%s13681_s1 + $0x14cc] ss:$16 sps:$4 sm:$0xff]   ;;  %v9867_v58 = vld [vmem:[%s13681_s1 + $0x14c0] ss:$16 sps:$4 sm:$0xff]  }
 0x25f   :  { %6669 = vmatpush1.bf16.msra.mxu0 %v9775_v59  ;;  %7325 = vmatpush1.bf16.msra.mxu1 %v9778_v60  ;;  %v9870_v59 = vld [vmem:[%s13681_s1 + $0x14c8] ss:$16 sps:$4 sm:$0xff]   ;;  %v9875_v60 = vld [vmem:[%s13681_s1 + $0x14e4] ss:$16 sps:$4 sm:$0xff]  }
 0x260   :  { %6670 = vmatprep.subr.bf16.mxu0 %v9783_v61  ;;  %7326 = vmatprep.subr.bf16.mxu1 %v9786_v62  ;;  %v9878_v61 = vld [vmem:[%s13681_s1 + $0x14ec] ss:$16 sps:$4 sm:$0xff]   ;;  %v9873_v62 = vld [vmem:[%s13681_s1 + $0x14e0] ss:$16 sps:$4 sm:$0xff]  }
 0x263   :  { %6671 = vmatpush1.bf16.msra.mxu0 %v9781_v63  ;;  %7327 = vmatpush1.bf16.msra.mxu1 %v9784_v0  ;;  %v9876_v63 = vld [vmem:[%s13681_s1 + $0x14e8] ss:$16 sps:$4 sm:$0xff]   ;;  %v9881_v0 = vld [vmem:[%s13681_s1 + $0x1504] ss:$16 sps:$4 sm:$0xff]  }
 0x264   :  { %6672 = vmatprep.subr.bf16.mxu0 %v9789_v1  ;;  %7328 = vmatprep.subr.bf16.mxu1 %v9792_v2  ;;  %v9884_v1 = vld [vmem:[%s13681_s1 + $0x150c] ss:$16 sps:$4 sm:$0xff]   ;;  %v9879_v2 = vld [vmem:[%s13681_s1 + $0x1500] ss:$16 sps:$4 sm:$0xff]  }
 0x267   :  { %6673 = vmatpush1.bf16.msra.mxu0 %v9787_v3  ;;  %7329 = vmatpush1.bf16.msra.mxu1 %v9790_v4  ;;  %v9882_v3 = vld [vmem:[%s13681_s1 + $0x1508] ss:$16 sps:$4 sm:$0xff]   ;;  %v9887_v4 = vld [vmem:[%s13681_s1 + $0x1524] ss:$16 sps:$4 sm:$0xff]  }
 0x268   :  { %6674 = vmatprep.subr.bf16.mxu0 %v9795_v5  ;;  %7330 = vmatprep.subr.bf16.mxu1 %v9798_v6  ;;  %v9890_v5 = vld [vmem:[%s13681_s1 + $0x152c] ss:$16 sps:$4 sm:$0xff]   ;;  %v9885_v6 = vld [vmem:[%s13681_s1 + $0x1520] ss:$16 sps:$4 sm:$0xff]  }
 0x26b   :  { %6675 = vmatpush1.bf16.msra.mxu0 %v9793_v7  ;;  %7331 = vmatpush1.bf16.msra.mxu1 %v9796_v8  ;;  %v9888_v7 = vld [vmem:[%s13681_s1 + $0x1528] ss:$16 sps:$4 sm:$0xff]   ;;  %v9893_v8 = vld [vmem:[%s13681_s1 + $0x1544] ss:$16 sps:$4 sm:$0xff]  }
 0x26c   :  { %6676 = vmatprep.subr.bf16.mxu0 %v9801_v9  ;;  %7332 = vmatprep.subr.bf16.mxu1 %v9804_v10  ;;  %v9896_v9 = vld [vmem:[%s13681_s1 + $0x154c] ss:$16 sps:$4 sm:$0xff]   ;;  %v9891_v10 = vld [vmem:[%s13681_s1 + $0x1540] ss:$16 sps:$4 sm:$0xff]  }
 0x26f   :  { %6677 = vmatpush1.bf16.msra.mxu0 %v9799_v12  ;;  %7333 = vmatpush1.bf16.msra.mxu1 %v9802_v13  ;;  %v9894_v12 = vld [vmem:[%s13681_s1 + $0x1548] ss:$16 sps:$4 sm:$0xff]   ;;  %v9899_v13 = vld [vmem:[%s13681_s1 + $0x1564] ss:$16 sps:$4 sm:$0xff]  }
 0x270   :  { %6678 = vmatprep.subr.bf16.mxu0 %v9807_v15  ;;  %7334 = vmatprep.subr.bf16.mxu1 %v9810_v11  ;;  %v9902_v15 = vld [vmem:[%s13681_s1 + $0x156c] ss:$16 sps:$4 sm:$0xff]   ;;  %v9897_v11 = vld [vmem:[%s13681_s1 + $0x1560] ss:$16 sps:$4 sm:$0xff]  }
 0x273   :  { %6679 = vmatpush1.bf16.msra.mxu0 %v9805_v17  ;;  %7335 = vmatpush1.bf16.msra.mxu1 %v9808_v14  ;;  %v9900_v17 = vld [vmem:[%s13681_s1 + $0x1568] ss:$16 sps:$4 sm:$0xff]   ;;  %v9905_v14 = vld [vmem:[%s13681_s1 + $0x1584] ss:$16 sps:$4 sm:$0xff]  }
 0x274   :  { %6680 = vmatprep.subr.bf16.mxu0 %v9813_v19  ;;  %7336 = vmatprep.subr.bf16.mxu1 %v9816_v20  ;;  %v9908_v19 = vld [vmem:[%s13681_s1 + $0x158c] ss:$16 sps:$4 sm:$0xff]   ;;  %v9903_v20 = vld [vmem:[%s13681_s1 + $0x1580] ss:$16 sps:$4 sm:$0xff]  }
 0x277   :  { %6681 = vmatpush1.bf16.msra.mxu0 %v9811_v16  ;;  %7337 = vmatpush1.bf16.msra.mxu1 %v9814_v22  ;;  %v9906_v16 = vld [vmem:[%s13681_s1 + $0x1588] ss:$16 sps:$4 sm:$0xff]   ;;  %v9911_v22 = vld [vmem:[%s13681_s1 + $0x15a4] ss:$16 sps:$4 sm:$0xff]  }
 0x278   :  { %6682 = vmatprep.subr.bf16.mxu0 %v9819_v23  ;;  %7338 = vmatprep.subr.bf16.mxu1 %v9822_v18  ;;  %v9914_v23 = vld [vmem:[%s13681_s1 + $0x15ac] ss:$16 sps:$4 sm:$0xff]   ;;  %v9909_v18 = vld [vmem:[%s13681_s1 + $0x15a0] ss:$16 sps:$4 sm:$0xff]  }
 0x27b   :  { %6683 = vmatpush1.bf16.msra.mxu0 %v9817_v25  ;;  %7339 = vmatpush1.bf16.msra.mxu1 %v9820_v26  ;;  %v9912_v25 = vld [vmem:[%s13681_s1 + $0x15a8] ss:$16 sps:$4 sm:$0xff]   ;;  %v9917_v26 = vld [vmem:[%s13681_s1 + $0x15c4] ss:$16 sps:$4 sm:$0xff]  }
 0x27c   :  { %6684 = vmatprep.subr.bf16.mxu0 %v9825_v21  ;;  %7340 = vmatprep.subr.bf16.mxu1 %v9828_v28  ;;  %v9920_v21 = vld [vmem:[%s13681_s1 + $0x15cc] ss:$16 sps:$4 sm:$0xff]   ;;  %v9915_v28 = vld [vmem:[%s13681_s1 + $0x15c0] ss:$16 sps:$4 sm:$0xff]  }
 0x27f   :  { %6685 = vmatpush1.bf16.msra.mxu0 %v9823_v29  ;;  %7341 = vmatpush1.bf16.msra.mxu1 %v9826_v24  ;;  %v9918_v29 = vld [vmem:[%s13681_s1 + $0x15c8] ss:$16 sps:$4 sm:$0xff]   ;;  %v9923_v24 = vld [vmem:[%s13681_s1 + $0x15e4] ss:$16 sps:$4 sm:$0xff]  }
 0x280   :  { %6695 = vmatprep.subr.bf16.mxu0 %v9833_v31  ;;  %7351 = vmatprep.subr.bf16.mxu1 %v9836_v32  ;;  %v9926_v31 = vld [vmem:[%s13681_s1 + $0x15ec] ss:$16 sps:$4 sm:$0xff]   ;;  %v9921_v32 = vld [vmem:[%s13681_s1 + $0x15e0] ss:$16 sps:$4 sm:$0xff]  }
 0x282   :  { %6687 = vmatmul.mubr.bf16.vlgmr.msra.gmra.mrb[0].mxu0 %v7693_v33  ;;  %7343 = vmatmul.mubr.bf16.vlgmr.msra.gmra.mrb[0].mxu1 %v7693_v33  ;;  %v9924_v33 = vld [vmem:[%s13681_s1 + $0x15e8] ss:$16 sps:$4 sm:$0xff]  }
 0x283   :  { %6696 = vmatpush1.bf16.msra.mxu0 %v9831_v34  ;;  %7352 = vmatpush1.bf16.msra.mxu1 %v9834_v35  ;;  %v9931_v34 = vld [vmem:[%s13681_s1 + $0x1604] ss:$16 sps:$4 sm:$0xff]   ;;  %v9934_v35 = vld [vmem:[%s13681_s1 + $0x160c] ss:$16 sps:$4 sm:$0xff]  }
 0x284   :  { %6697 = vmatprep.subr.bf16.mxu0 %v9839_v30  ;;  %7353 = vmatprep.subr.bf16.mxu1 %v9842_v36  ;;  %v7695_v30 = vcombine.low %v12452_v27, %v12452_v27  ;;  %v12653_v36 = vld [vmem:[%s13682_s0 + $0x58] sm:$0xff]  ;;  %v9937_v27 = vld [vmem:[%s13681_s1 + $0x1624] ss:$16 sps:$4 sm:$0xff]  }
 0x285   :  { %6727 = vmatprep.mubr.bf16.mxu0 %v7696_v37  ;;  %7383 = vmatprep.mubr.bf16.mxu1 %v7696_v37  ;;  %v9929_v37 = vld [vmem:[%s13681_s1 + $0x1600] ss:$16 sps:$4 sm:$0xff]  }
 0x287   :  { %6698 = vmatpush1.bf16.msra.mxu0 %v9837_v38  ;;  %7354 = vmatpush1.bf16.msra.mxu1 %v9840_v39  ;;  %v9932_v38 = vld [vmem:[%s13681_s1 + $0x1608] ss:$16 sps:$4 sm:$0xff]   ;;  %v9940_v39 = vld [vmem:[%s13681_s1 + $0x162c] ss:$16 sps:$4 sm:$0xff]  }
 0x288   :  { %6699 = vmatprep.subr.bf16.mxu0 %v9845_v40  ;;  %7355 = vmatprep.subr.bf16.mxu1 %v9848_v41  ;;  %v7698_v40 = vcombine.high %v12653_v36, %v12653_v36  ;;  %v9935_v41 = vld [vmem:[%s13681_s1 + $0x1620] ss:$16 sps:$4 sm:$0xff]  }
 0x28b   :  { %6700 = vmatpush1.bf16.msra.mxu0 %v9843_v42  ;;  %7356 = vmatpush1.bf16.msra.mxu1 %v9846_v43  ;;  %v9938_v42 = vld [vmem:[%s13681_s1 + $0x1628] ss:$16 sps:$4 sm:$0xff]   ;;  %v9943_v43 = vld [vmem:[%s13681_s1 + $0x1644] ss:$16 sps:$4 sm:$0xff]  }
 0x28c   :  { %6701 = vmatprep.subr.bf16.mxu0 %v9851_v44  ;;  %7357 = vmatprep.subr.bf16.mxu1 %v9854_v45  ;;  %v9946_v44 = vld [vmem:[%s13681_s1 + $0x164c] ss:$16 sps:$4 sm:$0xff]   ;;  %v9941_v45 = vld [vmem:[%s13681_s1 + $0x1640] ss:$16 sps:$4 sm:$0xff]  }
 0x28f   :  { %6702 = vmatpush1.bf16.msra.mxu0 %v9849_v46  ;;  %7358 = vmatpush1.bf16.msra.mxu1 %v9852_v47  ;;  %v9944_v46 = vld [vmem:[%s13681_s1 + $0x1648] ss:$16 sps:$4 sm:$0xff]   ;;  %v9949_v47 = vld [vmem:[%s13681_s1 + $0x1664] ss:$16 sps:$4 sm:$0xff]  }
 0x290   :  { %6703 = vmatprep.subr.bf16.mxu0 %v9857_v48  ;;  %7359 = vmatprep.subr.bf16.mxu1 %v9860_v49  ;;  %v9952_v48 = vld [vmem:[%s13681_s1 + $0x166c] ss:$16 sps:$4 sm:$0xff]   ;;  %v9947_v49 = vld [vmem:[%s13681_s1 + $0x1660] ss:$16 sps:$4 sm:$0xff]  }
 0x293   :  { %6704 = vmatpush1.bf16.msra.mxu0 %v9855_v50  ;;  %7360 = vmatpush1.bf16.msra.mxu1 %v9858_v51  ;;  %v9950_v50 = vld [vmem:[%s13681_s1 + $0x1668] ss:$16 sps:$4 sm:$0xff]   ;;  %v9955_v51 = vld [vmem:[%s13681_s1 + $0x1684] ss:$16 sps:$4 sm:$0xff]  }
 0x294   :  { %6705 = vmatprep.subr.bf16.mxu0 %v9863_v52  ;;  %7361 = vmatprep.subr.bf16.mxu1 %v9866_v53  ;;  %v9958_v52 = vld [vmem:[%s13681_s1 + $0x168c] ss:$16 sps:$4 sm:$0xff]   ;;  %v9953_v53 = vld [vmem:[%s13681_s1 + $0x1680] ss:$16 sps:$4 sm:$0xff]  }
 0x297   :  { %6706 = vmatpush1.bf16.msra.mxu0 %v9861_v54  ;;  %7362 = vmatpush1.bf16.msra.mxu1 %v9864_v55  ;;  %v9956_v54 = vld [vmem:[%s13681_s1 + $0x1688] ss:$16 sps:$4 sm:$0xff]   ;;  %v9961_v55 = vld [vmem:[%s13681_s1 + $0x16a4] ss:$16 sps:$4 sm:$0xff]  }
 0x298   :  { %6707 = vmatprep.subr.bf16.mxu0 %v9869_v56  ;;  %7363 = vmatprep.subr.bf16.mxu1 %v9872_v57  ;;  %v9964_v56 = vld [vmem:[%s13681_s1 + $0x16ac] ss:$16 sps:$4 sm:$0xff]   ;;  %v9959_v57 = vld [vmem:[%s13681_s1 + $0x16a0] ss:$16 sps:$4 sm:$0xff]  }
 0x29b   :  { %6708 = vmatpush1.bf16.msra.mxu0 %v9867_v58  ;;  %7364 = vmatpush1.bf16.msra.mxu1 %v9870_v59  ;;  %v9962_v58 = vld [vmem:[%s13681_s1 + $0x16a8] ss:$16 sps:$4 sm:$0xff]   ;;  %v9967_v59 = vld [vmem:[%s13681_s1 + $0x16c4] ss:$16 sps:$4 sm:$0xff]  }
 0x29c   :  { %6709 = vmatprep.subr.bf16.mxu0 %v9875_v60  ;;  %7365 = vmatprep.subr.bf16.mxu1 %v9878_v61  ;;  %v9970_v60 = vld [vmem:[%s13681_s1 + $0x16cc] ss:$16 sps:$4 sm:$0xff]   ;;  %v9965_v61 = vld [vmem:[%s13681_s1 + $0x16c0] ss:$16 sps:$4 sm:$0xff]  }
 0x29f   :  { %6710 = vmatpush1.bf16.msra.mxu0 %v9873_v62  ;;  %7366 = vmatpush1.bf16.msra.mxu1 %v9876_v63  ;;  %v9968_v62 = vld [vmem:[%s13681_s1 + $0x16c8] ss:$16 sps:$4 sm:$0xff]   ;;  %v9973_v63 = vld [vmem:[%s13681_s1 + $0x16e4] ss:$16 sps:$4 sm:$0xff]  }
 0x2a0   :  { %6711 = vmatprep.subr.bf16.mxu0 %v9881_v0  ;;  %7367 = vmatprep.subr.bf16.mxu1 %v9884_v1  ;;  %v9976_v0 = vld [vmem:[%s13681_s1 + $0x16ec] ss:$16 sps:$4 sm:$0xff]   ;;  %v9971_v1 = vld [vmem:[%s13681_s1 + $0x16e0] ss:$16 sps:$4 sm:$0xff]  }
 0x2a3   :  { %6712 = vmatpush1.bf16.msra.mxu0 %v9879_v2  ;;  %7368 = vmatpush1.bf16.msra.mxu1 %v9882_v3  ;;  %v9974_v2 = vld [vmem:[%s13681_s1 + $0x16e8] ss:$16 sps:$4 sm:$0xff]   ;;  %v9979_v3 = vld [vmem:[%s13681_s1 + $0x1704] ss:$16 sps:$4 sm:$0xff]  }
 0x2a4   :  { %6713 = vmatprep.subr.bf16.mxu0 %v9887_v4  ;;  %7369 = vmatprep.subr.bf16.mxu1 %v9890_v5  ;;  %v9982_v4 = vld [vmem:[%s13681_s1 + $0x170c] ss:$16 sps:$4 sm:$0xff]   ;;  %v9977_v5 = vld [vmem:[%s13681_s1 + $0x1700] ss:$16 sps:$4 sm:$0xff]  }
 0x2a7   :  { %6714 = vmatpush1.bf16.msra.mxu0 %v9885_v6  ;;  %7370 = vmatpush1.bf16.msra.mxu1 %v9888_v7  ;;  %v9980_v6 = vld [vmem:[%s13681_s1 + $0x1708] ss:$16 sps:$4 sm:$0xff]   ;;  %v9985_v7 = vld [vmem:[%s13681_s1 + $0x1724] ss:$16 sps:$4 sm:$0xff]  }
 0x2a8   :  { %6715 = vmatprep.subr.bf16.mxu0 %v9893_v8  ;;  %7371 = vmatprep.subr.bf16.mxu1 %v9896_v9  ;;  %v9988_v8 = vld [vmem:[%s13681_s1 + $0x172c] ss:$16 sps:$4 sm:$0xff]   ;;  %v9983_v9 = vld [vmem:[%s13681_s1 + $0x1720] ss:$16 sps:$4 sm:$0xff]  }
 0x2ab   :  { %6716 = vmatpush1.bf16.msra.mxu0 %v9891_v10  ;;  %7372 = vmatpush1.bf16.msra.mxu1 %v9894_v12  ;;  %v9986_v10 = vld [vmem:[%s13681_s1 + $0x1728] ss:$16 sps:$4 sm:$0xff]   ;;  %v9991_v12 = vld [vmem:[%s13681_s1 + $0x1744] ss:$16 sps:$4 sm:$0xff]  }
 0x2ac   :  { %6717 = vmatprep.subr.bf16.mxu0 %v9899_v13  ;;  %7373 = vmatprep.subr.bf16.mxu1 %v9902_v15  ;;  %v9994_v13 = vld [vmem:[%s13681_s1 + $0x174c] ss:$16 sps:$4 sm:$0xff]   ;;  %v9989_v15 = vld [vmem:[%s13681_s1 + $0x1740] ss:$16 sps:$4 sm:$0xff]  }
 0x2af   :  { %6718 = vmatpush1.bf16.msra.mxu0 %v9897_v11  ;;  %7374 = vmatpush1.bf16.msra.mxu1 %v9900_v17  ;;  %v9992_v11 = vld [vmem:[%s13681_s1 + $0x1748] ss:$16 sps:$4 sm:$0xff]   ;;  %v9997_v17 = vld [vmem:[%s13681_s1 + $0x1764] ss:$16 sps:$4 sm:$0xff]  }
 0x2b0   :  { %6719 = vmatprep.subr.bf16.mxu0 %v9905_v14  ;;  %7375 = vmatprep.subr.bf16.mxu1 %v9908_v19  ;;  %v10000_v14 = vld [vmem:[%s13681_s1 + $0x176c] ss:$16 sps:$4 sm:$0xff]   ;;  %v9995_v19 = vld [vmem:[%s13681_s1 + $0x1760] ss:$16 sps:$4 sm:$0xff]  }
 0x2b3   :  { %6720 = vmatpush1.bf16.msra.mxu0 %v9903_v20  ;;  %7376 = vmatpush1.bf16.msra.mxu1 %v9906_v16  ;;  %v9998_v20 = vld [vmem:[%s13681_s1 + $0x1768] ss:$16 sps:$4 sm:$0xff]   ;;  %v10003_v16 = vld [vmem:[%s13681_s1 + $0x1784] ss:$16 sps:$4 sm:$0xff]  }
 0x2b4   :  { %6721 = vmatprep.subr.bf16.mxu0 %v9911_v22  ;;  %7377 = vmatprep.subr.bf16.mxu1 %v9914_v23  ;;  %v10006_v22 = vld [vmem:[%s13681_s1 + $0x178c] ss:$16 sps:$4 sm:$0xff]   ;;  %v10001_v23 = vld [vmem:[%s13681_s1 + $0x1780] ss:$16 sps:$4 sm:$0xff]  }
 0x2b7   :  { %6722 = vmatpush1.bf16.msra.mxu0 %v9909_v18  ;;  %7378 = vmatpush1.bf16.msra.mxu1 %v9912_v25  ;;  %v10004_v18 = vld [vmem:[%s13681_s1 + $0x1788] ss:$16 sps:$4 sm:$0xff]   ;;  %v10009_v25 = vld [vmem:[%s13681_s1 + $0x17a4] ss:$16 sps:$4 sm:$0xff]  }
 0x2b8   :  { %6723 = vmatprep.subr.bf16.mxu0 %v9917_v26  ;;  %7379 = vmatprep.subr.bf16.mxu1 %v9920_v21  ;;  %v10012_v26 = vld [vmem:[%s13681_s1 + $0x17ac] ss:$16 sps:$4 sm:$0xff]   ;;  %v10007_v21 = vld [vmem:[%s13681_s1 + $0x17a0] ss:$16 sps:$4 sm:$0xff]  }
 0x2bb   :  { %6724 = vmatpush1.bf16.msra.mxu0 %v9915_v28  ;;  %7380 = vmatpush1.bf16.msra.mxu1 %v9918_v29  ;;  %v10010_v28 = vld [vmem:[%s13681_s1 + $0x17a8] ss:$16 sps:$4 sm:$0xff]   ;;  %v10015_v29 = vld [vmem:[%s13681_s1 + $0x17c4] ss:$16 sps:$4 sm:$0xff]  }
 0x2bc   :  { %6725 = vmatprep.subr.bf16.mxu0 %v9923_v24  ;;  %7381 = vmatprep.subr.bf16.mxu1 %v9926_v31  ;;  %v10018_v24 = vld [vmem:[%s13681_s1 + $0x17cc] ss:$16 sps:$4 sm:$0xff]   ;;  %v10013_v31 = vld [vmem:[%s13681_s1 + $0x17c0] ss:$16 sps:$4 sm:$0xff]  }
 0x2bf   :  { %6726 = vmatpush1.bf16.msra.mxu0 %v9921_v32  ;;  %7382 = vmatpush1.bf16.msra.mxu1 %v9924_v33  ;;  %v10016_v32 = vld [vmem:[%s13681_s1 + $0x17c8] ss:$16 sps:$4 sm:$0xff]   ;;  %v10021_v33 = vld [vmem:[%s13681_s1 + $0x17e4] ss:$16 sps:$4 sm:$0xff]  }
 0x2c0   :  { %6736 = vmatprep.subr.bf16.mxu0 %v9931_v34  ;;  %7392 = vmatprep.subr.bf16.mxu1 %v9934_v35  ;;  %v10024_v34 = vld [vmem:[%s13681_s1 + $0x17ec] ss:$16 sps:$4 sm:$0xff]   ;;  %v10019_v35 = vld [vmem:[%s13681_s1 + $0x17e0] ss:$16 sps:$4 sm:$0xff]  }
 0x2c2   :  { %6728 = vmatmul.mubr.bf16.vlgmr.msra.gmra.mrb[0].mxu0 %v7695_v30  ;;  %7384 = vmatmul.mubr.bf16.vlgmr.msra.gmra.mrb[0].mxu1 %v7695_v30  ;;  %v10022_v30 = vld [vmem:[%s13681_s1 + $0x17e8] ss:$16 sps:$4 sm:$0xff]  }
 0x2c3   :  { %6737 = vmatpush1.bf16.msra.mxu0 %v9929_v37  ;;  %7393 = vmatpush1.bf16.msra.mxu1 %v9932_v38  ;;  %v10029_v37 = vld [vmem:[%s13681_s1 + $0x1804] ss:$16 sps:$4 sm:$0xff]   ;;  %v10032_v38 = vld [vmem:[%s13681_s1 + $0x180c] ss:$16 sps:$4 sm:$0xff]  }
 0x2c4   :  { %6738 = vmatprep.subr.bf16.mxu0 %v9937_v27  ;;  %7394 = vmatprep.subr.bf16.mxu1 %v9940_v39  ;;  %v7697_v27 = vcombine.low %v12653_v36, %v12653_v36  ;;  %v12854_v39 = vld [vmem:[%s13682_s0 + $0x60] sm:$0xff] }
 0x2c5   :  { %6768 = vmatprep.mubr.bf16.mxu0 %v7698_v40  ;;  %7424 = vmatprep.mubr.bf16.mxu1 %v7698_v40  ;;  %v10027_v40 = vld [vmem:[%s13681_s1 + $0x1800] ss:$16 sps:$4 sm:$0xff]   ;;  %v10035_v36 = vld [vmem:[%s13681_s1 + $0x1824] ss:$16 sps:$4 sm:$0xff]  }
 0x2c7   :  { %6739 = vmatpush1.bf16.msra.mxu0 %v9935_v41  ;;  %7395 = vmatpush1.bf16.msra.mxu1 %v9938_v42  ;;  %v10030_v41 = vld [vmem:[%s13681_s1 + $0x1808] ss:$16 sps:$4 sm:$0xff]   ;;  %v10038_v42 = vld [vmem:[%s13681_s1 + $0x182c] ss:$16 sps:$4 sm:$0xff]  }
 0x2c8   :  { %6740 = vmatprep.subr.bf16.mxu0 %v9943_v43  ;;  %7396 = vmatprep.subr.bf16.mxu1 %v9946_v44  ;;  %v7700_v43 = vcombine.high %v12854_v39, %v12854_v39  ;;  %v10033_v44 = vld [vmem:[%s13681_s1 + $0x1820] ss:$16 sps:$4 sm:$0xff]  }
 0x2cb   :  { %6741 = vmatpush1.bf16.msra.mxu0 %v9941_v45  ;;  %7397 = vmatpush1.bf16.msra.mxu1 %v9944_v46  ;;  %v10036_v45 = vld [vmem:[%s13681_s1 + $0x1828] ss:$16 sps:$4 sm:$0xff]   ;;  %v10041_v46 = vld [vmem:[%s13681_s1 + $0x1844] ss:$16 sps:$4 sm:$0xff]  }
 0x2cc   :  { %6742 = vmatprep.subr.bf16.mxu0 %v9949_v47  ;;  %7398 = vmatprep.subr.bf16.mxu1 %v9952_v48  ;;  %v10044_v47 = vld [vmem:[%s13681_s1 + $0x184c] ss:$16 sps:$4 sm:$0xff]   ;;  %v10039_v48 = vld [vmem:[%s13681_s1 + $0x1840] ss:$16 sps:$4 sm:$0xff]  }
 0x2cf   :  { %6743 = vmatpush1.bf16.msra.mxu0 %v9947_v49  ;;  %7399 = vmatpush1.bf16.msra.mxu1 %v9950_v50  ;;  %v10042_v49 = vld [vmem:[%s13681_s1 + $0x1848] ss:$16 sps:$4 sm:$0xff]   ;;  %v10047_v50 = vld [vmem:[%s13681_s1 + $0x1864] ss:$16 sps:$4 sm:$0xff]  }
 0x2d0   :  { %6744 = vmatprep.subr.bf16.mxu0 %v9955_v51  ;;  %7400 = vmatprep.subr.bf16.mxu1 %v9958_v52  ;;  %v10050_v51 = vld [vmem:[%s13681_s1 + $0x186c] ss:$16 sps:$4 sm:$0xff]   ;;  %v10045_v52 = vld [vmem:[%s13681_s1 + $0x1860] ss:$16 sps:$4 sm:$0xff]  }
 0x2d3   :  { %6745 = vmatpush1.bf16.msra.mxu0 %v9953_v53  ;;  %7401 = vmatpush1.bf16.msra.mxu1 %v9956_v54  ;;  %v10048_v53 = vld [vmem:[%s13681_s1 + $0x1868] ss:$16 sps:$4 sm:$0xff]   ;;  %v10053_v54 = vld [vmem:[%s13681_s1 + $0x1884] ss:$16 sps:$4 sm:$0xff]  }
 0x2d4   :  { %6746 = vmatprep.subr.bf16.mxu0 %v9961_v55  ;;  %7402 = vmatprep.subr.bf16.mxu1 %v9964_v56  ;;  %v10056_v55 = vld [vmem:[%s13681_s1 + $0x188c] ss:$16 sps:$4 sm:$0xff]   ;;  %v10051_v56 = vld [vmem:[%s13681_s1 + $0x1880] ss:$16 sps:$4 sm:$0xff]  }
 0x2d7   :  { %6747 = vmatpush1.bf16.msra.mxu0 %v9959_v57  ;;  %7403 = vmatpush1.bf16.msra.mxu1 %v9962_v58  ;;  %v10054_v57 = vld [vmem:[%s13681_s1 + $0x1888] ss:$16 sps:$4 sm:$0xff]   ;;  %v10059_v58 = vld [vmem:[%s13681_s1 + $0x18a4] ss:$16 sps:$4 sm:$0xff]  }
 0x2d8   :  { %6748 = vmatprep.subr.bf16.mxu0 %v9967_v59  ;;  %7404 = vmatprep.subr.bf16.mxu1 %v9970_v60  ;;  %v10062_v59 = vld [vmem:[%s13681_s1 + $0x18ac] ss:$16 sps:$4 sm:$0xff]   ;;  %v10057_v60 = vld [vmem:[%s13681_s1 + $0x18a0] ss:$16 sps:$4 sm:$0xff]  }
 0x2db   :  { %6749 = vmatpush1.bf16.msra.mxu0 %v9965_v61  ;;  %7405 = vmatpush1.bf16.msra.mxu1 %v9968_v62  ;;  %v10060_v61 = vld [vmem:[%s13681_s1 + $0x18a8] ss:$16 sps:$4 sm:$0xff]   ;;  %v10065_v62 = vld [vmem:[%s13681_s1 + $0x18c4] ss:$16 sps:$4 sm:$0xff]  }
 0x2dc   :  { %6750 = vmatprep.subr.bf16.mxu0 %v9973_v63  ;;  %7406 = vmatprep.subr.bf16.mxu1 %v9976_v0  ;;  %v10068_v63 = vld [vmem:[%s13681_s1 + $0x18cc] ss:$16 sps:$4 sm:$0xff]   ;;  %v10063_v0 = vld [vmem:[%s13681_s1 + $0x18c0] ss:$16 sps:$4 sm:$0xff]  }
 0x2df   :  { %6751 = vmatpush1.bf16.msra.mxu0 %v9971_v1  ;;  %7407 = vmatpush1.bf16.msra.mxu1 %v9974_v2  ;;  %v10066_v1 = vld [vmem:[%s13681_s1 + $0x18c8] ss:$16 sps:$4 sm:$0xff]   ;;  %v10071_v2 = vld [vmem:[%s13681_s1 + $0x18e4] ss:$16 sps:$4 sm:$0xff]  }
 0x2e0   :  { %6752 = vmatprep.subr.bf16.mxu0 %v9979_v3  ;;  %7408 = vmatprep.subr.bf16.mxu1 %v9982_v4  ;;  %v10074_v3 = vld [vmem:[%s13681_s1 + $0x18ec] ss:$16 sps:$4 sm:$0xff]   ;;  %v10069_v4 = vld [vmem:[%s13681_s1 + $0x18e0] ss:$16 sps:$4 sm:$0xff]  }
 0x2e3   :  { %6753 = vmatpush1.bf16.msra.mxu0 %v9977_v5  ;;  %7409 = vmatpush1.bf16.msra.mxu1 %v9980_v6  ;;  %v10072_v5 = vld [vmem:[%s13681_s1 + $0x18e8] ss:$16 sps:$4 sm:$0xff]   ;;  %v10077_v6 = vld [vmem:[%s13681_s1 + $0x1904] ss:$16 sps:$4 sm:$0xff]  }
 0x2e4   :  { %6754 = vmatprep.subr.bf16.mxu0 %v9985_v7  ;;  %7410 = vmatprep.subr.bf16.mxu1 %v9988_v8  ;;  %v10080_v7 = vld [vmem:[%s13681_s1 + $0x190c] ss:$16 sps:$4 sm:$0xff]   ;;  %v10075_v8 = vld [vmem:[%s13681_s1 + $0x1900] ss:$16 sps:$4 sm:$0xff]  }
 0x2e7   :  { %6755 = vmatpush1.bf16.msra.mxu0 %v9983_v9  ;;  %7411 = vmatpush1.bf16.msra.mxu1 %v9986_v10  ;;  %v10078_v9 = vld [vmem:[%s13681_s1 + $0x1908] ss:$16 sps:$4 sm:$0xff]   ;;  %v10083_v10 = vld [vmem:[%s13681_s1 + $0x1924] ss:$16 sps:$4 sm:$0xff]  }
 0x2e8   :  { %6756 = vmatprep.subr.bf16.mxu0 %v9991_v12  ;;  %7412 = vmatprep.subr.bf16.mxu1 %v9994_v13  ;;  %v10086_v12 = vld [vmem:[%s13681_s1 + $0x192c] ss:$16 sps:$4 sm:$0xff]   ;;  %v10081_v13 = vld [vmem:[%s13681_s1 + $0x1920] ss:$16 sps:$4 sm:$0xff]  }
 0x2eb   :  { %6757 = vmatpush1.bf16.msra.mxu0 %v9989_v15  ;;  %7413 = vmatpush1.bf16.msra.mxu1 %v9992_v11  ;;  %v10084_v15 = vld [vmem:[%s13681_s1 + $0x1928] ss:$16 sps:$4 sm:$0xff]   ;;  %v10089_v11 = vld [vmem:[%s13681_s1 + $0x1944] ss:$16 sps:$4 sm:$0xff]  }
 0x2ec   :  { %6758 = vmatprep.subr.bf16.mxu0 %v9997_v17  ;;  %7414 = vmatprep.subr.bf16.mxu1 %v10000_v14  ;;  %v10092_v17 = vld [vmem:[%s13681_s1 + $0x194c] ss:$16 sps:$4 sm:$0xff]   ;;  %v10087_v14 = vld [vmem:[%s13681_s1 + $0x1940] ss:$16 sps:$4 sm:$0xff]  }
 0x2ef   :  { %6759 = vmatpush1.bf16.msra.mxu0 %v9995_v19  ;;  %7415 = vmatpush1.bf16.msra.mxu1 %v9998_v20  ;;  %v10090_v19 = vld [vmem:[%s13681_s1 + $0x1948] ss:$16 sps:$4 sm:$0xff]   ;;  %v10095_v20 = vld [vmem:[%s13681_s1 + $0x1964] ss:$16 sps:$4 sm:$0xff]  }
 0x2f0   :  { %6760 = vmatprep.subr.bf16.mxu0 %v10003_v16  ;;  %7416 = vmatprep.subr.bf16.mxu1 %v10006_v22  ;;  %v10098_v16 = vld [vmem:[%s13681_s1 + $0x196c] ss:$16 sps:$4 sm:$0xff]   ;;  %v10093_v22 = vld [vmem:[%s13681_s1 + $0x1960] ss:$16 sps:$4 sm:$0xff]  }
 0x2f3   :  { %6761 = vmatpush1.bf16.msra.mxu0 %v10001_v23  ;;  %7417 = vmatpush1.bf16.msra.mxu1 %v10004_v18  ;;  %v10096_v23 = vld [vmem:[%s13681_s1 + $0x1968] ss:$16 sps:$4 sm:$0xff]   ;;  %v10101_v18 = vld [vmem:[%s13681_s1 + $0x1984] ss:$16 sps:$4 sm:$0xff]  }
 0x2f4   :  { %6762 = vmatprep.subr.bf16.mxu0 %v10009_v25  ;;  %7418 = vmatprep.subr.bf16.mxu1 %v10012_v26  ;;  %v10104_v25 = vld [vmem:[%s13681_s1 + $0x198c] ss:$16 sps:$4 sm:$0xff]   ;;  %v10099_v26 = vld [vmem:[%s13681_s1 + $0x1980] ss:$16 sps:$4 sm:$0xff]  }
 0x2f7   :  { %6763 = vmatpush1.bf16.msra.mxu0 %v10007_v21  ;;  %7419 = vmatpush1.bf16.msra.mxu1 %v10010_v28  ;;  %v10102_v21 = vld [vmem:[%s13681_s1 + $0x1988] ss:$16 sps:$4 sm:$0xff]   ;;  %v10107_v28 = vld [vmem:[%s13681_s1 + $0x19a4] ss:$16 sps:$4 sm:$0xff]  }
 0x2f8   :  { %6764 = vmatprep.subr.bf16.mxu0 %v10015_v29  ;;  %7420 = vmatprep.subr.bf16.mxu1 %v10018_v24  ;;  %v10110_v29 = vld [vmem:[%s13681_s1 + $0x19ac] ss:$16 sps:$4 sm:$0xff]   ;;  %v10105_v24 = vld [vmem:[%s13681_s1 + $0x19a0] ss:$16 sps:$4 sm:$0xff]  }
 0x2fb   :  { %6765 = vmatpush1.bf16.msra.mxu0 %v10013_v31  ;;  %7421 = vmatpush1.bf16.msra.mxu1 %v10016_v32  ;;  %v10108_v31 = vld [vmem:[%s13681_s1 + $0x19a8] ss:$16 sps:$4 sm:$0xff]   ;;  %v10113_v32 = vld [vmem:[%s13681_s1 + $0x19c4] ss:$16 sps:$4 sm:$0xff]  }
 0x2fc   :  { %6766 = vmatprep.subr.bf16.mxu0 %v10021_v33  ;;  %7422 = vmatprep.subr.bf16.mxu1 %v10024_v34  ;;  %v10116_v33 = vld [vmem:[%s13681_s1 + $0x19cc] ss:$16 sps:$4 sm:$0xff]   ;;  %v10111_v34 = vld [vmem:[%s13681_s1 + $0x19c0] ss:$16 sps:$4 sm:$0xff]  }
 0x2ff   :  { %6767 = vmatpush1.bf16.msra.mxu0 %v10019_v35  ;;  %7423 = vmatpush1.bf16.msra.mxu1 %v10022_v30  ;;  %v10114_v35 = vld [vmem:[%s13681_s1 + $0x19c8] ss:$16 sps:$4 sm:$0xff]   ;;  %v10119_v30 = vld [vmem:[%s13681_s1 + $0x19e4] ss:$16 sps:$4 sm:$0xff]  }
 0x300   :  { %6777 = vmatprep.subr.bf16.mxu0 %v10029_v37  ;;  %7433 = vmatprep.subr.bf16.mxu1 %v10032_v38  ;;  %v10122_v37 = vld [vmem:[%s13681_s1 + $0x19ec] ss:$16 sps:$4 sm:$0xff]   ;;  %v10117_v38 = vld [vmem:[%s13681_s1 + $0x19e0] ss:$16 sps:$4 sm:$0xff]  }
 0x302   :  { %6769 = vmatmul.mubr.bf16.vlgmr.msra.gmra.mrb[0].mxu0 %v7697_v27  ;;  %7425 = vmatmul.mubr.bf16.vlgmr.msra.gmra.mrb[0].mxu1 %v7697_v27  ;;  %v10120_v27 = vld [vmem:[%s13681_s1 + $0x19e8] ss:$16 sps:$4 sm:$0xff]  }
 0x303   :  { %6778 = vmatpush1.bf16.msra.mxu0 %v10027_v40  ;;  %7434 = vmatpush1.bf16.msra.mxu1 %v10030_v41  ;;  %v10127_v40 = vld [vmem:[%s13681_s1 + $0x1a04] ss:$16 sps:$4 sm:$0xff]   ;;  %v10130_v41 = vld [vmem:[%s13681_s1 + $0x1a0c] ss:$16 sps:$4 sm:$0xff]  }
 0x304   :  { %6779 = vmatprep.subr.bf16.mxu0 %v10035_v36  ;;  %7435 = vmatprep.subr.bf16.mxu1 %v10038_v42  ;;  %v7699_v36 = vcombine.low %v12854_v39, %v12854_v39  ;;  %v13055_v42 = vld [vmem:[%s13682_s0 + $0x68] sm:$0xff]  ;;  %v10133_v39 = vld [vmem:[%s13681_s1 + $0x1a24] ss:$16 sps:$4 sm:$0xff]  }
 0x305   :  { %6809 = vmatprep.mubr.bf16.mxu0 %v7700_v43  ;;  %7465 = vmatprep.mubr.bf16.mxu1 %v7700_v43  ;;  %v10125_v43 = vld [vmem:[%s13681_s1 + $0x1a00] ss:$16 sps:$4 sm:$0xff]  }
 0x307   :  { %6780 = vmatpush1.bf16.msra.mxu0 %v10033_v44  ;;  %7436 = vmatpush1.bf16.msra.mxu1 %v10036_v45  ;;  %v10128_v44 = vld [vmem:[%s13681_s1 + $0x1a08] ss:$16 sps:$4 sm:$0xff]   ;;  %v10136_v45 = vld [vmem:[%s13681_s1 + $0x1a2c] ss:$16 sps:$4 sm:$0xff]  }
 0x308   :  { %6781 = vmatprep.subr.bf16.mxu0 %v10041_v46  ;;  %7437 = vmatprep.subr.bf16.mxu1 %v10044_v47  ;;  %v7702_v46 = vcombine.high %v13055_v42, %v13055_v42  ;;  %v10131_v47 = vld [vmem:[%s13681_s1 + $0x1a20] ss:$16 sps:$4 sm:$0xff]  }
 0x30b   :  { %6782 = vmatpush1.bf16.msra.mxu0 %v10039_v48  ;;  %7438 = vmatpush1.bf16.msra.mxu1 %v10042_v49  ;;  %v10134_v48 = vld [vmem:[%s13681_s1 + $0x1a28] ss:$16 sps:$4 sm:$0xff]   ;;  %v10139_v49 = vld [vmem:[%s13681_s1 + $0x1a44] ss:$16 sps:$4 sm:$0xff]  }
 0x30c   :  { %6783 = vmatprep.subr.bf16.mxu0 %v10047_v50  ;;  %7439 = vmatprep.subr.bf16.mxu1 %v10050_v51  ;;  %v10142_v50 = vld [vmem:[%s13681_s1 + $0x1a4c] ss:$16 sps:$4 sm:$0xff]   ;;  %v10137_v51 = vld [vmem:[%s13681_s1 + $0x1a40] ss:$16 sps:$4 sm:$0xff]  }
 0x30f   :  { %6784 = vmatpush1.bf16.msra.mxu0 %v10045_v52  ;;  %7440 = vmatpush1.bf16.msra.mxu1 %v10048_v53  ;;  %v10140_v52 = vld [vmem:[%s13681_s1 + $0x1a48] ss:$16 sps:$4 sm:$0xff]   ;;  %v10145_v53 = vld [vmem:[%s13681_s1 + $0x1a64] ss:$16 sps:$4 sm:$0xff]  }
 0x310   :  { %6785 = vmatprep.subr.bf16.mxu0 %v10053_v54  ;;  %7441 = vmatprep.subr.bf16.mxu1 %v10056_v55  ;;  %v10148_v54 = vld [vmem:[%s13681_s1 + $0x1a6c] ss:$16 sps:$4 sm:$0xff]   ;;  %v10143_v55 = vld [vmem:[%s13681_s1 + $0x1a60] ss:$16 sps:$4 sm:$0xff]  }
 0x313   :  { %6786 = vmatpush1.bf16.msra.mxu0 %v10051_v56  ;;  %7442 = vmatpush1.bf16.msra.mxu1 %v10054_v57  ;;  %v10146_v56 = vld [vmem:[%s13681_s1 + $0x1a68] ss:$16 sps:$4 sm:$0xff]   ;;  %v10151_v57 = vld [vmem:[%s13681_s1 + $0x1a84] ss:$16 sps:$4 sm:$0xff]  }
 0x314   :  { %6787 = vmatprep.subr.bf16.mxu0 %v10059_v58  ;;  %7443 = vmatprep.subr.bf16.mxu1 %v10062_v59  ;;  %v10154_v58 = vld [vmem:[%s13681_s1 + $0x1a8c] ss:$16 sps:$4 sm:$0xff]   ;;  %v10149_v59 = vld [vmem:[%s13681_s1 + $0x1a80] ss:$16 sps:$4 sm:$0xff]  }
 0x317   :  { %6788 = vmatpush1.bf16.msra.mxu0 %v10057_v60  ;;  %7444 = vmatpush1.bf16.msra.mxu1 %v10060_v61  ;;  %v10152_v60 = vld [vmem:[%s13681_s1 + $0x1a88] ss:$16 sps:$4 sm:$0xff]   ;;  %v10157_v61 = vld [vmem:[%s13681_s1 + $0x1aa4] ss:$16 sps:$4 sm:$0xff]  }
 0x318   :  { %6789 = vmatprep.subr.bf16.mxu0 %v10065_v62  ;;  %7445 = vmatprep.subr.bf16.mxu1 %v10068_v63  ;;  %v10160_v62 = vld [vmem:[%s13681_s1 + $0x1aac] ss:$16 sps:$4 sm:$0xff]   ;;  %v10155_v63 = vld [vmem:[%s13681_s1 + $0x1aa0] ss:$16 sps:$4 sm:$0xff]  }
 0x31b   :  { %6790 = vmatpush1.bf16.msra.mxu0 %v10063_v0  ;;  %7446 = vmatpush1.bf16.msra.mxu1 %v10066_v1  ;;  %v10158_v0 = vld [vmem:[%s13681_s1 + $0x1aa8] ss:$16 sps:$4 sm:$0xff]   ;;  %v10163_v1 = vld [vmem:[%s13681_s1 + $0x1ac4] ss:$16 sps:$4 sm:$0xff]  }
 0x31c   :  { %6791 = vmatprep.subr.bf16.mxu0 %v10071_v2  ;;  %7447 = vmatprep.subr.bf16.mxu1 %v10074_v3  ;;  %v10166_v2 = vld [vmem:[%s13681_s1 + $0x1acc] ss:$16 sps:$4 sm:$0xff]   ;;  %v10161_v3 = vld [vmem:[%s13681_s1 + $0x1ac0] ss:$16 sps:$4 sm:$0xff]  }
 0x31f   :  { %6792 = vmatpush1.bf16.msra.mxu0 %v10069_v4  ;;  %7448 = vmatpush1.bf16.msra.mxu1 %v10072_v5  ;;  %v10164_v4 = vld [vmem:[%s13681_s1 + $0x1ac8] ss:$16 sps:$4 sm:$0xff]   ;;  %v10169_v5 = vld [vmem:[%s13681_s1 + $0x1ae4] ss:$16 sps:$4 sm:$0xff]  }
 0x320   :  { %6793 = vmatprep.subr.bf16.mxu0 %v10077_v6  ;;  %7449 = vmatprep.subr.bf16.mxu1 %v10080_v7  ;;  %v10172_v6 = vld [vmem:[%s13681_s1 + $0x1aec] ss:$16 sps:$4 sm:$0xff]   ;;  %v10167_v7 = vld [vmem:[%s13681_s1 + $0x1ae0] ss:$16 sps:$4 sm:$0xff]  }
 0x323   :  { %6794 = vmatpush1.bf16.msra.mxu0 %v10075_v8  ;;  %7450 = vmatpush1.bf16.msra.mxu1 %v10078_v9  ;;  %v10170_v8 = vld [vmem:[%s13681_s1 + $0x1ae8] ss:$16 sps:$4 sm:$0xff]   ;;  %v10175_v9 = vld [vmem:[%s13681_s1 + $0x1b04] ss:$16 sps:$4 sm:$0xff]  }
 0x324   :  { %6795 = vmatprep.subr.bf16.mxu0 %v10083_v10  ;;  %7451 = vmatprep.subr.bf16.mxu1 %v10086_v12  ;;  %v10178_v10 = vld [vmem:[%s13681_s1 + $0x1b0c] ss:$16 sps:$4 sm:$0xff]   ;;  %v10173_v12 = vld [vmem:[%s13681_s1 + $0x1b00] ss:$16 sps:$4 sm:$0xff]  }
 0x327   :  { %6796 = vmatpush1.bf16.msra.mxu0 %v10081_v13  ;;  %7452 = vmatpush1.bf16.msra.mxu1 %v10084_v15  ;;  %v10176_v13 = vld [vmem:[%s13681_s1 + $0x1b08] ss:$16 sps:$4 sm:$0xff]   ;;  %v10181_v15 = vld [vmem:[%s13681_s1 + $0x1b24] ss:$16 sps:$4 sm:$0xff]  }
 0x328   :  { %6797 = vmatprep.subr.bf16.mxu0 %v10089_v11  ;;  %7453 = vmatprep.subr.bf16.mxu1 %v10092_v17  ;;  %v10184_v11 = vld [vmem:[%s13681_s1 + $0x1b2c] ss:$16 sps:$4 sm:$0xff]   ;;  %v10179_v17 = vld [vmem:[%s13681_s1 + $0x1b20] ss:$16 sps:$4 sm:$0xff]  }
 0x32b   :  { %6798 = vmatpush1.bf16.msra.mxu0 %v10087_v14  ;;  %7454 = vmatpush1.bf16.msra.mxu1 %v10090_v19  ;;  %v10182_v14 = vld [vmem:[%s13681_s1 + $0x1b28] ss:$16 sps:$4 sm:$0xff]   ;;  %v10187_v19 = vld [vmem:[%s13681_s1 + $0x1b44] ss:$16 sps:$4 sm:$0xff]  }
 0x32c   :  { %6799 = vmatprep.subr.bf16.mxu0 %v10095_v20  ;;  %7455 = vmatprep.subr.bf16.mxu1 %v10098_v16  ;;  %v10190_v20 = vld [vmem:[%s13681_s1 + $0x1b4c] ss:$16 sps:$4 sm:$0xff]   ;;  %v10185_v16 = vld [vmem:[%s13681_s1 + $0x1b40] ss:$16 sps:$4 sm:$0xff]  }
 0x32f   :  { %6800 = vmatpush1.bf16.msra.mxu0 %v10093_v22  ;;  %7456 = vmatpush1.bf16.msra.mxu1 %v10096_v23  ;;  %v10188_v22 = vld [vmem:[%s13681_s1 + $0x1b48] ss:$16 sps:$4 sm:$0xff]   ;;  %v10193_v23 = vld [vmem:[%s13681_s1 + $0x1b64] ss:$16 sps:$4 sm:$0xff]  }
 0x330   :  { %6801 = vmatprep.subr.bf16.mxu0 %v10101_v18  ;;  %7457 = vmatprep.subr.bf16.mxu1 %v10104_v25  ;;  %v10196_v18 = vld [vmem:[%s13681_s1 + $0x1b6c] ss:$16 sps:$4 sm:$0xff]   ;;  %v10191_v25 = vld [vmem:[%s13681_s1 + $0x1b60] ss:$16 sps:$4 sm:$0xff]  }
 0x333   :  { %6802 = vmatpush1.bf16.msra.mxu0 %v10099_v26  ;;  %7458 = vmatpush1.bf16.msra.mxu1 %v10102_v21  ;;  %v10194_v26 = vld [vmem:[%s13681_s1 + $0x1b68] ss:$16 sps:$4 sm:$0xff]   ;;  %v10199_v21 = vld [vmem:[%s13681_s1 + $0x1b84] ss:$16 sps:$4 sm:$0xff]  }
 0x334   :  { %6803 = vmatprep.subr.bf16.mxu0 %v10107_v28  ;;  %7459 = vmatprep.subr.bf16.mxu1 %v10110_v29  ;;  %v10202_v28 = vld [vmem:[%s13681_s1 + $0x1b8c] ss:$16 sps:$4 sm:$0xff]   ;;  %v10197_v29 = vld [vmem:[%s13681_s1 + $0x1b80] ss:$16 sps:$4 sm:$0xff]  }
 0x337   :  { %6804 = vmatpush1.bf16.msra.mxu0 %v10105_v24  ;;  %7460 = vmatpush1.bf16.msra.mxu1 %v10108_v31  ;;  %v10200_v24 = vld [vmem:[%s13681_s1 + $0x1b88] ss:$16 sps:$4 sm:$0xff]   ;;  %v10205_v31 = vld [vmem:[%s13681_s1 + $0x1ba4] ss:$16 sps:$4 sm:$0xff]  }
 0x338   :  { %6805 = vmatprep.subr.bf16.mxu0 %v10113_v32  ;;  %7461 = vmatprep.subr.bf16.mxu1 %v10116_v33  ;;  %v10208_v32 = vld [vmem:[%s13681_s1 + $0x1bac] ss:$16 sps:$4 sm:$0xff]   ;;  %v10203_v33 = vld [vmem:[%s13681_s1 + $0x1ba0] ss:$16 sps:$4 sm:$0xff]  }
 0x33b   :  { %6806 = vmatpush1.bf16.msra.mxu0 %v10111_v34  ;;  %7462 = vmatpush1.bf16.msra.mxu1 %v10114_v35  ;;  %v10206_v34 = vld [vmem:[%s13681_s1 + $0x1ba8] ss:$16 sps:$4 sm:$0xff]   ;;  %v10211_v35 = vld [vmem:[%s13681_s1 + $0x1bc4] ss:$16 sps:$4 sm:$0xff]  }
 0x33c   :  { %6807 = vmatprep.subr.bf16.mxu0 %v10119_v30  ;;  %7463 = vmatprep.subr.bf16.mxu1 %v10122_v37  ;;  %v10214_v30 = vld [vmem:[%s13681_s1 + $0x1bcc] ss:$16 sps:$4 sm:$0xff]   ;;  %v10209_v37 = vld [vmem:[%s13681_s1 + $0x1bc0] ss:$16 sps:$4 sm:$0xff]  }
 0x33f   :  { %6808 = vmatpush1.bf16.msra.mxu0 %v10117_v38  ;;  %7464 = vmatpush1.bf16.msra.mxu1 %v10120_v27  ;;  %v10212_v38 = vld [vmem:[%s13681_s1 + $0x1bc8] ss:$16 sps:$4 sm:$0xff]   ;;  %v10217_v27 = vld [vmem:[%s13681_s1 + $0x1be4] ss:$16 sps:$4 sm:$0xff]  }
 0x340   :  { %6818 = vmatprep.subr.bf16.mxu0 %v10127_v40  ;;  %7474 = vmatprep.subr.bf16.mxu1 %v10130_v41  ;;  %v10220_v40 = vld [vmem:[%s13681_s1 + $0x1bec] ss:$16 sps:$4 sm:$0xff]   ;;  %v10215_v41 = vld [vmem:[%s13681_s1 + $0x1be0] ss:$16 sps:$4 sm:$0xff]  }
 0x342   :  { %6810 = vmatmul.mubr.bf16.vlgmr.msra.gmra.mrb[0].mxu0 %v7699_v36  ;;  %7466 = vmatmul.mubr.bf16.vlgmr.msra.gmra.mrb[0].mxu1 %v7699_v36  ;;  %v10218_v36 = vld [vmem:[%s13681_s1 + $0x1be8] ss:$16 sps:$4 sm:$0xff]  }
 0x343   :  { %6819 = vmatpush1.bf16.msra.mxu0 %v10125_v43  ;;  %7475 = vmatpush1.bf16.msra.mxu1 %v10128_v44  ;;  %v10225_v43 = vld [vmem:[%s13681_s1 + $0x1c04] ss:$16 sps:$4 sm:$0xff]   ;;  %v10228_v44 = vld [vmem:[%s13681_s1 + $0x1c0c] ss:$16 sps:$4 sm:$0xff]  }
 0x344   :  { %6820 = vmatprep.subr.bf16.mxu0 %v10133_v39  ;;  %7476 = vmatprep.subr.bf16.mxu1 %v10136_v45  ;;  %v7701_v39 = vcombine.low %v13055_v42, %v13055_v42  ;;  %v13256_v45 = vld [vmem:[%s13682_s0 + $0x70] sm:$0xff] }
 0x345   :  { %6850 = vmatprep.mubr.bf16.mxu0 %v7702_v46  ;;  %7506 = vmatprep.mubr.bf16.mxu1 %v7702_v46  ;;  %v10223_v46 = vld [vmem:[%s13681_s1 + $0x1c00] ss:$16 sps:$4 sm:$0xff]   ;;  %v10231_v42 = vld [vmem:[%s13681_s1 + $0x1c24] ss:$16 sps:$4 sm:$0xff]  }
 0x347   :  { %6821 = vmatpush1.bf16.msra.mxu0 %v10131_v47  ;;  %7477 = vmatpush1.bf16.msra.mxu1 %v10134_v48  ;;  %v10226_v47 = vld [vmem:[%s13681_s1 + $0x1c08] ss:$16 sps:$4 sm:$0xff]   ;;  %v10234_v48 = vld [vmem:[%s13681_s1 + $0x1c2c] ss:$16 sps:$4 sm:$0xff]  }
 0x348   :  { %6822 = vmatprep.subr.bf16.mxu0 %v10139_v49  ;;  %7478 = vmatprep.subr.bf16.mxu1 %v10142_v50  ;;  %v7704_v49 = vcombine.high %v13256_v45, %v13256_v45  ;;  %v10229_v50 = vld [vmem:[%s13681_s1 + $0x1c20] ss:$16 sps:$4 sm:$0xff]  }
 0x34b   :  { %6823 = vmatpush1.bf16.msra.mxu0 %v10137_v51  ;;  %7479 = vmatpush1.bf16.msra.mxu1 %v10140_v52  ;;  %v10232_v51 = vld [vmem:[%s13681_s1 + $0x1c28] ss:$16 sps:$4 sm:$0xff]   ;;  %v10237_v52 = vld [vmem:[%s13681_s1 + $0x1c44] ss:$16 sps:$4 sm:$0xff]  }
 0x34c   :  { %6824 = vmatprep.subr.bf16.mxu0 %v10145_v53  ;;  %7480 = vmatprep.subr.bf16.mxu1 %v10148_v54  ;;  %v10240_v53 = vld [vmem:[%s13681_s1 + $0x1c4c] ss:$16 sps:$4 sm:$0xff]   ;;  %v10235_v54 = vld [vmem:[%s13681_s1 + $0x1c40] ss:$16 sps:$4 sm:$0xff]  }
 0x34f   :  { %6825 = vmatpush1.bf16.msra.mxu0 %v10143_v55  ;;  %7481 = vmatpush1.bf16.msra.mxu1 %v10146_v56  ;;  %v10238_v55 = vld [vmem:[%s13681_s1 + $0x1c48] ss:$16 sps:$4 sm:$0xff]   ;;  %v10243_v56 = vld [vmem:[%s13681_s1 + $0x1c64] ss:$16 sps:$4 sm:$0xff]  }
 0x350   :  { %6826 = vmatprep.subr.bf16.mxu0 %v10151_v57  ;;  %7482 = vmatprep.subr.bf16.mxu1 %v10154_v58  ;;  %v10246_v57 = vld [vmem:[%s13681_s1 + $0x1c6c] ss:$16 sps:$4 sm:$0xff]   ;;  %v10241_v58 = vld [vmem:[%s13681_s1 + $0x1c60] ss:$16 sps:$4 sm:$0xff]  }
 0x353   :  { %6827 = vmatpush1.bf16.msra.mxu0 %v10149_v59  ;;  %7483 = vmatpush1.bf16.msra.mxu1 %v10152_v60  ;;  %v10244_v59 = vld [vmem:[%s13681_s1 + $0x1c68] ss:$16 sps:$4 sm:$0xff]   ;;  %v10249_v60 = vld [vmem:[%s13681_s1 + $0x1c84] ss:$16 sps:$4 sm:$0xff]  }
 0x354   :  { %6828 = vmatprep.subr.bf16.mxu0 %v10157_v61  ;;  %7484 = vmatprep.subr.bf16.mxu1 %v10160_v62  ;;  %v10252_v61 = vld [vmem:[%s13681_s1 + $0x1c8c] ss:$16 sps:$4 sm:$0xff]   ;;  %v10247_v62 = vld [vmem:[%s13681_s1 + $0x1c80] ss:$16 sps:$4 sm:$0xff]  }
 0x357   :  { %6829 = vmatpush1.bf16.msra.mxu0 %v10155_v63  ;;  %7485 = vmatpush1.bf16.msra.mxu1 %v10158_v0  ;;  %v10250_v63 = vld [vmem:[%s13681_s1 + $0x1c88] ss:$16 sps:$4 sm:$0xff]   ;;  %v10255_v0 = vld [vmem:[%s13681_s1 + $0x1ca4] ss:$16 sps:$4 sm:$0xff]  }
 0x358   :  { %6830 = vmatprep.subr.bf16.mxu0 %v10163_v1  ;;  %7486 = vmatprep.subr.bf16.mxu1 %v10166_v2  ;;  %v10258_v1 = vld [vmem:[%s13681_s1 + $0x1cac] ss:$16 sps:$4 sm:$0xff]   ;;  %v10253_v2 = vld [vmem:[%s13681_s1 + $0x1ca0] ss:$16 sps:$4 sm:$0xff]  }
 0x35b   :  { %6831 = vmatpush1.bf16.msra.mxu0 %v10161_v3  ;;  %7487 = vmatpush1.bf16.msra.mxu1 %v10164_v4  ;;  %v10256_v3 = vld [vmem:[%s13681_s1 + $0x1ca8] ss:$16 sps:$4 sm:$0xff]   ;;  %v10261_v4 = vld [vmem:[%s13681_s1 + $0x1cc4] ss:$16 sps:$4 sm:$0xff]  }
 0x35c   :  { %6832 = vmatprep.subr.bf16.mxu0 %v10169_v5  ;;  %7488 = vmatprep.subr.bf16.mxu1 %v10172_v6  ;;  %v10264_v5 = vld [vmem:[%s13681_s1 + $0x1ccc] ss:$16 sps:$4 sm:$0xff]   ;;  %v10259_v6 = vld [vmem:[%s13681_s1 + $0x1cc0] ss:$16 sps:$4 sm:$0xff]  }
 0x35f   :  { %6833 = vmatpush1.bf16.msra.mxu0 %v10167_v7  ;;  %7489 = vmatpush1.bf16.msra.mxu1 %v10170_v8  ;;  %v10262_v7 = vld [vmem:[%s13681_s1 + $0x1cc8] ss:$16 sps:$4 sm:$0xff]   ;;  %v10267_v8 = vld [vmem:[%s13681_s1 + $0x1ce4] ss:$16 sps:$4 sm:$0xff]  }
 0x360   :  { %6834 = vmatprep.subr.bf16.mxu0 %v10175_v9  ;;  %7490 = vmatprep.subr.bf16.mxu1 %v10178_v10  ;;  %v10270_v9 = vld [vmem:[%s13681_s1 + $0x1cec] ss:$16 sps:$4 sm:$0xff]   ;;  %v10265_v10 = vld [vmem:[%s13681_s1 + $0x1ce0] ss:$16 sps:$4 sm:$0xff]  }
 0x363   :  { %6835 = vmatpush1.bf16.msra.mxu0 %v10173_v12  ;;  %7491 = vmatpush1.bf16.msra.mxu1 %v10176_v13  ;;  %v10268_v12 = vld [vmem:[%s13681_s1 + $0x1ce8] ss:$16 sps:$4 sm:$0xff]   ;;  %v10273_v13 = vld [vmem:[%s13681_s1 + $0x1d04] ss:$16 sps:$4 sm:$0xff]  }
 0x364   :  { %6836 = vmatprep.subr.bf16.mxu0 %v10181_v15  ;;  %7492 = vmatprep.subr.bf16.mxu1 %v10184_v11  ;;  %v10276_v15 = vld [vmem:[%s13681_s1 + $0x1d0c] ss:$16 sps:$4 sm:$0xff]   ;;  %v10271_v11 = vld [vmem:[%s13681_s1 + $0x1d00] ss:$16 sps:$4 sm:$0xff]  }
 0x367   :  { %6837 = vmatpush1.bf16.msra.mxu0 %v10179_v17  ;;  %7493 = vmatpush1.bf16.msra.mxu1 %v10182_v14  ;;  %v10274_v17 = vld [vmem:[%s13681_s1 + $0x1d08] ss:$16 sps:$4 sm:$0xff]   ;;  %v10279_v14 = vld [vmem:[%s13681_s1 + $0x1d24] ss:$16 sps:$4 sm:$0xff]  }
 0x368   :  { %6838 = vmatprep.subr.bf16.mxu0 %v10187_v19  ;;  %7494 = vmatprep.subr.bf16.mxu1 %v10190_v20  ;;  %v10282_v19 = vld [vmem:[%s13681_s1 + $0x1d2c] ss:$16 sps:$4 sm:$0xff]   ;;  %v10277_v20 = vld [vmem:[%s13681_s1 + $0x1d20] ss:$16 sps:$4 sm:$0xff]  }
 0x36b   :  { %6839 = vmatpush1.bf16.msra.mxu0 %v10185_v16  ;;  %7495 = vmatpush1.bf16.msra.mxu1 %v10188_v22  ;;  %v10280_v16 = vld [vmem:[%s13681_s1 + $0x1d28] ss:$16 sps:$4 sm:$0xff]   ;;  %v10285_v22 = vld [vmem:[%s13681_s1 + $0x1d44] ss:$16 sps:$4 sm:$0xff]  }
 0x36c   :  { %6840 = vmatprep.subr.bf16.mxu0 %v10193_v23  ;;  %7496 = vmatprep.subr.bf16.mxu1 %v10196_v18  ;;  %v10288_v23 = vld [vmem:[%s13681_s1 + $0x1d4c] ss:$16 sps:$4 sm:$0xff]   ;;  %v10283_v18 = vld [vmem:[%s13681_s1 + $0x1d40] ss:$16 sps:$4 sm:$0xff]  }
 0x36f   :  { %6841 = vmatpush1.bf16.msra.mxu0 %v10191_v25  ;;  %7497 = vmatpush1.bf16.msra.mxu1 %v10194_v26  ;;  %v10286_v25 = vld [vmem:[%s13681_s1 + $0x1d48] ss:$16 sps:$4 sm:$0xff]   ;;  %v10291_v26 = vld [vmem:[%s13681_s1 + $0x1d64] ss:$16 sps:$4 sm:$0xff]  }
 0x370   :  { %6842 = vmatprep.subr.bf16.mxu0 %v10199_v21  ;;  %7498 = vmatprep.subr.bf16.mxu1 %v10202_v28  ;;  %v10294_v21 = vld [vmem:[%s13681_s1 + $0x1d6c] ss:$16 sps:$4 sm:$0xff]   ;;  %v10289_v28 = vld [vmem:[%s13681_s1 + $0x1d60] ss:$16 sps:$4 sm:$0xff]  }
 0x373   :  { %6843 = vmatpush1.bf16.msra.mxu0 %v10197_v29  ;;  %7499 = vmatpush1.bf16.msra.mxu1 %v10200_v24  ;;  %v10292_v29 = vld [vmem:[%s13681_s1 + $0x1d68] ss:$16 sps:$4 sm:$0xff]   ;;  %v10297_v24 = vld [vmem:[%s13681_s1 + $0x1d84] ss:$16 sps:$4 sm:$0xff]  }
 0x374   :  { %6844 = vmatprep.subr.bf16.mxu0 %v10205_v31  ;;  %7500 = vmatprep.subr.bf16.mxu1 %v10208_v32  ;;  %v10300_v31 = vld [vmem:[%s13681_s1 + $0x1d8c] ss:$16 sps:$4 sm:$0xff]   ;;  %v10295_v32 = vld [vmem:[%s13681_s1 + $0x1d80] ss:$16 sps:$4 sm:$0xff]  }
 0x377   :  { %6845 = vmatpush1.bf16.msra.mxu0 %v10203_v33  ;;  %7501 = vmatpush1.bf16.msra.mxu1 %v10206_v34  ;;  %v10298_v33 = vld [vmem:[%s13681_s1 + $0x1d88] ss:$16 sps:$4 sm:$0xff]   ;;  %v10303_v34 = vld [vmem:[%s13681_s1 + $0x1da4] ss:$16 sps:$4 sm:$0xff]  }
 0x378   :  { %6846 = vmatprep.subr.bf16.mxu0 %v10211_v35  ;;  %7502 = vmatprep.subr.bf16.mxu1 %v10214_v30  ;;  %v10306_v35 = vld [vmem:[%s13681_s1 + $0x1dac] ss:$16 sps:$4 sm:$0xff]   ;;  %v10301_v30 = vld [vmem:[%s13681_s1 + $0x1da0] ss:$16 sps:$4 sm:$0xff]  }
 0x37b   :  { %6847 = vmatpush1.bf16.msra.mxu0 %v10209_v37  ;;  %7503 = vmatpush1.bf16.msra.mxu1 %v10212_v38  ;;  %v10304_v37 = vld [vmem:[%s13681_s1 + $0x1da8] ss:$16 sps:$4 sm:$0xff]   ;;  %v10309_v38 = vld [vmem:[%s13681_s1 + $0x1dc4] ss:$16 sps:$4 sm:$0xff]  }
 0x37c   :  { %6848 = vmatprep.subr.bf16.mxu0 %v10217_v27  ;;  %7504 = vmatprep.subr.bf16.mxu1 %v10220_v40  ;;  %v10312_v27 = vld [vmem:[%s13681_s1 + $0x1dcc] ss:$16 sps:$4 sm:$0xff]   ;;  %v10307_v40 = vld [vmem:[%s13681_s1 + $0x1dc0] ss:$16 sps:$4 sm:$0xff]  }
 0x37f   :  { %6849 = vmatpush1.bf16.msra.mxu0 %v10215_v41  ;;  %7505 = vmatpush1.bf16.msra.mxu1 %v10218_v36  ;;  %v10310_v41 = vld [vmem:[%s13681_s1 + $0x1dc8] ss:$16 sps:$4 sm:$0xff]   ;;  %v10315_v36 = vld [vmem:[%s13681_s1 + $0x1de4] ss:$16 sps:$4 sm:$0xff]  }
 0x380   :  { %6859 = vmatprep.subr.bf16.mxu0 %v10225_v43  ;;  %7515 = vmatprep.subr.bf16.mxu1 %v10228_v44  ;;  %v10318_v43 = vld [vmem:[%s13681_s1 + $0x1dec] ss:$16 sps:$4 sm:$0xff]   ;;  %v10313_v44 = vld [vmem:[%s13681_s1 + $0x1de0] ss:$16 sps:$4 sm:$0xff]  }
 0x382   :  { %6851 = vmatmul.mubr.bf16.vlgmr.msra.gmra.mrb[0].mxu0 %v7701_v39  ;;  %7507 = vmatmul.mubr.bf16.vlgmr.msra.gmra.mrb[0].mxu1 %v7701_v39  ;;  %v10316_v39 = vld [vmem:[%s13681_s1 + $0x1de8] ss:$16 sps:$4 sm:$0xff]  }
 0x383   :  { %6860 = vmatpush1.bf16.msra.mxu0 %v10223_v46  ;;  %7516 = vmatpush1.bf16.msra.mxu1 %v10226_v47  ;;  %v10323_v46 = vld [vmem:[%s13681_s1 + $0x1e04] ss:$16 sps:$4 sm:$0xff]   ;;  %v10326_v47 = vld [vmem:[%s13681_s1 + $0x1e0c] ss:$16 sps:$4 sm:$0xff]  }
 0x384   :  { %6861 = vmatprep.subr.bf16.mxu0 %v10231_v42  ;;  %7517 = vmatprep.subr.bf16.mxu1 %v10234_v48  ;;  %v7703_v42 = vcombine.low %v13256_v45, %v13256_v45  ;;  %v13457_v48 = vld [vmem:[%s13682_s0 + $0x78] sm:$0xff]  ;;  %v10329_v45 = vld [vmem:[%s13681_s1 + $0x1e24] ss:$16 sps:$4 sm:$0xff]  }
 0x385   :  { %6891 = vmatprep.mubr.bf16.mxu0 %v7704_v49  ;;  %7547 = vmatprep.mubr.bf16.mxu1 %v7704_v49  ;;  %v10321_v49 = vld [vmem:[%s13681_s1 + $0x1e00] ss:$16 sps:$4 sm:$0xff]  }
 0x387   :  { %6862 = vmatpush1.bf16.msra.mxu0 %v10229_v50  ;;  %7518 = vmatpush1.bf16.msra.mxu1 %v10232_v51  ;;  %v10324_v50 = vld [vmem:[%s13681_s1 + $0x1e08] ss:$16 sps:$4 sm:$0xff]   ;;  %v10332_v51 = vld [vmem:[%s13681_s1 + $0x1e2c] ss:$16 sps:$4 sm:$0xff]  }
 0x388   :  { %6863 = vmatprep.subr.bf16.mxu0 %v10237_v52  ;;  %7519 = vmatprep.subr.bf16.mxu1 %v10240_v53  ;;  %v7706_v52 = vcombine.high %v13457_v48, %v13457_v48  ;;  %v10327_v53 = vld [vmem:[%s13681_s1 + $0x1e20] ss:$16 sps:$4 sm:$0xff]  }
 0x38b   :  { %6864 = vmatpush1.bf16.msra.mxu0 %v10235_v54  ;;  %7520 = vmatpush1.bf16.msra.mxu1 %v10238_v55  ;;  %v10330_v54 = vld [vmem:[%s13681_s1 + $0x1e28] ss:$16 sps:$4 sm:$0xff]   ;;  %v10335_v55 = vld [vmem:[%s13681_s1 + $0x1e44] ss:$16 sps:$4 sm:$0xff]  }
 0x38c   :  { %6865 = vmatprep.subr.bf16.mxu0 %v10243_v56  ;;  %7521 = vmatprep.subr.bf16.mxu1 %v10246_v57  ;;  %v10338_v56 = vld [vmem:[%s13681_s1 + $0x1e4c] ss:$16 sps:$4 sm:$0xff]   ;;  %v10333_v57 = vld [vmem:[%s13681_s1 + $0x1e40] ss:$16 sps:$4 sm:$0xff]  }
 0x38f   :  { %6866 = vmatpush1.bf16.msra.mxu0 %v10241_v58  ;;  %7522 = vmatpush1.bf16.msra.mxu1 %v10244_v59  ;;  %v10336_v58 = vld [vmem:[%s13681_s1 + $0x1e48] ss:$16 sps:$4 sm:$0xff]   ;;  %v10341_v59 = vld [vmem:[%s13681_s1 + $0x1e64] ss:$16 sps:$4 sm:$0xff]  }
 0x390   :  { %6867 = vmatprep.subr.bf16.mxu0 %v10249_v60  ;;  %7523 = vmatprep.subr.bf16.mxu1 %v10252_v61  ;;  %v10344_v60 = vld [vmem:[%s13681_s1 + $0x1e6c] ss:$16 sps:$4 sm:$0xff]   ;;  %v10339_v61 = vld [vmem:[%s13681_s1 + $0x1e60] ss:$16 sps:$4 sm:$0xff]  }
 0x393   :  { %6868 = vmatpush1.bf16.msra.mxu0 %v10247_v62  ;;  %7524 = vmatpush1.bf16.msra.mxu1 %v10250_v63  ;;  %v10342_v62 = vld [vmem:[%s13681_s1 + $0x1e68] ss:$16 sps:$4 sm:$0xff]   ;;  %v10347_v63 = vld [vmem:[%s13681_s1 + $0x1e84] ss:$16 sps:$4 sm:$0xff]  }
 0x394   :  { %6869 = vmatprep.subr.bf16.mxu0 %v10255_v0  ;;  %7525 = vmatprep.subr.bf16.mxu1 %v10258_v1  ;;  %v10350_v0 = vld [vmem:[%s13681_s1 + $0x1e8c] ss:$16 sps:$4 sm:$0xff]   ;;  %v10345_v1 = vld [vmem:[%s13681_s1 + $0x1e80] ss:$16 sps:$4 sm:$0xff]  }
 0x397   :  { %6870 = vmatpush1.bf16.msra.mxu0 %v10253_v2  ;;  %7526 = vmatpush1.bf16.msra.mxu1 %v10256_v3  ;;  %v10348_v2 = vld [vmem:[%s13681_s1 + $0x1e88] ss:$16 sps:$4 sm:$0xff]   ;;  %v10353_v3 = vld [vmem:[%s13681_s1 + $0x1ea4] ss:$16 sps:$4 sm:$0xff]  }
 0x398   :  { %6871 = vmatprep.subr.bf16.mxu0 %v10261_v4  ;;  %7527 = vmatprep.subr.bf16.mxu1 %v10264_v5  ;;  %v10356_v4 = vld [vmem:[%s13681_s1 + $0x1eac] ss:$16 sps:$4 sm:$0xff]   ;;  %v10351_v5 = vld [vmem:[%s13681_s1 + $0x1ea0] ss:$16 sps:$4 sm:$0xff]  }
 0x39b   :  { %6872 = vmatpush1.bf16.msra.mxu0 %v10259_v6  ;;  %7528 = vmatpush1.bf16.msra.mxu1 %v10262_v7  ;;  %v10354_v6 = vld [vmem:[%s13681_s1 + $0x1ea8] ss:$16 sps:$4 sm:$0xff]   ;;  %v10359_v7 = vld [vmem:[%s13681_s1 + $0x1ec4] ss:$16 sps:$4 sm:$0xff]  }
 0x39c   :  { %6873 = vmatprep.subr.bf16.mxu0 %v10267_v8  ;;  %7529 = vmatprep.subr.bf16.mxu1 %v10270_v9  ;;  %v10362_v8 = vld [vmem:[%s13681_s1 + $0x1ecc] ss:$16 sps:$4 sm:$0xff]   ;;  %v10357_v9 = vld [vmem:[%s13681_s1 + $0x1ec0] ss:$16 sps:$4 sm:$0xff]  }
 0x39f   :  { %6874 = vmatpush1.bf16.msra.mxu0 %v10265_v10  ;;  %7530 = vmatpush1.bf16.msra.mxu1 %v10268_v12  ;;  %v10360_v10 = vld [vmem:[%s13681_s1 + $0x1ec8] ss:$16 sps:$4 sm:$0xff]   ;;  %v10365_v12 = vld [vmem:[%s13681_s1 + $0x1ee4] ss:$16 sps:$4 sm:$0xff]  }
 0x3a0   :  { %6875 = vmatprep.subr.bf16.mxu0 %v10273_v13  ;;  %7531 = vmatprep.subr.bf16.mxu1 %v10276_v15  ;;  %v10368_v13 = vld [vmem:[%s13681_s1 + $0x1eec] ss:$16 sps:$4 sm:$0xff]   ;;  %v10363_v15 = vld [vmem:[%s13681_s1 + $0x1ee0] ss:$16 sps:$4 sm:$0xff]  }
 0x3a3   :  { %6876 = vmatpush1.bf16.msra.mxu0 %v10271_v11  ;;  %7532 = vmatpush1.bf16.msra.mxu1 %v10274_v17  ;;  %v10366_v11 = vld [vmem:[%s13681_s1 + $0x1ee8] ss:$16 sps:$4 sm:$0xff]   ;;  %v10371_v17 = vld [vmem:[%s13681_s1 + $0x1f04] ss:$16 sps:$4 sm:$0xff]  }
 0x3a4   :  { %6877 = vmatprep.subr.bf16.mxu0 %v10279_v14  ;;  %7533 = vmatprep.subr.bf16.mxu1 %v10282_v19  ;;  %v10374_v14 = vld [vmem:[%s13681_s1 + $0x1f0c] ss:$16 sps:$4 sm:$0xff]   ;;  %v10369_v19 = vld [vmem:[%s13681_s1 + $0x1f00] ss:$16 sps:$4 sm:$0xff]  }
 0x3a7   :  { %6878 = vmatpush1.bf16.msra.mxu0 %v10277_v20  ;;  %7534 = vmatpush1.bf16.msra.mxu1 %v10280_v16  ;;  %v10372_v20 = vld [vmem:[%s13681_s1 + $0x1f08] ss:$16 sps:$4 sm:$0xff]   ;;  %v10377_v16 = vld [vmem:[%s13681_s1 + $0x1f24] ss:$16 sps:$4 sm:$0xff]  }
 0x3a8   :  { %6879 = vmatprep.subr.bf16.mxu0 %v10285_v22  ;;  %7535 = vmatprep.subr.bf16.mxu1 %v10288_v23  ;;  %v10380_v22 = vld [vmem:[%s13681_s1 + $0x1f2c] ss:$16 sps:$4 sm:$0xff]   ;;  %v10375_v23 = vld [vmem:[%s13681_s1 + $0x1f20] ss:$16 sps:$4 sm:$0xff]  }
 0x3ab   :  { %6880 = vmatpush1.bf16.msra.mxu0 %v10283_v18  ;;  %7536 = vmatpush1.bf16.msra.mxu1 %v10286_v25  ;;  %v10378_v18 = vld [vmem:[%s13681_s1 + $0x1f28] ss:$16 sps:$4 sm:$0xff]   ;;  %v10383_v25 = vld [vmem:[%s13681_s1 + $0x1f44] ss:$16 sps:$4 sm:$0xff]  }
 0x3ac   :  { %6881 = vmatprep.subr.bf16.mxu0 %v10291_v26  ;;  %7537 = vmatprep.subr.bf16.mxu1 %v10294_v21  ;;  %v10386_v26 = vld [vmem:[%s13681_s1 + $0x1f4c] ss:$16 sps:$4 sm:$0xff]   ;;  %v10381_v21 = vld [vmem:[%s13681_s1 + $0x1f40] ss:$16 sps:$4 sm:$0xff]  }
 0x3af   :  { %6882 = vmatpush1.bf16.msra.mxu0 %v10289_v28  ;;  %7538 = vmatpush1.bf16.msra.mxu1 %v10292_v29  ;;  %v10384_v28 = vld [vmem:[%s13681_s1 + $0x1f48] ss:$16 sps:$4 sm:$0xff]   ;;  %v10389_v29 = vld [vmem:[%s13681_s1 + $0x1f64] ss:$16 sps:$4 sm:$0xff]  }
 0x3b0   :  { %6883 = vmatprep.subr.bf16.mxu0 %v10297_v24  ;;  %7539 = vmatprep.subr.bf16.mxu1 %v10300_v31  ;;  %v10392_v24 = vld [vmem:[%s13681_s1 + $0x1f6c] ss:$16 sps:$4 sm:$0xff]   ;;  %v10387_v31 = vld [vmem:[%s13681_s1 + $0x1f60] ss:$16 sps:$4 sm:$0xff]  }
 0x3b3   :  { %6884 = vmatpush1.bf16.msra.mxu0 %v10295_v32  ;;  %7540 = vmatpush1.bf16.msra.mxu1 %v10298_v33  ;;  %v10390_v32 = vld [vmem:[%s13681_s1 + $0x1f68] ss:$16 sps:$4 sm:$0xff]   ;;  %v10395_v33 = vld [vmem:[%s13681_s1 + $0x1f84] ss:$16 sps:$4 sm:$0xff]  }
 0x3b4   :  { %6885 = vmatprep.subr.bf16.mxu0 %v10303_v34  ;;  %7541 = vmatprep.subr.bf16.mxu1 %v10306_v35  ;;  %v10398_v34 = vld [vmem:[%s13681_s1 + $0x1f8c] ss:$16 sps:$4 sm:$0xff]   ;;  %v10393_v35 = vld [vmem:[%s13681_s1 + $0x1f80] ss:$16 sps:$4 sm:$0xff]  }
 0x3b7   :  { %6886 = vmatpush1.bf16.msra.mxu0 %v10301_v30  ;;  %7542 = vmatpush1.bf16.msra.mxu1 %v10304_v37  ;;  %v10396_v30 = vld [vmem:[%s13681_s1 + $0x1f88] ss:$16 sps:$4 sm:$0xff]   ;;  %v10401_v37 = vld [vmem:[%s13681_s1 + $0x1fa4] ss:$16 sps:$4 sm:$0xff]  }
 0x3b8   :  { %6887 = vmatprep.subr.bf16.mxu0 %v10309_v38  ;;  %7543 = vmatprep.subr.bf16.mxu1 %v10312_v27  ;;  %v10404_v38 = vld [vmem:[%s13681_s1 + $0x1fac] ss:$16 sps:$4 sm:$0xff]   ;;  %v10399_v27 = vld [vmem:[%s13681_s1 + $0x1fa0] ss:$16 sps:$4 sm:$0xff]  }
 0x3bb   :  { %6888 = vmatpush1.bf16.msra.mxu0 %v10307_v40  ;;  %7544 = vmatpush1.bf16.msra.mxu1 %v10310_v41  ;;  %v10402_v40 = vld [vmem:[%s13681_s1 + $0x1fa8] ss:$16 sps:$4 sm:$0xff]   ;;  %v10407_v41 = vld [vmem:[%s13681_s1 + $0x1fc4] ss:$16 sps:$4 sm:$0xff]  }
 0x3bc   :  { %6889 = vmatprep.subr.bf16.mxu0 %v10315_v36  ;;  %7545 = vmatprep.subr.bf16.mxu1 %v10318_v43  ;;  %v10410_v36 = vld [vmem:[%s13681_s1 + $0x1fcc] ss:$16 sps:$4 sm:$0xff]   ;;  %v10405_v43 = vld [vmem:[%s13681_s1 + $0x1fc0] ss:$16 sps:$4 sm:$0xff]  }
 0x3bf   :  { %6890 = vmatpush1.bf16.msra.mxu0 %v10313_v44  ;;  %7546 = vmatpush1.bf16.msra.mxu1 %v10316_v39  ;;  %v10408_v44 = vld [vmem:[%s13681_s1 + $0x1fc8] ss:$16 sps:$4 sm:$0xff]   ;;  %v10413_v39 = vld [vmem:[%s13681_s1 + $0x1fe4] ss:$16 sps:$4 sm:$0xff]  }
 0x3c0   :  { %6900 = vmatprep.subr.bf16.mxu0 %v10323_v46  ;;  %7556 = vmatprep.subr.bf16.mxu1 %v10326_v47  ;;  %v10416_v46 = vld [vmem:[%s13681_s1 + $0x1fec] ss:$16 sps:$4 sm:$0xff]   ;;  %v10411_v47 = vld [vmem:[%s13681_s1 + $0x1fe0] ss:$16 sps:$4 sm:$0xff]  }
 0x3c2   :  { %6892 = vmatmul.mubr.bf16.vlgmr.msra.gmra.mrb[0].mxu0 %v7703_v42  ;;  %7548 = vmatmul.mubr.bf16.vlgmr.msra.gmra.mrb[0].mxu1 %v7703_v42  ;;  %v10414_v42 = vld [vmem:[%s13681_s1 + $0x1fe8] ss:$16 sps:$4 sm:$0xff]  }
 0x3c3   :  { %6901 = vmatpush1.bf16.msra.mxu0 %v10321_v49  ;;  %7557 = vmatpush1.bf16.msra.mxu1 %v10324_v50  ;;  %v7705_v49 = vcombine.low %v13457_v48, %v13457_v48 }
 0x3c4   :  { %6902 = vmatprep.subr.bf16.mxu0 %v10329_v45  ;;  %7558 = vmatprep.subr.bf16.mxu1 %v10332_v51 }
 0x3c5   :  { %6932 = vmatprep.mubr.bf16.mxu0 %v7706_v52  ;;  %7588 = vmatprep.mubr.bf16.mxu1 %v7706_v52 }
 0x3c7   :  { %6903 = vmatpush1.bf16.msra.mxu0 %v10327_v53  ;;  %7559 = vmatpush1.bf16.msra.mxu1 %v10330_v54 }
 0x3c8   :  { %6904 = vmatprep.subr.bf16.mxu0 %v10335_v55  ;;  %7560 = vmatprep.subr.bf16.mxu1 %v10338_v56 }
 0x3cb   :  { %6905 = vmatpush1.bf16.msra.mxu0 %v10333_v57  ;;  %7561 = vmatpush1.bf16.msra.mxu1 %v10336_v58 }
 0x3cc   :  { %6906 = vmatprep.subr.bf16.mxu0 %v10341_v59  ;;  %7562 = vmatprep.subr.bf16.mxu1 %v10344_v60 }
 0x3cf   :  { %6907 = vmatpush1.bf16.msra.mxu0 %v10339_v61  ;;  %7563 = vmatpush1.bf16.msra.mxu1 %v10342_v62 }
 0x3d0   :  { %6908 = vmatprep.subr.bf16.mxu0 %v10347_v63  ;;  %7564 = vmatprep.subr.bf16.mxu1 %v10350_v0 }
 0x3d3   :  { %6909 = vmatpush1.bf16.msra.mxu0 %v10345_v1  ;;  %7565 = vmatpush1.bf16.msra.mxu1 %v10348_v2 }
 0x3d4   :  { %6910 = vmatprep.subr.bf16.mxu0 %v10353_v3  ;;  %7566 = vmatprep.subr.bf16.mxu1 %v10356_v4 }
 0x3d7   :  { %6911 = vmatpush1.bf16.msra.mxu0 %v10351_v5  ;;  %7567 = vmatpush1.bf16.msra.mxu1 %v10354_v6 }
 0x3d8   :  { %6912 = vmatprep.subr.bf16.mxu0 %v10359_v7  ;;  %7568 = vmatprep.subr.bf16.mxu1 %v10362_v8 }
 0x3db   :  { %6913 = vmatpush1.bf16.msra.mxu0 %v10357_v9  ;;  %7569 = vmatpush1.bf16.msra.mxu1 %v10360_v10 }
 0x3dc   :  { %6914 = vmatprep.subr.bf16.mxu0 %v10365_v12  ;;  %7570 = vmatprep.subr.bf16.mxu1 %v10368_v13 }
 0x3df   :  { %6915 = vmatpush1.bf16.msra.mxu0 %v10363_v15  ;;  %7571 = vmatpush1.bf16.msra.mxu1 %v10366_v11 }
 0x3e0   :  { %6916 = vmatprep.subr.bf16.mxu0 %v10371_v17  ;;  %7572 = vmatprep.subr.bf16.mxu1 %v10374_v14 }
 0x3e3   :  { %6917 = vmatpush1.bf16.msra.mxu0 %v10369_v19  ;;  %7573 = vmatpush1.bf16.msra.mxu1 %v10372_v20 }
 0x3e4   :  { %6918 = vmatprep.subr.bf16.mxu0 %v10377_v16  ;;  %7574 = vmatprep.subr.bf16.mxu1 %v10380_v22 }
 0x3e7   :  { %6919 = vmatpush1.bf16.msra.mxu0 %v10375_v23  ;;  %7575 = vmatpush1.bf16.msra.mxu1 %v10378_v18 }
 0x3e8   :  { %6920 = vmatprep.subr.bf16.mxu0 %v10383_v25  ;;  %7576 = vmatprep.subr.bf16.mxu1 %v10386_v26 }
 0x3eb   :  { %6921 = vmatpush1.bf16.msra.mxu0 %v10381_v21  ;;  %7577 = vmatpush1.bf16.msra.mxu1 %v10384_v28 }
 0x3ec   :  { %6922 = vmatprep.subr.bf16.mxu0 %v10389_v29  ;;  %7578 = vmatprep.subr.bf16.mxu1 %v10392_v24 }
 0x3ef   :  { %6923 = vmatpush1.bf16.msra.mxu0 %v10387_v31  ;;  %7579 = vmatpush1.bf16.msra.mxu1 %v10390_v32 }
 0x3f0   :  { %6924 = vmatprep.subr.bf16.mxu0 %v10395_v33  ;;  %7580 = vmatprep.subr.bf16.mxu1 %v10398_v34 }
 0x3f3   :  { %6925 = vmatpush1.bf16.msra.mxu0 %v10393_v35  ;;  %7581 = vmatpush1.bf16.msra.mxu1 %v10396_v30 }
 0x3f4   :  { %6926 = vmatprep.subr.bf16.mxu0 %v10401_v37  ;;  %7582 = vmatprep.subr.bf16.mxu1 %v10404_v38 }
 0x3f7   :  { %6927 = vmatpush1.bf16.msra.mxu0 %v10399_v27  ;;  %7583 = vmatpush1.bf16.msra.mxu1 %v10402_v40 }
 0x3f8   :  { %6928 = vmatprep.subr.bf16.mxu0 %v10407_v41  ;;  %7584 = vmatprep.subr.bf16.mxu1 %v10410_v36 }
 0x3fb   :  { %6929 = vmatpush1.bf16.msra.mxu0 %v10405_v43  ;;  %7585 = vmatpush1.bf16.msra.mxu1 %v10408_v44 }
 0x3fc   :  { %6930 = vmatprep.subr.bf16.mxu0 %v10413_v39  ;;  %7586 = vmatprep.subr.bf16.mxu1 %v10416_v46 }
 0x3ff   :  { %6931 = vmatpush1.bf16.msra.mxu0 %v10411_v47  ;;  %7587 = vmatpush1.bf16.msra.mxu1 %v10414_v42 }
 0x402   :  { %6933 = vmatmul.mubr.bf16.vlgmr.msra.gmra.mrb[0].mxu0 %v7705_v49  ;;  %7589 = vmatmul.mubr.bf16.vlgmr.msra.gmra.mrb[0].mxu1 %v7705_v49 }
 0x4d5   :  { %v6934_v50 = vpop.f32.mrb[0].mxu0  ;;  %v7590_v45 = vpop.f32.mrb[0].mxu1 }
 0x4d6   :  { %7597 = vst [vmem:[%s13683_s2] sm:$0xff] %v6934_v50  ;;  %v7601_v51 = vrot.slane %v6934_v50, 4  ;;  %v7625_v52 = vmul.f32 %v6934_v50, %v6934_v50  ;;  %7599 = vst [vmem:[%s13683_s2 + $0x10] sm:$0xff] %v7590_v45  ;;  %v7613_v53 = vrot.slane %v7590_v45, 4  ;;  %v7627_v54 = vmul.f32 %v7590_v45, %v7590_v45  ;;  %v6936_v55 = vpop.f32.mrb[1].mxu0  ;;  %v7592_v48 = vpop.f32.mrb[1].mxu1 }
 0x4d7   :  { %7598 = vst [vmem:[%s13683_s2 + $0x8] sm:$0xff] %v6936_v55  ;;  %v7607_v56 = vrot.slane %v6936_v55, 4  ;;  %v7626_v57 = vmul.f32 %v6936_v55, %v6936_v55  ;;  %7600 = vst [vmem:[%s13683_s2 + $0x18] sm:$0xff] %v7592_v48  ;;  %v7619_v58 = vrot.slane %v7592_v48, 4  ;;  %v7628_v59 = vmul.f32 %v7592_v48, %v7592_v48  ;;  %v6938_v60 = vpop.f32.mrb[2].mxu0  ;;  %v7594_v61 = vpop.f32.mrb[2].mxu1 }
 0x4d8   :  { %v7602_v62 = vadd.f32 %v7601_v51, %v6934_v50  ;;  %v7629_v63 = vrot.slane %v7625_v52, 4  ;;  %v7614_v0 = vadd.f32 %v7613_v53, %v7590_v45  ;;  %v7641_v1 = vrot.slane %v7627_v54, 4  ;;  %v6939_v2 = vpop.f32.mrb[3].mxu0  ;;  %v7595_v3 = vpop.f32.mrb[3].mxu1 }
 0x4d9   :  { %v7608_v4 = vadd.f32 %v7607_v56, %v6936_v55  ;;  %v7635_v5 = vrot.slane %v7626_v57, 4  ;;  %v7620_v6 = vadd.f32 %v7619_v58, %v7592_v48  ;;  %v7647_v7 = vrot.slane %v7628_v59, 4 }
 0x4da   :  { %v7603_v8 = vrot.slane %v7602_v62, 2  ;;  %v7630_v9 = vadd.f32 %v7629_v63, %v7625_v52  ;;  %v7615_v10 = vrot.slane %v7614_v0, 2  ;;  %v7642_v12 = vadd.f32 %v7641_v1, %v7627_v54 }
 0x4db   :  { %v7609_v13 = vrot.slane %v7608_v4, 2  ;;  %v7636_v15 = vadd.f32 %v7635_v5, %v7626_v57  ;;  %v7621_v11 = vrot.slane %v7620_v6, 2  ;;  %v7648_v17 = vadd.f32 %v7647_v7, %v7628_v59 }
 0x4dc   :  { %v7604_v14 = vadd.f32 %v7603_v8, %v7602_v62  ;;  %v7631_v19 = vrot.slane %v7630_v9, 2  ;;  %v7616_v20 = vadd.f32 %v7615_v10, %v7614_v0  ;;  %v7643_v16 = vrot.slane %v7642_v12, 2 }
 0x4dd   :  { %v7610_v22 = vadd.f32 %v7609_v13, %v7608_v4  ;;  %v7637_v23 = vrot.slane %v7636_v15, 2  ;;  %v7622_v18 = vadd.f32 %v7621_v11, %v7620_v6  ;;  %v7649_v25 = vrot.slane %v7648_v17, 2 }
 0x4de   :  { %v7605_v26 = vrot.slane %v7604_v14, 1  ;;  %v7632_v21 = vadd.f32 %v7631_v19, %v7630_v9  ;;  %v7617_v28 = vrot.slane %v7616_v20, 1  ;;  %v7644_v29 = vadd.f32 %v7643_v16, %v7642_v12 }
 0x4df   :  { %v7611_v24 = vrot.slane %v7610_v22, 1  ;;  %v7638_v31 = vadd.f32 %v7637_v23, %v7636_v15  ;;  %v7623_v32 = vrot.slane %v7622_v18, 1  ;;  %v7650_v33 = vadd.f32 %v7649_v25, %v7648_v17 }
 0x4e0   :  { %v7633_v34 = vrot.slane %v7632_v21, 1  ;;  %v7645_v35 = vrot.slane %v7644_v29, 1  ;;  %v7606_v38 = vadd.f32 %v7605_v26, %v7604_v14  ;;  %v7618_v40 = vadd.f32 %v7617_v28, %v7616_v20 }
 0x4e1   :  { %v7639_v30 = vrot.slane %v7638_v31, 1  ;;  %v7651_v37 = vrot.slane %v7650_v33, 1  ;;  %v7612_v36 = vadd.f32 %v7611_v24, %v7610_v22  ;;  %v7624_v44 = vadd.f32 %v7623_v32, %v7622_v18 }
 0x4e2   :  { %v7634_v27 = vadd.f32 %v7633_v34, %v7632_v21  ;;  %v7646_v41 = vadd.f32 %v7645_v35, %v7644_v29 }
 0x4e3   :  { %v7640_v43 = vadd.f32 %v7639_v30, %v7638_v31  ;;  %v7652_v39 = vadd.f32 %v7651_v37, %v7650_v33 }
 0x4e4   :  { %v7654_v46 = vsel %vm7653_vm0, %v7606_v38, %v7634_v27  ;;  %v7656_v47 = vsel %vm7653_vm0, %v7618_v40, %v7646_v41 }
 0x4e5   :  { %v7659_v42 = vsel %vm7658_vm1, %v7654_v46, 0.0  ;;  %v7661_v49 = vsel %vm7658_vm1, %v7656_v47, 0.0  ;;  %v7655_v50 = vsel %vm7653_vm0, %v7612_v36, %v7640_v43  ;;  %v7657_v45 = vsel %vm7653_vm0, %v7624_v44, %v7652_v39 }
 0x4e6   :  { %7663 = vst [vmem:[%s13684_s3] sm:$0xff] %v7659_v42  ;;  %7665 = vst [vmem:[%s13684_s3 + $0x10] sm:$0xff] %v7661_v49  ;;  %v7660_v51 = vsel %vm7658_vm1, %v7655_v50, 0.0  ;;  %v7662_v52 = vsel %vm7658_vm1, %v7657_v45, 0.0 }
 0x4e7   :  { %7664 = vst [vmem:[%s13684_s3 + $0x8] sm:$0xff] %v7660_v51  ;;  %7666 = vst [vmem:[%s13684_s3 + $0x18] sm:$0xff] %v7662_v52 }

// kernel: discriminator_forward.15
= control target key start
LH: loop header
LB: loop body
LE: loop exit
PB: predicated region body
PF: predicated region fallthrough
CT: control target
= control target key end

     0   :  { %s5187_s1 = inlined_call_operand.vmem [shape: bf16[4608,128], index: 1, kind: input, shape index: {}]   ;;  %s5188_s0 = inlined_call_operand.vmem [shape: bf16[8,4608], index: 0, kind: input, shape index: {}]   ;;  %s5189_s2 = inlined_call_operand.vmem [shape: f32[1,128], index: 2, kind: input, shape index: {}]   ;;  %s5190_s3 = inlined_call_operand.vmem [shape: f32[8,128], index: 3, kind: output, shape index: {}]  }
   0x1   :  { %v3916_v0 = vld [vmem:[%s5187_s1 + $0x40] sm:$0xff]   ;;  %v3920_v4 = vld [vmem:[%s5187_s1 + $0x48] sm:$0xff]   ;;  %v3924_v8 = vld [vmem:[%s5187_s1 + $0x50] sm:$0xff]  }
   0x2   :  { %v3917_v1 = vld [vmem:[%s5187_s1 + $0xc0] sm:$0xff]   ;;  %3520 = vmatprep.subr.bf16.mxu0 %v3916_v0  ;;  %v3921_v5 = vld [vmem:[%s5187_s1 + $0xc8] sm:$0xff]   ;;  %v3925_v9 = vld [vmem:[%s5187_s1 + $0xd0] sm:$0xff]  }
   0x3   :  { %v3918_v2 = vld [vmem:[%s5187_s1] sm:$0xff]   ;;  %3542 = vmatprep.subr.bf16.mxu1 %v3917_v1  ;;  %v3922_v6 = vld [vmem:[%s5187_s1 + $0x8] sm:$0xff]   ;;  %v3926_v10 = vld [vmem:[%s5187_s1 + $0x10] sm:$0xff]  }
   0x4   :  { %v3919_v3 = vld [vmem:[%s5187_s1 + $0x80] sm:$0xff]   ;;  %3521 = vmatpush3.bf16.msra.mxu0 %v3918_v2  ;;  %v3923_v7 = vld [vmem:[%s5187_s1 + $0x88] sm:$0xff]   ;;  %v3927_v11 = vld [vmem:[%s5187_s1 + $0x90] sm:$0xff]  }
   0x5   :  { %3543 = vmatpush3.bf16.msra.mxu1 %v3919_v3  ;;  %3522 = vmatprep.subr.bf16.mxu0 %v3920_v4  ;;  %v3928_v12 = vld [vmem:[%s5187_s1 + $0x58] sm:$0xff]   ;;  %v3932_v16 = vld [vmem:[%s5187_s1 + $0x60] sm:$0xff]   ;;  %v3936_v20 = vld [vmem:[%s5187_s1 + $0x68] sm:$0xff]  }
   0x6   :  { %3544 = vmatprep.subr.bf16.mxu1 %v3921_v5  ;;  %v3929_v13 = vld [vmem:[%s5187_s1 + $0xd8] sm:$0xff]   ;;  %v3933_v17 = vld [vmem:[%s5187_s1 + $0xe0] sm:$0xff]   ;;  %v3937_v21 = vld [vmem:[%s5187_s1 + $0xe8] sm:$0xff]  }
   0x7   :  { %v3930_v14 = vld [vmem:[%s5187_s1 + $0x18] sm:$0xff]   ;;  %v3934_v18 = vld [vmem:[%s5187_s1 + $0x20] sm:$0xff]   ;;  %v3938_v22 = vld [vmem:[%s5187_s1 + $0x28] sm:$0xff]  }
   0x8   :  { %3523 = vmatpush3.bf16.msra.mxu0 %v3922_v6  ;;  %v3931_v15 = vld [vmem:[%s5187_s1 + $0x98] sm:$0xff]   ;;  %v3935_v19 = vld [vmem:[%s5187_s1 + $0xa0] sm:$0xff]   ;;  %v3939_v23 = vld [vmem:[%s5187_s1 + $0xa8] sm:$0xff]  }
   0x9   :  { %3545 = vmatpush3.bf16.msra.mxu1 %v3923_v7  ;;  %3524 = vmatprep.subr.bf16.mxu0 %v3924_v8  ;;  %v3940_v24 = vld [vmem:[%s5187_s1 + $0x70] sm:$0xff]   ;;  %v3944_v28 = vld [vmem:[%s5187_s1 + $0x78] sm:$0xff]   ;;  %v15_v32 = vld [vmem:[%s5188_s0] sm:$0xff] }
   0xa   :  { %3546 = vmatprep.subr.bf16.mxu1 %v3925_v9  ;;  %v3941_v25 = vld [vmem:[%s5187_s1 + $0xf0] sm:$0xff]   ;;  %v3945_v29 = vld [vmem:[%s5187_s1 + $0xf8] sm:$0xff]   ;;  %v16_v33 = vld [vmem:[%s5188_s0 + $0x8] sm:$0xff]  ;;  %v3196_v34 = vcombine.low %v15_v32, %v15_v32  ;;  %v3197_v35 = vcombine.high %v15_v32, %v15_v32 }
   0xb   :  { %v3942_v26 = vld [vmem:[%s5187_s1 + $0x30] sm:$0xff]   ;;  %v3946_v30 = vld [vmem:[%s5187_s1 + $0x38] sm:$0xff]   ;;  %v3198_v36 = vcombine.low %v16_v33, %v16_v33  ;;  %v3199_v37 = vcombine.high %v16_v33, %v16_v33  ;;  %v3952_v38 = vld [vmem:[%s5187_s1 + $0x140] sm:$0xff]  }
   0xc   :  { %3525 = vmatpush3.bf16.msra.mxu0 %v3926_v10  ;;  %v3943_v27 = vld [vmem:[%s5187_s1 + $0xb0] sm:$0xff]   ;;  %v3947_v31 = vld [vmem:[%s5187_s1 + $0xb8] sm:$0xff]   ;;  %v3953_v39 = vld [vmem:[%s5187_s1 + $0x1c0] sm:$0xff]   ;;  %2502 = vmatprep.mubr.bf16.mxu0 %v3197_v35 }
   0xd   :  { %3547 = vmatpush3.bf16.msra.mxu1 %v3927_v11  ;;  %3526 = vmatprep.subr.bf16.mxu0 %v3928_v12  ;;  %v3954_v40 = vld [vmem:[%s5187_s1 + $0x100] sm:$0xff]   ;;  %v3956_v42 = vld [vmem:[%s5187_s1 + $0x148] sm:$0xff]   ;;  %v3960_v46 = vld [vmem:[%s5187_s1 + $0x150] sm:$0xff]  }
   0xe   :  { %3548 = vmatprep.subr.bf16.mxu1 %v3929_v13  ;;  %2542 = vmatprep.mubr.bf16.mxu1 %v3199_v37  ;;  %v3955_v41 = vld [vmem:[%s5187_s1 + $0x180] sm:$0xff]   ;;  %v3957_v43 = vld [vmem:[%s5187_s1 + $0x1c8] sm:$0xff]   ;;  %v3961_v47 = vld [vmem:[%s5187_s1 + $0x1d0] sm:$0xff]  }
   0xf   :  { %v3958_v44 = vld [vmem:[%s5187_s1 + $0x108] sm:$0xff]   ;;  %v3962_v48 = vld [vmem:[%s5187_s1 + $0x110] sm:$0xff]   ;;  %v3964_v50 = vld [vmem:[%s5187_s1 + $0x158] sm:$0xff]  }
  0x10   :  { %3527 = vmatpush3.bf16.msra.mxu0 %v3930_v14  ;;  %v3959_v45 = vld [vmem:[%s5187_s1 + $0x188] sm:$0xff]   ;;  %v3963_v49 = vld [vmem:[%s5187_s1 + $0x190] sm:$0xff]   ;;  %v3965_v51 = vld [vmem:[%s5187_s1 + $0x1d8] sm:$0xff]  }
  0x11   :  { %3549 = vmatpush3.bf16.msra.mxu1 %v3931_v15  ;;  %3528 = vmatprep.subr.bf16.mxu0 %v3932_v16  ;;  %v3966_v52 = vld [vmem:[%s5187_s1 + $0x118] sm:$0xff]   ;;  %v3968_v54 = vld [vmem:[%s5187_s1 + $0x160] sm:$0xff]   ;;  %v3972_v58 = vld [vmem:[%s5187_s1 + $0x168] sm:$0xff]  }
  0x12   :  { %3550 = vmatprep.subr.bf16.mxu1 %v3933_v17  ;;  %v3967_v53 = vld [vmem:[%s5187_s1 + $0x198] sm:$0xff]   ;;  %v3969_v55 = vld [vmem:[%s5187_s1 + $0x1e0] sm:$0xff]   ;;  %v3973_v59 = vld [vmem:[%s5187_s1 + $0x1e8] sm:$0xff]  }
  0x13   :  { %v3970_v56 = vld [vmem:[%s5187_s1 + $0x120] sm:$0xff]   ;;  %v3974_v60 = vld [vmem:[%s5187_s1 + $0x128] sm:$0xff]   ;;  %v3976_v62 = vld [vmem:[%s5187_s1 + $0x170] sm:$0xff]  }
  0x14   :  { %3529 = vmatpush3.bf16.msra.mxu0 %v3934_v18  ;;  %v3971_v57 = vld [vmem:[%s5187_s1 + $0x1a0] sm:$0xff]   ;;  %v3975_v61 = vld [vmem:[%s5187_s1 + $0x1a8] sm:$0xff]   ;;  %v3977_v63 = vld [vmem:[%s5187_s1 + $0x1f0] sm:$0xff]  }
  0x15   :  { %3551 = vmatpush3.bf16.msra.mxu1 %v3935_v19  ;;  %3530 = vmatprep.subr.bf16.mxu0 %v3936_v20  ;;  %v3978_v0 = vld [vmem:[%s5187_s1 + $0x130] sm:$0xff]   ;;  %v3980_v2 = vld [vmem:[%s5187_s1 + $0x178] sm:$0xff]   ;;  %v3988_v12 = vld [vmem:[%s5187_s1 + $0x240] sm:$0xff]  }
  0x16   :  { %3552 = vmatprep.subr.bf16.mxu1 %v3937_v21  ;;  %v3979_v1 = vld [vmem:[%s5187_s1 + $0x1b0] sm:$0xff]   ;;  %v3981_v3 = vld [vmem:[%s5187_s1 + $0x1f8] sm:$0xff]   ;;  %v3989_v13 = vld [vmem:[%s5187_s1 + $0x2c0] sm:$0xff]  }
  0x17   :  { %v3982_v4 = vld [vmem:[%s5187_s1 + $0x138] sm:$0xff]   ;;  %v17_v6 = vld [vmem:[%s5188_s0 + $0x10] sm:$0xff]  ;;  %v3990_v14 = vld [vmem:[%s5187_s1 + $0x200] sm:$0xff]  }
  0x18   :  { %3531 = vmatpush3.bf16.msra.mxu0 %v3938_v22  ;;  %v3983_v5 = vld [vmem:[%s5187_s1 + $0x1b8] sm:$0xff]   ;;  %v3200_v7 = vcombine.low %v17_v6, %v17_v6  ;;  %v3201_v8 = vcombine.high %v17_v6, %v17_v6  ;;  %v3991_v15 = vld [vmem:[%s5187_s1 + $0x280] sm:$0xff]   ;;  %v3992_v16 = vld [vmem:[%s5187_s1 + $0x248] sm:$0xff]  }
  0x19   :  { %3553 = vmatpush3.bf16.msra.mxu1 %v3939_v23  ;;  %3532 = vmatprep.subr.bf16.mxu0 %v3940_v24  ;;  %v18_v9 = vld [vmem:[%s5188_s0 + $0x18] sm:$0xff]  ;;  %v3993_v17 = vld [vmem:[%s5187_s1 + $0x2c8] sm:$0xff]   ;;  %v3996_v20 = vld [vmem:[%s5187_s1 + $0x250] sm:$0xff]  }
  0x1a   :  { %3554 = vmatprep.subr.bf16.mxu1 %v3941_v25  ;;  %v3202_v10 = vcombine.low %v18_v9, %v18_v9  ;;  %v3203_v11 = vcombine.high %v18_v9, %v18_v9  ;;  %v3994_v18 = vld [vmem:[%s5187_s1 + $0x208] sm:$0xff]   ;;  %v3997_v21 = vld [vmem:[%s5187_s1 + $0x2d0] sm:$0xff]   ;;  %v4000_v24 = vld [vmem:[%s5187_s1 + $0x258] sm:$0xff]  }
  0x1b   :  { %v3995_v19 = vld [vmem:[%s5187_s1 + $0x288] sm:$0xff]   ;;  %v3998_v22 = vld [vmem:[%s5187_s1 + $0x210] sm:$0xff]   ;;  %v4001_v25 = vld [vmem:[%s5187_s1 + $0x2d8] sm:$0xff]  }
  0x1c   :  { %3533 = vmatpush3.bf16.msra.mxu0 %v3942_v26  ;;  %v3999_v23 = vld [vmem:[%s5187_s1 + $0x290] sm:$0xff]   ;;  %v4002_v26 = vld [vmem:[%s5187_s1 + $0x218] sm:$0xff]   ;;  %v4008_v32 = vld [vmem:[%s5187_s1 + $0x268] sm:$0xff]  }
  0x1d   :  { %3555 = vmatpush3.bf16.msra.mxu1 %v3943_v27  ;;  %3534 = vmatprep.subr.bf16.mxu0 %v3944_v28  ;;  %v4003_v27 = vld [vmem:[%s5187_s1 + $0x298] sm:$0xff]   ;;  %v4004_v28 = vld [vmem:[%s5187_s1 + $0x260] sm:$0xff]   ;;  %v4009_v33 = vld [vmem:[%s5187_s1 + $0x2e8] sm:$0xff]  }
  0x1e   :  { %3556 = vmatprep.subr.bf16.mxu1 %v3945_v29  ;;  %v4005_v29 = vld [vmem:[%s5187_s1 + $0x2e0] sm:$0xff]   ;;  %v4011_v35 = vld [vmem:[%s5187_s1 + $0x2a8] sm:$0xff]   ;;  %v4013_v37 = vld [vmem:[%s5187_s1 + $0x2f0] sm:$0xff]  }
  0x1f   :  { %v4044_v6 = vld [vmem:[%s5187_s1 + $0x368] sm:$0xff]  }
  0x20   :  { %3535 = vmatpush3.bf16.msra.mxu0 %v3946_v30  ;;  %v4006_v30 = vld [vmem:[%s5187_s1 + $0x220] sm:$0xff]   ;;  %v4047_v9 = vld [vmem:[%s5187_s1 + $0x3a8] sm:$0xff]  }
  0x21   :  { %3557 = vmatpush3.bf16.msra.mxu1 %v3947_v31  ;;  %3564 = vmatprep.subr.bf16.mxu0 %v3952_v38  ;;  %v4007_v31 = vld [vmem:[%s5187_s1 + $0x2a0] sm:$0xff]   ;;  %v4014_v38 = vld [vmem:[%s5187_s1 + $0x230] sm:$0xff]  }
  0x22   :  { %3586 = vmatprep.subr.bf16.mxu1 %v3953_v39  ;;  %v4015_v39 = vld [vmem:[%s5187_s1 + $0x2b0] sm:$0xff]  }
  0x23   :  { %2503 = vmatmul.mubr.bf16.vlgmr.msra.gmra.mrb[0].mxu0 %v3196_v34  ;;  %v4010_v34 = vld [vmem:[%s5187_s1 + $0x228] sm:$0xff]  }
  0x24   :  { %2543 = vmatmul.mubr.bf16.vlgmr.msra.gmra.mrb[0].mxu1 %v3198_v36  ;;  %3565 = vmatpush3.bf16.msra.mxu0 %v3954_v40  ;;  %v4012_v36 = vld [vmem:[%s5187_s1 + $0x270] sm:$0xff]   ;;  %v4016_v40 = vld [vmem:[%s5187_s1 + $0x278] sm:$0xff]  }
  0x25   :  { %3587 = vmatpush3.bf16.msra.mxu1 %v3955_v41  ;;  %3566 = vmatprep.subr.bf16.mxu0 %v3956_v42  ;;  %v4017_v41 = vld [vmem:[%s5187_s1 + $0x2f8] sm:$0xff]  }
  0x26   :  { %3588 = vmatprep.subr.bf16.mxu1 %v3957_v43  ;;  %2582 = vmatprep.mubr.bf16.mxu0 %v3201_v8  ;;  %v4018_v42 = vld [vmem:[%s5187_s1 + $0x238] sm:$0xff]   ;;  %v4046_v8 = vld [vmem:[%s5187_s1 + $0x328] sm:$0xff]  }
  0x27   :  { %2622 = vmatprep.mubr.bf16.mxu1 %v3203_v11  ;;  %v4019_v43 = vld [vmem:[%s5187_s1 + $0x2b8] sm:$0xff]   ;;  %v4049_v11 = vld [vmem:[%s5187_s1 + $0x3f0] sm:$0xff]  }
  0x28   :  { %3567 = vmatpush3.bf16.msra.mxu0 %v3958_v44  ;;  %v19_v44 = vld [vmem:[%s5188_s0 + $0x20] sm:$0xff] }
  0x29   :  { %3589 = vmatpush3.bf16.msra.mxu1 %v3959_v45  ;;  %3568 = vmatprep.subr.bf16.mxu0 %v3960_v46  ;;  %v20_v45 = vld [vmem:[%s5188_s0 + $0x28] sm:$0xff]  ;;  %v3204_v46 = vcombine.low %v19_v44, %v19_v44 }
  0x2a   :  { %3590 = vmatprep.subr.bf16.mxu1 %v3961_v47  ;;  %v3205_v47 = vcombine.high %v19_v44, %v19_v44  ;;  %v4080_v44 = vld [vmem:[%s5187_s1 + $0x468] sm:$0xff]  }
  0x2c   :  { %3569 = vmatpush3.bf16.msra.mxu0 %v3962_v48  ;;  %v3206_v48 = vcombine.low %v20_v45, %v20_v45 }
  0x2d   :  { %3591 = vmatpush3.bf16.msra.mxu1 %v3963_v49  ;;  %3570 = vmatprep.subr.bf16.mxu0 %v3964_v50  ;;  %v3207_v49 = vcombine.high %v20_v45, %v20_v45  ;;  %v4024_v50 = vld [vmem:[%s5187_s1 + $0x340] sm:$0xff]   ;;  %v4081_v45 = vld [vmem:[%s5187_s1 + $0x4e8] sm:$0xff]  }
  0x2e   :  { %3592 = vmatprep.subr.bf16.mxu1 %v3965_v51  ;;  %v4025_v51 = vld [vmem:[%s5187_s1 + $0x3c0] sm:$0xff]  }
  0x30   :  { %3571 = vmatpush3.bf16.msra.mxu0 %v3966_v52  ;;  %v4026_v52 = vld [vmem:[%s5187_s1 + $0x300] sm:$0xff]  }
  0x31   :  { %3593 = vmatpush3.bf16.msra.mxu1 %v3967_v53  ;;  %3572 = vmatprep.subr.bf16.mxu0 %v3968_v54  ;;  %v4027_v53 = vld [vmem:[%s5187_s1 + $0x380] sm:$0xff]   ;;  %v4028_v54 = vld [vmem:[%s5187_s1 + $0x348] sm:$0xff]  }
  0x32   :  { %3594 = vmatprep.subr.bf16.mxu1 %v3969_v55  ;;  %v4029_v55 = vld [vmem:[%s5187_s1 + $0x3c8] sm:$0xff]  }
  0x34   :  { %3573 = vmatpush3.bf16.msra.mxu0 %v3970_v56  ;;  %v4030_v56 = vld [vmem:[%s5187_s1 + $0x308] sm:$0xff]  }
  0x35   :  { %3595 = vmatpush3.bf16.msra.mxu1 %v3971_v57  ;;  %3574 = vmatprep.subr.bf16.mxu0 %v3972_v58  ;;  %v4031_v57 = vld [vmem:[%s5187_s1 + $0x388] sm:$0xff]   ;;  %v4032_v58 = vld [vmem:[%s5187_s1 + $0x350] sm:$0xff]  }
  0x36   :  { %3596 = vmatprep.subr.bf16.mxu1 %v3973_v59  ;;  %v4033_v59 = vld [vmem:[%s5187_s1 + $0x3d0] sm:$0xff]  }
  0x38   :  { %3575 = vmatpush3.bf16.msra.mxu0 %v3974_v60  ;;  %v4034_v60 = vld [vmem:[%s5187_s1 + $0x310] sm:$0xff]  }
  0x39   :  { %3597 = vmatpush3.bf16.msra.mxu1 %v3975_v61  ;;  %3576 = vmatprep.subr.bf16.mxu0 %v3976_v62  ;;  %v4035_v61 = vld [vmem:[%s5187_s1 + $0x390] sm:$0xff]   ;;  %v4036_v62 = vld [vmem:[%s5187_s1 + $0x358] sm:$0xff]  }
  0x3a   :  { %3598 = vmatprep.subr.bf16.mxu1 %v3977_v63  ;;  %v4037_v63 = vld [vmem:[%s5187_s1 + $0x3d8] sm:$0xff]  }
  0x3c   :  { %3577 = vmatpush3.bf16.msra.mxu0 %v3978_v0  ;;  %v4038_v0 = vld [vmem:[%s5187_s1 + $0x318] sm:$0xff]  }
  0x3d   :  { %3599 = vmatpush3.bf16.msra.mxu1 %v3979_v1  ;;  %3578 = vmatprep.subr.bf16.mxu0 %v3980_v2  ;;  %v4039_v1 = vld [vmem:[%s5187_s1 + $0x398] sm:$0xff]   ;;  %v4040_v2 = vld [vmem:[%s5187_s1 + $0x360] sm:$0xff]  }
  0x3e   :  { %3600 = vmatprep.subr.bf16.mxu1 %v3981_v3  ;;  %v4041_v3 = vld [vmem:[%s5187_s1 + $0x3e0] sm:$0xff]  }
  0x40   :  { %3579 = vmatpush3.bf16.msra.mxu0 %v3982_v4  ;;  %v4042_v4 = vld [vmem:[%s5187_s1 + $0x320] sm:$0xff]  }
  0x41   :  { %3601 = vmatpush3.bf16.msra.mxu1 %v3983_v5  ;;  %3608 = vmatprep.subr.bf16.mxu0 %v3988_v12  ;;  %v4043_v5 = vld [vmem:[%s5187_s1 + $0x3a0] sm:$0xff]   ;;  %v4050_v12 = vld [vmem:[%s5187_s1 + $0x330] sm:$0xff]  }
  0x42   :  { %3630 = vmatprep.subr.bf16.mxu1 %v3989_v13  ;;  %v4051_v13 = vld [vmem:[%s5187_s1 + $0x3b0] sm:$0xff]  }
  0x43   :  { %2583 = vmatmul.mubr.bf16.vlgmr.msra.gmra.mrb[4].mxu0 %v3200_v7  ;;  %v4045_v7 = vld [vmem:[%s5187_s1 + $0x3e8] sm:$0xff]  }
  0x44   :  { %2623 = vmatmul.mubr.bf16.vlgmr.msra.gmra.mrb[4].mxu1 %v3202_v10  ;;  %3609 = vmatpush3.bf16.msra.mxu0 %v3990_v14  ;;  %v4048_v10 = vld [vmem:[%s5187_s1 + $0x370] sm:$0xff]   ;;  %v4052_v14 = vld [vmem:[%s5187_s1 + $0x378] sm:$0xff]  }
  0x45   :  { %3631 = vmatpush3.bf16.msra.mxu1 %v3991_v15  ;;  %3610 = vmatprep.subr.bf16.mxu0 %v3992_v16  ;;  %v4053_v15 = vld [vmem:[%s5187_s1 + $0x3f8] sm:$0xff]  }
  0x46   :  { %3632 = vmatprep.subr.bf16.mxu1 %v3993_v17  ;;  %2662 = vmatprep.mubr.bf16.mxu0 %v3205_v47  ;;  %v4054_v16 = vld [vmem:[%s5187_s1 + $0x338] sm:$0xff]   ;;  %v4083_v47 = vld [vmem:[%s5187_s1 + $0x4a8] sm:$0xff]  }
  0x47   :  { %2702 = vmatprep.mubr.bf16.mxu1 %v3207_v49  ;;  %v4055_v17 = vld [vmem:[%s5187_s1 + $0x3b8] sm:$0xff]   ;;  %v4085_v49 = vld [vmem:[%s5187_s1 + $0x4f0] sm:$0xff]  }
  0x48   :  { %3611 = vmatpush3.bf16.msra.mxu0 %v3994_v18  ;;  %v21_v18 = vld [vmem:[%s5188_s0 + $0x30] sm:$0xff] }
  0x49   :  { %3633 = vmatpush3.bf16.msra.mxu1 %v3995_v19  ;;  %3612 = vmatprep.subr.bf16.mxu0 %v3996_v20  ;;  %v22_v19 = vld [vmem:[%s5188_s0 + $0x38] sm:$0xff]  ;;  %v3208_v20 = vcombine.low %v21_v18, %v21_v18 }
  0x4a   :  { %3634 = vmatprep.subr.bf16.mxu1 %v3997_v21  ;;  %v3209_v21 = vcombine.high %v21_v18, %v21_v18  ;;  %v4116_v18 = vld [vmem:[%s5187_s1 + $0x568] sm:$0xff]  }
  0x4c   :  { %3613 = vmatpush3.bf16.msra.mxu0 %v3998_v22  ;;  %v3210_v22 = vcombine.low %v22_v19, %v22_v19 }
  0x4d   :  { %3635 = vmatpush3.bf16.msra.mxu1 %v3999_v23  ;;  %3614 = vmatprep.subr.bf16.mxu0 %v4000_v24  ;;  %v4060_v23 = vld [vmem:[%s5187_s1 + $0x440] sm:$0xff]   ;;  %v3211_v24 = vcombine.high %v22_v19, %v22_v19  ;;  %v4117_v19 = vld [vmem:[%s5187_s1 + $0x5e8] sm:$0xff]  }
  0x4e   :  { %3636 = vmatprep.subr.bf16.mxu1 %v4001_v25  ;;  %v4061_v25 = vld [vmem:[%s5187_s1 + $0x4c0] sm:$0xff]  }
  0x50   :  { %3615 = vmatpush3.bf16.msra.mxu0 %v4002_v26  ;;  %v4062_v26 = vld [vmem:[%s5187_s1 + $0x400] sm:$0xff]  }
  0x51   :  { %3637 = vmatpush3.bf16.msra.mxu1 %v4003_v27  ;;  %3616 = vmatprep.subr.bf16.mxu0 %v4004_v28  ;;  %v4063_v27 = vld [vmem:[%s5187_s1 + $0x480] sm:$0xff]   ;;  %v4064_v28 = vld [vmem:[%s5187_s1 + $0x448] sm:$0xff]  }
  0x52   :  { %3638 = vmatprep.subr.bf16.mxu1 %v4005_v29  ;;  %v4065_v29 = vld [vmem:[%s5187_s1 + $0x4c8] sm:$0xff]  }
  0x54   :  { %3617 = vmatpush3.bf16.msra.mxu0 %v4006_v30  ;;  %v4066_v30 = vld [vmem:[%s5187_s1 + $0x408] sm:$0xff]  }
  0x55   :  { %3639 = vmatpush3.bf16.msra.mxu1 %v4007_v31  ;;  %3618 = vmatprep.subr.bf16.mxu0 %v4008_v32  ;;  %v4067_v31 = vld [vmem:[%s5187_s1 + $0x488] sm:$0xff]   ;;  %v4068_v32 = vld [vmem:[%s5187_s1 + $0x450] sm:$0xff]  }
  0x56   :  { %3640 = vmatprep.subr.bf16.mxu1 %v4009_v33  ;;  %v4069_v33 = vld [vmem:[%s5187_s1 + $0x4d0] sm:$0xff]  }
  0x58   :  { %3619 = vmatpush3.bf16.msra.mxu0 %v4010_v34  ;;  %v4070_v34 = vld [vmem:[%s5187_s1 + $0x410] sm:$0xff]  }
  0x59   :  { %3641 = vmatpush3.bf16.msra.mxu1 %v4011_v35  ;;  %3620 = vmatprep.subr.bf16.mxu0 %v4012_v36  ;;  %v4071_v35 = vld [vmem:[%s5187_s1 + $0x490] sm:$0xff]   ;;  %v4072_v36 = vld [vmem:[%s5187_s1 + $0x458] sm:$0xff]  }
  0x5a   :  { %3642 = vmatprep.subr.bf16.mxu1 %v4013_v37  ;;  %v4073_v37 = vld [vmem:[%s5187_s1 + $0x4d8] sm:$0xff]  }
  0x5c   :  { %3621 = vmatpush3.bf16.msra.mxu0 %v4014_v38  ;;  %v4074_v38 = vld [vmem:[%s5187_s1 + $0x418] sm:$0xff]  }
  0x5d   :  { %3643 = vmatpush3.bf16.msra.mxu1 %v4015_v39  ;;  %3622 = vmatprep.subr.bf16.mxu0 %v4016_v40  ;;  %v4075_v39 = vld [vmem:[%s5187_s1 + $0x498] sm:$0xff]   ;;  %v4076_v40 = vld [vmem:[%s5187_s1 + $0x460] sm:$0xff]  }
  0x5e   :  { %3644 = vmatprep.subr.bf16.mxu1 %v4017_v41  ;;  %v4077_v41 = vld [vmem:[%s5187_s1 + $0x4e0] sm:$0xff]  }
  0x60   :  { %3623 = vmatpush3.bf16.msra.mxu0 %v4018_v42  ;;  %v4078_v42 = vld [vmem:[%s5187_s1 + $0x420] sm:$0xff]  }
  0x61   :  { %3645 = vmatpush3.bf16.msra.mxu1 %v4019_v43  ;;  %3652 = vmatprep.subr.bf16.mxu0 %v4024_v50  ;;  %v4079_v43 = vld [vmem:[%s5187_s1 + $0x4a0] sm:$0xff]   ;;  %v4086_v50 = vld [vmem:[%s5187_s1 + $0x430] sm:$0xff]  }
  0x62   :  { %3674 = vmatprep.subr.bf16.mxu1 %v4025_v51  ;;  %v4087_v51 = vld [vmem:[%s5187_s1 + $0x4b0] sm:$0xff]  }
  0x63   :  { %2663 = vmatmul.mubr.bf16.vlgmr.msra.gmra.mrb[8].mxu0 %v3204_v46  ;;  %v4082_v46 = vld [vmem:[%s5187_s1 + $0x428] sm:$0xff]  }
  0x64   :  { %2703 = vmatmul.mubr.bf16.vlgmr.msra.gmra.mrb[8].mxu1 %v3206_v48  ;;  %3653 = vmatpush3.bf16.msra.mxu0 %v4026_v52  ;;  %v4084_v48 = vld [vmem:[%s5187_s1 + $0x470] sm:$0xff]   ;;  %v4088_v52 = vld [vmem:[%s5187_s1 + $0x478] sm:$0xff]  }
  0x65   :  { %3675 = vmatpush3.bf16.msra.mxu1 %v4027_v53  ;;  %3654 = vmatprep.subr.bf16.mxu0 %v4028_v54  ;;  %v4089_v53 = vld [vmem:[%s5187_s1 + $0x4f8] sm:$0xff]  }
  0x66   :  { %3676 = vmatprep.subr.bf16.mxu1 %v4029_v55  ;;  %2742 = vmatprep.mubr.bf16.mxu0 %v3209_v21  ;;  %v4090_v54 = vld [vmem:[%s5187_s1 + $0x438] sm:$0xff]   ;;  %v4119_v21 = vld [vmem:[%s5187_s1 + $0x5a8] sm:$0xff]  }
  0x67   :  { %2782 = vmatprep.mubr.bf16.mxu1 %v3211_v24  ;;  %v4091_v55 = vld [vmem:[%s5187_s1 + $0x4b8] sm:$0xff]   ;;  %v4122_v24 = vld [vmem:[%s5187_s1 + $0x530] sm:$0xff]  }
  0x68   :  { %3655 = vmatpush3.bf16.msra.mxu0 %v4030_v56  ;;  %v23_v56 = vld [vmem:[%s5188_s0 + $0x40] sm:$0xff] }
  0x69   :  { %3677 = vmatpush3.bf16.msra.mxu1 %v4031_v57  ;;  %3656 = vmatprep.subr.bf16.mxu0 %v4032_v58  ;;  %v3212_v57 = vcombine.low %v23_v56, %v23_v56  ;;  %v3213_v58 = vcombine.high %v23_v56, %v23_v56  ;;  %v4152_v56 = vld [vmem:[%s5187_s1 + $0x668] sm:$0xff]  }
  0x6a   :  { %3678 = vmatprep.subr.bf16.mxu1 %v4033_v59  ;;  %v24_v59 = vld [vmem:[%s5188_s0 + $0x48] sm:$0xff] }
  0x6c   :  { %3657 = vmatpush3.bf16.msra.mxu0 %v4034_v60  ;;  %v3214_v60 = vcombine.low %v24_v59, %v24_v59 }
  0x6d   :  { %3679 = vmatpush3.bf16.msra.mxu1 %v4035_v61  ;;  %3658 = vmatprep.subr.bf16.mxu0 %v4036_v62  ;;  %v3215_v61 = vcombine.high %v24_v59, %v24_v59  ;;  %v4096_v62 = vld [vmem:[%s5187_s1 + $0x540] sm:$0xff]   ;;  %v4155_v59 = vld [vmem:[%s5187_s1 + $0x6a8] sm:$0xff]  }
  0x6e   :  { %3680 = vmatprep.subr.bf16.mxu1 %v4037_v63  ;;  %v4097_v63 = vld [vmem:[%s5187_s1 + $0x5c0] sm:$0xff]  }
  0x70   :  { %3659 = vmatpush3.bf16.msra.mxu0 %v4038_v0  ;;  %v4098_v0 = vld [vmem:[%s5187_s1 + $0x500] sm:$0xff]  }
  0x71   :  { %3681 = vmatpush3.bf16.msra.mxu1 %v4039_v1  ;;  %3660 = vmatprep.subr.bf16.mxu0 %v4040_v2  ;;  %v4099_v1 = vld [vmem:[%s5187_s1 + $0x580] sm:$0xff]   ;;  %v4100_v2 = vld [vmem:[%s5187_s1 + $0x548] sm:$0xff]  }
  0x72   :  { %3682 = vmatprep.subr.bf16.mxu1 %v4041_v3  ;;  %v4101_v3 = vld [vmem:[%s5187_s1 + $0x5c8] sm:$0xff]  }
  0x74   :  { %3661 = vmatpush3.bf16.msra.mxu0 %v4042_v4  ;;  %v4102_v4 = vld [vmem:[%s5187_s1 + $0x508] sm:$0xff]  }
  0x75   :  { %3683 = vmatpush3.bf16.msra.mxu1 %v4043_v5  ;;  %3662 = vmatprep.subr.bf16.mxu0 %v4044_v6  ;;  %v4103_v5 = vld [vmem:[%s5187_s1 + $0x588] sm:$0xff]   ;;  %v4104_v6 = vld [vmem:[%s5187_s1 + $0x550] sm:$0xff]  }
  0x76   :  { %3684 = vmatprep.subr.bf16.mxu1 %v4045_v7  ;;  %v4105_v7 = vld [vmem:[%s5187_s1 + $0x5d0] sm:$0xff]  }
  0x78   :  { %3663 = vmatpush3.bf16.msra.mxu0 %v4046_v8  ;;  %v4106_v8 = vld [vmem:[%s5187_s1 + $0x510] sm:$0xff]  }
  0x79   :  { %3685 = vmatpush3.bf16.msra.mxu1 %v4047_v9  ;;  %3664 = vmatprep.subr.bf16.mxu0 %v4048_v10  ;;  %v4107_v9 = vld [vmem:[%s5187_s1 + $0x590] sm:$0xff]   ;;  %v4108_v10 = vld [vmem:[%s5187_s1 + $0x558] sm:$0xff]  }
  0x7a   :  { %3686 = vmatprep.subr.bf16.mxu1 %v4049_v11  ;;  %v4109_v11 = vld [vmem:[%s5187_s1 + $0x5d8] sm:$0xff]  }
  0x7c   :  { %3665 = vmatpush3.bf16.msra.mxu0 %v4050_v12  ;;  %v4110_v12 = vld [vmem:[%s5187_s1 + $0x518] sm:$0xff]  }
  0x7d   :  { %3687 = vmatpush3.bf16.msra.mxu1 %v4051_v13  ;;  %3666 = vmatprep.subr.bf16.mxu0 %v4052_v14  ;;  %v4111_v13 = vld [vmem:[%s5187_s1 + $0x598] sm:$0xff]   ;;  %v4112_v14 = vld [vmem:[%s5187_s1 + $0x560] sm:$0xff]  }
  0x7e   :  { %3688 = vmatprep.subr.bf16.mxu1 %v4053_v15  ;;  %v4113_v15 = vld [vmem:[%s5187_s1 + $0x5e0] sm:$0xff]  }
  0x80   :  { %3667 = vmatpush3.bf16.msra.mxu0 %v4054_v16  ;;  %v4114_v16 = vld [vmem:[%s5187_s1 + $0x520] sm:$0xff]  }
  0x81   :  { %3689 = vmatpush3.bf16.msra.mxu1 %v4055_v17  ;;  %3696 = vmatprep.subr.bf16.mxu0 %v4060_v23  ;;  %v4115_v17 = vld [vmem:[%s5187_s1 + $0x5a0] sm:$0xff]   ;;  %v4121_v23 = vld [vmem:[%s5187_s1 + $0x5f0] sm:$0xff]  }
  0x82   :  { %3718 = vmatprep.subr.bf16.mxu1 %v4061_v25  ;;  %v4123_v25 = vld [vmem:[%s5187_s1 + $0x5b0] sm:$0xff]  }
  0x83   :  { %2743 = vmatmul.mubr.bf16.vlgmr.msra.gmra.mrb[12].mxu0 %v3208_v20  ;;  %v4118_v20 = vld [vmem:[%s5187_s1 + $0x528] sm:$0xff]  }
  0x84   :  { %2783 = vmatmul.mubr.bf16.vlgmr.msra.gmra.mrb[12].mxu1 %v3210_v22  ;;  %3697 = vmatpush3.bf16.msra.mxu0 %v4062_v26  ;;  %v4120_v22 = vld [vmem:[%s5187_s1 + $0x570] sm:$0xff]   ;;  %v4124_v26 = vld [vmem:[%s5187_s1 + $0x578] sm:$0xff]  }
  0x85   :  { %3719 = vmatpush3.bf16.msra.mxu1 %v4063_v27  ;;  %3698 = vmatprep.subr.bf16.mxu0 %v4064_v28  ;;  %v4125_v27 = vld [vmem:[%s5187_s1 + $0x5f8] sm:$0xff]  }
  0x86   :  { %3720 = vmatprep.subr.bf16.mxu1 %v4065_v29  ;;  %2822 = vmatprep.mubr.bf16.mxu0 %v3213_v58  ;;  %v4126_v28 = vld [vmem:[%s5187_s1 + $0x538] sm:$0xff]   ;;  %v4154_v58 = vld [vmem:[%s5187_s1 + $0x628] sm:$0xff]  }
  0x87   :  { %2862 = vmatprep.mubr.bf16.mxu1 %v3215_v61  ;;  %v4127_v29 = vld [vmem:[%s5187_s1 + $0x5b8] sm:$0xff]   ;;  %v4157_v61 = vld [vmem:[%s5187_s1 + $0x6f0] sm:$0xff]  }
  0x88   :  { %3699 = vmatpush3.bf16.msra.mxu0 %v4066_v30  ;;  %v25_v30 = vld [vmem:[%s5188_s0 + $0x50] sm:$0xff] }
  0x89   :  { %3721 = vmatpush3.bf16.msra.mxu1 %v4067_v31  ;;  %3700 = vmatprep.subr.bf16.mxu0 %v4068_v32  ;;  %v26_v31 = vld [vmem:[%s5188_s0 + $0x58] sm:$0xff]  ;;  %v3216_v32 = vcombine.low %v25_v30, %v25_v30 }
  0x8a   :  { %3722 = vmatprep.subr.bf16.mxu1 %v4069_v33  ;;  %v3217_v33 = vcombine.high %v25_v30, %v25_v30  ;;  %v4187_v30 = vld [vmem:[%s5187_s1 + $0x7a0] sm:$0xff]  }
  0x8c   :  { %3701 = vmatpush3.bf16.msra.mxu0 %v4070_v34  ;;  %v3218_v34 = vcombine.low %v26_v31, %v26_v31 }
  0x8d   :  { %3723 = vmatpush3.bf16.msra.mxu1 %v4071_v35  ;;  %3702 = vmatprep.subr.bf16.mxu0 %v4072_v36  ;;  %v3219_v35 = vcombine.high %v26_v31, %v26_v31  ;;  %v4132_v36 = vld [vmem:[%s5187_s1 + $0x640] sm:$0xff]  }
  0x8e   :  { %3724 = vmatprep.subr.bf16.mxu1 %v4073_v37  ;;  %v4133_v37 = vld [vmem:[%s5187_s1 + $0x6c0] sm:$0xff]  }
  0x90   :  { %3703 = vmatpush3.bf16.msra.mxu0 %v4074_v38  ;;  %v4134_v38 = vld [vmem:[%s5187_s1 + $0x600] sm:$0xff]  }
  0x91   :  { %3725 = vmatpush3.bf16.msra.mxu1 %v4075_v39  ;;  %3704 = vmatprep.subr.bf16.mxu0 %v4076_v40  ;;  %v4135_v39 = vld [vmem:[%s5187_s1 + $0x680] sm:$0xff]   ;;  %v4136_v40 = vld [vmem:[%s5187_s1 + $0x648] sm:$0xff]  }
  0x92   :  { %3726 = vmatprep.subr.bf16.mxu1 %v4077_v41  ;;  %v4137_v41 = vld [vmem:[%s5187_s1 + $0x6c8] sm:$0xff]  }
  0x94   :  { %3705 = vmatpush3.bf16.msra.mxu0 %v4078_v42  ;;  %v4138_v42 = vld [vmem:[%s5187_s1 + $0x608] sm:$0xff]  }
  0x95   :  { %3727 = vmatpush3.bf16.msra.mxu1 %v4079_v43  ;;  %3706 = vmatprep.subr.bf16.mxu0 %v4080_v44  ;;  %v4139_v43 = vld [vmem:[%s5187_s1 + $0x688] sm:$0xff]   ;;  %v4140_v44 = vld [vmem:[%s5187_s1 + $0x650] sm:$0xff]  }
  0x96   :  { %3728 = vmatprep.subr.bf16.mxu1 %v4081_v45  ;;  %v4141_v45 = vld [vmem:[%s5187_s1 + $0x6d0] sm:$0xff]  }
  0x98   :  { %3707 = vmatpush3.bf16.msra.mxu0 %v4082_v46  ;;  %v4142_v46 = vld [vmem:[%s5187_s1 + $0x610] sm:$0xff]  }
  0x99   :  { %3729 = vmatpush3.bf16.msra.mxu1 %v4083_v47  ;;  %3708 = vmatprep.subr.bf16.mxu0 %v4084_v48  ;;  %v4143_v47 = vld [vmem:[%s5187_s1 + $0x690] sm:$0xff]   ;;  %v4144_v48 = vld [vmem:[%s5187_s1 + $0x658] sm:$0xff]  }
  0x9a   :  { %3730 = vmatprep.subr.bf16.mxu1 %v4085_v49  ;;  %v4145_v49 = vld [vmem:[%s5187_s1 + $0x6d8] sm:$0xff]  }
  0x9c   :  { %3709 = vmatpush3.bf16.msra.mxu0 %v4086_v50  ;;  %v4146_v50 = vld [vmem:[%s5187_s1 + $0x618] sm:$0xff]  }
  0x9d   :  { %3731 = vmatpush3.bf16.msra.mxu1 %v4087_v51  ;;  %3710 = vmatprep.subr.bf16.mxu0 %v4088_v52  ;;  %v4147_v51 = vld [vmem:[%s5187_s1 + $0x698] sm:$0xff]   ;;  %v4148_v52 = vld [vmem:[%s5187_s1 + $0x660] sm:$0xff]  }
  0x9e   :  { %3732 = vmatprep.subr.bf16.mxu1 %v4089_v53  ;;  %v4149_v53 = vld [vmem:[%s5187_s1 + $0x6e0] sm:$0xff]  }
  0xa0   :  { %3711 = vmatpush3.bf16.msra.mxu0 %v4090_v54  ;;  %v4150_v54 = vld [vmem:[%s5187_s1 + $0x620] sm:$0xff]  }
  0xa1   :  { %3733 = vmatpush3.bf16.msra.mxu1 %v4091_v55  ;;  %3740 = vmatprep.subr.bf16.mxu0 %v4096_v62  ;;  %v4151_v55 = vld [vmem:[%s5187_s1 + $0x6a0] sm:$0xff]   ;;  %v4158_v62 = vld [vmem:[%s5187_s1 + $0x630] sm:$0xff]  }
  0xa2   :  { %3762 = vmatprep.subr.bf16.mxu1 %v4097_v63  ;;  %v4159_v63 = vld [vmem:[%s5187_s1 + $0x6b0] sm:$0xff]  }
  0xa3   :  { %2823 = vmatmul.mubr.bf16.vlgmr.msra.gmra.mrb[16].mxu0 %v3212_v57  ;;  %v4153_v57 = vld [vmem:[%s5187_s1 + $0x6e8] sm:$0xff]  }
  0xa4   :  { %2863 = vmatmul.mubr.bf16.vlgmr.msra.gmra.mrb[16].mxu1 %v3214_v60  ;;  %3741 = vmatpush3.bf16.msra.mxu0 %v4098_v0  ;;  %v4156_v60 = vld [vmem:[%s5187_s1 + $0x670] sm:$0xff]   ;;  %v4160_v0 = vld [vmem:[%s5187_s1 + $0x678] sm:$0xff]  }
  0xa5   :  { %3763 = vmatpush3.bf16.msra.mxu1 %v4099_v1  ;;  %3742 = vmatprep.subr.bf16.mxu0 %v4100_v2  ;;  %v4161_v1 = vld [vmem:[%s5187_s1 + $0x6f8] sm:$0xff]  }
  0xa6   :  { %3764 = vmatprep.subr.bf16.mxu1 %v4101_v3  ;;  %2902 = vmatprep.mubr.bf16.mxu0 %v3217_v33  ;;  %v4162_v2 = vld [vmem:[%s5187_s1 + $0x638] sm:$0xff]  }
  0xa7   :  { %2942 = vmatprep.mubr.bf16.mxu1 %v3219_v35  ;;  %v4163_v3 = vld [vmem:[%s5187_s1 + $0x6b8] sm:$0xff]  }
  0xa8   :  { %3743 = vmatpush3.bf16.msra.mxu0 %v4102_v4  ;;  %v27_v4 = vld [vmem:[%s5188_s0 + $0x60] sm:$0xff] }
  0xa9   :  { %3765 = vmatpush3.bf16.msra.mxu1 %v4103_v5  ;;  %3744 = vmatprep.subr.bf16.mxu0 %v4104_v6  ;;  %v28_v5 = vld [vmem:[%s5188_s0 + $0x68] sm:$0xff]  ;;  %v3220_v6 = vcombine.low %v27_v4, %v27_v4 }
  0xaa   :  { %3766 = vmatprep.subr.bf16.mxu1 %v4105_v7  ;;  %v3221_v7 = vcombine.high %v27_v4, %v27_v4  ;;  %v4211_v4 = vld [vmem:[%s5187_s1 + $0x888] sm:$0xff]  }
  0xac   :  { %3745 = vmatpush3.bf16.msra.mxu0 %v4106_v8  ;;  %v3222_v8 = vcombine.low %v28_v5, %v28_v5 }
  0xad   :  { %3767 = vmatpush3.bf16.msra.mxu1 %v4107_v9  ;;  %3746 = vmatprep.subr.bf16.mxu0 %v4108_v10  ;;  %v4168_v9 = vld [vmem:[%s5187_s1 + $0x740] sm:$0xff]   ;;  %v3223_v10 = vcombine.high %v28_v5, %v28_v5  ;;  %v4212_v5 = vld [vmem:[%s5187_s1 + $0x850] sm:$0xff]  }
  0xae   :  { %3768 = vmatprep.subr.bf16.mxu1 %v4109_v11  ;;  %v4169_v11 = vld [vmem:[%s5187_s1 + $0x7c0] sm:$0xff]  }
  0xb0   :  { %3747 = vmatpush3.bf16.msra.mxu0 %v4110_v12  ;;  %v4170_v12 = vld [vmem:[%s5187_s1 + $0x700] sm:$0xff]  }
  0xb1   :  { %3769 = vmatpush3.bf16.msra.mxu1 %v4111_v13  ;;  %3748 = vmatprep.subr.bf16.mxu0 %v4112_v14  ;;  %v4171_v13 = vld [vmem:[%s5187_s1 + $0x780] sm:$0xff]   ;;  %v4172_v14 = vld [vmem:[%s5187_s1 + $0x748] sm:$0xff]  }
  0xb2   :  { %3770 = vmatprep.subr.bf16.mxu1 %v4113_v15  ;;  %v4173_v15 = vld [vmem:[%s5187_s1 + $0x7c8] sm:$0xff]  }
  0xb4   :  { %3749 = vmatpush3.bf16.msra.mxu0 %v4114_v16  ;;  %v4174_v16 = vld [vmem:[%s5187_s1 + $0x708] sm:$0xff]  }
  0xb5   :  { %3771 = vmatpush3.bf16.msra.mxu1 %v4115_v17  ;;  %3750 = vmatprep.subr.bf16.mxu0 %v4116_v18  ;;  %v4175_v17 = vld [vmem:[%s5187_s1 + $0x788] sm:$0xff]   ;;  %v4176_v18 = vld [vmem:[%s5187_s1 + $0x750] sm:$0xff]  }
  0xb6   :  { %3772 = vmatprep.subr.bf16.mxu1 %v4117_v19  ;;  %v4177_v19 = vld [vmem:[%s5187_s1 + $0x7d0] sm:$0xff]  }
  0xb8   :  { %3751 = vmatpush3.bf16.msra.mxu0 %v4118_v20  ;;  %v4178_v20 = vld [vmem:[%s5187_s1 + $0x710] sm:$0xff]  }
  0xb9   :  { %3773 = vmatpush3.bf16.msra.mxu1 %v4119_v21  ;;  %3752 = vmatprep.subr.bf16.mxu0 %v4120_v22  ;;  %v4179_v21 = vld [vmem:[%s5187_s1 + $0x790] sm:$0xff]   ;;  %v4180_v22 = vld [vmem:[%s5187_s1 + $0x758] sm:$0xff]  }
  0xba   :  { %3774 = vmatprep.subr.bf16.mxu1 %v4121_v23  ;;  %v4181_v23 = vld [vmem:[%s5187_s1 + $0x7d8] sm:$0xff]  }
  0xbc   :  { %3753 = vmatpush3.bf16.msra.mxu0 %v4122_v24  ;;  %v4182_v24 = vld [vmem:[%s5187_s1 + $0x718] sm:$0xff]  }
  0xbd   :  { %3775 = vmatpush3.bf16.msra.mxu1 %v4123_v25  ;;  %3754 = vmatprep.subr.bf16.mxu0 %v4124_v26  ;;  %v4183_v25 = vld [vmem:[%s5187_s1 + $0x798] sm:$0xff]   ;;  %v4184_v26 = vld [vmem:[%s5187_s1 + $0x760] sm:$0xff]  }
  0xbe   :  { %3776 = vmatprep.subr.bf16.mxu1 %v4125_v27  ;;  %v4185_v27 = vld [vmem:[%s5187_s1 + $0x7e0] sm:$0xff]  }
  0xc0   :  { %3755 = vmatpush3.bf16.msra.mxu0 %v4126_v28  ;;  %v4186_v28 = vld [vmem:[%s5187_s1 + $0x720] sm:$0xff]  }
  0xc1   :  { %3777 = vmatpush3.bf16.msra.mxu1 %v4127_v29  ;;  %3784 = vmatprep.subr.bf16.mxu0 %v4132_v36 }
  0xc2   :  { %3806 = vmatprep.subr.bf16.mxu1 %v4133_v37  ;;  %v4188_v37 = vld [vmem:[%s5187_s1 + $0x768] sm:$0xff]  }
  0xc3   :  { %2903 = vmatmul.mubr.bf16.vlgmr.msra.gmra.mrb[20].mxu0 %v3216_v32  ;;  %v3195_v32 = vld [vmem:[%s5189_s2] ss:$0 sm:$0xff] }
  0xc4   :  { %2943 = vmatmul.mubr.bf16.vlgmr.msra.gmra.mrb[20].mxu1 %v3218_v34  ;;  %3785 = vmatpush3.bf16.msra.mxu0 %v4134_v38 }
  0xc5   :  { %3807 = vmatpush3.bf16.msra.mxu1 %v4135_v39  ;;  %3786 = vmatprep.subr.bf16.mxu0 %v4136_v40  ;;  %v4189_v39 = vld [vmem:[%s5187_s1 + $0x7e8] sm:$0xff]  }
  0xc6   :  { %3808 = vmatprep.subr.bf16.mxu1 %v4137_v41  ;;  %2982 = vmatprep.mubr.bf16.mxu0 %v3221_v7  ;;  %v4214_v7 = vld [vmem:[%s5187_s1 + $0x810] sm:$0xff]  }
  0xc7   :  { %3022 = vmatprep.mubr.bf16.mxu1 %v3223_v10  ;;  %v4217_v10 = vld [vmem:[%s5187_s1 + $0x8d8] sm:$0xff]  }
  0xc8   :  { %3787 = vmatpush3.bf16.msra.mxu0 %v4138_v42  ;;  %v4190_v42 = vld [vmem:[%s5187_s1 + $0x728] sm:$0xff]  }
  0xc9   :  { %3809 = vmatpush3.bf16.msra.mxu1 %v4139_v43  ;;  %3788 = vmatprep.subr.bf16.mxu0 %v4140_v44  ;;  %v4191_v44 = vld [vmem:[%s5187_s1 + $0x7a8] sm:$0xff]  }
  0xca   :  { %3810 = vmatprep.subr.bf16.mxu1 %v4141_v45 }
  0xcc   :  { %3789 = vmatpush3.bf16.msra.mxu0 %v4142_v46 }
  0xcd   :  { %3811 = vmatpush3.bf16.msra.mxu1 %v4143_v47  ;;  %3790 = vmatprep.subr.bf16.mxu0 %v4144_v48  ;;  %v4192_v47 = vld [vmem:[%s5187_s1 + $0x770] sm:$0xff]  }
  0xce   :  { %3812 = vmatprep.subr.bf16.mxu1 %v4145_v49  ;;  %v4193_v48 = vld [vmem:[%s5187_s1 + $0x7f0] sm:$0xff]  }
  0xcf   :  { %v4194_v49 = vld [vmem:[%s5187_s1 + $0x730] sm:$0xff]  }
  0xd0   :  { %3791 = vmatpush3.bf16.msra.mxu0 %v4146_v50  ;;  %v4195_v50 = vld [vmem:[%s5187_s1 + $0x7b0] sm:$0xff]  }
  0xd1   :  { %3813 = vmatpush3.bf16.msra.mxu1 %v4147_v51  ;;  %3792 = vmatprep.subr.bf16.mxu0 %v4148_v52  ;;  %v4196_v51 = vld [vmem:[%s5187_s1 + $0x778] sm:$0xff]  }
  0xd2   :  { %3814 = vmatprep.subr.bf16.mxu1 %v4149_v53  ;;  %v4197_v52 = vld [vmem:[%s5187_s1 + $0x7f8] sm:$0xff]  }
  0xd3   :  { %v4198_v53 = vld [vmem:[%s5187_s1 + $0x738] sm:$0xff]  }
  0xd4   :  { %3793 = vmatpush3.bf16.msra.mxu0 %v4150_v54  ;;  %v4199_v54 = vld [vmem:[%s5187_s1 + $0x7b8] sm:$0xff]  }
  0xd5   :  { %3815 = vmatpush3.bf16.msra.mxu1 %v4151_v55  ;;  %3794 = vmatprep.subr.bf16.mxu0 %v4152_v56  ;;  %v29_v55 = vld [vmem:[%s5188_s0 + $0x70] sm:$0xff]  ;;  %v30_v56 = vld [vmem:[%s5188_s0 + $0x78] sm:$0xff] }
  0xd6   :  { %3816 = vmatprep.subr.bf16.mxu1 %v4153_v57  ;;  %v3224_v57 = vcombine.low %v29_v55, %v29_v55 }
  0xd8   :  { %3795 = vmatpush3.bf16.msra.mxu0 %v4154_v58  ;;  %v3225_v58 = vcombine.high %v29_v55, %v29_v55 }
  0xd9   :  { %3817 = vmatpush3.bf16.msra.mxu1 %v4155_v59  ;;  %3796 = vmatprep.subr.bf16.mxu0 %v4156_v60  ;;  %v3226_v59 = vcombine.low %v30_v56, %v30_v56  ;;  %v3227_v60 = vcombine.high %v30_v56, %v30_v56 }
  0xda   :  { %3818 = vmatprep.subr.bf16.mxu1 %v4157_v61  ;;  %v4204_v61 = vld [vmem:[%s5187_s1 + $0x840] sm:$0xff]  }
  0xdc   :  { %3797 = vmatpush3.bf16.msra.mxu0 %v4158_v62  ;;  %v4205_v62 = vld [vmem:[%s5187_s1 + $0x8c0] sm:$0xff]  }
  0xdd   :  { %3819 = vmatpush3.bf16.msra.mxu1 %v4159_v63  ;;  %3798 = vmatprep.subr.bf16.mxu0 %v4160_v0  ;;  %v4206_v63 = vld [vmem:[%s5187_s1 + $0x800] sm:$0xff]  }
  0xde   :  { %3820 = vmatprep.subr.bf16.mxu1 %v4161_v1  ;;  %v4207_v0 = vld [vmem:[%s5187_s1 + $0x880] sm:$0xff]   ;;  %v4208_v1 = vld [vmem:[%s5187_s1 + $0x848] sm:$0xff]  }
  0xe0   :  { %3799 = vmatpush3.bf16.msra.mxu0 %v4162_v2  ;;  %v4209_v2 = vld [vmem:[%s5187_s1 + $0x8c8] sm:$0xff]  }
  0xe1   :  { %3821 = vmatpush3.bf16.msra.mxu1 %v4163_v3  ;;  %3828 = vmatprep.subr.bf16.mxu0 %v4168_v9  ;;  %v4210_v3 = vld [vmem:[%s5187_s1 + $0x808] sm:$0xff]   ;;  %v4216_v9 = vld [vmem:[%s5187_s1 + $0x858] sm:$0xff]  }
  0xe2   :  { %3850 = vmatprep.subr.bf16.mxu1 %v4169_v11  ;;  %v4218_v11 = vld [vmem:[%s5187_s1 + $0x818] sm:$0xff]  }
  0xe3   :  { %2983 = vmatmul.mubr.bf16.vlgmr.msra.gmra.mrb[24].mxu0 %v3220_v6  ;;  %v4213_v6 = vld [vmem:[%s5187_s1 + $0x8d0] sm:$0xff]  }
  0xe4   :  { %3023 = vmatmul.mubr.bf16.vlgmr.msra.gmra.mrb[24].mxu1 %v3222_v8  ;;  %3829 = vmatpush3.bf16.msra.mxu0 %v4170_v12  ;;  %v4215_v8 = vld [vmem:[%s5187_s1 + $0x890] sm:$0xff]   ;;  %v4219_v12 = vld [vmem:[%s5187_s1 + $0x898] sm:$0xff]  }
  0xe5   :  { %3851 = vmatpush3.bf16.msra.mxu1 %v4171_v13  ;;  %3830 = vmatprep.subr.bf16.mxu0 %v4172_v14  ;;  %v4220_v13 = vld [vmem:[%s5187_s1 + $0x860] sm:$0xff]  }
  0xe6   :  { %3852 = vmatprep.subr.bf16.mxu1 %v4173_v15  ;;  %3062 = vmatprep.mubr.bf16.mxu0 %v3225_v58  ;;  %v4221_v14 = vld [vmem:[%s5187_s1 + $0x8e0] sm:$0xff]  }
  0xe7   :  { %3102 = vmatprep.mubr.bf16.mxu1 %v3227_v60  ;;  %v4222_v15 = vld [vmem:[%s5187_s1 + $0x820] sm:$0xff]  }
  0xe8   :  { %3831 = vmatpush3.bf16.msra.mxu0 %v4174_v16 }
  0xe9   :  { %3853 = vmatpush3.bf16.msra.mxu1 %v4175_v17  ;;  %3832 = vmatprep.subr.bf16.mxu0 %v4176_v18  ;;  %v4223_v17 = vld [vmem:[%s5187_s1 + $0x8a0] sm:$0xff]  }
  0xea   :  { %3854 = vmatprep.subr.bf16.mxu1 %v4177_v19 }
  0xec   :  { %3833 = vmatpush3.bf16.msra.mxu0 %v4178_v20 }
  0xed   :  { %3855 = vmatpush3.bf16.msra.mxu1 %v4179_v21  ;;  %3834 = vmatprep.subr.bf16.mxu0 %v4180_v22 }
  0xee   :  { %3856 = vmatprep.subr.bf16.mxu1 %v4181_v23  ;;  %v4224_v23 = vld [vmem:[%s5187_s1 + $0x868] sm:$0xff]  }
  0xf0   :  { %3835 = vmatpush3.bf16.msra.mxu0 %v4182_v24 }
  0xf1   :  { %3857 = vmatpush3.bf16.msra.mxu1 %v4183_v25  ;;  %3836 = vmatprep.subr.bf16.mxu0 %v4184_v26  ;;  %v4225_v25 = vld [vmem:[%s5187_s1 + $0x8e8] sm:$0xff]  }
  0xf2   :  { %3858 = vmatprep.subr.bf16.mxu1 %v4185_v27 }
  0xf4   :  { %3837 = vmatpush3.bf16.msra.mxu0 %v4186_v28  ;;  %v4226_v28 = vld [vmem:[%s5187_s1 + $0x828] sm:$0xff]  }
  0xf5   :  { %3859 = vmatpush3.bf16.msra.mxu1 %v4187_v30  ;;  %3838 = vmatprep.subr.bf16.mxu0 %v4188_v37  ;;  %v4227_v30 = vld [vmem:[%s5187_s1 + $0x8a8] sm:$0xff]   ;;  %v4232_v37 = vld [vmem:[%s5187_s1 + $0x878] sm:$0xff]  }
  0xf6   :  { %v3536_v29 = vpop.f32.mrb[0].mxu0  ;;  %3860 = vmatprep.subr.bf16.mxu1 %v4189_v39  ;;  %v4234_v39 = vld [vmem:[%s5187_s1 + $0x838] sm:$0xff]  }
  0xf7   :  { %v3558_v31 = vpop.f32.mrb[0].mxu1  ;;  %v3537_v33 = vpop.f32.mrb[1].mxu0 }
  0xf8   :  { %v3559_v34 = vpop.f32.mrb[1].mxu1  ;;  %v3538_v35 = vadd.f32 %v3537_v33, %v3536_v29  ;;  %v3539_v38 = vpop.f32.mrb[2].mxu0  ;;  %3839 = vmatpush3.bf16.msra.mxu0 %v4190_v42  ;;  %v4228_v33 = vld [vmem:[%s5187_s1 + $0x870] sm:$0xff]   ;;  %v32_v42 = vld [vmem:[%s5188_s0 + $0x88] sm:$0xff] }
  0xf9   :  { %v3560_v36 = vadd.f32 %v3559_v34, %v3558_v31  ;;  %v3561_v40 = vpop.f32.mrb[2].mxu1  ;;  %v3540_v43 = vpop.f32.mrb[3].mxu0  ;;  %3861 = vmatpush3.bf16.msra.mxu1 %v4191_v44  ;;  %3840 = vmatprep.subr.bf16.mxu0 %v4192_v47  ;;  %v4229_v34 = vld [vmem:[%s5187_s1 + $0x8f0] sm:$0xff]   ;;  %v4233_v38 = vld [vmem:[%s5187_s1 + $0x8f8] sm:$0xff]  }
  0xfa   :  { %v2505_v41 = vadd.f32 %v3538_v35, %v3195_v32  ;;  %v3562_v45 = vpop.f32.mrb[3].mxu1  ;;  %3862 = vmatprep.subr.bf16.mxu1 %v4193_v48  ;;  %v4230_v35 = vld [vmem:[%s5187_s1 + $0x830] sm:$0xff]   ;;  %v4235_v40 = vld [vmem:[%s5187_s1 + $0x8b8] sm:$0xff]  }
  0xfb   :  { %v3230_v45 = vcombine.low %v32_v42, %v32_v42 }
  0xfc   :  { %v5049_v46 = vadd.f32 %v3560_v36, %v2505_v41  ;;  %3841 = vmatpush3.bf16.msra.mxu0 %v4194_v49  ;;  %v4231_v36 = vld [vmem:[%s5187_s1 + $0x8b0] sm:$0xff]   ;;  %v31_v41 = vld [vmem:[%s5188_s0 + $0x80] sm:$0xff] }
  0xfd   :  { %3863 = vmatpush3.bf16.msra.mxu1 %v4195_v50  ;;  %3842 = vmatprep.subr.bf16.mxu0 %v4196_v51  ;;  %v3228_v43 = vcombine.low %v31_v41, %v31_v41  ;;  %v3229_v44 = vcombine.high %v31_v41, %v31_v41 }
  0xfe   :  { %3864 = vmatprep.subr.bf16.mxu1 %v4197_v52 }
 0x100   :  { %3843 = vmatpush3.bf16.msra.mxu0 %v4198_v53 }
 0x101   :  { %3865 = vmatpush3.bf16.msra.mxu1 %v4199_v54  ;;  %3872 = vmatprep.subr.bf16.mxu0 %v4204_v61 }
 0x102   :  { %3894 = vmatprep.subr.bf16.mxu1 %v4205_v62 }
 0x103   :  { %3063 = vmatmul.mubr.bf16.vlgmr.msra.gmra.mrb[28].mxu0 %v3224_v57 }
 0x104   :  { %3103 = vmatmul.mubr.bf16.vlgmr.msra.gmra.mrb[28].mxu1 %v3226_v59  ;;  %3873 = vmatpush3.bf16.msra.mxu0 %v4206_v63 }
 0x105   :  { %3895 = vmatpush3.bf16.msra.mxu1 %v4207_v0  ;;  %3874 = vmatprep.subr.bf16.mxu0 %v4208_v1 }
 0x106   :  { %3896 = vmatprep.subr.bf16.mxu1 %v4209_v2  ;;  %3142 = vmatprep.mubr.bf16.mxu0 %v3229_v44 }
 0x108   :  { %3875 = vmatpush3.bf16.msra.mxu0 %v4210_v3 }
 0x109   :  { %3897 = vmatpush3.bf16.msra.mxu1 %v4211_v4  ;;  %3876 = vmatprep.subr.bf16.mxu0 %v4212_v5 }
 0x10a   :  { %3898 = vmatprep.subr.bf16.mxu1 %v4213_v6 }
 0x10c   :  { %3877 = vmatpush3.bf16.msra.mxu0 %v4214_v7 }
 0x10d   :  { %3899 = vmatpush3.bf16.msra.mxu1 %v4215_v8  ;;  %3878 = vmatprep.subr.bf16.mxu0 %v4216_v9 }
 0x10e   :  { %3900 = vmatprep.subr.bf16.mxu1 %v4217_v10 }
 0x110   :  { %3879 = vmatpush3.bf16.msra.mxu0 %v4218_v11 }
 0x111   :  { %3901 = vmatpush3.bf16.msra.mxu1 %v4219_v12  ;;  %3880 = vmatprep.subr.bf16.mxu0 %v4220_v13 }
 0x112   :  { %3902 = vmatprep.subr.bf16.mxu1 %v4221_v14 }
 0x114   :  { %3881 = vmatpush3.bf16.msra.mxu0 %v4222_v15 }
 0x115   :  { %3903 = vmatpush3.bf16.msra.mxu1 %v4223_v17  ;;  %3882 = vmatprep.subr.bf16.mxu0 %v4224_v23 }
 0x116   :  { %v3580_v16 = vpop.f32.mrb[4].mxu0  ;;  %3904 = vmatprep.subr.bf16.mxu1 %v4225_v25 }
 0x117   :  { %v3602_v18 = vpop.f32.mrb[4].mxu1  ;;  %v3581_v19 = vpop.f32.mrb[5].mxu0 }
 0x118   :  { %v3603_v20 = vpop.f32.mrb[5].mxu1  ;;  %v3582_v21 = vadd.f32 %v3581_v19, %v3580_v16  ;;  %v3583_v24 = vpop.f32.mrb[6].mxu0  ;;  %3883 = vmatpush3.bf16.msra.mxu0 %v4226_v28 }
 0x119   :  { %v3604_v22 = vadd.f32 %v3603_v20, %v3602_v18  ;;  %v3605_v26 = vpop.f32.mrb[6].mxu1  ;;  %v3584_v29 = vpop.f32.mrb[7].mxu0  ;;  %3905 = vmatpush3.bf16.msra.mxu1 %v4227_v30  ;;  %3884 = vmatprep.subr.bf16.mxu0 %v4228_v33 }
 0x11a   :  { %v2585_v27 = vadd.f32 %v3582_v21, %v5049_v46  ;;  %v3606_v31 = vpop.f32.mrb[7].mxu1  ;;  %3906 = vmatprep.subr.bf16.mxu1 %v4229_v34  ;;  %v3231_v46 = vcombine.high %v32_v42, %v32_v42 }
 0x11c   :  { %v2625_v32 = vadd.f32 %v3604_v22, %v2585_v27  ;;  %3885 = vmatpush3.bf16.msra.mxu0 %v4230_v35  ;;  %3182 = vmatprep.mubr.bf16.mxu1 %v3231_v46 }
 0x11d   :  { %3907 = vmatpush3.bf16.msra.mxu1 %v4231_v36  ;;  %3886 = vmatprep.subr.bf16.mxu0 %v4232_v37 }
 0x11e   :  { %3908 = vmatprep.subr.bf16.mxu1 %v4233_v38 }
 0x120   :  { %3887 = vmatpush3.bf16.msra.mxu0 %v4234_v39 }
 0x121   :  { %3909 = vmatpush3.bf16.msra.mxu1 %v4235_v40 }
 0x123   :  { %3143 = vmatmul.mubr.bf16.vlgmr.msra.gmra.mrb[32].mxu0 %v3228_v43 }
 0x124   :  { %3183 = vmatmul.mubr.bf16.vlgmr.msra.gmra.mrb[32].mxu1 %v3230_v45 }
 0x136   :  { %v3624_v47 = vpop.f32.mrb[8].mxu0 }
 0x137   :  { %v3646_v48 = vpop.f32.mrb[8].mxu1  ;;  %v3625_v49 = vpop.f32.mrb[9].mxu0 }
 0x138   :  { %v3626_v50 = vadd.f32 %v3625_v49, %v3624_v47  ;;  %v3647_v51 = vpop.f32.mrb[9].mxu1  ;;  %v3627_v52 = vpop.f32.mrb[10].mxu0 }
 0x139   :  { %v3648_v53 = vadd.f32 %v3647_v51, %v3646_v48  ;;  %v3649_v54 = vpop.f32.mrb[10].mxu1  ;;  %v3628_v55 = vpop.f32.mrb[11].mxu0 }
 0x13a   :  { %v2665_v56 = vadd.f32 %v3626_v50, %v2625_v32  ;;  %v3650_v57 = vpop.f32.mrb[11].mxu1 }
 0x13c   :  { %v2705_v58 = vadd.f32 %v3648_v53, %v2665_v56 }
 0x156   :  { %v3668_v59 = vpop.f32.mrb[12].mxu0 }
 0x157   :  { %v3690_v60 = vpop.f32.mrb[12].mxu1  ;;  %v3669_v61 = vpop.f32.mrb[13].mxu0 }
 0x158   :  { %v3670_v62 = vadd.f32 %v3669_v61, %v3668_v59  ;;  %v3691_v63 = vpop.f32.mrb[13].mxu1  ;;  %v3671_v0 = vpop.f32.mrb[14].mxu0 }
 0x159   :  { %v3692_v1 = vadd.f32 %v3691_v63, %v3690_v60  ;;  %v3693_v2 = vpop.f32.mrb[14].mxu1  ;;  %v3672_v3 = vpop.f32.mrb[15].mxu0 }
 0x15a   :  { %v2745_v4 = vadd.f32 %v3670_v62, %v2705_v58  ;;  %v3694_v5 = vpop.f32.mrb[15].mxu1 }
 0x15c   :  { %v2785_v6 = vadd.f32 %v3692_v1, %v2745_v4 }
 0x176   :  { %v3712_v7 = vpop.f32.mrb[16].mxu0 }
 0x177   :  { %v3734_v8 = vpop.f32.mrb[16].mxu1  ;;  %v3713_v9 = vpop.f32.mrb[17].mxu0 }
 0x178   :  { %v3735_v10 = vpop.f32.mrb[17].mxu1  ;;  %v3714_v11 = vadd.f32 %v3713_v9, %v3712_v7  ;;  %v3715_v13 = vpop.f32.mrb[18].mxu0 }
 0x179   :  { %v3736_v12 = vadd.f32 %v3735_v10, %v3734_v8  ;;  %v3737_v14 = vpop.f32.mrb[18].mxu1  ;;  %v3716_v15 = vpop.f32.mrb[19].mxu0 }
 0x17a   :  { %v3738_v16 = vpop.f32.mrb[19].mxu1  ;;  %v2825_v17 = vadd.f32 %v3714_v11, %v2785_v6 }
 0x17c   :  { %v2865_v18 = vadd.f32 %v3736_v12, %v2825_v17 }
 0x196   :  { %v3756_v19 = vpop.f32.mrb[20].mxu0 }
 0x197   :  { %v3778_v20 = vpop.f32.mrb[20].mxu1  ;;  %v3757_v21 = vpop.f32.mrb[21].mxu0 }
 0x198   :  { %v3758_v22 = vadd.f32 %v3757_v21, %v3756_v19  ;;  %v3779_v23 = vpop.f32.mrb[21].mxu1  ;;  %v3759_v24 = vpop.f32.mrb[22].mxu0 }
 0x199   :  { %v3780_v25 = vadd.f32 %v3779_v23, %v3778_v20  ;;  %v3781_v26 = vpop.f32.mrb[22].mxu1  ;;  %v3760_v27 = vpop.f32.mrb[23].mxu0 }
 0x19a   :  { %v2905_v28 = vadd.f32 %v3758_v22, %v2865_v18  ;;  %v3782_v29 = vpop.f32.mrb[23].mxu1 }
 0x19c   :  { %v2945_v30 = vadd.f32 %v3780_v25, %v2905_v28 }
 0x1b6   :  { %v3800_v31 = vpop.f32.mrb[24].mxu0 }
 0x1b7   :  { %v3822_v32 = vpop.f32.mrb[24].mxu1  ;;  %v3801_v33 = vpop.f32.mrb[25].mxu0 }
 0x1b8   :  { %v3802_v34 = vadd.f32 %v3801_v33, %v3800_v31  ;;  %v3823_v35 = vpop.f32.mrb[25].mxu1  ;;  %v3803_v36 = vpop.f32.mrb[26].mxu0 }
 0x1b9   :  { %v3824_v37 = vadd.f32 %v3823_v35, %v3822_v32  ;;  %v3825_v38 = vpop.f32.mrb[26].mxu1  ;;  %v3804_v39 = vpop.f32.mrb[27].mxu0 }
 0x1ba   :  { %v2985_v40 = vadd.f32 %v3802_v34, %v2945_v30  ;;  %v3826_v41 = vpop.f32.mrb[27].mxu1 }
 0x1bc   :  { %v3025_v42 = vadd.f32 %v3824_v37, %v2985_v40 }
 0x1d6   :  { %v3844_v43 = vpop.f32.mrb[28].mxu0 }
 0x1d7   :  { %v3866_v44 = vpop.f32.mrb[28].mxu1  ;;  %v3845_v45 = vpop.f32.mrb[29].mxu0 }
 0x1d8   :  { %v3846_v46 = vadd.f32 %v3845_v45, %v3844_v43  ;;  %v3867_v47 = vpop.f32.mrb[29].mxu1  ;;  %v3847_v48 = vpop.f32.mrb[30].mxu0 }
 0x1d9   :  { %v3868_v49 = vadd.f32 %v3867_v47, %v3866_v44  ;;  %v3869_v50 = vpop.f32.mrb[30].mxu1  ;;  %v3848_v51 = vpop.f32.mrb[31].mxu0 }
 0x1da   :  { %v3065_v52 = vadd.f32 %v3846_v46, %v3025_v42  ;;  %v3870_v53 = vpop.f32.mrb[31].mxu1 }
 0x1dc   :  { %v3105_v54 = vadd.f32 %v3868_v49, %v3065_v52 }
 0x1f6   :  { %v3888_v55 = vpop.f32.mrb[32].mxu0 }
 0x1f7   :  { %v3910_v56 = vpop.f32.mrb[32].mxu1  ;;  %v3889_v57 = vpop.f32.mrb[33].mxu0 }
 0x1f8   :  { %v3890_v58 = vadd.f32 %v3889_v57, %v3888_v55  ;;  %v3911_v59 = vpop.f32.mrb[33].mxu1  ;;  %v3891_v60 = vpop.f32.mrb[34].mxu0 }
 0x1f9   :  { %v3912_v61 = vadd.f32 %v3911_v59, %v3910_v56  ;;  %v3913_v62 = vpop.f32.mrb[34].mxu1  ;;  %v3892_v63 = vpop.f32.mrb[35].mxu0 }
 0x1fa   :  { %v3145_v0 = vadd.f32 %v3890_v58, %v3105_v54  ;;  %v3914_v1 = vpop.f32.mrb[35].mxu1 }
 0x1fc   :  { %v3185_v2 = vadd.f32 %v3912_v61, %v3145_v0 }
 0x1fe   :  { %3190 = vst [vmem:[%s5190_s3] sm:$0xff] %v3185_v2 }

</bundles_post_ra>
